<compile_context>
chip_gen: v7x
topology: tpu7x:2x2x1
jax: 0.10.0
libtpu: 0.0.40
codegen_flags: <defaults>
</compile_context>

<pallas_src>
import math
from functools import partial

import numpy as np
import jax
import jax.numpy as jnp
from jax import lax
from jax.experimental import pallas as pl


# ---------------------------------------------------------------------------
# Pallas kernel: the entire autoencoder forward, VMEM-resident.
# refs = [x2d, (L, R, bias) * num_layers, recon_out, code_out]
# ---------------------------------------------------------------------------
def _dcec_fused_kernel(*refs, num_layers, relu_flags, code_layer):
    x_ref = refs[0]
    recon_ref = refs[1 + 3 * num_layers]
    code_ref = refs[2 + 3 * num_layers]

    act = x_ref[...].astype(jnp.bfloat16)          # (C*N*H, W) activations
    acc = None
    for li in range(num_layers):                   # statically unrolled
        l_ref = refs[1 + 3 * li]                   # (k, Q, Cin*N*Hi)  bf16
        r_ref = refs[2 + 3 * li]                   # (k, Wi, Wo)       bf16
        b_ref = refs[3 + 3 * li]                   # (Q, Wo)           f32
        k = l_ref.shape[0]

        acc = b_ref[...]                           # f32 accumulator = bias
        for dj in range(k):                        # k W-axis taps
            g = jnp.dot(act, r_ref[dj], preferred_element_type=jnp.float32)
            acc = acc + jnp.dot(l_ref[dj], g.astype(jnp.bfloat16),
                                preferred_element_type=jnp.float32)
        if relu_flags[li]:
            acc = jnp.maximum(acc, 0.0)
        if li == code_layer:
            code_ref[...] = acc                    # bottleneck code (Dc*N, 1)
        act = acc.astype(jnp.bfloat16)             # bf16 activations end-to-end

    recon_ref[...] = acc


# ---------------------------------------------------------------------------
# Host-side one-time prep: build per-layer (L, R, bias) matrices.
# ---------------------------------------------------------------------------
def _np32(a):
    return np.asarray(jax.device_get(a), dtype=np.float32)


def _build_conv_layer(w, b, N, Hi, Wi, stride, pad, transposed, out_pad=0):
    """Conv2d / ConvTranspose2d over the (C*N*H, W) activation layout."""
    wnp, bnp = _np32(w), _np32(b)
    if not transposed:
        Cout, Cin, k, _ = wnp.shape
        Ho = (Hi + 2 * pad - k) // stride + 1
        Wo = (Wi + 2 * pad - k) // stride + 1
    else:  # torch ConvTranspose2d weight layout (Cin, Cout, k, k)
        Cin, Cout, k, _ = wnp.shape
        Ho = (Hi - 1) * stride - 2 * pad + k + out_pad
        Wo = (Wi - 1) * stride - 2 * pad + k + out_pad

    Q, Cr = Cout * N * Ho, Cin * N * Hi
    L = np.zeros((k, Q, Cr), np.float32)
    R = np.zeros((k, Wi, Wo), np.float32)
    co = np.arange(Cout) * N * Ho
    ci = np.arange(Cin) * N * Hi

    for dj in range(k):
        # W-axis (lane) tap selection: stride / padding / dilation as 0/1 matmul.
        if not transposed:
            for wo in range(Wo):
                wi = stride * wo + dj - pad
                if 0 <= wi < Wi:
                    R[dj, wi, wo] = 1.0
        else:
            for wi in range(Wi):
                wo = stride * wi + dj - pad
                if 0 <= wo < Wo:
                    R[dj, wi, wo] = 1.0
        # H-axis tap selection combined with the channel weights.
        for di in range(k):
            wtap = wnp[:, :, di, dj] if not transposed else wnp[:, :, di, dj].T
            if not transposed:
                pairs = ((ho, stride * ho + di - pad) for ho in range(Ho))
            else:
                pairs = ((stride * hi + di - pad, hi) for hi in range(Hi))
            for ho, hi in pairs:
                if 0 <= hi < Hi and 0 <= ho < Ho:
                    for n in range(N):
                        L[dj][np.ix_(co + n * Ho + ho, ci + n * Hi + hi)] += wtap

    bias = np.broadcast_to(bnp[:, None, None, None], (Cout, N, Ho, Wo)).reshape(Q, Wo)
    return L, R, bias, Cout, Ho, Wo


def _build_fc1_layer(w1, b1, N, C, S):
    """Linear(C*S*S -> Dc) on the PyTorch (c,h,w) flatten; output layout (Dc*N, 1)."""
    w1np, b1np = _np32(w1), _np32(b1)
    Dc = w1np.shape[0]
    w4 = w1np.reshape(Dc, C, S, S)
    L = np.zeros((S, Dc * N, C * N * S), np.float32)
    R = np.zeros((S, S, 1), np.float32)
    d_rows = np.arange(Dc) * N
    for w in range(S):
        R[w, w, 0] = 1.0
        for c in range(C):
            for h in range(S):
                for n in range(N):
                    L[w, d_rows + n, c * N * S + n * S + h] += w4[:, c, h, w]
    bias = np.repeat(b1np, N).reshape(Dc * N, 1)
    return L, R, bias


def _build_fc2_layer(w2, b2, N, C, S):
    """Linear(Dc -> C*S*S) producing the (C*N*S, S) layout expected by dec2."""
    w2np, b2np = _np32(w2), _np32(b2)
    Dc = w2np.shape[1]
    w4 = w2np.reshape(C, S, S, Dc)
    L = np.zeros((S, C * N * S, Dc * N), np.float32)
    R = np.zeros((S, 1, S), np.float32)
    d_cols = np.arange(Dc) * N
    for w in range(S):
        R[w, 0, w] = 1.0
        for c in range(C):
            for h in range(S):
                for n in range(N):
                    L[w, c * N * S + n * S + h, d_cols + n] += w4[c, h, w, :]
    bias = np.broadcast_to(b2np.reshape(C, 1, S, S), (C, N, S, S)).reshape(C * N * S, S)
    return L, R, bias


def prepare_params(params, batch, dim_input, dim_code, c_in):
    """Per-layer (L bf16, R bf16, bias f32, relu) in matmul-ready form."""
    N = batch
    layers = []

    def add(L, R, bias, relu):
        layers.append(dict(
            L=jnp.asarray(L).astype(jnp.bfloat16),
            R=jnp.asarray(R).astype(jnp.bfloat16),
            bias=jnp.asarray(bias, dtype=jnp.float32),
            relu=relu))

    C, H, W = c_in, dim_input, dim_input
    for name, s, p in (("enc0", 2, 2), ("enc1", 2, 2), ("enc2", 2, 0)):
        L, R, bias, C, H, W = _build_conv_layer(
            params[f"{name}_w"], params[f"{name}_b"], N, H, W, s, p, transposed=False)
        add(L, R, bias, relu=True)

    S, f2 = H, C
    L, R, bias = _build_fc1_layer(params["fc1_w"], params["fc1_b"], N, f2, S)
    add(L, R, bias, relu=False)           # code = fc1 output (no activation)
    L, R, bias = _build_fc2_layer(params["fc2_w"], params["fc2_b"], N, f2, S)
    add(L, R, bias, relu=False)
    C, H, W = f2, S, S

    for name, s, p, op in (("dec2", 2, 0, 0), ("dec1", 2, 2, 1), ("dec0", 2, 2, 1)):
        L, R, bias, C, H, W = _build_conv_layer(
            params[f"{name}_w"], params[f"{name}_b"], N, H, W, s, p,
            transposed=True, out_pad=op)
        add(L, R, bias, relu=True)        # TODO(synk): final ReLU per assumed ConvBlock

    meta = dict(batch=N, dim_code=dim_code, code_layer=3,
                c_out=C, h_out=H, w_out=W)
    return layers, meta


# ---------------------------------------------------------------------------
# Forward wrapper (PyTorch NCHW interface).
# ---------------------------------------------------------------------------
def dcec_forward(x_nchw, layers, meta):
    N, Cin, H, W = x_nchw.shape
    # (N, C, H, W) -> (C*N*H, W) 2-D layout; only I/O plumbing stays in XLA.
    x2d = jnp.transpose(x_nchw, (1, 0, 2, 3)).reshape(Cin * N * H, W).astype(jnp.bfloat16)

    operands = [x2d]
    relu_flags = []
    for layer in layers:
        operands.extend((layer["L"], layer["R"], layer["bias"]))
        relu_flags.append(layer["relu"])

    q_out, w_out = layers[-1]["bias"].shape
    code_rows = layers[meta["code_layer"]]["bias"].shape[0]

    recon2d, code2d = pl.pallas_call(
        partial(_dcec_fused_kernel,
                num_layers=len(layers),
                relu_flags=tuple(relu_flags),
                code_layer=meta["code_layer"]),
        out_shape=(jax.ShapeDtypeStruct((q_out, w_out), jnp.float32),
                   jax.ShapeDtypeStruct((code_rows, 1), jnp.float32)),
    )(*operands)

    recon = recon2d.reshape(meta["c_out"], N, meta["h_out"], meta["w_out"])
    recon = jnp.transpose(recon, (1, 0, 2, 3))            # NCHW
    code = code2d.reshape(meta["dim_code"], N).T           # (N, dim_code)
    return recon, code


# ---------------------------------------------------------------------------
# Parameters (torch layout) and a pure-JAX reference of the PyTorch forward.
# ---------------------------------------------------------------------------
def init_params(key, dim_input, dim_code, c_in, f0, f1, f2):
    s = math.floor((dim_input + 2 * 2 - (5 - 1) - 1) / 2 + 1)
    s = math.floor((s + 2 * 2 - (5 - 1) - 1) / 2 + 1)
    s = math.floor((s + 2 * 0 - (3 - 1) - 1) / 2 + 1)
    dim_around_code = f2 * s * s

    keys = jax.random.split(key, 16)
    scale = 0.05

    def nrm(k, shape):
        return scale * jax.random.normal(k, shape, dtype=jnp.float32)

    params = {
        "enc0_w": nrm(keys[0], (f0, c_in, 5, 5)), "enc0_b": nrm(keys[1], (f0,)),
        "enc1_w": nrm(keys[2], (f1, f0, 5, 5)),   "enc1_b": nrm(keys[3], (f1,)),
        "enc2_w": nrm(keys[4], (f2, f1, 3, 3)),   "enc2_b": nrm(keys[5], (f2,)),
        "fc1_w": nrm(keys[6], (dim_code, dim_around_code)),
        "fc1_b": nrm(keys[7], (dim_code,)),
        "fc2_w": nrm(keys[8], (dim_around_code, dim_code)),
        "fc2_b": nrm(keys[9], (dim_around_code,)),
        "dec2_w": nrm(keys[10], (f2, f1, 3, 3)),  "dec2_b": nrm(keys[11], (f1,)),
        "dec1_w": nrm(keys[12], (f1, f0, 5, 5)),  "dec1_b": nrm(keys[13], (f0,)),
        "dec0_w": nrm(keys[14], (f0, c_in, 5, 5)), "dec0_b": nrm(keys[15], (c_in,)),
    }
    return params, s


def reference_forward(x, params):
    dn = ("NCHW", "OIHW", "NCHW")

    def conv(v, w, b, s, p):
        y = lax.conv_general_dilated(v, w, (s, s), ((p, p), (p, p)),
                                     dimension_numbers=dn)
        return y + b.reshape(1, -1, 1, 1)

    def convT(v, w, b, s, p, op):
        k = w.shape[-1]
        wf = jnp.transpose(w[:, :, ::-1, ::-1], (1, 0, 2, 3))
        pad = ((k - 1 - p, k - 1 - p + op), (k - 1 - p, k - 1 - p + op))
        y = lax.conv_general_dilated(v, wf, (1, 1), pad, lhs_dilation=(s, s),
                                     dimension_numbers=dn)
        return y + b.reshape(1, -1, 1, 1)

    relu = lambda v: jnp.maximum(v, 0.0)
    h = relu(conv(x, params["enc0_w"], params["enc0_b"], 2, 2))
    h = relu(conv(h, params["enc1_w"], params["enc1_b"], 2, 2))
    h = relu(conv(h, params["enc2_w"], params["enc2_b"], 2, 0))
    n = x.shape[0]
    code = h.reshape(n, -1) @ params["fc1_w"].T + params["fc1_b"]
    y = code @ params["fc2_w"].T + params["fc2_b"]
    s = h.shape[-1]
    y = y.reshape(n, -1, s, s)
    y = relu(convT(y, params["dec2_w"], params["dec2_b"], 2, 0, 0))
    y = relu(convT(y, params["dec1_w"], params["dec1_b"], 2, 2, 1))
    y = relu(convT(y, params["dec0_w"], params["dec0_b"], 2, 2, 1))
    return y, code


if __name__ == "__main__":
    # Small config: dim_input=32, dim_code=10, C_in=4, feature maps 8/8/8.
    dim_input, dim_code = 32, 10
    c_in, f0, f1, f2 = 4, 8, 8, 8
    batch = 2

    key = jax.random.PRNGKey(0)
    kp, kx = jax.random.split(key)
    params, _side = init_params(kp, dim_input, dim_code, c_in, f0, f1, f2)
    layers, meta = prepare_params(params, batch, dim_input, dim_code, c_in)

    x = jax.random.normal(kx, (batch, c_in, dim_input, dim_input), dtype=jnp.float32)

    fwd = jax.jit(lambda inp: dcec_forward(inp, layers, meta))
    recon, code = fwd(x)
    jax.block_until_ready((recon, code))

    # Shape / sanity checks; compare against a pure-JAX reference of the
    # PyTorch forward (loose tolerance: kernel uses bf16 weights/activations).
    assert code.shape == (batch, dim_code), code.shape
    assert recon.shape == (batch, c_in, 28, 28), recon.shape
    assert bool(jnp.all(jnp.isfinite(recon))) and bool(jnp.all(jnp.isfinite(code)))

    ref_recon, ref_code = reference_forward(x, params)
    assert float(jnp.max(jnp.abs(recon - ref_recon))) < 3e-2
    assert float(jnp.max(jnp.abs(code - ref_code))) < 3e-2

    print("KERNEL_OK")
</pallas_src>

<mosaic_0001>
module attributes {stable_mosaic.version = 11 : i64} {
  func.func @_dcec_fused_kernel(%arg0: memref<256x32xbf16, #tpu.memory_space<vmem>>, %arg1: memref<5x256x256xbf16, #tpu.memory_space<vmem>>, %arg2: memref<5x32x16xbf16, #tpu.memory_space<vmem>>, %arg3: memref<256x16xf32, #tpu.memory_space<vmem>>, %arg4: memref<5x128x256xbf16, #tpu.memory_space<vmem>>, %arg5: memref<5x16x8xbf16, #tpu.memory_space<vmem>>, %arg6: memref<128x8xf32, #tpu.memory_space<vmem>>, %arg7: memref<3x48x128xbf16, #tpu.memory_space<vmem>>, %arg8: memref<3x8x3xbf16, #tpu.memory_space<vmem>>, %arg9: memref<48x3xf32, #tpu.memory_space<vmem>>, %arg10: memref<3x20x48xbf16, #tpu.memory_space<vmem>>, %arg11: memref<3x3x1xbf16, #tpu.memory_space<vmem>>, %arg12: memref<20x1xf32, #tpu.memory_space<vmem>>, %arg13: memref<3x48x20xbf16, #tpu.memory_space<vmem>>, %arg14: memref<3x1x3xbf16, #tpu.memory_space<vmem>>, %arg15: memref<48x3xf32, #tpu.memory_space<vmem>>, %arg16: memref<3x112x48xbf16, #tpu.memory_space<vmem>>, %arg17: memref<3x3x7xbf16, #tpu.memory_space<vmem>>, %arg18: memref<112x7xf32, #tpu.memory_space<vmem>>, %arg19: memref<5x224x112xbf16, #tpu.memory_space<vmem>>, %arg20: memref<5x7x14xbf16, #tpu.memory_space<vmem>>, %arg21: memref<224x14xf32, #tpu.memory_space<vmem>>, %arg22: memref<5x224x224xbf16, #tpu.memory_space<vmem>>, %arg23: memref<5x14x28xbf16, #tpu.memory_space<vmem>>, %arg24: memref<224x28xf32, #tpu.memory_space<vmem>>, %arg25: memref<224x28xf32, #tpu.memory_space<vmem>>, %arg26: memref<20x1xf32, #tpu.memory_space<vmem>>) attributes {dimension_semantics = [], scalar_prefetch = 0 : i64, scratch_operands = 0 : i64, tpu.core_type = #tpu.core_type<tc>} {
    %c0 = arith.constant 0 : index
    %c0_0 = arith.constant 0 : index
    %0 = vector.load %arg0[%c0, %c0_0] : memref<256x32xbf16, #tpu.memory_space<vmem>>, vector<256x32xbf16>
    %c0_1 = arith.constant 0 : index
    %c0_2 = arith.constant 0 : index
    %1 = vector.load %arg3[%c0_1, %c0_2] : memref<256x16xf32, #tpu.memory_space<vmem>>, vector<256x16xf32>
    %c0_3 = arith.constant 0 : index
    %c0_4 = arith.constant 0 : index
    %c0_5 = arith.constant 0 : index
    %2 = vector.load %arg2[%c0_3, %c0_4, %c0_5] : memref<5x32x16xbf16, #tpu.memory_space<vmem>>, vector<1x32x16xbf16>
    %3 = vector.shape_cast %2 : vector<1x32x16xbf16> to vector<32x16xbf16>
    %cst = arith.constant dense<0.000000e+00> : vector<256x16xf32>
    %4 = tpu.matmul %0, %3, %cst {dimension_numbers = #tpu.dot_dimension_numbers<[1], [0], [0], [1], [0, 0, 1, 1], [], []>} : vector<256x32xbf16>, vector<32x16xbf16>, vector<256x16xf32> -> vector<256x16xf32>
    %c0_6 = arith.constant 0 : index
    %c0_7 = arith.constant 0 : index
    %c0_8 = arith.constant 0 : index
    %5 = vector.load %arg1[%c0_6, %c0_7, %c0_8] : memref<5x256x256xbf16, #tpu.memory_space<vmem>>, vector<1x256x256xbf16>
    %6 = vector.shape_cast %5 : vector<1x256x256xbf16> to vector<256x256xbf16>
    %7 = arith.truncf %4 : vector<256x16xf32> to vector<256x16xbf16>
    %cst_9 = arith.constant dense<0.000000e+00> : vector<256x16xf32>
    %8 = tpu.matmul %6, %7, %cst_9 {dimension_numbers = #tpu.dot_dimension_numbers<[1], [0], [0], [1], [0, 0, 1, 1], [], []>} : vector<256x256xbf16>, vector<256x16xbf16>, vector<256x16xf32> -> vector<256x16xf32>
    %9 = arith.addf %1, %8 : vector<256x16xf32>
    %c1 = arith.constant 1 : index
    %c0_10 = arith.constant 0 : index
    %c0_11 = arith.constant 0 : index
    %10 = vector.load %arg2[%c1, %c0_10, %c0_11] : memref<5x32x16xbf16, #tpu.memory_space<vmem>>, vector<1x32x16xbf16>
    %11 = vector.shape_cast %10 : vector<1x32x16xbf16> to vector<32x16xbf16>
    %cst_12 = arith.constant dense<0.000000e+00> : vector<256x16xf32>
    %12 = tpu.matmul %0, %11, %cst_12 {dimension_numbers = #tpu.dot_dimension_numbers<[1], [0], [0], [1], [0, 0, 1, 1], [], []>} : vector<256x32xbf16>, vector<32x16xbf16>, vector<256x16xf32> -> vector<256x16xf32>
    %c1_13 = arith.constant 1 : index
    %c0_14 = arith.constant 0 : index
    %c0_15 = arith.constant 0 : index
    %13 = vector.load %arg1[%c1_13, %c0_14, %c0_15] : memref<5x256x256xbf16, #tpu.memory_space<vmem>>, vector<1x256x256xbf16>
    %14 = vector.shape_cast %13 : vector<1x256x256xbf16> to vector<256x256xbf16>
    %15 = arith.truncf %12 : vector<256x16xf32> to vector<256x16xbf16>
    %cst_16 = arith.constant dense<0.000000e+00> : vector<256x16xf32>
    %16 = tpu.matmul %14, %15, %cst_16 {dimension_numbers = #tpu.dot_dimension_numbers<[1], [0], [0], [1], [0, 0, 1, 1], [], []>} : vector<256x256xbf16>, vector<256x16xbf16>, vector<256x16xf32> -> vector<256x16xf32>
    %17 = arith.addf %9, %16 : vector<256x16xf32>
    %c2 = arith.constant 2 : index
    %c0_17 = arith.constant 0 : index
    %c0_18 = arith.constant 0 : index
    %18 = vector.load %arg2[%c2, %c0_17, %c0_18] : memref<5x32x16xbf16, #tpu.memory_space<vmem>>, vector<1x32x16xbf16>
    %19 = vector.shape_cast %18 : vector<1x32x16xbf16> to vector<32x16xbf16>
    %cst_19 = arith.constant dense<0.000000e+00> : vector<256x16xf32>
    %20 = tpu.matmul %0, %19, %cst_19 {dimension_numbers = #tpu.dot_dimension_numbers<[1], [0], [0], [1], [0, 0, 1, 1], [], []>} : vector<256x32xbf16>, vector<32x16xbf16>, vector<256x16xf32> -> vector<256x16xf32>
    %c2_20 = arith.constant 2 : index
    %c0_21 = arith.constant 0 : index
    %c0_22 = arith.constant 0 : index
    %21 = vector.load %arg1[%c2_20, %c0_21, %c0_22] : memref<5x256x256xbf16, #tpu.memory_space<vmem>>, vector<1x256x256xbf16>
    %22 = vector.shape_cast %21 : vector<1x256x256xbf16> to vector<256x256xbf16>
    %23 = arith.truncf %20 : vector<256x16xf32> to vector<256x16xbf16>
    %cst_23 = arith.constant dense<0.000000e+00> : vector<256x16xf32>
    %24 = tpu.matmul %22, %23, %cst_23 {dimension_numbers = #tpu.dot_dimension_numbers<[1], [0], [0], [1], [0, 0, 1, 1], [], []>} : vector<256x256xbf16>, vector<256x16xbf16>, vector<256x16xf32> -> vector<256x16xf32>
    %25 = arith.addf %17, %24 : vector<256x16xf32>
    %c3 = arith.constant 3 : index
    %c0_24 = arith.constant 0 : index
    %c0_25 = arith.constant 0 : index
    %26 = vector.load %arg2[%c3, %c0_24, %c0_25] : memref<5x32x16xbf16, #tpu.memory_space<vmem>>, vector<1x32x16xbf16>
    %27 = vector.shape_cast %26 : vector<1x32x16xbf16> to vector<32x16xbf16>
    %cst_26 = arith.constant dense<0.000000e+00> : vector<256x16xf32>
    %28 = tpu.matmul %0, %27, %cst_26 {dimension_numbers = #tpu.dot_dimension_numbers<[1], [0], [0], [1], [0, 0, 1, 1], [], []>} : vector<256x32xbf16>, vector<32x16xbf16>, vector<256x16xf32> -> vector<256x16xf32>
    %c3_27 = arith.constant 3 : index
    %c0_28 = arith.constant 0 : index
    %c0_29 = arith.constant 0 : index
    %29 = vector.load %arg1[%c3_27, %c0_28, %c0_29] : memref<5x256x256xbf16, #tpu.memory_space<vmem>>, vector<1x256x256xbf16>
    %30 = vector.shape_cast %29 : vector<1x256x256xbf16> to vector<256x256xbf16>
    %31 = arith.truncf %28 : vector<256x16xf32> to vector<256x16xbf16>
    %cst_30 = arith.constant dense<0.000000e+00> : vector<256x16xf32>
    %32 = tpu.matmul %30, %31, %cst_30 {dimension_numbers = #tpu.dot_dimension_numbers<[1], [0], [0], [1], [0, 0, 1, 1], [], []>} : vector<256x256xbf16>, vector<256x16xbf16>, vector<256x16xf32> -> vector<256x16xf32>
    %33 = arith.addf %25, %32 : vector<256x16xf32>
    %c4 = arith.constant 4 : index
    %c0_31 = arith.constant 0 : index
    %c0_32 = arith.constant 0 : index
    %34 = vector.load %arg2[%c4, %c0_31, %c0_32] : memref<5x32x16xbf16, #tpu.memory_space<vmem>>, vector<1x32x16xbf16>
    %35 = vector.shape_cast %34 : vector<1x32x16xbf16> to vector<32x16xbf16>
    %cst_33 = arith.constant dense<0.000000e+00> : vector<256x16xf32>
    %36 = tpu.matmul %0, %35, %cst_33 {dimension_numbers = #tpu.dot_dimension_numbers<[1], [0], [0], [1], [0, 0, 1, 1], [], []>} : vector<256x32xbf16>, vector<32x16xbf16>, vector<256x16xf32> -> vector<256x16xf32>
    %c4_34 = arith.constant 4 : index
    %c0_35 = arith.constant 0 : index
    %c0_36 = arith.constant 0 : index
    %37 = vector.load %arg1[%c4_34, %c0_35, %c0_36] : memref<5x256x256xbf16, #tpu.memory_space<vmem>>, vector<1x256x256xbf16>
    %38 = vector.shape_cast %37 : vector<1x256x256xbf16> to vector<256x256xbf16>
    %39 = arith.truncf %36 : vector<256x16xf32> to vector<256x16xbf16>
    %cst_37 = arith.constant dense<0.000000e+00> : vector<256x16xf32>
    %40 = tpu.matmul %38, %39, %cst_37 {dimension_numbers = #tpu.dot_dimension_numbers<[1], [0], [0], [1], [0, 0, 1, 1], [], []>} : vector<256x256xbf16>, vector<256x16xbf16>, vector<256x16xf32> -> vector<256x16xf32>
    %41 = arith.addf %33, %40 : vector<256x16xf32>
    %cst_38 = arith.constant 0.000000e+00 : f32
    %42 = vector.broadcast %cst_38 : f32 to vector<256x16xf32>
    %43 = arith.maximumf %41, %42 : vector<256x16xf32>
    %44 = arith.truncf %43 : vector<256x16xf32> to vector<256x16xbf16>
    %c0_39 = arith.constant 0 : index
    %c0_40 = arith.constant 0 : index
    %45 = vector.load %arg6[%c0_39, %c0_40] : memref<128x8xf32, #tpu.memory_space<vmem>>, vector<128x8xf32>
    %c0_41 = arith.constant 0 : index
    %c0_42 = arith.constant 0 : index
    %c0_43 = arith.constant 0 : index
    %46 = vector.load %arg5[%c0_41, %c0_42, %c0_43] : memref<5x16x8xbf16, #tpu.memory_space<vmem>>, vector<1x16x8xbf16>
    %47 = vector.shape_cast %46 : vector<1x16x8xbf16> to vector<16x8xbf16>
    %cst_44 = arith.constant dense<0.000000e+00> : vector<256x8xf32>
    %48 = tpu.matmul %44, %47, %cst_44 {dimension_numbers = #tpu.dot_dimension_numbers<[1], [0], [0], [1], [0, 0, 1, 1], [], []>} : vector<256x16xbf16>, vector<16x8xbf16>, vector<256x8xf32> -> vector<256x8xf32>
    %c0_45 = arith.constant 0 : index
    %c0_46 = arith.constant 0 : index
    %c0_47 = arith.constant 0 : index
    %49 = vector.load %arg4[%c0_45, %c0_46, %c0_47] : memref<5x128x256xbf16, #tpu.memory_space<vmem>>, vector<1x128x256xbf16>
    %50 = vector.shape_cast %49 : vector<1x128x256xbf16> to vector<128x256xbf16>
    %51 = arith.truncf %48 : vector<256x8xf32> to vector<256x8xbf16>
    %cst_48 = arith.constant dense<0.000000e+00> : vector<128x8xf32>
    %52 = tpu.matmul %50, %51, %cst_48 {dimension_numbers = #tpu.dot_dimension_numbers<[1], [0], [0], [1], [0, 0, 1, 1], [], []>} : vector<128x256xbf16>, vector<256x8xbf16>, vector<128x8xf32> -> vector<128x8xf32>
    %53 = arith.addf %45, %52 : vector<128x8xf32>
    %c1_49 = arith.constant 1 : index
    %c0_50 = arith.constant 0 : index
    %c0_51 = arith.constant 0 : index
    %54 = vector.load %arg5[%c1_49, %c0_50, %c0_51] : memref<5x16x8xbf16, #tpu.memory_space<vmem>>, vector<1x16x8xbf16>
    %55 = vector.shape_cast %54 : vector<1x16x8xbf16> to vector<16x8xbf16>
    %cst_52 = arith.constant dense<0.000000e+00> : vector<256x8xf32>
    %56 = tpu.matmul %44, %55, %cst_52 {dimension_numbers = #tpu.dot_dimension_numbers<[1], [0], [0], [1], [0, 0, 1, 1], [], []>} : vector<256x16xbf16>, vector<16x8xbf16>, vector<256x8xf32> -> vector<256x8xf32>
    %c1_53 = arith.constant 1 : index
    %c0_54 = arith.constant 0 : index
    %c0_55 = arith.constant 0 : index
    %57 = vector.load %arg4[%c1_53, %c0_54, %c0_55] : memref<5x128x256xbf16, #tpu.memory_space<vmem>>, vector<1x128x256xbf16>
    %58 = vector.shape_cast %57 : vector<1x128x256xbf16> to vector<128x256xbf16>
    %59 = arith.truncf %56 : vector<256x8xf32> to vector<256x8xbf16>
    %cst_56 = arith.constant dense<0.000000e+00> : vector<128x8xf32>
    %60 = tpu.matmul %58, %59, %cst_56 {dimension_numbers = #tpu.dot_dimension_numbers<[1], [0], [0], [1], [0, 0, 1, 1], [], []>} : vector<128x256xbf16>, vector<256x8xbf16>, vector<128x8xf32> -> vector<128x8xf32>
    %61 = arith.addf %53, %60 : vector<128x8xf32>
    %c2_57 = arith.constant 2 : index
    %c0_58 = arith.constant 0 : index
    %c0_59 = arith.constant 0 : index
    %62 = vector.load %arg5[%c2_57, %c0_58, %c0_59] : memref<5x16x8xbf16, #tpu.memory_space<vmem>>, vector<1x16x8xbf16>
    %63 = vector.shape_cast %62 : vector<1x16x8xbf16> to vector<16x8xbf16>
    %cst_60 = arith.constant dense<0.000000e+00> : vector<256x8xf32>
    %64 = tpu.matmul %44, %63, %cst_60 {dimension_numbers = #tpu.dot_dimension_numbers<[1], [0], [0], [1], [0, 0, 1, 1], [], []>} : vector<256x16xbf16>, vector<16x8xbf16>, vector<256x8xf32> -> vector<256x8xf32>
    %c2_61 = arith.constant 2 : index
    %c0_62 = arith.constant 0 : index
    %c0_63 = arith.constant 0 : index
    %65 = vector.load %arg4[%c2_61, %c0_62, %c0_63] : memref<5x128x256xbf16, #tpu.memory_space<vmem>>, vector<1x128x256xbf16>
    %66 = vector.shape_cast %65 : vector<1x128x256xbf16> to vector<128x256xbf16>
    %67 = arith.truncf %64 : vector<256x8xf32> to vector<256x8xbf16>
    %cst_64 = arith.constant dense<0.000000e+00> : vector<128x8xf32>
    %68 = tpu.matmul %66, %67, %cst_64 {dimension_numbers = #tpu.dot_dimension_numbers<[1], [0], [0], [1], [0, 0, 1, 1], [], []>} : vector<128x256xbf16>, vector<256x8xbf16>, vector<128x8xf32> -> vector<128x8xf32>
    %69 = arith.addf %61, %68 : vector<128x8xf32>
    %c3_65 = arith.constant 3 : index
    %c0_66 = arith.constant 0 : index
    %c0_67 = arith.constant 0 : index
    %70 = vector.load %arg5[%c3_65, %c0_66, %c0_67] : memref<5x16x8xbf16, #tpu.memory_space<vmem>>, vector<1x16x8xbf16>
    %71 = vector.shape_cast %70 : vector<1x16x8xbf16> to vector<16x8xbf16>
    %cst_68 = arith.constant dense<0.000000e+00> : vector<256x8xf32>
    %72 = tpu.matmul %44, %71, %cst_68 {dimension_numbers = #tpu.dot_dimension_numbers<[1], [0], [0], [1], [0, 0, 1, 1], [], []>} : vector<256x16xbf16>, vector<16x8xbf16>, vector<256x8xf32> -> vector<256x8xf32>
    %c3_69 = arith.constant 3 : index
    %c0_70 = arith.constant 0 : index
    %c0_71 = arith.constant 0 : index
    %73 = vector.load %arg4[%c3_69, %c0_70, %c0_71] : memref<5x128x256xbf16, #tpu.memory_space<vmem>>, vector<1x128x256xbf16>
    %74 = vector.shape_cast %73 : vector<1x128x256xbf16> to vector<128x256xbf16>
    %75 = arith.truncf %72 : vector<256x8xf32> to vector<256x8xbf16>
    %cst_72 = arith.constant dense<0.000000e+00> : vector<128x8xf32>
    %76 = tpu.matmul %74, %75, %cst_72 {dimension_numbers = #tpu.dot_dimension_numbers<[1], [0], [0], [1], [0, 0, 1, 1], [], []>} : vector<128x256xbf16>, vector<256x8xbf16>, vector<128x8xf32> -> vector<128x8xf32>
    %77 = arith.addf %69, %76 : vector<128x8xf32>
    %c4_73 = arith.constant 4 : index
    %c0_74 = arith.constant 0 : index
    %c0_75 = arith.constant 0 : index
    %78 = vector.load %arg5[%c4_73, %c0_74, %c0_75] : memref<5x16x8xbf16, #tpu.memory_space<vmem>>, vector<1x16x8xbf16>
    %79 = vector.shape_cast %78 : vector<1x16x8xbf16> to vector<16x8xbf16>
    %cst_76 = arith.constant dense<0.000000e+00> : vector<256x8xf32>
    %80 = tpu.matmul %44, %79, %cst_76 {dimension_numbers = #tpu.dot_dimension_numbers<[1], [0], [0], [1], [0, 0, 1, 1], [], []>} : vector<256x16xbf16>, vector<16x8xbf16>, vector<256x8xf32> -> vector<256x8xf32>
    %c4_77 = arith.constant 4 : index
    %c0_78 = arith.constant 0 : index
    %c0_79 = arith.constant 0 : index
    %81 = vector.load %arg4[%c4_77, %c0_78, %c0_79] : memref<5x128x256xbf16, #tpu.memory_space<vmem>>, vector<1x128x256xbf16>
    %82 = vector.shape_cast %81 : vector<1x128x256xbf16> to vector<128x256xbf16>
    %83 = arith.truncf %80 : vector<256x8xf32> to vector<256x8xbf16>
    %cst_80 = arith.constant dense<0.000000e+00> : vector<128x8xf32>
    %84 = tpu.matmul %82, %83, %cst_80 {dimension_numbers = #tpu.dot_dimension_numbers<[1], [0], [0], [1], [0, 0, 1, 1], [], []>} : vector<128x256xbf16>, vector<256x8xbf16>, vector<128x8xf32> -> vector<128x8xf32>
    %85 = arith.addf %77, %84 : vector<128x8xf32>
    %cst_81 = arith.constant 0.000000e+00 : f32
    %86 = vector.broadcast %cst_81 : f32 to vector<128x8xf32>
    %87 = arith.maximumf %85, %86 : vector<128x8xf32>
    %88 = arith.truncf %87 : vector<128x8xf32> to vector<128x8xbf16>
    %c0_82 = arith.constant 0 : index
    %c0_83 = arith.constant 0 : index
    %89 = vector.load %arg9[%c0_82, %c0_83] : memref<48x3xf32, #tpu.memory_space<vmem>>, vector<48x3xf32>
    %c0_84 = arith.constant 0 : index
    %c0_85 = arith.constant 0 : index
    %c0_86 = arith.constant 0 : index
    %90 = vector.load %arg8[%c0_84, %c0_85, %c0_86] : memref<3x8x3xbf16, #tpu.memory_space<vmem>>, vector<1x8x3xbf16>
    %91 = vector.shape_cast %90 : vector<1x8x3xbf16> to vector<8x3xbf16>
    %cst_87 = arith.constant dense<0.000000e+00> : vector<128x3xf32>
    %92 = tpu.matmul %88, %91, %cst_87 {dimension_numbers = #tpu.dot_dimension_numbers<[1], [0], [0], [1], [0, 0, 1, 1], [], []>} : vector<128x8xbf16>, vector<8x3xbf16>, vector<128x3xf32> -> vector<128x3xf32>
    %c0_88 = arith.constant 0 : index
    %c0_89 = arith.constant 0 : index
    %c0_90 = arith.constant 0 : index
    %93 = vector.load %arg7[%c0_88, %c0_89, %c0_90] : memref<3x48x128xbf16, #tpu.memory_space<vmem>>, vector<1x48x128xbf16>
    %94 = vector.shape_cast %93 : vector<1x48x128xbf16> to vector<48x128xbf16>
    %95 = arith.truncf %92 : vector<128x3xf32> to vector<128x3xbf16>
    %cst_91 = arith.constant dense<0.000000e+00> : vector<48x3xf32>
    %96 = tpu.matmul %94, %95, %cst_91 {dimension_numbers = #tpu.dot_dimension_numbers<[1], [0], [0], [1], [0, 0, 1, 1], [], []>} : vector<48x128xbf16>, vector<128x3xbf16>, vector<48x3xf32> -> vector<48x3xf32>
    %97 = arith.addf %89, %96 : vector<48x3xf32>
    %c1_92 = arith.constant 1 : index
    %c0_93 = arith.constant 0 : index
    %c0_94 = arith.constant 0 : index
    %98 = vector.load %arg8[%c1_92, %c0_93, %c0_94] : memref<3x8x3xbf16, #tpu.memory_space<vmem>>, vector<1x8x3xbf16>
    %99 = vector.shape_cast %98 : vector<1x8x3xbf16> to vector<8x3xbf16>
    %cst_95 = arith.constant dense<0.000000e+00> : vector<128x3xf32>
    %100 = tpu.matmul %88, %99, %cst_95 {dimension_numbers = #tpu.dot_dimension_numbers<[1], [0], [0], [1], [0, 0, 1, 1], [], []>} : vector<128x8xbf16>, vector<8x3xbf16>, vector<128x3xf32> -> vector<128x3xf32>
    %c1_96 = arith.constant 1 : index
    %c0_97 = arith.constant 0 : index
    %c0_98 = arith.constant 0 : index
    %101 = vector.load %arg7[%c1_96, %c0_97, %c0_98] : memref<3x48x128xbf16, #tpu.memory_space<vmem>>, vector<1x48x128xbf16>
    %102 = vector.shape_cast %101 : vector<1x48x128xbf16> to vector<48x128xbf16>
    %103 = arith.truncf %100 : vector<128x3xf32> to vector<128x3xbf16>
    %cst_99 = arith.constant dense<0.000000e+00> : vector<48x3xf32>
    %104 = tpu.matmul %102, %103, %cst_99 {dimension_numbers = #tpu.dot_dimension_numbers<[1], [0], [0], [1], [0, 0, 1, 1], [], []>} : vector<48x128xbf16>, vector<128x3xbf16>, vector<48x3xf32> -> vector<48x3xf32>
    %105 = arith.addf %97, %104 : vector<48x3xf32>
    %c2_100 = arith.constant 2 : index
    %c0_101 = arith.constant 0 : index
    %c0_102 = arith.constant 0 : index
    %106 = vector.load %arg8[%c2_100, %c0_101, %c0_102] : memref<3x8x3xbf16, #tpu.memory_space<vmem>>, vector<1x8x3xbf16>
    %107 = vector.shape_cast %106 : vector<1x8x3xbf16> to vector<8x3xbf16>
    %cst_103 = arith.constant dense<0.000000e+00> : vector<128x3xf32>
    %108 = tpu.matmul %88, %107, %cst_103 {dimension_numbers = #tpu.dot_dimension_numbers<[1], [0], [0], [1], [0, 0, 1, 1], [], []>} : vector<128x8xbf16>, vector<8x3xbf16>, vector<128x3xf32> -> vector<128x3xf32>
    %c2_104 = arith.constant 2 : index
    %c0_105 = arith.constant 0 : index
    %c0_106 = arith.constant 0 : index
    %109 = vector.load %arg7[%c2_104, %c0_105, %c0_106] : memref<3x48x128xbf16, #tpu.memory_space<vmem>>, vector<1x48x128xbf16>
    %110 = vector.shape_cast %109 : vector<1x48x128xbf16> to vector<48x128xbf16>
    %111 = arith.truncf %108 : vector<128x3xf32> to vector<128x3xbf16>
    %cst_107 = arith.constant dense<0.000000e+00> : vector<48x3xf32>
    %112 = tpu.matmul %110, %111, %cst_107 {dimension_numbers = #tpu.dot_dimension_numbers<[1], [0], [0], [1], [0, 0, 1, 1], [], []>} : vector<48x128xbf16>, vector<128x3xbf16>, vector<48x3xf32> -> vector<48x3xf32>
    %113 = arith.addf %105, %112 : vector<48x3xf32>
    %cst_108 = arith.constant 0.000000e+00 : f32
    %114 = vector.broadcast %cst_108 : f32 to vector<48x3xf32>
    %115 = arith.maximumf %113, %114 : vector<48x3xf32>
    %116 = arith.truncf %115 : vector<48x3xf32> to vector<48x3xbf16>
    %c0_109 = arith.constant 0 : index
    %c0_110 = arith.constant 0 : index
    %117 = vector.load %arg12[%c0_109, %c0_110] : memref<20x1xf32, #tpu.memory_space<vmem>>, vector<20x1xf32>
    %c0_111 = arith.constant 0 : index
    %c0_112 = arith.constant 0 : index
    %c0_113 = arith.constant 0 : index
    %118 = vector.load %arg11[%c0_111, %c0_112, %c0_113] : memref<3x3x1xbf16, #tpu.memory_space<vmem>>, vector<1x3x1xbf16>
    %119 = vector.shape_cast %118 : vector<1x3x1xbf16> to vector<3x1xbf16>
    %cst_114 = arith.constant dense<0.000000e+00> : vector<48x1xf32>
    %120 = tpu.matmul %116, %119, %cst_114 {dimension_numbers = #tpu.dot_dimension_numbers<[1], [0], [0], [1], [0, 0, 1, 1], [], []>} : vector<48x3xbf16>, vector<3x1xbf16>, vector<48x1xf32> -> vector<48x1xf32>
    %c0_115 = arith.constant 0 : index
    %c0_116 = arith.constant 0 : index
    %c0_117 = arith.constant 0 : index
    %121 = vector.load %arg10[%c0_115, %c0_116, %c0_117] : memref<3x20x48xbf16, #tpu.memory_space<vmem>>, vector<1x20x48xbf16>
    %122 = vector.shape_cast %121 : vector<1x20x48xbf16> to vector<20x48xbf16>
    %123 = arith.truncf %120 : vector<48x1xf32> to vector<48x1xbf16>
    %cst_118 = arith.constant dense<0.000000e+00> : vector<20x1xf32>
    %124 = tpu.matmul %122, %123, %cst_118 {dimension_numbers = #tpu.dot_dimension_numbers<[1], [0], [0], [1], [0, 0, 1, 1], [], []>} : vector<20x48xbf16>, vector<48x1xbf16>, vector<20x1xf32> -> vector<20x1xf32>
    %125 = arith.addf %117, %124 : vector<20x1xf32>
    %c1_119 = arith.constant 1 : index
    %c0_120 = arith.constant 0 : index
    %c0_121 = arith.constant 0 : index
    %126 = vector.load %arg11[%c1_119, %c0_120, %c0_121] : memref<3x3x1xbf16, #tpu.memory_space<vmem>>, vector<1x3x1xbf16>
    %127 = vector.shape_cast %126 : vector<1x3x1xbf16> to vector<3x1xbf16>
    %cst_122 = arith.constant dense<0.000000e+00> : vector<48x1xf32>
    %128 = tpu.matmul %116, %127, %cst_122 {dimension_numbers = #tpu.dot_dimension_numbers<[1], [0], [0], [1], [0, 0, 1, 1], [], []>} : vector<48x3xbf16>, vector<3x1xbf16>, vector<48x1xf32> -> vector<48x1xf32>
    %c1_123 = arith.constant 1 : index
    %c0_124 = arith.constant 0 : index
    %c0_125 = arith.constant 0 : index
    %129 = vector.load %arg10[%c1_123, %c0_124, %c0_125] : memref<3x20x48xbf16, #tpu.memory_space<vmem>>, vector<1x20x48xbf16>
    %130 = vector.shape_cast %129 : vector<1x20x48xbf16> to vector<20x48xbf16>
    %131 = arith.truncf %128 : vector<48x1xf32> to vector<48x1xbf16>
    %cst_126 = arith.constant dense<0.000000e+00> : vector<20x1xf32>
    %132 = tpu.matmul %130, %131, %cst_126 {dimension_numbers = #tpu.dot_dimension_numbers<[1], [0], [0], [1], [0, 0, 1, 1], [], []>} : vector<20x48xbf16>, vector<48x1xbf16>, vector<20x1xf32> -> vector<20x1xf32>
    %133 = arith.addf %125, %132 : vector<20x1xf32>
    %c2_127 = arith.constant 2 : index
    %c0_128 = arith.constant 0 : index
    %c0_129 = arith.constant 0 : index
    %134 = vector.load %arg11[%c2_127, %c0_128, %c0_129] : memref<3x3x1xbf16, #tpu.memory_space<vmem>>, vector<1x3x1xbf16>
    %135 = vector.shape_cast %134 : vector<1x3x1xbf16> to vector<3x1xbf16>
    %cst_130 = arith.constant dense<0.000000e+00> : vector<48x1xf32>
    %136 = tpu.matmul %116, %135, %cst_130 {dimension_numbers = #tpu.dot_dimension_numbers<[1], [0], [0], [1], [0, 0, 1, 1], [], []>} : vector<48x3xbf16>, vector<3x1xbf16>, vector<48x1xf32> -> vector<48x1xf32>
    %c2_131 = arith.constant 2 : index
    %c0_132 = arith.constant 0 : index
    %c0_133 = arith.constant 0 : index
    %137 = vector.load %arg10[%c2_131, %c0_132, %c0_133] : memref<3x20x48xbf16, #tpu.memory_space<vmem>>, vector<1x20x48xbf16>
    %138 = vector.shape_cast %137 : vector<1x20x48xbf16> to vector<20x48xbf16>
    %139 = arith.truncf %136 : vector<48x1xf32> to vector<48x1xbf16>
    %cst_134 = arith.constant dense<0.000000e+00> : vector<20x1xf32>
    %140 = tpu.matmul %138, %139, %cst_134 {dimension_numbers = #tpu.dot_dimension_numbers<[1], [0], [0], [1], [0, 0, 1, 1], [], []>} : vector<20x48xbf16>, vector<48x1xbf16>, vector<20x1xf32> -> vector<20x1xf32>
    %141 = arith.addf %133, %140 : vector<20x1xf32>
    %c0_135 = arith.constant 0 : index
    %c0_136 = arith.constant 0 : index
    %142 = vector.load %arg26[%c0_135, %c0_136] : memref<20x1xf32, #tpu.memory_space<vmem>>, vector<20x1xf32>
    tpu.vector_store %arg26[%c0_135, %c0_136], %141 {strides = array<i32>} : memref<20x1xf32, #tpu.memory_space<vmem>>, vector<20x1xf32>,
    %143 = arith.truncf %141 : vector<20x1xf32> to vector<20x1xbf16>
    %c0_137 = arith.constant 0 : index
    %c0_138 = arith.constant 0 : index
    %144 = vector.load %arg15[%c0_137, %c0_138] : memref<48x3xf32, #tpu.memory_space<vmem>>, vector<48x3xf32>
    %c0_139 = arith.constant 0 : index
    %c0_140 = arith.constant 0 : index
    %c0_141 = arith.constant 0 : index
    %145 = vector.load %arg14[%c0_139, %c0_140, %c0_141] : memref<3x1x3xbf16, #tpu.memory_space<vmem>>, vector<1x1x3xbf16>
    %146 = vector.shape_cast %145 : vector<1x1x3xbf16> to vector<1x3xbf16>
    %cst_142 = arith.constant dense<0.000000e+00> : vector<20x3xf32>
    %147 = tpu.matmul %143, %146, %cst_142 {dimension_numbers = #tpu.dot_dimension_numbers<[1], [0], [0], [1], [0, 0, 1, 1], [], []>} : vector<20x1xbf16>, vector<1x3xbf16>, vector<20x3xf32> -> vector<20x3xf32>
    %c0_143 = arith.constant 0 : index
    %c0_144 = arith.constant 0 : index
    %c0_145 = arith.constant 0 : index
    %148 = vector.load %arg13[%c0_143, %c0_144, %c0_145] : memref<3x48x20xbf16, #tpu.memory_space<vmem>>, vector<1x48x20xbf16>
    %149 = vector.shape_cast %148 : vector<1x48x20xbf16> to vector<48x20xbf16>
    %150 = arith.truncf %147 : vector<20x3xf32> to vector<20x3xbf16>
    %cst_146 = arith.constant dense<0.000000e+00> : vector<48x3xf32>
    %151 = tpu.matmul %149, %150, %cst_146 {dimension_numbers = #tpu.dot_dimension_numbers<[1], [0], [0], [1], [0, 0, 1, 1], [], []>} : vector<48x20xbf16>, vector<20x3xbf16>, vector<48x3xf32> -> vector<48x3xf32>
    %152 = arith.addf %144, %151 : vector<48x3xf32>
    %c1_147 = arith.constant 1 : index
    %c0_148 = arith.constant 0 : index
    %c0_149 = arith.constant 0 : index
    %153 = vector.load %arg14[%c1_147, %c0_148, %c0_149] : memref<3x1x3xbf16, #tpu.memory_space<vmem>>, vector<1x1x3xbf16>
    %154 = vector.shape_cast %153 : vector<1x1x3xbf16> to vector<1x3xbf16>
    %cst_150 = arith.constant dense<0.000000e+00> : vector<20x3xf32>
    %155 = tpu.matmul %143, %154, %cst_150 {dimension_numbers = #tpu.dot_dimension_numbers<[1], [0], [0], [1], [0, 0, 1, 1], [], []>} : vector<20x1xbf16>, vector<1x3xbf16>, vector<20x3xf32> -> vector<20x3xf32>
    %c1_151 = arith.constant 1 : index
    %c0_152 = arith.constant 0 : index
    %c0_153 = arith.constant 0 : index
    %156 = vector.load %arg13[%c1_151, %c0_152, %c0_153] : memref<3x48x20xbf16, #tpu.memory_space<vmem>>, vector<1x48x20xbf16>
    %157 = vector.shape_cast %156 : vector<1x48x20xbf16> to vector<48x20xbf16>
    %158 = arith.truncf %155 : vector<20x3xf32> to vector<20x3xbf16>
    %cst_154 = arith.constant dense<0.000000e+00> : vector<48x3xf32>
    %159 = tpu.matmul %157, %158, %cst_154 {dimension_numbers = #tpu.dot_dimension_numbers<[1], [0], [0], [1], [0, 0, 1, 1], [], []>} : vector<48x20xbf16>, vector<20x3xbf16>, vector<48x3xf32> -> vector<48x3xf32>
    %160 = arith.addf %152, %159 : vector<48x3xf32>
    %c2_155 = arith.constant 2 : index
    %c0_156 = arith.constant 0 : index
    %c0_157 = arith.constant 0 : index
    %161 = vector.load %arg14[%c2_155, %c0_156, %c0_157] : memref<3x1x3xbf16, #tpu.memory_space<vmem>>, vector<1x1x3xbf16>
    %162 = vector.shape_cast %161 : vector<1x1x3xbf16> to vector<1x3xbf16>
    %cst_158 = arith.constant dense<0.000000e+00> : vector<20x3xf32>
    %163 = tpu.matmul %143, %162, %cst_158 {dimension_numbers = #tpu.dot_dimension_numbers<[1], [0], [0], [1], [0, 0, 1, 1], [], []>} : vector<20x1xbf16>, vector<1x3xbf16>, vector<20x3xf32> -> vector<20x3xf32>
    %c2_159 = arith.constant 2 : index
    %c0_160 = arith.constant 0 : index
    %c0_161 = arith.constant 0 : index
    %164 = vector.load %arg13[%c2_159, %c0_160, %c0_161] : memref<3x48x20xbf16, #tpu.memory_space<vmem>>, vector<1x48x20xbf16>
    %165 = vector.shape_cast %164 : vector<1x48x20xbf16> to vector<48x20xbf16>
    %166 = arith.truncf %163 : vector<20x3xf32> to vector<20x3xbf16>
    %cst_162 = arith.constant dense<0.000000e+00> : vector<48x3xf32>
    %167 = tpu.matmul %165, %166, %cst_162 {dimension_numbers = #tpu.dot_dimension_numbers<[1], [0], [0], [1], [0, 0, 1, 1], [], []>} : vector<48x20xbf16>, vector<20x3xbf16>, vector<48x3xf32> -> vector<48x3xf32>
    %168 = arith.addf %160, %167 : vector<48x3xf32>
    %169 = arith.truncf %168 : vector<48x3xf32> to vector<48x3xbf16>
    %c0_163 = arith.constant 0 : index
    %c0_164 = arith.constant 0 : index
    %170 = vector.load %arg18[%c0_163, %c0_164] : memref<112x7xf32, #tpu.memory_space<vmem>>, vector<112x7xf32>
    %c0_165 = arith.constant 0 : index
    %c0_166 = arith.constant 0 : index
    %c0_167 = arith.constant 0 : index
    %171 = vector.load %arg17[%c0_165, %c0_166, %c0_167] : memref<3x3x7xbf16, #tpu.memory_space<vmem>>, vector<1x3x7xbf16>
    %172 = vector.shape_cast %171 : vector<1x3x7xbf16> to vector<3x7xbf16>
    %cst_168 = arith.constant dense<0.000000e+00> : vector<48x7xf32>
    %173 = tpu.matmul %169, %172, %cst_168 {dimension_numbers = #tpu.dot_dimension_numbers<[1], [0], [0], [1], [0, 0, 1, 1], [], []>} : vector<48x3xbf16>, vector<3x7xbf16>, vector<48x7xf32> -> vector<48x7xf32>
    %c0_169 = arith.constant 0 : index
    %c0_170 = arith.constant 0 : index
    %c0_171 = arith.constant 0 : index
    %174 = vector.load %arg16[%c0_169, %c0_170, %c0_171] : memref<3x112x48xbf16, #tpu.memory_space<vmem>>, vector<1x112x48xbf16>
    %175 = vector.shape_cast %174 : vector<1x112x48xbf16> to vector<112x48xbf16>
    %176 = arith.truncf %173 : vector<48x7xf32> to vector<48x7xbf16>
    %cst_172 = arith.constant dense<0.000000e+00> : vector<112x7xf32>
    %177 = tpu.matmul %175, %176, %cst_172 {dimension_numbers = #tpu.dot_dimension_numbers<[1], [0], [0], [1], [0, 0, 1, 1], [], []>} : vector<112x48xbf16>, vector<48x7xbf16>, vector<112x7xf32> -> vector<112x7xf32>
    %178 = arith.addf %170, %177 : vector<112x7xf32>
    %c1_173 = arith.constant 1 : index
    %c0_174 = arith.constant 0 : index
    %c0_175 = arith.constant 0 : index
    %179 = vector.load %arg17[%c1_173, %c0_174, %c0_175] : memref<3x3x7xbf16, #tpu.memory_space<vmem>>, vector<1x3x7xbf16>
    %180 = vector.shape_cast %179 : vector<1x3x7xbf16> to vector<3x7xbf16>
    %cst_176 = arith.constant dense<0.000000e+00> : vector<48x7xf32>
    %181 = tpu.matmul %169, %180, %cst_176 {dimension_numbers = #tpu.dot_dimension_numbers<[1], [0], [0], [1], [0, 0, 1, 1], [], []>} : vector<48x3xbf16>, vector<3x7xbf16>, vector<48x7xf32> -> vector<48x7xf32>
    %c1_177 = arith.constant 1 : index
    %c0_178 = arith.constant 0 : index
    %c0_179 = arith.constant 0 : index
    %182 = vector.load %arg16[%c1_177, %c0_178, %c0_179] : memref<3x112x48xbf16, #tpu.memory_space<vmem>>, vector<1x112x48xbf16>
    %183 = vector.shape_cast %182 : vector<1x112x48xbf16> to vector<112x48xbf16>
    %184 = arith.truncf %181 : vector<48x7xf32> to vector<48x7xbf16>
    %cst_180 = arith.constant dense<0.000000e+00> : vector<112x7xf32>
    %185 = tpu.matmul %183, %184, %cst_180 {dimension_numbers = #tpu.dot_dimension_numbers<[1], [0], [0], [1], [0, 0, 1, 1], [], []>} : vector<112x48xbf16>, vector<48x7xbf16>, vector<112x7xf32> -> vector<112x7xf32>
    %186 = arith.addf %178, %185 : vector<112x7xf32>
    %c2_181 = arith.constant 2 : index
    %c0_182 = arith.constant 0 : index
    %c0_183 = arith.constant 0 : index
    %187 = vector.load %arg17[%c2_181, %c0_182, %c0_183] : memref<3x3x7xbf16, #tpu.memory_space<vmem>>, vector<1x3x7xbf16>
    %188 = vector.shape_cast %187 : vector<1x3x7xbf16> to vector<3x7xbf16>
    %cst_184 = arith.constant dense<0.000000e+00> : vector<48x7xf32>
    %189 = tpu.matmul %169, %188, %cst_184 {dimension_numbers = #tpu.dot_dimension_numbers<[1], [0], [0], [1], [0, 0, 1, 1], [], []>} : vector<48x3xbf16>, vector<3x7xbf16>, vector<48x7xf32> -> vector<48x7xf32>
    %c2_185 = arith.constant 2 : index
    %c0_186 = arith.constant 0 : index
    %c0_187 = arith.constant 0 : index
    %190 = vector.load %arg16[%c2_185, %c0_186, %c0_187] : memref<3x112x48xbf16, #tpu.memory_space<vmem>>, vector<1x112x48xbf16>
    %191 = vector.shape_cast %190 : vector<1x112x48xbf16> to vector<112x48xbf16>
    %192 = arith.truncf %189 : vector<48x7xf32> to vector<48x7xbf16>
    %cst_188 = arith.constant dense<0.000000e+00> : vector<112x7xf32>
    %193 = tpu.matmul %191, %192, %cst_188 {dimension_numbers = #tpu.dot_dimension_numbers<[1], [0], [0], [1], [0, 0, 1, 1], [], []>} : vector<112x48xbf16>, vector<48x7xbf16>, vector<112x7xf32> -> vector<112x7xf32>
    %194 = arith.addf %186, %193 : vector<112x7xf32>
    %cst_189 = arith.constant 0.000000e+00 : f32
    %195 = vector.broadcast %cst_189 : f32 to vector<112x7xf32>
    %196 = arith.maximumf %194, %195 : vector<112x7xf32>
    %197 = arith.truncf %196 : vector<112x7xf32> to vector<112x7xbf16>
    %c0_190 = arith.constant 0 : index
    %c0_191 = arith.constant 0 : index
    %198 = vector.load %arg21[%c0_190, %c0_191] : memref<224x14xf32, #tpu.memory_space<vmem>>, vector<224x14xf32>
    %c0_192 = arith.constant 0 : index
    %c0_193 = arith.constant 0 : index
    %c0_194 = arith.constant 0 : index
    %199 = vector.load %arg20[%c0_192, %c0_193, %c0_194] : memref<5x7x14xbf16, #tpu.memory_space<vmem>>, vector<1x7x14xbf16>
    %200 = vector.shape_cast %199 : vector<1x7x14xbf16> to vector<7x14xbf16>
    %cst_195 = arith.constant dense<0.000000e+00> : vector<112x14xf32>
    %201 = tpu.matmul %197, %200, %cst_195 {dimension_numbers = #tpu.dot_dimension_numbers<[1], [0], [0], [1], [0, 0, 1, 1], [], []>} : vector<112x7xbf16>, vector<7x14xbf16>, vector<112x14xf32> -> vector<112x14xf32>
    %c0_196 = arith.constant 0 : index
    %c0_197 = arith.constant 0 : index
    %c0_198 = arith.constant 0 : index
    %202 = vector.load %arg19[%c0_196, %c0_197, %c0_198] : memref<5x224x112xbf16, #tpu.memory_space<vmem>>, vector<1x224x112xbf16>
    %203 = vector.shape_cast %202 : vector<1x224x112xbf16> to vector<224x112xbf16>
    %204 = arith.truncf %201 : vector<112x14xf32> to vector<112x14xbf16>
    %cst_199 = arith.constant dense<0.000000e+00> : vector<224x14xf32>
    %205 = tpu.matmul %203, %204, %cst_199 {dimension_numbers = #tpu.dot_dimension_numbers<[1], [0], [0], [1], [0, 0, 1, 1], [], []>} : vector<224x112xbf16>, vector<112x14xbf16>, vector<224x14xf32> -> vector<224x14xf32>
    %206 = arith.addf %198, %205 : vector<224x14xf32>
    %c1_200 = arith.constant 1 : index
    %c0_201 = arith.constant 0 : index
    %c0_202 = arith.constant 0 : index
    %207 = vector.load %arg20[%c1_200, %c0_201, %c0_202] : memref<5x7x14xbf16, #tpu.memory_space<vmem>>, vector<1x7x14xbf16>
    %208 = vector.shape_cast %207 : vector<1x7x14xbf16> to vector<7x14xbf16>
    %cst_203 = arith.constant dense<0.000000e+00> : vector<112x14xf32>
    %209 = tpu.matmul %197, %208, %cst_203 {dimension_numbers = #tpu.dot_dimension_numbers<[1], [0], [0], [1], [0, 0, 1, 1], [], []>} : vector<112x7xbf16>, vector<7x14xbf16>, vector<112x14xf32> -> vector<112x14xf32>
    %c1_204 = arith.constant 1 : index
    %c0_205 = arith.constant 0 : index
    %c0_206 = arith.constant 0 : index
    %210 = vector.load %arg19[%c1_204, %c0_205, %c0_206] : memref<5x224x112xbf16, #tpu.memory_space<vmem>>, vector<1x224x112xbf16>
    %211 = vector.shape_cast %210 : vector<1x224x112xbf16> to vector<224x112xbf16>
    %212 = arith.truncf %209 : vector<112x14xf32> to vector<112x14xbf16>
    %cst_207 = arith.constant dense<0.000000e+00> : vector<224x14xf32>
    %213 = tpu.matmul %211, %212, %cst_207 {dimension_numbers = #tpu.dot_dimension_numbers<[1], [0], [0], [1], [0, 0, 1, 1], [], []>} : vector<224x112xbf16>, vector<112x14xbf16>, vector<224x14xf32> -> vector<224x14xf32>
    %214 = arith.addf %206, %213 : vector<224x14xf32>
    %c2_208 = arith.constant 2 : index
    %c0_209 = arith.constant 0 : index
    %c0_210 = arith.constant 0 : index
    %215 = vector.load %arg20[%c2_208, %c0_209, %c0_210] : memref<5x7x14xbf16, #tpu.memory_space<vmem>>, vector<1x7x14xbf16>
    %216 = vector.shape_cast %215 : vector<1x7x14xbf16> to vector<7x14xbf16>
    %cst_211 = arith.constant dense<0.000000e+00> : vector<112x14xf32>
    %217 = tpu.matmul %197, %216, %cst_211 {dimension_numbers = #tpu.dot_dimension_numbers<[1], [0], [0], [1], [0, 0, 1, 1], [], []>} : vector<112x7xbf16>, vector<7x14xbf16>, vector<112x14xf32> -> vector<112x14xf32>
    %c2_212 = arith.constant 2 : index
    %c0_213 = arith.constant 0 : index
    %c0_214 = arith.constant 0 : index
    %218 = vector.load %arg19[%c2_212, %c0_213, %c0_214] : memref<5x224x112xbf16, #tpu.memory_space<vmem>>, vector<1x224x112xbf16>
    %219 = vector.shape_cast %218 : vector<1x224x112xbf16> to vector<224x112xbf16>
    %220 = arith.truncf %217 : vector<112x14xf32> to vector<112x14xbf16>
    %cst_215 = arith.constant dense<0.000000e+00> : vector<224x14xf32>
    %221 = tpu.matmul %219, %220, %cst_215 {dimension_numbers = #tpu.dot_dimension_numbers<[1], [0], [0], [1], [0, 0, 1, 1], [], []>} : vector<224x112xbf16>, vector<112x14xbf16>, vector<224x14xf32> -> vector<224x14xf32>
    %222 = arith.addf %214, %221 : vector<224x14xf32>
    %c3_216 = arith.constant 3 : index
    %c0_217 = arith.constant 0 : index
    %c0_218 = arith.constant 0 : index
    %223 = vector.load %arg20[%c3_216, %c0_217, %c0_218] : memref<5x7x14xbf16, #tpu.memory_space<vmem>>, vector<1x7x14xbf16>
    %224 = vector.shape_cast %223 : vector<1x7x14xbf16> to vector<7x14xbf16>
    %cst_219 = arith.constant dense<0.000000e+00> : vector<112x14xf32>
    %225 = tpu.matmul %197, %224, %cst_219 {dimension_numbers = #tpu.dot_dimension_numbers<[1], [0], [0], [1], [0, 0, 1, 1], [], []>} : vector<112x7xbf16>, vector<7x14xbf16>, vector<112x14xf32> -> vector<112x14xf32>
    %c3_220 = arith.constant 3 : index
    %c0_221 = arith.constant 0 : index
    %c0_222 = arith.constant 0 : index
    %226 = vector.load %arg19[%c3_220, %c0_221, %c0_222] : memref<5x224x112xbf16, #tpu.memory_space<vmem>>, vector<1x224x112xbf16>
    %227 = vector.shape_cast %226 : vector<1x224x112xbf16> to vector<224x112xbf16>
    %228 = arith.truncf %225 : vector<112x14xf32> to vector<112x14xbf16>
    %cst_223 = arith.constant dense<0.000000e+00> : vector<224x14xf32>
    %229 = tpu.matmul %227, %228, %cst_223 {dimension_numbers = #tpu.dot_dimension_numbers<[1], [0], [0], [1], [0, 0, 1, 1], [], []>} : vector<224x112xbf16>, vector<112x14xbf16>, vector<224x14xf32> -> vector<224x14xf32>
    %230 = arith.addf %222, %229 : vector<224x14xf32>
    %c4_224 = arith.constant 4 : index
    %c0_225 = arith.constant 0 : index
    %c0_226 = arith.constant 0 : index
    %231 = vector.load %arg20[%c4_224, %c0_225, %c0_226] : memref<5x7x14xbf16, #tpu.memory_space<vmem>>, vector<1x7x14xbf16>
    %232 = vector.shape_cast %231 : vector<1x7x14xbf16> to vector<7x14xbf16>
    %cst_227 = arith.constant dense<0.000000e+00> : vector<112x14xf32>
    %233 = tpu.matmul %197, %232, %cst_227 {dimension_numbers = #tpu.dot_dimension_numbers<[1], [0], [0], [1], [0, 0, 1, 1], [], []>} : vector<112x7xbf16>, vector<7x14xbf16>, vector<112x14xf32> -> vector<112x14xf32>
    %c4_228 = arith.constant 4 : index
    %c0_229 = arith.constant 0 : index
    %c0_230 = arith.constant 0 : index
    %234 = vector.load %arg19[%c4_228, %c0_229, %c0_230] : memref<5x224x112xbf16, #tpu.memory_space<vmem>>, vector<1x224x112xbf16>
    %235 = vector.shape_cast %234 : vector<1x224x112xbf16> to vector<224x112xbf16>
    %236 = arith.truncf %233 : vector<112x14xf32> to vector<112x14xbf16>
    %cst_231 = arith.constant dense<0.000000e+00> : vector<224x14xf32>
    %237 = tpu.matmul %235, %236, %cst_231 {dimension_numbers = #tpu.dot_dimension_numbers<[1], [0], [0], [1], [0, 0, 1, 1], [], []>} : vector<224x112xbf16>, vector<112x14xbf16>, vector<224x14xf32> -> vector<224x14xf32>
    %238 = arith.addf %230, %237 : vector<224x14xf32>
    %cst_232 = arith.constant 0.000000e+00 : f32
    %239 = vector.broadcast %cst_232 : f32 to vector<224x14xf32>
    %240 = arith.maximumf %238, %239 : vector<224x14xf32>
    %241 = arith.truncf %240 : vector<224x14xf32> to vector<224x14xbf16>
    %c0_233 = arith.constant 0 : index
    %c0_234 = arith.constant 0 : index
    %242 = vector.load %arg24[%c0_233, %c0_234] : memref<224x28xf32, #tpu.memory_space<vmem>>, vector<224x28xf32>
    %c0_235 = arith.constant 0 : index
    %c0_236 = arith.constant 0 : index
    %c0_237 = arith.constant 0 : index
    %243 = vector.load %arg23[%c0_235, %c0_236, %c0_237] : memref<5x14x28xbf16, #tpu.memory_space<vmem>>, vector<1x14x28xbf16>
    %244 = vector.shape_cast %243 : vector<1x14x28xbf16> to vector<14x28xbf16>
    %cst_238 = arith.constant dense<0.000000e+00> : vector<224x28xf32>
    %245 = tpu.matmul %241, %244, %cst_238 {dimension_numbers = #tpu.dot_dimension_numbers<[1], [0], [0], [1], [0, 0, 1, 1], [], []>} : vector<224x14xbf16>, vector<14x28xbf16>, vector<224x28xf32> -> vector<224x28xf32>
    %c0_239 = arith.constant 0 : index
    %c0_240 = arith.constant 0 : index
    %c0_241 = arith.constant 0 : index
    %246 = vector.load %arg22[%c0_239, %c0_240, %c0_241] : memref<5x224x224xbf16, #tpu.memory_space<vmem>>, vector<1x224x224xbf16>
    %247 = vector.shape_cast %246 : vector<1x224x224xbf16> to vector<224x224xbf16>
    %248 = arith.truncf %245 : vector<224x28xf32> to vector<224x28xbf16>
    %cst_242 = arith.constant dense<0.000000e+00> : vector<224x28xf32>
    %249 = tpu.matmul %247, %248, %cst_242 {dimension_numbers = #tpu.dot_dimension_numbers<[1], [0], [0], [1], [0, 0, 1, 1], [], []>} : vector<224x224xbf16>, vector<224x28xbf16>, vector<224x28xf32> -> vector<224x28xf32>
    %250 = arith.addf %242, %249 : vector<224x28xf32>
    %c1_243 = arith.constant 1 : index
    %c0_244 = arith.constant 0 : index
    %c0_245 = arith.constant 0 : index
    %251 = vector.load %arg23[%c1_243, %c0_244, %c0_245] : memref<5x14x28xbf16, #tpu.memory_space<vmem>>, vector<1x14x28xbf16>
    %252 = vector.shape_cast %251 : vector<1x14x28xbf16> to vector<14x28xbf16>
    %cst_246 = arith.constant dense<0.000000e+00> : vector<224x28xf32>
    %253 = tpu.matmul %241, %252, %cst_246 {dimension_numbers = #tpu.dot_dimension_numbers<[1], [0], [0], [1], [0, 0, 1, 1], [], []>} : vector<224x14xbf16>, vector<14x28xbf16>, vector<224x28xf32> -> vector<224x28xf32>
    %c1_247 = arith.constant 1 : index
    %c0_248 = arith.constant 0 : index
    %c0_249 = arith.constant 0 : index
    %254 = vector.load %arg22[%c1_247, %c0_248, %c0_249] : memref<5x224x224xbf16, #tpu.memory_space<vmem>>, vector<1x224x224xbf16>
    %255 = vector.shape_cast %254 : vector<1x224x224xbf16> to vector<224x224xbf16>
    %256 = arith.truncf %253 : vector<224x28xf32> to vector<224x28xbf16>
    %cst_250 = arith.constant dense<0.000000e+00> : vector<224x28xf32>
    %257 = tpu.matmul %255, %256, %cst_250 {dimension_numbers = #tpu.dot_dimension_numbers<[1], [0], [0], [1], [0, 0, 1, 1], [], []>} : vector<224x224xbf16>, vector<224x28xbf16>, vector<224x28xf32> -> vector<224x28xf32>
    %258 = arith.addf %250, %257 : vector<224x28xf32>
    %c2_251 = arith.constant 2 : index
    %c0_252 = arith.constant 0 : index
    %c0_253 = arith.constant 0 : index
    %259 = vector.load %arg23[%c2_251, %c0_252, %c0_253] : memref<5x14x28xbf16, #tpu.memory_space<vmem>>, vector<1x14x28xbf16>
    %260 = vector.shape_cast %259 : vector<1x14x28xbf16> to vector<14x28xbf16>
    %cst_254 = arith.constant dense<0.000000e+00> : vector<224x28xf32>
    %261 = tpu.matmul %241, %260, %cst_254 {dimension_numbers = #tpu.dot_dimension_numbers<[1], [0], [0], [1], [0, 0, 1, 1], [], []>} : vector<224x14xbf16>, vector<14x28xbf16>, vector<224x28xf32> -> vector<224x28xf32>
    %c2_255 = arith.constant 2 : index
    %c0_256 = arith.constant 0 : index
    %c0_257 = arith.constant 0 : index
    %262 = vector.load %arg22[%c2_255, %c0_256, %c0_257] : memref<5x224x224xbf16, #tpu.memory_space<vmem>>, vector<1x224x224xbf16>
    %263 = vector.shape_cast %262 : vector<1x224x224xbf16> to vector<224x224xbf16>
    %264 = arith.truncf %261 : vector<224x28xf32> to vector<224x28xbf16>
    %cst_258 = arith.constant dense<0.000000e+00> : vector<224x28xf32>
    %265 = tpu.matmul %263, %264, %cst_258 {dimension_numbers = #tpu.dot_dimension_numbers<[1], [0], [0], [1], [0, 0, 1, 1], [], []>} : vector<224x224xbf16>, vector<224x28xbf16>, vector<224x28xf32> -> vector<224x28xf32>
    %266 = arith.addf %258, %265 : vector<224x28xf32>
    %c3_259 = arith.constant 3 : index
    %c0_260 = arith.constant 0 : index
    %c0_261 = arith.constant 0 : index
    %267 = vector.load %arg23[%c3_259, %c0_260, %c0_261] : memref<5x14x28xbf16, #tpu.memory_space<vmem>>, vector<1x14x28xbf16>
    %268 = vector.shape_cast %267 : vector<1x14x28xbf16> to vector<14x28xbf16>
    %cst_262 = arith.constant dense<0.000000e+00> : vector<224x28xf32>
    %269 = tpu.matmul %241, %268, %cst_262 {dimension_numbers = #tpu.dot_dimension_numbers<[1], [0], [0], [1], [0, 0, 1, 1], [], []>} : vector<224x14xbf16>, vector<14x28xbf16>, vector<224x28xf32> -> vector<224x28xf32>
    %c3_263 = arith.constant 3 : index
    %c0_264 = arith.constant 0 : index
    %c0_265 = arith.constant 0 : index
    %270 = vector.load %arg22[%c3_263, %c0_264, %c0_265] : memref<5x224x224xbf16, #tpu.memory_space<vmem>>, vector<1x224x224xbf16>
    %271 = vector.shape_cast %270 : vector<1x224x224xbf16> to vector<224x224xbf16>
    %272 = arith.truncf %269 : vector<224x28xf32> to vector<224x28xbf16>
    %cst_266 = arith.constant dense<0.000000e+00> : vector<224x28xf32>
    %273 = tpu.matmul %271, %272, %cst_266 {dimension_numbers = #tpu.dot_dimension_numbers<[1], [0], [0], [1], [0, 0, 1, 1], [], []>} : vector<224x224xbf16>, vector<224x28xbf16>, vector<224x28xf32> -> vector<224x28xf32>
    %274 = arith.addf %266, %273 : vector<224x28xf32>
    %c4_267 = arith.constant 4 : index
    %c0_268 = arith.constant 0 : index
    %c0_269 = arith.constant 0 : index
    %275 = vector.load %arg23[%c4_267, %c0_268, %c0_269] : memref<5x14x28xbf16, #tpu.memory_space<vmem>>, vector<1x14x28xbf16>
    %276 = vector.shape_cast %275 : vector<1x14x28xbf16> to vector<14x28xbf16>
    %cst_270 = arith.constant dense<0.000000e+00> : vector<224x28xf32>
    %277 = tpu.matmul %241, %276, %cst_270 {dimension_numbers = #tpu.dot_dimension_numbers<[1], [0], [0], [1], [0, 0, 1, 1], [], []>} : vector<224x14xbf16>, vector<14x28xbf16>, vector<224x28xf32> -> vector<224x28xf32>
    %c4_271 = arith.constant 4 : index
    %c0_272 = arith.constant 0 : index
    %c0_273 = arith.constant 0 : index
    %278 = vector.load %arg22[%c4_271, %c0_272, %c0_273] : memref<5x224x224xbf16, #tpu.memory_space<vmem>>, vector<1x224x224xbf16>
    %279 = vector.shape_cast %278 : vector<1x224x224xbf16> to vector<224x224xbf16>
    %280 = arith.truncf %277 : vector<224x28xf32> to vector<224x28xbf16>
    %cst_274 = arith.constant dense<0.000000e+00> : vector<224x28xf32>
    %281 = tpu.matmul %279, %280, %cst_274 {dimension_numbers = #tpu.dot_dimension_numbers<[1], [0], [0], [1], [0, 0, 1, 1], [], []>} : vector<224x224xbf16>, vector<224x28xbf16>, vector<224x28xf32> -> vector<224x28xf32>
    %282 = arith.addf %274, %281 : vector<224x28xf32>
    %cst_275 = arith.constant 0.000000e+00 : f32
    %283 = vector.broadcast %cst_275 : f32 to vector<224x28xf32>
    %284 = arith.maximumf %282, %283 : vector<224x28xf32>
    %c0_276 = arith.constant 0 : index
    %c0_277 = arith.constant 0 : index
    %285 = vector.load %arg25[%c0_276, %c0_277] : memref<224x28xf32, #tpu.memory_space<vmem>>, vector<224x28xf32>
    tpu.vector_store %arg25[%c0_276, %c0_277], %284 {strides = array<i32>} : memref<224x28xf32, #tpu.memory_space<vmem>>, vector<224x28xf32>,
    return
  }
}

</mosaic_0001>

<bundles_post_ra>
// kernel: _lambda_.1
= control target key start
LH: loop header
LB: loop body
LE: loop exit
PB: predicated region body
PF: predicated region fallthrough
CT: control target
= control target key end

     0   :  { %vm243_vm0 = vcmask 261120   ;;  %vm3246_vm1 = vcmask 130048   ;;  %vm5321_vm2 = vcmask 1043456   ;;  %vm5296_vm3 = vcmask 64512   ;;  %s23216_s2 = inlined_call_operand.vmem [shape: bf16[5,32,16], index: 2, kind: input, shape index: {}]   ;;  %s23217_s0 = inlined_call_operand.vmem [shape: bf16[256,32], index: 0, kind: input, shape index: {}]   ;;  %s23218_s1 = inlined_call_operand.vmem [shape: bf16[5,256,256], index: 1, kind: input, shape index: {}]   ;;  %s23219_s3 = inlined_call_operand.vmem [shape: f32[256,16], index: 3, kind: input, shape index: {}]   ;;  %s23220_s5 = inlined_call_operand.vmem [shape: bf16[5,16,8], index: 5, kind: input, shape index: {}]   ;;  %s23221_s4 = inlined_call_operand.vmem [shape: bf16[5,128,256], index: 4, kind: input, shape index: {}]   ;;  %s23222_s6 = inlined_call_operand.vmem [shape: f32[128,8], index: 6, kind: input, shape index: {}]   ;;  %s23223_s8 = inlined_call_operand.vmem [shape: bf16[3,8,3], index: 8, kind: input, shape index: {}]   ;;  %s23224_s7 = inlined_call_operand.vmem [shape: bf16[3,48,128], index: 7, kind: input, shape index: {}]   ;;  %s23225_s11 = inlined_call_operand.vmem [shape: bf16[3,3,1], index: 11, kind: input, shape index: {}]   ;;  %s23226_s9 = inlined_call_operand.vmem [shape: f32[48,3], index: 9, kind: input, shape index: {}]   ;;  %s23227_s10 = inlined_call_operand.vmem [shape: bf16[3,20,48], index: 10, kind: input, shape index: {}]   ;;  %s23228_s14 = inlined_call_operand.vmem [shape: bf16[3,1,3], index: 14, kind: input, shape index: {}]   ;;  %s23229_s12 = inlined_call_operand.vmem [shape: f32[20,1], index: 12, kind: input, shape index: {}]   ;;  %s23230_s26 = inlined_call_operand.vmem [shape: f32[20,1], index: 26, kind: output, shape index: {1}]   ;;  %s23231_s13 = inlined_call_operand.vmem [shape: bf16[3,48,20], index: 13, kind: input, shape index: {}]   ;;  %s23232_s17 = inlined_call_operand.vmem [shape: bf16[3,3,7], index: 17, kind: input, shape index: {}]   ;;  %s23233_s15 = inlined_call_operand.vmem [shape: f32[48,3], index: 15, kind: input, shape index: {}]   ;;  %s23234_s16 = inlined_call_operand.vmem [shape: bf16[3,112,48], index: 16, kind: input, shape index: {}]   ;;  %s23235_s20 = inlined_call_operand.vmem [shape: bf16[5,7,14], index: 20, kind: input, shape index: {}]   ;;  %s23236_s18 = inlined_call_operand.vmem [shape: f32[112,7], index: 18, kind: input, shape index: {}]   ;;  %s23237_s19 = inlined_call_operand.vmem [shape: bf16[5,224,112], index: 19, kind: input, shape index: {}]   ;;  %s23238_s23 = inlined_call_operand.vmem [shape: bf16[5,14,28], index: 23, kind: input, shape index: {}]   ;;  %s23239_s21 = inlined_call_operand.vmem [shape: f32[224,14], index: 21, kind: input, shape index: {}]   ;;  %s23240_s22 = inlined_call_operand.vmem [shape: bf16[5,224,224], index: 22, kind: input, shape index: {}]   ;;  %s23241_s24 = inlined_call_operand.vmem [shape: f32[224,28], index: 24, kind: input, shape index: {}]   ;;  %s23242_s25 = inlined_call_operand.vmem [shape: f32[224,28], index: 25, kind: output, shape index: {0}]  }
   0x1   :  { %23254 = sst [smem:[#allocation8_spill]] %s23216_s2  ;;  %vm18116_vm4 = vmmov 0   ;;  %vm5936_vm5 = vcmask 1040384   ;;  %vm5937_vm6 = vcmask 1041408   ;;  %vm5926_vm7 = vcmask 23552  }
   0x2   :  { %23255 = sst [smem:[#allocation9_spill]] %s23217_s0  ;;  %vm6014_vm8 = vcmask 392192   ;;  %vm6343_vm9 = vcmask 3072   ;;  %vm6340_vm10 = vcmask 7168   ;;  %vm6436_vm11 = vcmask 162816  }
   0x3   :  { %23256 = sst [smem:[#allocation10_spill]] %s23218_s1  ;;  %s23266_s1 = sld [smem:[#allocation9_spill]]  ;;  %vm7629_vm12 = vcmask 1042432   ;;  %vm7607_vm13 = vcmask 56320   ;;  %vm7829_vm14 = vcmask 916480   ;;  %vm9825_vm15 = vcmask 1046528  }
   0x4   :  { %23257 = sst [smem:[#allocation11_spill]] %s23219_s3 }
   0x5   :  { %23258 = sst [smem:[#allocation12_spill]] %s23220_s5 }
   0x6   :  { %23259 = sst [smem:[#allocation13_spill]] %s23221_s4  ;;  %s23281_s28 = sld [smem:[#allocation12_spill]] }
   0x7   :  { %23260 = sst [smem:[#allocation14_spill]] %s23222_s6  ;;  %s23268_s6 = sld [smem:[#allocation11_spill]] }
   0x8   :  { %23261 = sst [smem:[#allocation15_spill]] %s23223_s8  ;;  %s23265_s8 = sld [smem:[#allocation8_spill]] }
   0x9   :  { %23262 = sst [smem:[#allocation16_spill]] %s23224_s7  ;;  %v17380_v2 = vld [vmem:[%s23266_s1] sm:$0xff]   ;;  %v17381_v3 = vld [vmem:[%s23266_s1 + $0x8] sm:$0xff]   ;;  %v17382_v4 = vld [vmem:[%s23266_s1 + $0x10] sm:$0xff]   ;;  %s23267_s7 = sld [smem:[#allocation10_spill]] }
   0xa   :  { %23263 = sst [smem:[#allocation17_spill]] %s23225_s11  ;;  %15553 = vmatprep.mubr.msk.bf16.mxu0 %vm243_vm0, %v17380_v2  ;;  %v17383_v5 = vld [vmem:[%s23266_s1 + $0x18] sm:$0xff]   ;;  %v17384_v6 = vld [vmem:[%s23266_s1 + $0x20] sm:$0xff]   ;;  %v17385_v9 = vld [vmem:[%s23266_s1 + $0x28] sm:$0xff]   ;;  %s23282_s2 = sld [smem:[#allocation13_spill]] }
   0xb   :  { %23264 = sst [smem:[#allocation18_spill]] %s23226_s9  ;;  %v17386_v10 = vld [vmem:[%s23266_s1 + $0x30] sm:$0xff]   ;;  %v17387_v11 = vld [vmem:[%s23266_s1 + $0x38] sm:$0xff]   ;;  %v17388_v12 = vld [vmem:[%s23266_s1 + $0x40] sm:$0xff]   ;;  %s23286_s9 = sld [smem:[#allocation14_spill]] }
   0xc   :  { %v17389_v13 = vld [vmem:[%s23266_s1 + $0x48] sm:$0xff]   ;;  %v17390_v14 = vld [vmem:[%s23266_s1 + $0x50] sm:$0xff]   ;;  %v17391_v15 = vld [vmem:[%s23266_s1 + $0x58] sm:$0xff]   ;;  %s23288_s3 = sld [smem:[#allocation16_spill]]  ;;  %s23289_s11 = sld [smem:[#allocation17_spill]] }
   0xd   :  { %v17392_v16 = vld [vmem:[%s23266_s1 + $0x60] sm:$0xff]   ;;  %v17393_v17 = vld [vmem:[%s23266_s1 + $0x68] sm:$0xff]   ;;  %v17394_v18 = vld [vmem:[%s23266_s1 + $0x70] sm:$0xff]   ;;  %s23290_s30 = sld [smem:[#allocation18_spill]] }
   0xe   :  { %v17378_v0 = vld [vmem:[%s23265_s8] sm:$0xff]   ;;  %v17379_v1 = vld [vmem:[%s23265_s8 + $0x8] sm:$0xff]   ;;  %v17396_v7 = vld [vmem:[%s23265_s8 + $0x10] sm:$0xff]  }
   0xf   :  { %15549 = vmatprep.subr.bf16.mxu0 %v17378_v0  ;;  %v17397_v8 = vld [vmem:[%s23265_s8 + $0x18] sm:$0xff]   ;;  %v17400_v20 = vld [vmem:[%s23267_s7 + $0x4] ss:$8 sps:$4 sm:$0xff]  }
  0x10   :  { %15550 = vmatpush3.bf16.msra.mxu0 %v17378_v0  ;;  %v17395_v19 = vld [vmem:[%s23266_s1 + $0x78] sm:$0xff]   ;;  %693 = vmatprep.mubr.bf16.mxu1 %v17400_v20 }
  0x11   :  { %15551 = vmatprep.subr.bf16.mxu0 %v17379_v1 }
  0x14   :  { %15552 = vmatpush3.bf16.msra.mxu0 %v17379_v1 }
  0x15   :  { %15585 = vmatprep.subr.bf16.mxu0 %v17396_v7 }
  0x17   :  { %15554 = vmatmul.mubr.msk.bf16.vlgmr.msra.gmra.mrb[0].mxu0 %vm243_vm0, %v17381_v3 }
  0x18   :  { %15557 = vmatprep.mubr.msk.bf16.mxu0 %vm243_vm0, %v17382_v4  ;;  %15586 = vmatpush3.bf16.msra.mxu0 %v17396_v7 }
  0x19   :  { %15587 = vmatprep.subr.bf16.mxu0 %v17397_v8 }
  0x1c   :  { %15588 = vmatpush3.bf16.msra.mxu0 %v17397_v8  ;;  %v17398_v8 = vld [vmem:[%s23267_s7] ss:$8 sps:$4 sm:$0xff]  }
  0x1f   :  { %15558 = vmatmul.mubr.msk.bf16.gmra.mrb[4].mxu0 %vm243_vm0, %v17383_v5 }
  0x20   :  { %15561 = vmatprep.mubr.msk.bf16.mxu0 %vm243_vm0, %v17384_v6 }
  0x27   :  { %15562 = vmatmul.mubr.msk.bf16.gmra.mrb[8].mxu0 %vm243_vm0, %v17385_v9 }
  0x28   :  { %15565 = vmatprep.mubr.msk.bf16.mxu0 %vm243_vm0, %v17386_v10 }
  0x2f   :  { %15566 = vmatmul.mubr.msk.bf16.gmra.mrb[12].mxu0 %vm243_vm0, %v17387_v11 }
  0x30   :  { %15569 = vmatprep.mubr.msk.bf16.mxu0 %vm243_vm0, %v17388_v12 }
  0x37   :  { %15570 = vmatmul.mubr.msk.bf16.gmra.mrb[16].mxu0 %vm243_vm0, %v17389_v13 }
  0x38   :  { %15573 = vmatprep.mubr.msk.bf16.mxu0 %vm243_vm0, %v17390_v14 }
  0x3f   :  { %15574 = vmatmul.mubr.msk.bf16.gmra.mrb[20].mxu0 %vm243_vm0, %v17391_v15 }
  0x40   :  { %15577 = vmatprep.mubr.msk.bf16.mxu0 %vm243_vm0, %v17392_v16 }
  0x47   :  { %15578 = vmatmul.mubr.msk.bf16.gmra.mrb[24].mxu0 %vm243_vm0, %v17393_v17 }
  0x48   :  { %15581 = vmatprep.mubr.msk.bf16.mxu0 %vm243_vm0, %v17394_v18 }
  0x4f   :  { %15582 = vmatmul.mubr.msk.bf16.gmra.mrb[28].mxu0 %vm243_vm0, %v17395_v19 }
  0x50   :  { %15589 = vmatprep.mubr.msk.bf16.mxu0 %vm243_vm0, %v17380_v2 }
  0x57   :  { %15590 = vmatmul.mubr.msk.bf16.vlgmr.msra.gmra.mrb[32].mxu0 %vm243_vm0, %v17381_v3 }
  0x58   :  { %15593 = vmatprep.mubr.msk.bf16.mxu0 %vm243_vm0, %v17382_v4 }
  0x5f   :  { %15594 = vmatmul.mubr.msk.bf16.gmra.mrb[36].mxu0 %vm243_vm0, %v17383_v5 }
  0x60   :  { %15597 = vmatprep.mubr.msk.bf16.mxu0 %vm243_vm0, %v17384_v6 }
  0x67   :  { %15598 = vmatmul.mubr.msk.bf16.gmra.mrb[40].mxu0 %vm243_vm0, %v17385_v9 }
  0x68   :  { %15601 = vmatprep.mubr.msk.bf16.mxu0 %vm243_vm0, %v17386_v10 }
  0x6f   :  { %15602 = vmatmul.mubr.msk.bf16.gmra.mrb[44].mxu0 %vm243_vm0, %v17387_v11  ;;  %v17401_v11 = vld [vmem:[%s23267_s7 + $0x14] ss:$8 sps:$4 sm:$0xff]  }
  0x70   :  { %15605 = vmatprep.mubr.msk.bf16.mxu0 %vm243_vm0, %v17388_v12 }
  0x77   :  { %15606 = vmatmul.mubr.msk.bf16.gmra.mrb[48].mxu0 %vm243_vm0, %v17389_v13 }
  0x78   :  { %15609 = vmatprep.mubr.msk.bf16.mxu0 %vm243_vm0, %v17390_v14 }
  0x7f   :  { %15610 = vmatmul.mubr.msk.bf16.gmra.mrb[52].mxu0 %vm243_vm0, %v17391_v15 }
  0x80   :  { %15613 = vmatprep.mubr.msk.bf16.mxu0 %vm243_vm0, %v17392_v16  ;;  %v17403_v16 = vld [vmem:[%s23267_s7 + $0x10] ss:$8 sps:$4 sm:$0xff]  }
  0x87   :  { %15614 = vmatmul.mubr.msk.bf16.gmra.mrb[56].mxu0 %vm243_vm0, %v17393_v17 }
  0x88   :  { %15617 = vmatprep.mubr.msk.bf16.mxu0 %vm243_vm0, %v17394_v18 }
  0x8f   :  { %15618 = vmatmul.mubr.msk.bf16.gmra.mrb[60].mxu0 %vm243_vm0, %v17395_v19  ;;  %v17404_v19 = vld [vmem:[%s23267_s7 + $0x24] ss:$8 sps:$4 sm:$0xff]  }
  0x90   :  { %15661 = vmatprep.mubr.msk.bf16.mxu0 %vm243_vm0, %v17380_v2 }
  0xea   :  { %v15555_v21 = vpop.f32.mrb[0].mxu0 }
  0xeb   :  { %v326_v22 = vpop.f32.mrb[1].mxu0 }
  0xec   :  { %v15556_v23 = vpop.f32.mrb[2].mxu0 }
  0xed   :  { %v486_v24 = vpack.c.bf16 %v15556_v23, %v15555_v21  ;;  %v329_v25 = vpop.f32.mrb[3].mxu0 }
  0xee   :  { %v485_v26 = vpack.c.bf16 %v329_v25, %v326_v22 }
  0xf2   :  { %v15559_v27 = vpop.f32.mrb[4].mxu0 }
  0xf3   :  { %v342_v28 = vpop.f32.mrb[5].mxu0 }
  0xf4   :  { %v15560_v29 = vpop.f32.mrb[6].mxu0 }
  0xf5   :  { %v488_v30 = vpack.c.bf16 %v15560_v29, %v15559_v27  ;;  %v345_v31 = vpop.f32.mrb[7].mxu0  ;;  %v17407_v27 = vld [vmem:[%s23267_s7 + $0x34] ss:$8 sps:$4 sm:$0xff]  }
  0xf6   :  { %v487_v32 = vpack.c.bf16 %v345_v31, %v342_v28 }
  0xfa   :  { %v15563_v33 = vpop.f32.mrb[8].mxu0 }
  0xfb   :  { %v358_v34 = vpop.f32.mrb[9].mxu0 }
  0xfc   :  { %v15564_v35 = vpop.f32.mrb[10].mxu0 }
  0xfd   :  { %v490_v36 = vpack.c.bf16 %v15564_v35, %v15563_v33  ;;  %v361_v37 = vpop.f32.mrb[11].mxu0  ;;  %v17410_v35 = vld [vmem:[%s23267_s7 + $0x44] ss:$8 sps:$4 sm:$0xff]  }
  0xfe   :  { %v489_v38 = vpack.c.bf16 %v361_v37, %v358_v34 }
 0x102   :  { %v15567_v39 = vpop.f32.mrb[12].mxu0 }
 0x103   :  { %v374_v40 = vpop.f32.mrb[13].mxu0 }
 0x104   :  { %v15568_v41 = vpop.f32.mrb[14].mxu0 }
 0x105   :  { %v492_v42 = vpack.c.bf16 %v15568_v41, %v15567_v39  ;;  %v377_v43 = vpop.f32.mrb[15].mxu0 }
 0x106   :  { %v491_v44 = vpack.c.bf16 %v377_v43, %v374_v40  ;;  %v17412_v40 = vld [vmem:[%s23267_s7 + $0x40] ss:$8 sps:$4 sm:$0xff]   ;;  %v17413_v43 = vld [vmem:[%s23267_s7 + $0x54] ss:$8 sps:$4 sm:$0xff]  }
 0x10a   :  { %v15571_v45 = vpop.f32.mrb[16].mxu0 }
 0x10b   :  { %v390_v46 = vpop.f32.mrb[17].mxu0 }
 0x10c   :  { %v15572_v47 = vpop.f32.mrb[18].mxu0 }
 0x10d   :  { %v494_v48 = vpack.c.bf16 %v15572_v47, %v15571_v45  ;;  %v393_v49 = vpop.f32.mrb[19].mxu0 }
 0x10e   :  { %v493_v50 = vpack.c.bf16 %v393_v49, %v390_v46 }
 0x110   :  { %14139 = vmatprep.subr.bf16.mxu1 %v493_v50 }
 0x111   :  { %14140 = vmatpush3.bf16.msra.mxu1 %v485_v26 }
 0x112   :  { %v15575_v51 = vpop.f32.mrb[20].mxu0  ;;  %14141 = vmatprep.subr.bf16.mxu1 %v494_v48  ;;  %v17415_v48 = vld [vmem:[%s23267_s7 + $0x50] ss:$8 sps:$4 sm:$0xff]  }
 0x113   :  { %v406_v52 = vpop.f32.mrb[21].mxu0 }
 0x114   :  { %v15576_v53 = vpop.f32.mrb[22].mxu0 }
 0x115   :  { %v496_v54 = vpack.c.bf16 %v15576_v53, %v15575_v51  ;;  %v409_v55 = vpop.f32.mrb[23].mxu0  ;;  %14142 = vmatpush3.bf16.msra.mxu1 %v486_v24  ;;  %v17406_v24 = vld [vmem:[%s23267_s7 + $0x20] ss:$8 sps:$4 sm:$0xff]   ;;  %v17416_v51 = vld [vmem:[%s23267_s7 + $0x64] ss:$8 sps:$4 sm:$0xff]  }
 0x116   :  { %v495_v56 = vpack.c.bf16 %v409_v55, %v406_v52 }
 0x118   :  { %14143 = vmatprep.subr.bf16.mxu1 %v495_v56  ;;  %v17418_v56 = vld [vmem:[%s23267_s7 + $0x60] ss:$8 sps:$4 sm:$0xff]  }
 0x119   :  { %14144 = vmatpush3.bf16.msra.mxu1 %v487_v32  ;;  %v17409_v32 = vld [vmem:[%s23267_s7 + $0x30] ss:$8 sps:$4 sm:$0xff]  }
 0x11a   :  { %v15579_v57 = vpop.f32.mrb[24].mxu0  ;;  %14145 = vmatprep.subr.bf16.mxu1 %v496_v54 }
 0x11b   :  { %v422_v58 = vpop.f32.mrb[25].mxu0 }
 0x11c   :  { %v15580_v59 = vpop.f32.mrb[26].mxu0 }
 0x11d   :  { %v498_v60 = vpack.c.bf16 %v15580_v59, %v15579_v57  ;;  %v425_v61 = vpop.f32.mrb[27].mxu0  ;;  %14146 = vmatpush3.bf16.msra.mxu1 %v488_v30  ;;  %v17419_v59 = vld [vmem:[%s23267_s7 + $0x74] ss:$8 sps:$4 sm:$0xff]  }
 0x11e   :  { %v497_v62 = vpack.c.bf16 %v425_v61, %v422_v58 }
 0x120   :  { %14147 = vmatprep.subr.bf16.mxu1 %v497_v62 }
 0x121   :  { %14148 = vmatpush3.bf16.msra.mxu1 %v489_v38 }
 0x122   :  { %v15583_v63 = vpop.f32.mrb[28].mxu0  ;;  %14149 = vmatprep.subr.bf16.mxu1 %v498_v60 }
 0x123   :  { %v438_v0 = vpop.f32.mrb[29].mxu0 }
 0x124   :  { %v15584_v1 = vpop.f32.mrb[30].mxu0 }
 0x125   :  { %v500_v2 = vpack.c.bf16 %v15584_v1, %v15583_v63  ;;  %v441_v3 = vpop.f32.mrb[31].mxu0  ;;  %14150 = vmatpush3.bf16.msra.mxu1 %v490_v36 }
 0x126   :  { %v499_v4 = vpack.c.bf16 %v441_v3, %v438_v0  ;;  %v17421_v0 = vld [vmem:[%s23267_s7 + $0x70] ss:$8 sps:$4 sm:$0xff]   ;;  %v17422_v3 = vld [vmem:[%s23267_s7 + $0x84] ss:$8 sps:$4 sm:$0xff]  }
 0x128   :  { %14151 = vmatprep.subr.bf16.mxu1 %v499_v4 }
 0x129   :  { %14152 = vmatpush3.bf16.msra.mxu1 %v491_v44 }
 0x12a   :  { %14153 = vmatprep.subr.bf16.mxu1 %v500_v2  ;;  %v15591_v5 = vpop.f32.mrb[32].mxu0 }
 0x12b   :  { %v905_v6 = vpop.f32.mrb[33].mxu0 }
 0x12c   :  { %v15592_v7 = vpop.f32.mrb[34].mxu0 }
 0x12d   :  { %v1066_v9 = vpack.c.bf16 %v15592_v7, %v15591_v5  ;;  %14154 = vmatpush3.bf16.msra.mxu1 %v492_v42  ;;  %v908_v10 = vpop.f32.mrb[35].mxu0  ;;  %v17461_v5 = vld [vmem:[%s23265_s8 + $0x20] sm:$0xff]   ;;  %v17425_v7 = vld [vmem:[%s23267_s7 + $0x94] ss:$8 sps:$4 sm:$0xff]  }
 0x12e   :  { %v1065_v12 = vpack.c.bf16 %v908_v10, %v905_v6  ;;  %v17424_v6 = vld [vmem:[%s23267_s7 + $0x80] ss:$8 sps:$4 sm:$0xff]  }
 0x12f   :  { %v17430_v10 = vld [vmem:[%s23267_s7 + $0xa0] ss:$8 sps:$4 sm:$0xff]  }
 0x130   :  { %694 = vmatmul.mubr.bf16.vlgmr.msra.gmra.mrb[0].mxu1 %v17398_v8  ;;  %v17427_v8 = vld [vmem:[%s23267_s7 + $0x90] ss:$8 sps:$4 sm:$0xff]  }
 0x131   :  { %701 = vmatprep.mubr.bf16.mxu1 %v17401_v11  ;;  %v17431_v11 = vld [vmem:[%s23267_s7 + $0xb4] ss:$8 sps:$4 sm:$0xff]  }
 0x132   :  { %v18356_v13 = vpop.f32.mrb[36].mxu0 }
 0x133   :  { %v921_v14 = vpop.f32.mrb[37].mxu0 }
 0x134   :  { %v15596_v15 = vpop.f32.mrb[38].mxu0 }
 0x135   :  { %v1068_v17 = vpack.c.bf16 %v15596_v15, %v18356_v13  ;;  %v924_v18 = vpop.f32.mrb[39].mxu0  ;;  %v17434_v13 = vld [vmem:[%s23267_s7 + $0xc4] ss:$8 sps:$4 sm:$0xff]   ;;  %v17437_v15 = vld [vmem:[%s23267_s7 + $0xd4] ss:$8 sps:$4 sm:$0xff]  }
 0x136   :  { %v1067_v20 = vpack.c.bf16 %v924_v18, %v921_v14  ;;  %v17436_v14 = vld [vmem:[%s23267_s7 + $0xc0] ss:$8 sps:$4 sm:$0xff]  }
 0x137   :  { %v17442_v18 = vld [vmem:[%s23267_s7 + $0xe0] ss:$8 sps:$4 sm:$0xff]  }
 0x138   :  { %702 = vmatmul.mubr.bf16.gmra.mrb[4].mxu1 %v17403_v16  ;;  %v17439_v16 = vld [vmem:[%s23267_s7 + $0xd0] ss:$8 sps:$4 sm:$0xff]  }
 0x139   :  { %709 = vmatprep.mubr.bf16.mxu1 %v17404_v19  ;;  %v17443_v19 = vld [vmem:[%s23267_s7 + $0xf4] ss:$8 sps:$4 sm:$0xff]  }
 0x13a   :  { %v18365_v21 = vpop.f32.mrb[40].mxu0 }
 0x13b   :  { %v937_v22 = vpop.f32.mrb[41].mxu0 }
 0x13c   :  { %v18367_v23 = vpop.f32.mrb[42].mxu0 }
 0x13d   :  { %v1070_v25 = vpack.c.bf16 %v18367_v23, %v18365_v21  ;;  %v940_v26 = vpop.f32.mrb[43].mxu0  ;;  %v17448_v21 = vld [vmem:[%s23267_s7 + $0x104] ss:$8 sps:$4 sm:$0xff]   ;;  %v17449_v23 = vld [vmem:[%s23267_s7 + $0x114] ss:$8 sps:$4 sm:$0xff]  }
 0x13e   :  { %v1069_v28 = vpack.c.bf16 %v940_v26, %v937_v22  ;;  %v17446_v22 = vld [vmem:[%s23267_s7 + $0x100] ss:$8 sps:$4 sm:$0xff]   ;;  %v17452_v26 = vld [vmem:[%s23267_s7 + $0x124] ss:$8 sps:$4 sm:$0xff]  }
 0x140   :  { %710 = vmatmul.mubr.bf16.gmra.mrb[8].mxu1 %v17406_v24  ;;  %v17486_v24 = vld [vmem:[%s23265_s8 + $0x28] sm:$0xff]  }
 0x141   :  { %717 = vmatprep.mubr.bf16.mxu1 %v17407_v27  ;;  %v17454_v27 = vld [vmem:[%s23267_s7 + $0x120] ss:$8 sps:$4 sm:$0xff]  }
 0x142   :  { %v18377_v29 = vpop.f32.mrb[44].mxu0 }
 0x143   :  { %v953_v30 = vpop.f32.mrb[45].mxu0 }
 0x144   :  { %v18379_v31 = vpop.f32.mrb[46].mxu0 }
 0x145   :  { %v1072_v33 = vpack.c.bf16 %v18379_v31, %v18377_v29  ;;  %v956_v34 = vpop.f32.mrb[47].mxu0  ;;  %v17457_v29 = vld [vmem:[%s23267_s7 + $0x130] ss:$8 sps:$4 sm:$0xff]   ;;  %v17460_v31 = vld [vmem:[%s23267_s7 + $0x140] ss:$8 sps:$4 sm:$0xff]  }
 0x146   :  { %v1071_v36 = vpack.c.bf16 %v956_v34, %v953_v30  ;;  %v17458_v30 = vld [vmem:[%s23267_s7 + $0x144] ss:$8 sps:$4 sm:$0xff]  }
 0x147   :  { %v17465_v34 = vld [vmem:[%s23267_s7 + $0x164] ss:$8 sps:$4 sm:$0xff]  }
 0x148   :  { %718 = vmatmul.mubr.bf16.gmra.mrb[12].mxu1 %v17409_v32  ;;  %v17462_v32 = vld [vmem:[%s23267_s7 + $0x154] ss:$8 sps:$4 sm:$0xff]  }
 0x149   :  { %725 = vmatprep.mubr.bf16.mxu1 %v17410_v35  ;;  %v17467_v35 = vld [vmem:[%s23267_s7 + $0x160] ss:$8 sps:$4 sm:$0xff]  }
 0x14a   :  { %v15607_v37 = vpop.f32.mrb[48].mxu0 }
 0x14b   :  { %v969_v38 = vpop.f32.mrb[49].mxu0 }
 0x14c   :  { %v15608_v39 = vpop.f32.mrb[50].mxu0 }
 0x14d   :  { %v1074_v41 = vpack.c.bf16 %v15608_v39, %v15607_v37  ;;  %v972_v42 = vpop.f32.mrb[51].mxu0  ;;  %v17470_v37 = vld [vmem:[%s23267_s7 + $0x170] ss:$8 sps:$4 sm:$0xff]   ;;  %v17473_v39 = vld [vmem:[%s23267_s7 + $0x180] ss:$8 sps:$4 sm:$0xff]  }
 0x14e   :  { %v1073_v44 = vpack.c.bf16 %v972_v42, %v969_v38  ;;  %v17471_v38 = vld [vmem:[%s23267_s7 + $0x184] ss:$8 sps:$4 sm:$0xff]  }
 0x14f   :  { %v17477_v42 = vld [vmem:[%s23267_s7 + $0x1a4] ss:$8 sps:$4 sm:$0xff]  }
 0x150   :  { %726 = vmatmul.mubr.bf16.gmra.mrb[16].mxu1 %v17412_v40  ;;  %14269 = vmatprep.subr.bf16.mxu1 %v1073_v44  ;;  %v17474_v40 = vld [vmem:[%s23267_s7 + $0x194] ss:$8 sps:$4 sm:$0xff]  }
 0x151   :  { %14270 = vmatpush3.bf16.msra.mxu1 %v1065_v12  ;;  %733 = vmatprep.mubr.bf16.mxu1 %v17413_v43  ;;  %v17433_v12 = vld [vmem:[%s23267_s7 + $0xb0] ss:$8 sps:$4 sm:$0xff]   ;;  %v17479_v43 = vld [vmem:[%s23267_s7 + $0x1a0] ss:$8 sps:$4 sm:$0xff]   ;;  %v17480_v44 = vld [vmem:[%s23267_s7 + $0x1b4] ss:$8 sps:$4 sm:$0xff]  }
 0x152   :  { %v15611_v45 = vpop.f32.mrb[52].mxu0  ;;  %14271 = vmatprep.subr.bf16.mxu1 %v1074_v41  ;;  %v17476_v41 = vld [vmem:[%s23267_s7 + $0x190] ss:$8 sps:$4 sm:$0xff]  }
 0x153   :  { %v985_v46 = vpop.f32.mrb[53].mxu0 }
 0x154   :  { %v15612_v47 = vpop.f32.mrb[54].mxu0 }
 0x155   :  { %v1076_v49 = vpack.c.bf16 %v15612_v47, %v15611_v45  ;;  %v988_v50 = vpop.f32.mrb[55].mxu0  ;;  %14272 = vmatpush3.bf16.msra.mxu1 %v1066_v9  ;;  %v17428_v9 = vld [vmem:[%s23267_s7 + $0xa4] ss:$8 sps:$4 sm:$0xff]   ;;  %v17482_v47 = vld [vmem:[%s23267_s7 + $0x1b0] ss:$8 sps:$4 sm:$0xff]  }
 0x156   :  { %v1075_v52 = vpack.c.bf16 %v988_v50, %v985_v46  ;;  %v17483_v50 = vld [vmem:[%s23267_s7 + $0x1c4] ss:$8 sps:$4 sm:$0xff]  }
 0x158   :  { %734 = vmatmul.mubr.bf16.gmra.mrb[20].mxu1 %v17415_v48  ;;  %14273 = vmatprep.subr.bf16.mxu1 %v1075_v52 }
 0x159   :  { %14274 = vmatpush3.bf16.msra.mxu1 %v1067_v20  ;;  %741 = vmatprep.mubr.bf16.mxu1 %v17416_v51  ;;  %v17445_v20 = vld [vmem:[%s23267_s7 + $0xf0] ss:$8 sps:$4 sm:$0xff]  }
 0x15a   :  { %v15615_v53 = vpop.f32.mrb[56].mxu0  ;;  %14275 = vmatprep.subr.bf16.mxu1 %v1076_v49 }
 0x15b   :  { %v1001_v54 = vpop.f32.mrb[57].mxu0 }
 0x15c   :  { %v15616_v55 = vpop.f32.mrb[58].mxu0 }
 0x15d   :  { %v1078_v57 = vpack.c.bf16 %v15616_v55, %v15615_v53  ;;  %v1004_v58 = vpop.f32.mrb[59].mxu0  ;;  %14276 = vmatpush3.bf16.msra.mxu1 %v1068_v17  ;;  %v17440_v17 = vld [vmem:[%s23267_s7 + $0xe4] ss:$8 sps:$4 sm:$0xff]   ;;  %v17485_v55 = vld [vmem:[%s23267_s7 + $0x1c0] ss:$8 sps:$4 sm:$0xff]  }
 0x15e   :  { %v1077_v60 = vpack.c.bf16 %v1004_v58, %v1001_v54  ;;  %v17487_v58 = vld [vmem:[%s23267_s7 + $0x1d4] ss:$8 sps:$4 sm:$0xff]  }
 0x160   :  { %742 = vmatmul.mubr.bf16.gmra.mrb[24].mxu1 %v17418_v56  ;;  %14277 = vmatprep.subr.bf16.mxu1 %v1077_v60 }
 0x161   :  { %14278 = vmatpush3.bf16.msra.mxu1 %v1069_v28  ;;  %749 = vmatprep.mubr.bf16.mxu1 %v17419_v59  ;;  %v17455_v28 = vld [vmem:[%s23267_s7 + $0x134] ss:$8 sps:$4 sm:$0xff]  }
 0x162   :  { %v15619_v61 = vpop.f32.mrb[60].mxu0  ;;  %14279 = vmatprep.subr.bf16.mxu1 %v1078_v57 }
 0x163   :  { %v1017_v62 = vpop.f32.mrb[61].mxu0 }
 0x164   :  { %v15620_v63 = vpop.f32.mrb[62].mxu0 }
 0x165   :  { %v1080_v1 = vpack.c.bf16 %v15620_v63, %v15619_v61  ;;  %v1020_v2 = vpop.f32.mrb[63].mxu0  ;;  %14280 = vmatpush3.bf16.msra.mxu1 %v1070_v25  ;;  %v17451_v25 = vld [vmem:[%s23267_s7 + $0x110] ss:$8 sps:$4 sm:$0xff]  }
 0x166   :  { %v1079_v4 = vpack.c.bf16 %v1020_v2, %v1017_v62  ;;  %v17489_v63 = vld [vmem:[%s23267_s7 + $0x1d0] ss:$8 sps:$4 sm:$0xff]   ;;  %v17490_v2 = vld [vmem:[%s23267_s7 + $0x1e4] ss:$8 sps:$4 sm:$0xff]  }
 0x168   :  { %750 = vmatmul.mubr.bf16.gmra.mrb[28].mxu1 %v17421_v0  ;;  %14281 = vmatprep.subr.bf16.mxu1 %v1079_v4 }
 0x169   :  { %14282 = vmatpush3.bf16.msra.mxu1 %v1071_v36  ;;  %757 = vmatprep.mubr.bf16.mxu1 %v17422_v3  ;;  %v17468_v36 = vld [vmem:[%s23267_s7 + $0x174] ss:$8 sps:$4 sm:$0xff]  }
 0x16a   :  { %14283 = vmatprep.subr.bf16.mxu1 %v1080_v1 }
 0x16d   :  { %14284 = vmatpush3.bf16.msra.mxu1 %v1072_v33  ;;  %v17464_v33 = vld [vmem:[%s23267_s7 + $0x150] ss:$8 sps:$4 sm:$0xff]  }
 0x16e   :  { %15621 = vmatprep.subr.bf16.mxu1 %v17461_v5 }
 0x170   :  { %758 = vmatmul.mubr.bf16.gmra.mrb[32].mxu1 %v17424_v6 }
 0x171   :  { %765 = vmatprep.mubr.bf16.mxu1 %v17425_v7  ;;  %v17492_v7 = vld [vmem:[%s23267_s7 + $0x1e0] ss:$8 sps:$4 sm:$0xff]  }
 0x178   :  { %766 = vmatmul.mubr.bf16.gmra.mrb[36].mxu1 %v17427_v8 }
 0x179   :  { %773 = vmatprep.mubr.bf16.mxu1 %v17428_v9 }
 0x180   :  { %774 = vmatmul.mubr.bf16.gmra.mrb[40].mxu1 %v17430_v10  ;;  %v17493_v10 = vld [vmem:[%s23267_s7 + $0x1f4] ss:$8 sps:$4 sm:$0xff]  }
 0x181   :  { %781 = vmatprep.mubr.bf16.mxu1 %v17431_v11 }
 0x188   :  { %782 = vmatmul.mubr.bf16.gmra.mrb[44].mxu1 %v17433_v12 }
 0x189   :  { %789 = vmatprep.mubr.bf16.mxu1 %v17434_v13 }
 0x190   :  { %790 = vmatmul.mubr.bf16.gmra.mrb[48].mxu1 %v17436_v14 }
 0x191   :  { %797 = vmatprep.mubr.bf16.mxu1 %v17437_v15  ;;  %v17495_v15 = vld [vmem:[%s23267_s7 + $0x1f0] ss:$8 sps:$4 sm:$0xff]  }
 0x198   :  { %798 = vmatmul.mubr.bf16.gmra.mrb[52].mxu1 %v17439_v16 }
 0x199   :  { %805 = vmatprep.mubr.bf16.mxu1 %v17440_v17 }
 0x1a0   :  { %806 = vmatmul.mubr.bf16.gmra.mrb[56].mxu1 %v17442_v18 }
 0x1a1   :  { %813 = vmatprep.mubr.bf16.mxu1 %v17443_v19 }
 0x1a8   :  { %814 = vmatmul.mubr.bf16.gmra.mrb[60].mxu1 %v17445_v20  ;;  %v18583_v20 = vld [vmem:[%s23266_s1] sm:$0xff]  }
 0x1a9   :  { %1273 = vmatprep.mubr.bf16.mxu1 %v17448_v21 }
 0x1b0   :  { %1274 = vmatmul.mubr.bf16.vlgmr.msra.gmra.mrb[64].mxu1 %v17446_v22 }
 0x1b1   :  { %1281 = vmatprep.mubr.bf16.mxu1 %v17449_v23  ;;  %15622 = vmatpush3.bf16.msra.mxu1 %v17461_v5 }
 0x1b2   :  { %15623 = vmatprep.subr.bf16.mxu1 %v17486_v24 }
 0x1b5   :  { %15624 = vmatpush3.bf16.msra.mxu1 %v17486_v24 }
 0x1b8   :  { %1282 = vmatmul.mubr.bf16.gmra.mrb[68].mxu1 %v17451_v25 }
 0x1b9   :  { %1289 = vmatprep.mubr.bf16.mxu1 %v17452_v26 }
 0x1c0   :  { %1290 = vmatmul.mubr.bf16.gmra.mrb[72].mxu1 %v17454_v27  ;;  %v18594_v27 = vld [vmem:[%s23266_s1 + $0x8] sm:$0xff]  }
 0x1c1   :  { %1297 = vmatprep.mubr.bf16.mxu1 %v17455_v28  ;;  %v18601_v28 = vld [vmem:[%s23266_s1 + $0x10] sm:$0xff]  }
 0x1c8   :  { %1298 = vmatmul.mubr.bf16.gmra.mrb[76].mxu1 %v17457_v29 }
 0x1c9   :  { %1305 = vmatprep.mubr.bf16.mxu1 %v17458_v30 }
 0x1d0   :  { %1306 = vmatmul.mubr.bf16.gmra.mrb[80].mxu1 %v17460_v31 }
 0x1d1   :  { %1313 = vmatprep.mubr.bf16.mxu1 %v17462_v32 }
 0x1d8   :  { %1314 = vmatmul.mubr.bf16.gmra.mrb[84].mxu1 %v17464_v33 }
 0x1d9   :  { %1321 = vmatprep.mubr.bf16.mxu1 %v17465_v34 }
 0x1e0   :  { %1322 = vmatmul.mubr.bf16.gmra.mrb[88].mxu1 %v17467_v35  ;;  %v18612_v35 = vld [vmem:[%s23266_s1 + $0x18] sm:$0xff]  }
 0x1e1   :  { %1329 = vmatprep.mubr.bf16.mxu1 %v17468_v36  ;;  %v18619_v36 = vld [vmem:[%s23266_s1 + $0x20] sm:$0xff]  }
 0x1e8   :  { %1330 = vmatmul.mubr.bf16.gmra.mrb[92].mxu1 %v17470_v37 }
 0x1e9   :  { %1337 = vmatprep.mubr.bf16.mxu1 %v17471_v38 }
 0x1f0   :  { %1338 = vmatmul.mubr.bf16.gmra.mrb[96].mxu1 %v17473_v39 }
 0x1f1   :  { %1345 = vmatprep.mubr.bf16.mxu1 %v17474_v40 }
 0x1f8   :  { %1346 = vmatmul.mubr.bf16.gmra.mrb[100].mxu1 %v17476_v41 }
 0x1f9   :  { %1353 = vmatprep.mubr.bf16.mxu1 %v17477_v42 }
 0x200   :  { %1354 = vmatmul.mubr.bf16.gmra.mrb[104].mxu1 %v17479_v43  ;;  %v18630_v43 = vld [vmem:[%s23266_s1 + $0x28] sm:$0xff]  }
 0x201   :  { %1361 = vmatprep.mubr.bf16.mxu1 %v17480_v44  ;;  %v18637_v44 = vld [vmem:[%s23266_s1 + $0x30] sm:$0xff]  }
 0x203   :  { %v14155_v45 = vpop.f32.mrb[0].mxu1 }
 0x204   :  { %v14156_v46 = vpop.f32.mrb[1].mxu1 }
 0x205   :  { %v18536_v48 = vadd.f32 %v14156_v46, %v14155_v45  ;;  %v14158_v49 = vpop.f32.mrb[2].mxu1 }
 0x206   :  { %v14159_v51 = vpop.f32.mrb[3].mxu1 }
 0x207   :  { %v18541_v52 = vadd.f32 %v14159_v51, %v14158_v49 }
 0x208   :  { %1362 = vmatmul.mubr.bf16.gmra.mrb[108].mxu1 %v17482_v47 }
 0x209   :  { %1369 = vmatprep.mubr.bf16.mxu1 %v17483_v50 }
 0x20b   :  { %v14161_v53 = vpop.f32.mrb[4].mxu1 }
 0x20c   :  { %v14162_v54 = vpop.f32.mrb[5].mxu1 }
 0x20d   :  { %v18546_v56 = vadd.f32 %v14162_v54, %v14161_v53  ;;  %v14164_v57 = vpop.f32.mrb[6].mxu1  ;;  %v18648_v53 = vld [vmem:[%s23266_s1 + $0x38] sm:$0xff]   ;;  %v18655_v54 = vld [vmem:[%s23266_s1 + $0x40] sm:$0xff]  }
 0x20e   :  { %v14165_v59 = vpop.f32.mrb[7].mxu1 }
 0x20f   :  { %v18551_v60 = vadd.f32 %v14165_v59, %v14164_v57 }
 0x210   :  { %1370 = vmatmul.mubr.bf16.gmra.mrb[112].mxu1 %v17485_v55 }
 0x211   :  { %1377 = vmatprep.mubr.bf16.mxu1 %v17487_v58 }
 0x213   :  { %v14167_v61 = vpop.f32.mrb[8].mxu1 }
 0x214   :  { %v14168_v62 = vpop.f32.mrb[9].mxu1 }
 0x215   :  { %v18556_v0 = vadd.f32 %v14168_v62, %v14167_v61  ;;  %v14170_v1 = vpop.f32.mrb[10].mxu1 }
 0x216   :  { %v14171_v3 = vpop.f32.mrb[11].mxu1 }
 0x217   :  { %v18561_v4 = vadd.f32 %v14171_v3, %v14170_v1  ;;  %v18673_v1 = vld [vmem:[%s23266_s1 + $0x50] sm:$0xff]  }
 0x218   :  { %1378 = vmatmul.mubr.bf16.gmra.mrb[116].mxu1 %v17489_v63  ;;  %v18666_v63 = vld [vmem:[%s23266_s1 + $0x48] sm:$0xff]  }
 0x219   :  { %1385 = vmatprep.mubr.bf16.mxu1 %v17490_v2 }
 0x21b   :  { %v14173_v5 = vpop.f32.mrb[12].mxu1 }
 0x21c   :  { %v14174_v6 = vpop.f32.mrb[13].mxu1 }
 0x21d   :  { %v18566_v8 = vadd.f32 %v14174_v6, %v14173_v5  ;;  %v14176_v9 = vpop.f32.mrb[14].mxu1 }
 0x21e   :  { %v14177_v11 = vpop.f32.mrb[15].mxu1 }
 0x21f   :  { %v18571_v12 = vadd.f32 %v14177_v11, %v14176_v9  ;;  %v18691_v11 = vld [vmem:[%s23266_s1 + $0x60] sm:$0xff]  }
 0x220   :  { %1386 = vmatmul.mubr.bf16.gmra.mrb[120].mxu1 %v17492_v7 }
 0x221   :  { %1393 = vmatprep.mubr.bf16.mxu1 %v17493_v10  ;;  %v18684_v10 = vld [vmem:[%s23266_s1 + $0x58] sm:$0xff]  }
 0x223   :  { %v14179_v13 = vpop.f32.mrb[16].mxu1 }
 0x224   :  { %v14180_v14 = vpop.f32.mrb[17].mxu1 }
 0x225   :  { %v18576_v16 = vadd.f32 %v14180_v14, %v14179_v13  ;;  %v14182_v17 = vpop.f32.mrb[18].mxu1 }
 0x226   :  { %v14183_v18 = vpop.f32.mrb[19].mxu1 }
 0x227   :  { %v18578_v19 = vadd.f32 %v14183_v18, %v14182_v17 }
 0x228   :  { %1394 = vmatmul.mubr.bf16.gmra.mrb[124].mxu1 %v17495_v15 }
 0x229   :  { %15625 = vmatprep.mubr.msk.bf16.mxu1 %vm243_vm0, %v18583_v20 }
 0x22b   :  { %v14185_v21 = vpop.f32.mrb[20].mxu1 }
 0x22c   :  { %v14186_v22 = vpop.f32.mrb[21].mxu1 }
 0x22d   :  { %v18587_v23 = vadd.f32 %v14186_v22, %v14185_v21  ;;  %v14188_v24 = vpop.f32.mrb[22].mxu1  ;;  %v18702_v22 = vld [vmem:[%s23266_s1 + $0x68] sm:$0xff]  }
 0x22e   :  { %v14189_v25 = vpop.f32.mrb[23].mxu1 }
 0x22f   :  { %v18589_v26 = vadd.f32 %v14189_v25, %v14188_v24  ;;  %v18709_v24 = vld [vmem:[%s23266_s1 + $0x70] sm:$0xff]  }
 0x230   :  { %15626 = vmatmul.mubr.msk.bf16.vlgmr.msra.gmra.mrb[128].mxu1 %vm243_vm0, %v18594_v27 }
 0x231   :  { %15629 = vmatprep.mubr.msk.bf16.mxu1 %vm243_vm0, %v18601_v28 }
 0x233   :  { %v14191_v29 = vpop.f32.mrb[24].mxu1 }
 0x234   :  { %v14192_v30 = vpop.f32.mrb[25].mxu1 }
 0x235   :  { %v18605_v31 = vadd.f32 %v14192_v30, %v14191_v29  ;;  %v14194_v32 = vpop.f32.mrb[26].mxu1 }
 0x236   :  { %v14195_v33 = vpop.f32.mrb[27].mxu1 }
 0x237   :  { %v18607_v34 = vadd.f32 %v14195_v33, %v14194_v32 }
 0x238   :  { %15630 = vmatmul.mubr.msk.bf16.gmra.mrb[132].mxu1 %vm243_vm0, %v18612_v35 }
 0x239   :  { %15633 = vmatprep.mubr.msk.bf16.mxu1 %vm243_vm0, %v18619_v36 }
 0x23b   :  { %v14197_v37 = vpop.f32.mrb[28].mxu1 }
 0x23c   :  { %v14198_v38 = vpop.f32.mrb[29].mxu1 }
 0x23d   :  { %v18623_v39 = vadd.f32 %v14198_v38, %v14197_v37  ;;  %v14200_v40 = vpop.f32.mrb[30].mxu1  ;;  %v18720_v38 = vld [vmem:[%s23266_s1 + $0x78] sm:$0xff]  }
 0x23e   :  { %v14201_v41 = vpop.f32.mrb[31].mxu1 }
 0x23f   :  { %v18625_v42 = vadd.f32 %v14201_v41, %v14200_v40 }
 0x240   :  { %15634 = vmatmul.mubr.msk.bf16.gmra.mrb[136].mxu1 %vm243_vm0, %v18630_v43 }
 0x241   :  { %15637 = vmatprep.mubr.msk.bf16.mxu1 %vm243_vm0, %v18637_v44 }
 0x243   :  { %v14203_v45 = vpop.f32.mrb[32].mxu1 }
 0x244   :  { %v14204_v46 = vpop.f32.mrb[33].mxu1 }
 0x245   :  { %v18641_v47 = vadd.f32 %v14204_v46, %v14203_v45  ;;  %v14206_v49 = vpop.f32.mrb[34].mxu1 }
 0x246   :  { %v14207_v50 = vpop.f32.mrb[35].mxu1 }
 0x247   :  { %v18643_v51 = vadd.f32 %v14207_v50, %v14206_v49 }
 0x248   :  { %15638 = vmatmul.mubr.msk.bf16.gmra.mrb[140].mxu1 %vm243_vm0, %v18648_v53 }
 0x249   :  { %15641 = vmatprep.mubr.msk.bf16.mxu1 %vm243_vm0, %v18655_v54 }
 0x24b   :  { %v14209_v55 = vpop.f32.mrb[36].mxu1 }
 0x24c   :  { %v14210_v57 = vpop.f32.mrb[37].mxu1 }
 0x24d   :  { %v18659_v58 = vadd.f32 %v14210_v57, %v14209_v55  ;;  %v14212_v59 = vpop.f32.mrb[38].mxu1 }
 0x24e   :  { %v14213_v61 = vpop.f32.mrb[39].mxu1 }
 0x24f   :  { %v18661_v62 = vadd.f32 %v14213_v61, %v14212_v59 }
 0x250   :  { %15642 = vmatmul.mubr.msk.bf16.gmra.mrb[144].mxu1 %vm243_vm0, %v18666_v63 }
 0x251   :  { %15645 = vmatprep.mubr.msk.bf16.mxu1 %vm243_vm0, %v18673_v1 }
 0x253   :  { %v14215_v2 = vpop.f32.mrb[40].mxu1 }
 0x254   :  { %v14216_v3 = vpop.f32.mrb[41].mxu1 }
 0x255   :  { %v18677_v5 = vadd.f32 %v14216_v3, %v14215_v2  ;;  %v14218_v6 = vpop.f32.mrb[42].mxu1 }
 0x256   :  { %v14219_v7 = vpop.f32.mrb[43].mxu1 }
 0x257   :  { %v18679_v9 = vadd.f32 %v14219_v7, %v14218_v6 }
 0x258   :  { %15646 = vmatmul.mubr.msk.bf16.gmra.mrb[148].mxu1 %vm243_vm0, %v18684_v10 }
 0x259   :  { %15649 = vmatprep.mubr.msk.bf16.mxu1 %vm243_vm0, %v18691_v11 }
 0x25b   :  { %v14221_v13 = vpop.f32.mrb[44].mxu1 }
 0x25c   :  { %v14222_v14 = vpop.f32.mrb[45].mxu1 }
 0x25d   :  { %v18695_v15 = vadd.f32 %v14222_v14, %v14221_v13  ;;  %v14224_v17 = vpop.f32.mrb[46].mxu1 }
 0x25e   :  { %v14225_v18 = vpop.f32.mrb[47].mxu1 }
 0x25f   :  { %v18697_v21 = vadd.f32 %v14225_v18, %v14224_v17 }
 0x260   :  { %15650 = vmatmul.mubr.msk.bf16.gmra.mrb[152].mxu1 %vm243_vm0, %v18702_v22 }
 0x261   :  { %15653 = vmatprep.mubr.msk.bf16.mxu1 %vm243_vm0, %v18709_v24 }
 0x263   :  { %v14227_v25 = vpop.f32.mrb[48].mxu1 }
 0x264   :  { %v14228_v29 = vpop.f32.mrb[49].mxu1 }
 0x265   :  { %v18713_v30 = vadd.f32 %v14228_v29, %v14227_v25  ;;  %v14230_v32 = vpop.f32.mrb[50].mxu1  ;;  %v115_v25 = vld [vmem:[%s23268_s6] sm:$0xff] }
 0x266   :  { %v14231_v33 = vpop.f32.mrb[51].mxu1 }
 0x267   :  { %v18715_v37 = vadd.f32 %v14231_v33, %v14230_v32  ;;  %v116_v32 = vld [vmem:[%s23268_s6 + $0x8] sm:$0xff] }
 0x268   :  { %15654 = vmatmul.mubr.msk.bf16.gmra.mrb[156].mxu1 %vm243_vm0, %v18720_v38 }
 0x26b   :  { %v14233_v40 = vpop.f32.mrb[52].mxu1 }
 0x26c   :  { %v14234_v41 = vpop.f32.mrb[53].mxu1 }
 0x26d   :  { %v18724_v45 = vadd.f32 %v14234_v41, %v14233_v40  ;;  %v14236_v46 = vpop.f32.mrb[54].mxu1  ;;  %v822_v40 = vadd.f32 %v18536_v48, %v115_v25 }
 0x26e   :  { %v14237_v49 = vpop.f32.mrb[55].mxu1 }
 0x26f   :  { %v18726_v50 = vadd.f32 %v14237_v49, %v14236_v46 }
 0x273   :  { %v14239_v55 = vpop.f32.mrb[56].mxu1 }
 0x274   :  { %v14240_v57 = vpop.f32.mrb[57].mxu1 }
 0x275   :  { %v18728_v59 = vadd.f32 %v14240_v57, %v14239_v55  ;;  %v14242_v61 = vpop.f32.mrb[58].mxu1  ;;  %v823_v55 = vadd.f32 %v18541_v52, %v116_v32 }
 0x276   :  { %v14243_v2 = vpop.f32.mrb[59].mxu1 }
 0x277   :  { %v18730_v3 = vadd.f32 %v14243_v2, %v14242_v61 }
 0x27b   :  { %v14245_v6 = vpop.f32.mrb[60].mxu1 }
 0x27c   :  { %v14246_v7 = vpop.f32.mrb[61].mxu1 }
 0x27d   :  { %v18732_v13 = vadd.f32 %v14246_v7, %v14245_v6  ;;  %v14248_v14 = vpop.f32.mrb[62].mxu1  ;;  %v117_v6 = vld [vmem:[%s23268_s6 + $0x10] sm:$0xff] }
 0x27e   :  { %v14249_v17 = vpop.f32.mrb[63].mxu1 }
 0x27f   :  { %v18734_v18 = vadd.f32 %v14249_v17, %v14248_v14  ;;  %v118_v14 = vld [vmem:[%s23268_s6 + $0x18] sm:$0xff]  ;;  %v824_v17 = vadd.f32 %v18546_v56, %v117_v6 }
 0x280   :  { %v825_v32 = vadd.f32 %v18551_v60, %v118_v14 }
 0x283   :  { %v14285_v29 = vpop.f32.mrb[64].mxu1 }
 0x284   :  { %v14286_v33 = vpop.f32.mrb[65].mxu1 }
 0x285   :  { %v14287_v41 = vadd.f32 %v14286_v33, %v14285_v29  ;;  %v14288_v46 = vpop.f32.mrb[66].mxu1 }
 0x286   :  { %v14289_v49 = vpop.f32.mrb[67].mxu1 }
 0x287   :  { %v18744_v57 = vadd.f32 %v14287_v41, %v822_v40  ;;  %v14290_v61 = vadd.f32 %v14289_v49, %v14288_v46  ;;  %v119_v46 = vld [vmem:[%s23268_s6 + $0x20] sm:$0xff] }
 0x289   :  { %v18746_v2 = vadd.f32 %v14290_v61, %v823_v55  ;;  %v120_v55 = vld [vmem:[%s23268_s6 + $0x28] sm:$0xff]  ;;  %v826_v61 = vadd.f32 %v18556_v0, %v119_v46 }
 0x28a   :  { %v827_v14 = vadd.f32 %v18561_v4, %v120_v55 }
 0x28b   :  { %v14291_v7 = vpop.f32.mrb[68].mxu1 }
 0x28c   :  { %v14292_v48 = vpop.f32.mrb[69].mxu1 }
 0x28d   :  { %v14293_v25 = vadd.f32 %v14292_v48, %v14291_v7  ;;  %v14294_v29 = vpop.f32.mrb[70].mxu1 }
 0x28e   :  { %v14295_v52 = vpop.f32.mrb[71].mxu1 }
 0x28f   :  { %v18756_v33 = vadd.f32 %v14293_v25, %v824_v17  ;;  %v14296_v40 = vadd.f32 %v14295_v52, %v14294_v29  ;;  %v121_v29 = vld [vmem:[%s23268_s6 + $0x30] sm:$0xff] }
 0x291   :  { %v18758_v41 = vadd.f32 %v14296_v40, %v825_v32  ;;  %v122_v32 = vld [vmem:[%s23268_s6 + $0x38] sm:$0xff]  ;;  %v828_v40 = vadd.f32 %v18566_v8, %v121_v29 }
 0x292   :  { %v829_v55 = vadd.f32 %v18571_v12, %v122_v32 }
 0x293   :  { %v14297_v49 = vpop.f32.mrb[72].mxu1 }
 0x294   :  { %v14298_v56 = vpop.f32.mrb[73].mxu1 }
 0x295   :  { %v14299_v6 = vadd.f32 %v14298_v56, %v14297_v49  ;;  %v14300_v7 = vpop.f32.mrb[74].mxu1 }
 0x296   :  { %v14301_v60 = vpop.f32.mrb[75].mxu1 }
 0x297   :  { %v18768_v48 = vadd.f32 %v14299_v6, %v826_v61  ;;  %v14302_v17 = vadd.f32 %v14301_v60, %v14300_v7  ;;  %v123_v7 = vld [vmem:[%s23268_s6 + $0x40] sm:$0xff] }
 0x299   :  { %v18770_v25 = vadd.f32 %v14302_v17, %v827_v14  ;;  %v124_v14 = vld [vmem:[%s23268_s6 + $0x48] sm:$0xff]  ;;  %v830_v17 = vadd.f32 %v18576_v16, %v123_v7 }
 0x29a   :  { %v831_v32 = vadd.f32 %v18578_v19, %v124_v14 }
 0x29b   :  { %v14303_v52 = vpop.f32.mrb[76].mxu1 }
 0x29c   :  { %v14304_v0 = vpop.f32.mrb[77].mxu1 }
 0x29d   :  { %v14305_v46 = vadd.f32 %v14304_v0, %v14303_v52  ;;  %v14306_v49 = vpop.f32.mrb[78].mxu1 }
 0x29e   :  { %v14307_v4 = vpop.f32.mrb[79].mxu1 }
 0x29f   :  { %v18780_v56 = vadd.f32 %v14305_v46, %v828_v40  ;;  %v14308_v61 = vadd.f32 %v14307_v4, %v14306_v49  ;;  %v125_v49 = vld [vmem:[%s23268_s6 + $0x50] sm:$0xff] }
 0x2a1   :  { %v18782_v6 = vadd.f32 %v14308_v61, %v829_v55  ;;  %v126_v55 = vld [vmem:[%s23268_s6 + $0x58] sm:$0xff]  ;;  %v832_v61 = vadd.f32 %v18587_v23, %v125_v49 }
 0x2a2   :  { %v833_v14 = vadd.f32 %v18589_v26, %v126_v55 }
 0x2a3   :  { %v14309_v60 = vpop.f32.mrb[80].mxu1 }
 0x2a4   :  { %v14310_v8 = vpop.f32.mrb[81].mxu1 }
 0x2a5   :  { %v14311_v29 = vadd.f32 %v14310_v8, %v14309_v60  ;;  %v14312_v52 = vpop.f32.mrb[82].mxu1 }
 0x2a6   :  { %v14313_v12 = vpop.f32.mrb[83].mxu1 }
 0x2a7   :  { %v18792_v0 = vadd.f32 %v14311_v29, %v830_v17  ;;  %v14314_v40 = vadd.f32 %v14313_v12, %v14312_v52  ;;  %v127_v52 = vld [vmem:[%s23268_s6 + $0x60] sm:$0xff] }
 0x2a9   :  { %v18794_v46 = vadd.f32 %v14314_v40, %v831_v32  ;;  %v128_v32 = vld [vmem:[%s23268_s6 + $0x68] sm:$0xff]  ;;  %v834_v40 = vadd.f32 %v18605_v31, %v127_v52 }
 0x2aa   :  { %v835_v55 = vadd.f32 %v18607_v34, %v128_v32 }
 0x2ab   :  { %v14315_v4 = vpop.f32.mrb[84].mxu1 }
 0x2ac   :  { %v14316_v16 = vpop.f32.mrb[85].mxu1 }
 0x2ad   :  { %v14317_v7 = vadd.f32 %v14316_v16, %v14315_v4  ;;  %v14318_v60 = vpop.f32.mrb[86].mxu1 }
 0x2ae   :  { %v14319_v19 = vpop.f32.mrb[87].mxu1 }
 0x2af   :  { %v18804_v8 = vadd.f32 %v14317_v7, %v832_v61  ;;  %v14320_v17 = vadd.f32 %v14319_v19, %v14318_v60  ;;  %v129_v60 = vld [vmem:[%s23268_s6 + $0x70] sm:$0xff] }
 0x2b1   :  { %v18806_v29 = vadd.f32 %v14320_v17, %v833_v14  ;;  %v130_v14 = vld [vmem:[%s23268_s6 + $0x78] sm:$0xff]  ;;  %v836_v17 = vadd.f32 %v18623_v39, %v129_v60 }
 0x2b2   :  { %v837_v32 = vadd.f32 %v18625_v42, %v130_v14  ;;  %v17498_v14 = vld [vmem:[%s23267_s7 + $0x204] ss:$8 sps:$4 sm:$0xff]  }
 0x2b3   :  { %v14321_v12 = vpop.f32.mrb[88].mxu1  ;;  %1853 = vmatprep.mubr.bf16.mxu1 %v17498_v14 }
 0x2b4   :  { %v14322_v23 = vpop.f32.mrb[89].mxu1 }
 0x2b5   :  { %v14323_v49 = vadd.f32 %v14322_v23, %v14321_v12  ;;  %v14324_v4 = vpop.f32.mrb[90].mxu1 }
 0x2b6   :  { %v14325_v26 = vpop.f32.mrb[91].mxu1 }
 0x2b7   :  { %v18816_v16 = vadd.f32 %v14323_v49, %v834_v40  ;;  %v14326_v61 = vadd.f32 %v14325_v26, %v14324_v4  ;;  %v131_v4 = vld [vmem:[%s23268_s6 + $0x80] sm:$0xff] }
 0x2b9   :  { %v18818_v7 = vadd.f32 %v14326_v61, %v835_v55  ;;  %v132_v55 = vld [vmem:[%s23268_s6 + $0x88] sm:$0xff]  ;;  %v838_v61 = vadd.f32 %v18641_v47, %v131_v4 }
 0x2bb   :  { %v14327_v19 = vpop.f32.mrb[92].mxu1 }
 0x2bc   :  { %v14328_v31 = vpop.f32.mrb[93].mxu1 }
 0x2bd   :  { %v14329_v52 = vadd.f32 %v14328_v31, %v14327_v19  ;;  %v14330_v12 = vpop.f32.mrb[94].mxu1  ;;  %v839_v31 = vadd.f32 %v18643_v51, %v132_v55 }
 0x2be   :  { %v14331_v34 = vpop.f32.mrb[95].mxu1 }
 0x2bf   :  { %v18828_v23 = vadd.f32 %v14329_v52, %v836_v17  ;;  %v14332_v40 = vadd.f32 %v14331_v34, %v14330_v12  ;;  %v133_v34 = vld [vmem:[%s23268_s6 + $0x90] sm:$0xff] }
 0x2c0   :  { %v840_v4 = vadd.f32 %v18659_v58, %v133_v34 }
 0x2c1   :  { %v18830_v49 = vadd.f32 %v14332_v40, %v837_v32  ;;  %v134_v32 = vld [vmem:[%s23268_s6 + $0x98] sm:$0xff] }
 0x2c3   :  { %v14333_v26 = vpop.f32.mrb[96].mxu1 }
 0x2c4   :  { %v14334_v39 = vpop.f32.mrb[97].mxu1 }
 0x2c5   :  { %v14335_v60 = vadd.f32 %v14334_v39, %v14333_v26  ;;  %v14336_v19 = vpop.f32.mrb[98].mxu1  ;;  %v841_v39 = vadd.f32 %v18661_v62, %v134_v32 }
 0x2c6   :  { %v14337_v42 = vpop.f32.mrb[99].mxu1 }
 0x2c7   :  { %v18843_v17 = vadd.f32 %v14335_v60, %v838_v61  ;;  %v14338_v52 = vadd.f32 %v14337_v42, %v14336_v19  ;;  %v135_v42 = vld [vmem:[%s23268_s6 + $0xa0] sm:$0xff] }
 0x2c9   :  { %v18845_v12 = vadd.f32 %v14338_v52, %v839_v31  ;;  %v136_v31 = vld [vmem:[%s23268_s6 + $0xa8] sm:$0xff]  ;;  %v842_v52 = vadd.f32 %v18677_v5, %v135_v42 }
 0x2ca   :  { %v843_v32 = vadd.f32 %v18679_v9, %v136_v31 }
 0x2cb   :  { %v14339_v47 = vpop.f32.mrb[100].mxu1 }
 0x2cc   :  { %v14340_v40 = vpop.f32.mrb[101].mxu1 }
 0x2cd   :  { %v14341_v26 = vadd.f32 %v14340_v40, %v14339_v47  ;;  %v14342_v51 = vpop.f32.mrb[102].mxu1 }
 0x2ce   :  { %v14343_v55 = vpop.f32.mrb[103].mxu1 }
 0x2cf   :  { %v18855_v61 = vadd.f32 %v14341_v26, %v840_v4  ;;  %v14344_v60 = vadd.f32 %v14343_v55, %v14342_v51  ;;  %v137_v51 = vld [vmem:[%s23268_s6 + $0xb0] sm:$0xff] }
 0x2d1   :  { %v18857_v19 = vadd.f32 %v14344_v60, %v841_v39  ;;  %v138_v39 = vld [vmem:[%s23268_s6 + $0xb8] sm:$0xff]  ;;  %v844_v60 = vadd.f32 %v18695_v15, %v137_v51 }
 0x2d2   :  { %v845_v31 = vadd.f32 %v18697_v21, %v138_v39 }
 0x2d3   :  { %v14345_v14 = vpop.f32.mrb[104].mxu1 }
 0x2d4   :  { %v14346_v58 = vpop.f32.mrb[105].mxu1 }
 0x2d5   :  { %v14347_v34 = vadd.f32 %v14346_v58, %v14345_v14  ;;  %v14348_v47 = vpop.f32.mrb[106].mxu1 }
 0x2d6   :  { %v14349_v62 = vpop.f32.mrb[107].mxu1 }
 0x2d7   :  { %v18867_v40 = vadd.f32 %v14347_v34, %v842_v52  ;;  %v14350_v4 = vadd.f32 %v14349_v62, %v14348_v47  ;;  %v139_v47 = vld [vmem:[%s23268_s6 + $0xc0] sm:$0xff] }
 0x2d9   :  { %v18869_v26 = vadd.f32 %v14350_v4, %v843_v32  ;;  %v140_v32 = vld [vmem:[%s23268_s6 + $0xc8] sm:$0xff]  ;;  %v846_v4 = vadd.f32 %v18713_v30, %v139_v47 }
 0x2da   :  { %v847_v39 = vadd.f32 %v18715_v37, %v140_v32  ;;  %v142_v37 = vld [vmem:[%s23268_s6 + $0xd8] sm:$0xff] }
 0x2db   :  { %v14351_v55 = vpop.f32.mrb[108].mxu1 }
 0x2dc   :  { %v14352_v5 = vpop.f32.mrb[109].mxu1 }
 0x2dd   :  { %v14353_v42 = vadd.f32 %v14352_v5, %v14351_v55  ;;  %v14354_v14 = vpop.f32.mrb[110].mxu1 }
 0x2de   :  { %v14355_v9 = vpop.f32.mrb[111].mxu1 }
 0x2df   :  { %v18879_v58 = vadd.f32 %v14353_v42, %v844_v60  ;;  %v14356_v52 = vadd.f32 %v14355_v9, %v14354_v14  ;;  %v18898_v14 = vld [vmem:[%s23265_s8 + $0x30] sm:$0xff]  }
 0x2e0   :  { %v141_v9 = vld [vmem:[%s23268_s6 + $0xd0] sm:$0xff]  ;;  %15657 = vmatprep.subr.bf16.mxu0 %v18898_v14 }
 0x2e1   :  { %v18881_v34 = vadd.f32 %v14356_v52, %v845_v31  ;;  %15658 = vmatpush3.bf16.msra.mxu0 %v18898_v14  ;;  %v848_v52 = vadd.f32 %v18724_v45, %v141_v9 }
 0x2e3   :  { %v14357_v62 = vpop.f32.mrb[112].mxu1 }
 0x2e4   :  { %v14358_v15 = vpop.f32.mrb[113].mxu1 }
 0x2e5   :  { %v14359_v51 = vadd.f32 %v14358_v15, %v14357_v62  ;;  %v14360_v55 = vpop.f32.mrb[114].mxu1  ;;  %v849_v15 = vadd.f32 %v18726_v50, %v142_v37 }
 0x2e6   :  { %v14361_v21 = vpop.f32.mrb[115].mxu1 }
 0x2e7   :  { %v18891_v5 = vadd.f32 %v14359_v51, %v846_v4  ;;  %v14362_v60 = vadd.f32 %v14361_v21, %v14360_v55  ;;  %v143_v21 = vld [vmem:[%s23268_s6 + $0xe0] sm:$0xff] }
 0x2e8   :  { %v850_v9 = vadd.f32 %v18728_v59, %v143_v21 }
 0x2e9   :  { %23269 = vst [vmem:[#allocation2_spill] sm:$0xff] %v18891_v5  ;;  %v18893_v42 = vadd.f32 %v14362_v60, %v847_v39  ;;  %v144_v60 = vld [vmem:[%s23268_s6 + $0xe8] sm:$0xff] }
 0x2ea   :  { %v851_v37 = vadd.f32 %v18730_v3, %v144_v60 }
 0x2eb   :  { %23270 = vst [vmem:[#allocation3_spill] sm:$0xff] %v18893_v42  ;;  %v14363_v30 = vpop.f32.mrb[116].mxu1 }
 0x2ec   :  { %v14364_v31 = vpop.f32.mrb[117].mxu1 }
 0x2ed   :  { %v14365_v47 = vadd.f32 %v14364_v31, %v14363_v30  ;;  %v14366_v62 = vpop.f32.mrb[118].mxu1 }
 0x2ee   :  { %v14367_v32 = vpop.f32.mrb[119].mxu1 }
 0x2ef   :  { %v18910_v4 = vadd.f32 %v14365_v47, %v848_v52  ;;  %v14368_v51 = vadd.f32 %v14367_v32, %v14366_v62  ;;  %v145_v32 = vld [vmem:[%s23268_s6 + $0xf0] sm:$0xff] }
 0x2f0   :  { %v852_v21 = vadd.f32 %v18732_v13, %v145_v32 }
 0x2f1   :  { %23271 = vst [vmem:[#allocation4_spill] sm:$0xff] %v18910_v4  ;;  %v18912_v55 = vadd.f32 %v14368_v51, %v849_v15  ;;  %v146_v51 = vld [vmem:[%s23268_s6 + $0xf8] sm:$0xff] }
 0x2f2   :  { %v853_v60 = vadd.f32 %v18734_v18, %v146_v51  ;;  %v18941_v18 = vld [vmem:[%s23265_s8 + $0x38] sm:$0xff]  }
 0x2f3   :  { %23272 = vst [vmem:[#allocation5_spill] sm:$0xff] %v18912_v55  ;;  %v14369_v39 = vpop.f32.mrb[120].mxu1  ;;  %15659 = vmatprep.subr.bf16.mxu0 %v18941_v18 }
 0x2f4   :  { %v14370_v45 = vpop.f32.mrb[121].mxu1  ;;  %15660 = vmatpush3.bf16.msra.mxu0 %v18941_v18 }
 0x2f5   :  { %v14371_v30 = vadd.f32 %v14370_v45, %v14369_v39  ;;  %v14372_v31 = vpop.f32.mrb[122].mxu1 }
 0x2f6   :  { %v14373_v50 = vpop.f32.mrb[123].mxu1 }
 0x2f7   :  { %v18922_v52 = vadd.f32 %v14371_v30, %v850_v9  ;;  %v14374_v47 = vadd.f32 %v14373_v50, %v14372_v31  ;;  %15662 = vmatmul.mubr.msk.bf16.vlgmr.msra.gmra.mrb[64].mxu0 %vm243_vm0, %v18594_v27 }
 0x2f8   :  { %15665 = vmatprep.mubr.msk.bf16.mxu0 %vm243_vm0, %v18601_v28 }
 0x2f9   :  { %23273 = vst [vmem:[#allocation6_spill] sm:$0xff] %v18922_v52  ;;  %v18924_v62 = vadd.f32 %v14374_v47, %v851_v37 }
 0x2fb   :  { %23274 = vst [vmem:[#allocation7_spill] sm:$0xff] %v18924_v62  ;;  %v14375_v15 = vpop.f32.mrb[124].mxu1 }
 0x2fc   :  { %v14376_v59 = vpop.f32.mrb[125].mxu1 }
 0x2fd   :  { %v14377_v39 = vadd.f32 %v14376_v59, %v14375_v15  ;;  %v14378_v45 = vpop.f32.mrb[126].mxu1 }
 0x2fe   :  { %v14379_v3 = vpop.f32.mrb[127].mxu1 }
 0x2ff   :  { %v18934_v9 = vadd.f32 %v14377_v39, %v852_v21  ;;  %v14380_v30 = vadd.f32 %v14379_v3, %v14378_v45  ;;  %15666 = vmatmul.mubr.msk.bf16.gmra.mrb[68].mxu0 %vm243_vm0, %v18612_v35 }
 0x300   :  { %15669 = vmatprep.mubr.msk.bf16.mxu0 %vm243_vm0, %v18619_v36 }
 0x301   :  { %v18936_v31 = vadd.f32 %v14380_v30, %v853_v60 }
 0x303   :  { %v15627_v50 = vpop.f32.mrb[128].mxu1 }
 0x304   :  { %v1485_v37 = vpop.f32.mrb[129].mxu1 }
 0x305   :  { %v15628_v47 = vpop.f32.mrb[130].mxu1 }
 0x306   :  { %v1646_v62 = vpack.c.bf16 %v15628_v47, %v15627_v50  ;;  %v1488_v52 = vpop.f32.mrb[131].mxu1 }
 0x307   :  { %v1645_v55 = vpack.c.bf16 %v1488_v52, %v1485_v37  ;;  %15670 = vmatmul.mubr.msk.bf16.gmra.mrb[72].mxu0 %vm243_vm0, %v18630_v43 }
 0x308   :  { %15673 = vmatprep.mubr.msk.bf16.mxu0 %vm243_vm0, %v18637_v44 }
 0x30b   :  { %v15631_v4 = vpop.f32.mrb[132].mxu1 }
 0x30c   :  { %v1501_v42 = vpop.f32.mrb[133].mxu1 }
 0x30d   :  { %v15632_v5 = vpop.f32.mrb[134].mxu1 }
 0x30e   :  { %v1648_v13 = vpack.c.bf16 %v15632_v5, %v15631_v4  ;;  %v1504_v32 = vpop.f32.mrb[135].mxu1 }
 0x30f   :  { %v1647_v15 = vpack.c.bf16 %v1504_v32, %v1501_v42  ;;  %15674 = vmatmul.mubr.msk.bf16.gmra.mrb[76].mxu0 %vm243_vm0, %v18648_v53 }
 0x310   :  { %15677 = vmatprep.mubr.msk.bf16.mxu0 %vm243_vm0, %v18655_v54 }
 0x313   :  { %v15635_v51 = vpop.f32.mrb[136].mxu1 }
 0x314   :  { %v1517_v59 = vpop.f32.mrb[137].mxu1 }
 0x315   :  { %v15636_v21 = vpop.f32.mrb[138].mxu1 }
 0x316   :  { %v1650_v39 = vpack.c.bf16 %v15636_v21, %v15635_v51  ;;  %v1520_v52 = vpop.f32.mrb[139].mxu1 }
 0x317   :  { %v1649_v45 = vpack.c.bf16 %v1520_v52, %v1517_v59  ;;  %15678 = vmatmul.mubr.msk.bf16.gmra.mrb[80].mxu0 %vm243_vm0, %v18666_v63 }
 0x318   :  { %15681 = vmatprep.mubr.msk.bf16.mxu0 %vm243_vm0, %v18673_v1 }
 0x31b   :  { %v15639_v5 = vpop.f32.mrb[140].mxu1 }
 0x31c   :  { %v1533_v42 = vpop.f32.mrb[141].mxu1 }
 0x31d   :  { %v15640_v4 = vpop.f32.mrb[142].mxu1 }
 0x31e   :  { %v1652_v3 = vpack.c.bf16 %v15640_v4, %v15639_v5  ;;  %v1536_v60 = vpop.f32.mrb[143].mxu1 }
 0x31f   :  { %v1651_v30 = vpack.c.bf16 %v1536_v60, %v1533_v42  ;;  %15682 = vmatmul.mubr.msk.bf16.gmra.mrb[84].mxu0 %vm243_vm0, %v18684_v10 }
 0x323   :  { %v15643_v50 = vpop.f32.mrb[144].mxu1 }
 0x324   :  { %v1549_v37 = vpop.f32.mrb[145].mxu1 }
 0x325   :  { %v15644_v47 = vpop.f32.mrb[146].mxu1 }
 0x326   :  { %v1654_v32 = vpack.c.bf16 %v15644_v47, %v15643_v50  ;;  %v1552_v51 = vpop.f32.mrb[147].mxu1 }
 0x327   :  { %v1653_v59 = vpack.c.bf16 %v1552_v51, %v1549_v37 }
 0x329   :  { %14399 = vmatprep.subr.bf16.mxu1 %v1653_v59 }
 0x32a   :  { %14400 = vmatpush3.bf16.msra.mxu1 %v1645_v55 }
 0x32b   :  { %v15647_v21 = vpop.f32.mrb[148].mxu1  ;;  %14401 = vmatprep.subr.bf16.mxu1 %v1654_v32 }
 0x32c   :  { %v1565_v52 = vpop.f32.mrb[149].mxu1 }
 0x32d   :  { %v15648_v5 = vpop.f32.mrb[150].mxu1 }
 0x32e   :  { %v1656_v42 = vpack.c.bf16 %v15648_v5, %v15647_v21  ;;  %v1568_v4 = vpop.f32.mrb[151].mxu1  ;;  %14402 = vmatpush3.bf16.msra.mxu1 %v1646_v62 }
 0x32f   :  { %v1655_v60 = vpack.c.bf16 %v1568_v4, %v1565_v52  ;;  %v17508_v4 = vld [vmem:[%s23267_s7 + $0x244] ss:$8 sps:$4 sm:$0xff]  }
 0x331   :  { %14403 = vmatprep.subr.bf16.mxu1 %v1655_v60  ;;  %v17510_v60 = vld [vmem:[%s23267_s7 + $0x240] ss:$8 sps:$4 sm:$0xff]  }
 0x332   :  { %14404 = vmatpush3.bf16.msra.mxu1 %v1647_v15 }
 0x333   :  { %v15651_v50 = vpop.f32.mrb[152].mxu1  ;;  %14405 = vmatprep.subr.bf16.mxu1 %v1656_v42  ;;  %v17505_v42 = vld [vmem:[%s23267_s7 + $0x234] ss:$8 sps:$4 sm:$0xff]  }
 0x334   :  { %v1581_v37 = vpop.f32.mrb[153].mxu1 }
 0x335   :  { %v15652_v55 = vpop.f32.mrb[154].mxu1 }
 0x336   :  { %v1658_v47 = vpack.c.bf16 %v15652_v55, %v15651_v50  ;;  %v1584_v32 = vpop.f32.mrb[155].mxu1  ;;  %14406 = vmatpush3.bf16.msra.mxu1 %v1648_v13  ;;  %v17496_v13 = vld [vmem:[%s23267_s7 + $0x200] ss:$8 sps:$4 sm:$0xff]   ;;  %v17512_v50 = vld [vmem:[%s23267_s7 + $0x254] ss:$8 sps:$4 sm:$0xff]  }
 0x337   :  { %v1657_v51 = vpack.c.bf16 %v1584_v32, %v1581_v37  ;;  %v17514_v37 = vld [vmem:[%s23267_s7 + $0x250] ss:$8 sps:$4 sm:$0xff]   ;;  %v17515_v55 = vld [vmem:[%s23267_s7 + $0x264] ss:$8 sps:$4 sm:$0xff]   ;;  %v17518_v32 = vld [vmem:[%s23267_s7 + $0x274] ss:$8 sps:$4 sm:$0xff]  }
 0x339   :  { %14407 = vmatprep.subr.bf16.mxu1 %v1657_v51  ;;  %v17520_v51 = vld [vmem:[%s23267_s7 + $0x270] ss:$8 sps:$4 sm:$0xff]  }
 0x33a   :  { %14408 = vmatpush3.bf16.msra.mxu1 %v1649_v45  ;;  %v17499_v45 = vld [vmem:[%s23267_s7 + $0x214] ss:$8 sps:$4 sm:$0xff]  }
 0x33b   :  { %v15655_v62 = vpop.f32.mrb[156].mxu1  ;;  %14409 = vmatprep.subr.bf16.mxu1 %v1658_v47  ;;  %v17517_v47 = vld [vmem:[%s23267_s7 + $0x260] ss:$8 sps:$4 sm:$0xff]  }
 0x33c   :  { %v1597_v59 = vpop.f32.mrb[157].mxu1 }
 0x33d   :  { %v15656_v15 = vpop.f32.mrb[158].mxu1 }
 0x33e   :  { %v1660_v21 = vpack.c.bf16 %v15656_v15, %v15655_v62  ;;  %v1600_v52 = vpop.f32.mrb[159].mxu1  ;;  %14410 = vmatpush3.bf16.msra.mxu1 %v1650_v39  ;;  %v17501_v39 = vld [vmem:[%s23267_s7 + $0x210] ss:$8 sps:$4 sm:$0xff]   ;;  %v17521_v62 = vld [vmem:[%s23267_s7 + $0x284] ss:$8 sps:$4 sm:$0xff]  }
 0x33f   :  { %v1659_v5 = vpack.c.bf16 %v1600_v52, %v1597_v59  ;;  %v17523_v59 = vld [vmem:[%s23267_s7 + $0x280] ss:$8 sps:$4 sm:$0xff]   ;;  %v17524_v15 = vld [vmem:[%s23267_s7 + $0x294] ss:$8 sps:$4 sm:$0xff]   ;;  %v17528_v52 = vld [vmem:[%s23267_s7 + $0x2a4] ss:$8 sps:$4 sm:$0xff]  }
 0x341   :  { %14411 = vmatprep.subr.bf16.mxu1 %v1659_v5  ;;  %v17530_v5 = vld [vmem:[%s23267_s7 + $0x2a0] ss:$8 sps:$4 sm:$0xff]  }
 0x342   :  { %14412 = vmatpush3.bf16.msra.mxu1 %v1651_v30  ;;  %v17546_v30 = vld [vmem:[%s23265_s8 + $0x40] sm:$0xff]  }
 0x343   :  { %14413 = vmatprep.subr.bf16.mxu1 %v1660_v21  ;;  %v17526_v21 = vld [vmem:[%s23267_s7 + $0x290] ss:$8 sps:$4 sm:$0xff]  }
 0x346   :  { %14414 = vmatpush3.bf16.msra.mxu1 %v1652_v3  ;;  %v17502_v3 = vld [vmem:[%s23267_s7 + $0x224] ss:$8 sps:$4 sm:$0xff]  }
 0x347   :  { %16829 = vmatprep.subr.bf16.mxu1 %v18898_v14 }
 0x349   :  { %1854 = vmatmul.mubr.bf16.vlgmr.msra.gmra.mrb[160].mxu1 %v17496_v13  ;;  %v17531_v13 = vld [vmem:[%s23267_s7 + $0x2b4] ss:$8 sps:$4 sm:$0xff]  }
 0x34a   :  { %1861 = vmatprep.mubr.bf16.mxu1 %v17499_v45  ;;  %16831 = vmatpush3.bf16.msra.mxu1 %v18898_v14  ;;  %v17504_v14 = vld [vmem:[%s23267_s7 + $0x220] ss:$8 sps:$4 sm:$0xff]   ;;  %v17533_v45 = vld [vmem:[%s23267_s7 + $0x2b0] ss:$8 sps:$4 sm:$0xff]  }
 0x34b   :  { %16830 = vmatprep.subr.bf16.mxu1 %v18941_v18 }
 0x34e   :  { %16832 = vmatpush3.bf16.msra.mxu1 %v18941_v18  ;;  %v17507_v18 = vld [vmem:[%s23267_s7 + $0x230] ss:$8 sps:$4 sm:$0xff]  }
 0x34f   :  { %15693 = vmatprep.subr.bf16.mxu1 %v17546_v30 }
 0x351   :  { %1862 = vmatmul.mubr.bf16.gmra.mrb[164].mxu1 %v17501_v39  ;;  %v17534_v39 = vld [vmem:[%s23267_s7 + $0x2c4] ss:$8 sps:$4 sm:$0xff]  }
 0x352   :  { %1869 = vmatprep.mubr.bf16.mxu1 %v17502_v3  ;;  %v17536_v3 = vld [vmem:[%s23267_s7 + $0x2c0] ss:$8 sps:$4 sm:$0xff]  }
 0x359   :  { %1870 = vmatmul.mubr.bf16.gmra.mrb[168].mxu1 %v17504_v14  ;;  %v17537_v14 = vld [vmem:[%s23267_s7 + $0x2d4] ss:$8 sps:$4 sm:$0xff]  }
 0x35a   :  { %1877 = vmatprep.mubr.bf16.mxu1 %v17505_v42  ;;  %v17539_v42 = vld [vmem:[%s23267_s7 + $0x2d0] ss:$8 sps:$4 sm:$0xff]  }
 0x361   :  { %1878 = vmatmul.mubr.bf16.gmra.mrb[172].mxu1 %v17507_v18  ;;  %v17540_v18 = vld [vmem:[%s23267_s7 + $0x2e4] ss:$8 sps:$4 sm:$0xff]  }
 0x362   :  { %1885 = vmatprep.mubr.bf16.mxu1 %v17508_v4  ;;  %v17542_v4 = vld [vmem:[%s23267_s7 + $0x2e0] ss:$8 sps:$4 sm:$0xff]  }
 0x369   :  { %1886 = vmatmul.mubr.bf16.gmra.mrb[176].mxu1 %v17510_v60  ;;  %v17543_v60 = vld [vmem:[%s23267_s7 + $0x2f4] ss:$8 sps:$4 sm:$0xff]  }
 0x36a   :  { %1893 = vmatprep.mubr.bf16.mxu1 %v17512_v50  ;;  %v17545_v50 = vld [vmem:[%s23267_s7 + $0x2f0] ss:$8 sps:$4 sm:$0xff]  }
 0x371   :  { %1894 = vmatmul.mubr.bf16.gmra.mrb[180].mxu1 %v17514_v37  ;;  %v17547_v37 = vld [vmem:[%s23265_s8 + $0x48] sm:$0xff]  }
 0x372   :  { %1901 = vmatprep.mubr.bf16.mxu1 %v17515_v55 }
 0x379   :  { %1902 = vmatmul.mubr.bf16.gmra.mrb[184].mxu1 %v17517_v47 }
 0x37a   :  { %1909 = vmatprep.mubr.bf16.mxu1 %v17518_v32 }
 0x381   :  { %1910 = vmatmul.mubr.bf16.gmra.mrb[188].mxu1 %v17520_v51 }
 0x382   :  { %1917 = vmatprep.mubr.bf16.mxu1 %v17521_v62 }
 0x389   :  { %1918 = vmatmul.mubr.bf16.gmra.mrb[192].mxu1 %v17523_v59 }
 0x38a   :  { %1925 = vmatprep.mubr.bf16.mxu1 %v17524_v15 }
 0x391   :  { %1926 = vmatmul.mubr.bf16.gmra.mrb[196].mxu1 %v17526_v21 }
 0x392   :  { %1933 = vmatprep.mubr.bf16.mxu1 %v17528_v52 }
 0x399   :  { %1934 = vmatmul.mubr.bf16.gmra.mrb[200].mxu1 %v17530_v5 }
 0x39a   :  { %1941 = vmatprep.mubr.bf16.mxu1 %v17531_v13 }
 0x3a1   :  { %1942 = vmatmul.mubr.bf16.gmra.mrb[204].mxu1 %v17533_v45 }
 0x3a2   :  { %1949 = vmatprep.mubr.bf16.mxu1 %v17534_v39 }
 0x3a9   :  { %1950 = vmatmul.mubr.bf16.gmra.mrb[208].mxu1 %v17536_v3 }
 0x3aa   :  { %1957 = vmatprep.mubr.bf16.mxu1 %v17537_v14 }
 0x3b1   :  { %1958 = vmatmul.mubr.bf16.gmra.mrb[212].mxu1 %v17539_v42 }
 0x3b2   :  { %1965 = vmatprep.mubr.bf16.mxu1 %v17540_v18 }
 0x3b9   :  { %1966 = vmatmul.mubr.bf16.gmra.mrb[216].mxu1 %v17542_v4 }
 0x3ba   :  { %1973 = vmatprep.mubr.bf16.mxu1 %v17543_v60 }
 0x3c1   :  { %1974 = vmatmul.mubr.bf16.gmra.mrb[220].mxu1 %v17545_v50 }
 0x3c2   :  { %15685 = vmatprep.mubr.msk.bf16.mxu1 %vm243_vm0, %v18691_v11 }
 0x3c9   :  { %15686 = vmatmul.mubr.msk.bf16.vlgmr.msra.gmra.mrb[224].mxu1 %vm243_vm0, %v18702_v22 }
 0x3ca   :  { %15689 = vmatprep.mubr.msk.bf16.mxu1 %vm243_vm0, %v18709_v24  ;;  %15694 = vmatpush3.bf16.msra.mxu1 %v17546_v30 }
 0x3cb   :  { %15695 = vmatprep.subr.bf16.mxu1 %v17547_v37 }
 0x3ce   :  { %15696 = vmatpush3.bf16.msra.mxu1 %v17547_v37 }
 0x3d1   :  { %15690 = vmatmul.mubr.msk.bf16.gmra.mrb[228].mxu1 %vm243_vm0, %v18720_v38 }
 0x3d2   :  { %15697 = vmatprep.mubr.msk.bf16.mxu1 %vm243_vm0, %v18583_v20  ;;  %v15663_v20 = vpop.f32.mrb[64].mxu0 }
 0x3d9   :  { %15698 = vmatmul.mubr.msk.bf16.vlgmr.msra.gmra.mrb[232].mxu1 %vm243_vm0, %v18594_v27  ;;  %v2065_v27 = vpop.f32.mrb[65].mxu0 }
 0x3da   :  { %15701 = vmatprep.mubr.msk.bf16.mxu1 %vm243_vm0, %v18601_v28  ;;  %v15664_v28 = vpop.f32.mrb[66].mxu0 }
 0x3e1   :  { %15702 = vmatmul.mubr.msk.bf16.gmra.mrb[236].mxu1 %vm243_vm0, %v18612_v35  ;;  %v2068_v35 = vpop.f32.mrb[67].mxu0 }
 0x3e2   :  { %15705 = vmatprep.mubr.msk.bf16.mxu1 %vm243_vm0, %v18619_v36  ;;  %v2226_v36 = vpack.c.bf16 %v15664_v28, %v15663_v20 }
 0x3e9   :  { %15706 = vmatmul.mubr.msk.bf16.gmra.mrb[240].mxu1 %vm243_vm0, %v18630_v43  ;;  %v15667_v43 = vpop.f32.mrb[68].mxu0 }
 0x3ea   :  { %15709 = vmatprep.mubr.msk.bf16.mxu1 %vm243_vm0, %v18637_v44  ;;  %v2081_v44 = vpop.f32.mrb[69].mxu0 }
 0x3f1   :  { %15710 = vmatmul.mubr.msk.bf16.gmra.mrb[244].mxu1 %vm243_vm0, %v18648_v53  ;;  %v2225_v53 = vpack.c.bf16 %v2068_v35, %v2065_v27 }
 0x3f2   :  { %15713 = vmatprep.mubr.msk.bf16.mxu1 %vm243_vm0, %v18655_v54  ;;  %v15668_v54 = vpop.f32.mrb[70].mxu0 }
 0x3f3   :  { %v2228_v30 = vpack.c.bf16 %v15668_v54, %v15667_v43 }
 0x3f9   :  { %15714 = vmatmul.mubr.msk.bf16.gmra.mrb[248].mxu1 %vm243_vm0, %v18666_v63  ;;  %v2084_v63 = vpop.f32.mrb[71].mxu0 }
 0x3fa   :  { %15717 = vmatprep.mubr.msk.bf16.mxu1 %vm243_vm0, %v18673_v1  ;;  %v2227_v55 = vpack.c.bf16 %v2084_v63, %v2081_v44  ;;  %v19104_v47 = vpop.f32.mrb[72].mxu0 }
 0x3fb   :  { %v19106_v1 = vpop.f32.mrb[73].mxu0 }
 0x3fc   :  { %v19108_v32 = vpop.f32.mrb[74].mxu0 }
 0x3fd   :  { %v19110_v51 = vpop.f32.mrb[75].mxu0 }
 0x3fe   :  { %v19114_v62 = vpop.f32.mrb[76].mxu0  ;;  %v2229_v59 = vpack.c.bf16 %v19110_v51, %v19106_v1 }
 0x401   :  { %15718 = vmatmul.mubr.msk.bf16.gmra.mrb[252].mxu1 %vm243_vm0, %v18684_v10  ;;  %v2230_v10 = vpack.c.bf16 %v19108_v32, %v19104_v47  ;;  %v17551_v32 = vld [vmem:[%s23267_s7 + $0x314] ss:$8 sps:$4 sm:$0xff]  }
 0x402   :  { %15721 = vmatprep.mubr.msk.bf16.mxu1 %vm243_vm0, %v18691_v11  ;;  %v19118_v11 = vpop.f32.mrb[77].mxu0 }
 0x403   :  { %v19124_v15 = vpop.f32.mrb[78].mxu0 }
 0x404   :  { %v2232_v21 = vpack.c.bf16 %v19124_v15, %v19114_v62  ;;  %v19128_v52 = vpop.f32.mrb[79].mxu0  ;;  %v17554_v15 = vld [vmem:[%s23267_s7 + $0x324] ss:$8 sps:$4 sm:$0xff]  }
 0x405   :  { %v2231_v5 = vpack.c.bf16 %v19128_v52, %v19118_v11  ;;  %v15679_v13 = vpop.f32.mrb[80].mxu0 }
 0x409   :  { %15722 = vmatmul.mubr.msk.bf16.gmra.mrb[0].mxu1 %vm243_vm0, %v18702_v22  ;;  %v2129_v22 = vpop.f32.mrb[81].mxu0 }
 0x40a   :  { %15725 = vmatprep.mubr.msk.bf16.mxu1 %vm243_vm0, %v18709_v24  ;;  %v15680_v45 = vpop.f32.mrb[82].mxu0 }
 0x40b   :  { %v2234_v39 = vpack.c.bf16 %v15680_v45, %v15679_v13  ;;  %v2132_v3 = vpop.f32.mrb[83].mxu0 }
 0x40c   :  { %v2233_v14 = vpack.c.bf16 %v2132_v3, %v2129_v22  ;;  %v15683_v24 = vpop.f32.mrb[84].mxu0 }
 0x40d   :  { %v2145_v42 = vpop.f32.mrb[85].mxu0 }
 0x40e   :  { %14529 = vmatprep.subr.bf16.mxu0 %v2233_v14  ;;  %v15684_v18 = vpop.f32.mrb[86].mxu0 }
 0x40f   :  { %14530 = vmatpush3.bf16.msra.mxu0 %v2225_v53  ;;  %v2236_v4 = vpack.c.bf16 %v15684_v18, %v15683_v24  ;;  %v2148_v60 = vpop.f32.mrb[87].mxu0 }
 0x410   :  { %14531 = vmatprep.subr.bf16.mxu0 %v2234_v39  ;;  %v2235_v50 = vpack.c.bf16 %v2148_v60, %v2145_v42 }
 0x411   :  { %15726 = vmatmul.mubr.msk.bf16.gmra.mrb[4].mxu1 %vm243_vm0, %v18720_v38  ;;  %vm9782_vm0 = vcmask 113664  }
 0x413   :  { %14532 = vmatpush3.bf16.msra.mxu0 %v2226_v36 }
 0x414   :  { %14533 = vmatprep.subr.bf16.mxu0 %v2235_v50 }
 0x417   :  { %14534 = vmatpush3.bf16.msra.mxu0 %v2227_v55 }
 0x418   :  { %14535 = vmatprep.subr.bf16.mxu0 %v2236_v4 }
 0x41b   :  { %14536 = vmatpush3.bf16.msra.mxu0 %v2228_v30 }
 0x41c   :  { %v14415_v37 = vpop.f32.mrb[160].mxu1 }
 0x41d   :  { %v14416_v20 = vpop.f32.mrb[161].mxu1 }
 0x41e   :  { %v14417_v27 = vadd.f32 %v14416_v20, %v14415_v37  ;;  %v14418_v28 = vpop.f32.mrb[162].mxu1 }
 0x41f   :  { %v14419_v35 = vpop.f32.mrb[163].mxu1 }
 0x420   :  { %v19135_v38 = vadd.f32 %v14417_v27, %v18744_v57  ;;  %v14420_v43 = vadd.f32 %v14419_v35, %v14418_v28 }
 0x422   :  { %v19138_v44 = vadd.f32 %v14420_v43, %v18746_v2  ;;  %v17550_v2 = vld [vmem:[%s23267_s7 + $0x304] ss:$8 sps:$4 sm:$0xff]  }
 0x423   :  { %2433 = vmatprep.mubr.bf16.mxu0 %v17550_v2 }
 0x424   :  { %v14421_v53 = vpop.f32.mrb[164].mxu1 }
 0x425   :  { %v14422_v54 = vpop.f32.mrb[165].mxu1 }
 0x426   :  { %v14423_v36 = vadd.f32 %v14422_v54, %v14421_v53  ;;  %v14424_v63 = vpop.f32.mrb[166].mxu1 }
 0x427   :  { %v14425_v13 = vpop.f32.mrb[167].mxu1 }
 0x428   :  { %v19141_v55 = vadd.f32 %v14423_v36, %v18756_v33  ;;  %v14426_v22 = vadd.f32 %v14425_v13, %v14424_v63 }
 0x42a   :  { %v19144_v45 = vadd.f32 %v14426_v22, %v18758_v41 }
 0x42c   :  { %v14427_v30 = vpop.f32.mrb[168].mxu1 }
 0x42d   :  { %v14428_v39 = vpop.f32.mrb[169].mxu1 }
 0x42e   :  { %v14429_v57 = vadd.f32 %v14428_v39, %v14427_v30  ;;  %v14430_v3 = vpop.f32.mrb[170].mxu1 }
 0x42f   :  { %v14431_v14 = vpop.f32.mrb[171].mxu1 }
 0x430   :  { %v19150_v24 = vadd.f32 %v14429_v57, %v18768_v48  ;;  %v14432_v42 = vadd.f32 %v14431_v14, %v14430_v3 }
 0x432   :  { %v19153_v33 = vadd.f32 %v14432_v42, %v18770_v25 }
 0x434   :  { %v14433_v18 = vpop.f32.mrb[172].mxu1 }
 0x435   :  { %v14434_v41 = vpop.f32.mrb[173].mxu1 }
 0x436   :  { %v14435_v4 = vadd.f32 %v14434_v41, %v14433_v18  ;;  %v14436_v60 = vpop.f32.mrb[174].mxu1 }
 0x437   :  { %v14437_v50 = vpop.f32.mrb[175].mxu1 }
 0x438   :  { %v19156_v37 = vadd.f32 %v14435_v4, %v18780_v56  ;;  %v14438_v20 = vadd.f32 %v14437_v50, %v14436_v60 }
 0x43a   :  { %v19159_v27 = vadd.f32 %v14438_v20, %v18782_v6 }
 0x43c   :  { %v14439_v28 = vpop.f32.mrb[176].mxu1 }
 0x43d   :  { %v14440_v48 = vpop.f32.mrb[177].mxu1 }
 0x43e   :  { %v14441_v35 = vadd.f32 %v14440_v48, %v14439_v28  ;;  %v14442_v43 = vpop.f32.mrb[178].mxu1 }
 0x43f   :  { %v14443_v53 = vpop.f32.mrb[179].mxu1 }
 0x440   :  { %v19162_v25 = vadd.f32 %v14441_v35, %v18792_v0  ;;  %v14444_v54 = vadd.f32 %v14443_v53, %v14442_v43 }
 0x442   :  { %v19165_v36 = vadd.f32 %v14444_v54, %v18794_v46 }
 0x444   :  { %v14445_v63 = vpop.f32.mrb[180].mxu1 }
 0x445   :  { %v14446_v13 = vpop.f32.mrb[181].mxu1 }
 0x446   :  { %v14447_v56 = vadd.f32 %v14446_v13, %v14445_v63  ;;  %v14448_v22 = vpop.f32.mrb[182].mxu1 }
 0x447   :  { %v14449_v30 = vpop.f32.mrb[183].mxu1 }
 0x448   :  { %v19168_v6 = vadd.f32 %v14447_v56, %v18804_v8  ;;  %v14450_v39 = vadd.f32 %v14449_v30, %v14448_v22 }
 0x44a   :  { %v19171_v57 = vadd.f32 %v14450_v39, %v18806_v29 }
 0x44c   :  { %v14451_v3 = vpop.f32.mrb[184].mxu1 }
 0x44d   :  { %v14452_v14 = vpop.f32.mrb[185].mxu1 }
 0x44e   :  { %v14453_v0 = vadd.f32 %v14452_v14, %v14451_v3  ;;  %v14454_v2 = vpop.f32.mrb[186].mxu1 }
 0x44f   :  { %v14455_v42 = vpop.f32.mrb[187].mxu1 }
 0x450   :  { %v19174_v46 = vadd.f32 %v14453_v0, %v18816_v16  ;;  %v14456_v18 = vadd.f32 %v14455_v42, %v14454_v2 }
 0x452   :  { %v19177_v41 = vadd.f32 %v14456_v18, %v18818_v7 }
 0x454   :  { %v14457_v4 = vpop.f32.mrb[188].mxu1 }
 0x455   :  { %v14458_v60 = vpop.f32.mrb[189].mxu1 }
 0x456   :  { %v14459_v8 = vadd.f32 %v14458_v60, %v14457_v4  ;;  %v14460_v50 = vpop.f32.mrb[190].mxu1  ;;  %v17576_v60 = vld [vmem:[%s23267_s7 + $0x404] ss:$8 sps:$4 sm:$0xff]  }
 0x457   :  { %v14461_v20 = vpop.f32.mrb[191].mxu1  ;;  %3013 = vmatprep.mubr.bf16.mxu1 %v17576_v60 }
 0x458   :  { %v19180_v29 = vadd.f32 %v14459_v8, %v18828_v23  ;;  %v14462_v28 = vadd.f32 %v14461_v20, %v14460_v50 }
 0x45a   :  { %v19183_v48 = vadd.f32 %v14462_v28, %v18830_v49 }
 0x45c   :  { %v14463_v35 = vpop.f32.mrb[192].mxu1 }
 0x45d   :  { %v14464_v43 = vpop.f32.mrb[193].mxu1 }
 0x45e   :  { %v14465_v16 = vadd.f32 %v14464_v43, %v14463_v35  ;;  %v14466_v53 = vpop.f32.mrb[194].mxu1 }
 0x45f   :  { %v14467_v54 = vpop.f32.mrb[195].mxu1 }
 0x460   :  { %v19186_v7 = vadd.f32 %v14465_v16, %v18843_v17  ;;  %v14468_v63 = vadd.f32 %v14467_v54, %v14466_v53 }
 0x462   :  { %v19189_v13 = vadd.f32 %v14468_v63, %v18845_v12 }
 0x464   :  { %v14469_v56 = vpop.f32.mrb[196].mxu1 }
 0x465   :  { %v14470_v22 = vpop.f32.mrb[197].mxu1 }
 0x466   :  { %v14471_v23 = vadd.f32 %v14470_v22, %v14469_v56  ;;  %v14472_v30 = vpop.f32.mrb[198].mxu1 }
 0x467   :  { %v14473_v39 = vpop.f32.mrb[199].mxu1 }
 0x468   :  { %v19192_v49 = vadd.f32 %v14471_v23, %v18855_v61  ;;  %v14474_v3 = vadd.f32 %v14473_v39, %v14472_v30  ;;  %v23276_v30 = vld [vmem:[#allocation3_spill] sm:$0xff] }
 0x46a   :  { %v19195_v14 = vadd.f32 %v14474_v3, %v18857_v19 }
 0x46c   :  { %v14475_v0 = vpop.f32.mrb[200].mxu1 }
 0x46d   :  { %v14476_v2 = vpop.f32.mrb[201].mxu1 }
 0x46e   :  { %v14477_v17 = vadd.f32 %v14476_v2, %v14475_v0  ;;  %v14478_v42 = vpop.f32.mrb[202].mxu1 }
 0x46f   :  { %v14479_v18 = vpop.f32.mrb[203].mxu1 }
 0x470   :  { %v19198_v12 = vadd.f32 %v14477_v17, %v18867_v40  ;;  %v14480_v4 = vadd.f32 %v14479_v18, %v14478_v42  ;;  %v23277_v42 = vld [vmem:[#allocation4_spill] sm:$0xff] }
 0x472   :  { %v19204_v61 = vadd.f32 %v14480_v4, %v18869_v26  ;;  %v23275_v26 = vld [vmem:[#allocation2_spill] sm:$0xff]  ;;  %v23278_v4 = vld [vmem:[#allocation5_spill] sm:$0xff] }
 0x474   :  { %v14481_v8 = vpop.f32.mrb[204].mxu1 }
 0x475   :  { %v14482_v19 = vpop.f32.mrb[205].mxu1 }
 0x476   :  { %v14483_v50 = vadd.f32 %v14482_v19, %v14481_v8  ;;  %v14484_v20 = vpop.f32.mrb[206].mxu1 }
 0x477   :  { %v14485_v28 = vpop.f32.mrb[207].mxu1 }
 0x478   :  { %v19207_v35 = vadd.f32 %v14483_v50, %v18879_v58  ;;  %v14486_v43 = vadd.f32 %v14485_v28, %v14484_v20 }
 0x47a   :  { %v19210_v40 = vadd.f32 %v14486_v43, %v18881_v34 }
 0x47c   :  { %v14487_v16 = vpop.f32.mrb[208].mxu1 }
 0x47d   :  { %v14488_v53 = vpop.f32.mrb[209].mxu1 }
 0x47e   :  { %v14489_v54 = vadd.f32 %v14488_v53, %v14487_v16  ;;  %v14490_v63 = vpop.f32.mrb[210].mxu1  ;;  %v23279_v16 = vld [vmem:[#allocation6_spill] sm:$0xff] }
 0x47f   :  { %v14491_v56 = vpop.f32.mrb[211].mxu1 }
 0x480   :  { %v19213_v22 = vadd.f32 %v14489_v54, %v23275_v26  ;;  %v14492_v23 = vadd.f32 %v14491_v56, %v14490_v63  ;;  %v23280_v54 = vld [vmem:[#allocation7_spill] sm:$0xff] }
 0x482   :  { %v19216_v39 = vadd.f32 %v14492_v23, %v23276_v30 }
 0x484   :  { %v14493_v3 = vpop.f32.mrb[212].mxu1 }
 0x485   :  { %v14494_v0 = vpop.f32.mrb[213].mxu1 }
 0x486   :  { %v14495_v58 = vadd.f32 %v14494_v0, %v14493_v3  ;;  %v14496_v2 = vpop.f32.mrb[214].mxu1 }
 0x487   :  { %v14497_v17 = vpop.f32.mrb[215].mxu1 }
 0x488   :  { %v19219_v34 = vadd.f32 %v14495_v58, %v23277_v42  ;;  %v14498_v18 = vadd.f32 %v14497_v17, %v14496_v2 }
 0x48a   :  { %v19222_v60 = vadd.f32 %v14498_v18, %v23278_v4 }
 0x48c   :  { %v14499_v8 = vpop.f32.mrb[216].mxu1 }
 0x48d   :  { %v14500_v19 = vpop.f32.mrb[217].mxu1 }
 0x48e   :  { %v14501_v50 = vadd.f32 %v14500_v19, %v14499_v8  ;;  %v14502_v20 = vpop.f32.mrb[218].mxu1 }
 0x48f   :  { %v14503_v28 = vpop.f32.mrb[219].mxu1 }
 0x490   :  { %v14504_v43 = vadd.f32 %v14503_v28, %v14502_v20  ;;  %v19225_v53 = vadd.f32 %v14501_v50, %v23279_v16 }
 0x492   :  { %v19228_v63 = vadd.f32 %v14504_v43, %v23280_v54 }
 0x494   :  { %v14505_v56 = vpop.f32.mrb[220].mxu1 }
 0x495   :  { %v14506_v26 = vpop.f32.mrb[221].mxu1 }
 0x496   :  { %v14507_v23 = vadd.f32 %v14506_v26, %v14505_v56  ;;  %v14508_v30 = vpop.f32.mrb[222].mxu1  ;;  %v17553_v56 = vld [vmem:[%s23267_s7 + $0x310] ss:$8 sps:$4 sm:$0xff]  }
 0x497   :  { %v14509_v3 = vpop.f32.mrb[223].mxu1 }
 0x498   :  { %v14510_v0 = vadd.f32 %v14509_v3, %v14508_v30  ;;  %v19231_v58 = vadd.f32 %v14507_v23, %v18934_v9 }
 0x49a   :  { %v19234_v2 = vadd.f32 %v14510_v0, %v18936_v31  ;;  %v17556_v0 = vld [vmem:[%s23267_s7 + $0x320] ss:$8 sps:$4 sm:$0xff]  }
 0x49c   :  { %v15687_v17 = vpop.f32.mrb[224].mxu1 }
 0x49d   :  { %v2161_v42 = vpop.f32.mrb[225].mxu1 }
 0x49e   :  { %v15688_v18 = vpop.f32.mrb[226].mxu1 }
 0x49f   :  { %v2164_v4 = vpop.f32.mrb[227].mxu1  ;;  %v2238_v8 = vpack.c.bf16 %v15688_v18, %v15687_v17  ;;  %v17557_v18 = vld [vmem:[%s23267_s7 + $0x334] ss:$8 sps:$4 sm:$0xff]  }
 0x4a0   :  { %v2237_v19 = vpack.c.bf16 %v2164_v4, %v2161_v42 }
 0x4a2   :  { %14537 = vmatprep.subr.bf16.mxu0 %v2237_v19 }
 0x4a3   :  { %14538 = vmatpush3.bf16.msra.mxu0 %v2229_v59  ;;  %v17548_v59 = vld [vmem:[%s23267_s7 + $0x300] ss:$8 sps:$4 sm:$0xff]  }
 0x4a4   :  { %v15691_v50 = vpop.f32.mrb[228].mxu1  ;;  %14539 = vmatprep.subr.bf16.mxu0 %v2238_v8 }
 0x4a5   :  { %v2177_v20 = vpop.f32.mrb[229].mxu1 }
 0x4a6   :  { %v15692_v28 = vpop.f32.mrb[230].mxu1 }
 0x4a7   :  { %v2180_v9 = vpop.f32.mrb[231].mxu1  ;;  %14540 = vmatpush3.bf16.msra.mxu0 %v2230_v10  ;;  %v2240_v31 = vpack.c.bf16 %v15692_v28, %v15691_v50 }
 0x4a8   :  { %v2239_v43 = vpack.c.bf16 %v2180_v9, %v2177_v20  ;;  %v17559_v20 = vld [vmem:[%s23267_s7 + $0x330] ss:$8 sps:$4 sm:$0xff]  }
 0x4aa   :  { %14541 = vmatprep.subr.bf16.mxu0 %v2239_v43 }
 0x4ab   :  { %14542 = vmatpush3.bf16.msra.mxu0 %v2231_v5 }
 0x4ac   :  { %14543 = vmatprep.subr.bf16.mxu0 %v2240_v31  ;;  %v15699_v16 = vpop.f32.mrb[232].mxu1  ;;  %v17560_v31 = vld [vmem:[%s23267_s7 + $0x344] ss:$8 sps:$4 sm:$0xff]  }
 0x4ad   :  { %v2645_v1 = vpop.f32.mrb[233].mxu1 }
 0x4ae   :  { %v15700_v51 = vpop.f32.mrb[234].mxu1 }
 0x4af   :  { %v2806_v54 = vpack.c.bf16 %v15700_v51, %v15699_v16  ;;  %14544 = vmatpush3.bf16.msra.mxu0 %v2232_v21  ;;  %v2648_v47 = vpop.f32.mrb[235].mxu1 }
 0x4b0   :  { %v2805_v10 = vpack.c.bf16 %v2648_v47, %v2645_v1 }
 0x4b2   :  { %2434 = vmatmul.mubr.bf16.vlgmr.msra.gmra.mrb[88].mxu0 %v17548_v59  ;;  %v17562_v59 = vld [vmem:[%s23267_s7 + $0x340] ss:$8 sps:$4 sm:$0xff]  }
 0x4b3   :  { %2441 = vmatprep.mubr.bf16.mxu0 %v17551_v32 }
 0x4b4   :  { %v19254_v11 = vpop.f32.mrb[236].mxu1 }
 0x4b5   :  { %v2661_v52 = vpop.f32.mrb[237].mxu1 }
 0x4b6   :  { %v15704_v5 = vpop.f32.mrb[238].mxu1 }
 0x4b7   :  { %v2808_v26 = vpack.c.bf16 %v15704_v5, %v19254_v11  ;;  %v2664_v62 = vpop.f32.mrb[239].mxu1  ;;  %v17563_v11 = vld [vmem:[%s23267_s7 + $0x354] ss:$8 sps:$4 sm:$0xff]  }
 0x4b8   :  { %v2807_v21 = vpack.c.bf16 %v2664_v62, %v2661_v52 }
 0x4ba   :  { %2442 = vmatmul.mubr.bf16.gmra.mrb[92].mxu0 %v17553_v56 }
 0x4bb   :  { %2449 = vmatprep.mubr.bf16.mxu0 %v17554_v15  ;;  %v17565_v15 = vld [vmem:[%s23267_s7 + $0x350] ss:$8 sps:$4 sm:$0xff]  }
 0x4bc   :  { %v19263_v23 = vpop.f32.mrb[240].mxu1 }
 0x4bd   :  { %v2677_v30 = vpop.f32.mrb[241].mxu1 }
 0x4be   :  { %v19265_v3 = vpop.f32.mrb[242].mxu1 }
 0x4bf   :  { %v2810_v17 = vpack.c.bf16 %v19265_v3, %v19263_v23  ;;  %v2680_v42 = vpop.f32.mrb[243].mxu1  ;;  %v17566_v3 = vld [vmem:[%s23267_s7 + $0x364] ss:$8 sps:$4 sm:$0xff]  }
 0x4c0   :  { %v2809_v4 = vpack.c.bf16 %v2680_v42, %v2677_v30 }
 0x4c2   :  { %2450 = vmatmul.mubr.bf16.gmra.mrb[96].mxu0 %v17556_v0 }
 0x4c3   :  { %2457 = vmatprep.mubr.bf16.mxu0 %v17557_v18 }
 0x4c4   :  { %v19275_v8 = vpop.f32.mrb[244].mxu1 }
 0x4c5   :  { %v2693_v19 = vpop.f32.mrb[245].mxu1 }
 0x4c6   :  { %v19277_v50 = vpop.f32.mrb[246].mxu1 }
 0x4c7   :  { %v2812_v28 = vpack.c.bf16 %v19277_v50, %v19275_v8  ;;  %v2696_v9 = vpop.f32.mrb[247].mxu1  ;;  %v17568_v8 = vld [vmem:[%s23267_s7 + $0x360] ss:$8 sps:$4 sm:$0xff]  }
 0x4c8   :  { %v2811_v43 = vpack.c.bf16 %v2696_v9, %v2693_v19 }
 0x4ca   :  { %2458 = vmatmul.mubr.bf16.gmra.mrb[100].mxu0 %v17559_v20 }
 0x4cb   :  { %2465 = vmatprep.mubr.bf16.mxu0 %v17560_v31 }
 0x4cc   :  { %v15715_v16 = vpop.f32.mrb[248].mxu1 }
 0x4cd   :  { %v2709_v1 = vpop.f32.mrb[249].mxu1 }
 0x4ce   :  { %v15716_v51 = vpop.f32.mrb[250].mxu1 }
 0x4cf   :  { %v2814_v47 = vpack.c.bf16 %v15716_v51, %v15715_v16  ;;  %v2712_v32 = vpop.f32.mrb[251].mxu1  ;;  %v17571_v16 = vld [vmem:[%s23267_s7 + $0x370] ss:$8 sps:$4 sm:$0xff]  }
 0x4d0   :  { %v2813_v52 = vpack.c.bf16 %v2712_v32, %v2709_v1  ;;  %v17582_v32 = vld [vmem:[%s23267_s7 + $0x414] ss:$8 sps:$4 sm:$0xff]  }
 0x4d2   :  { %2466 = vmatmul.mubr.bf16.gmra.mrb[104].mxu0 %v17562_v59  ;;  %14659 = vmatprep.subr.bf16.mxu1 %v2813_v52  ;;  %v17588_v52 = vld [vmem:[%s23267_s7 + $0x424] ss:$8 sps:$4 sm:$0xff]  }
 0x4d3   :  { %14660 = vmatpush3.bf16.msra.mxu1 %v2805_v10  ;;  %2473 = vmatprep.mubr.bf16.mxu0 %v17563_v11  ;;  %v17584_v11 = vld [vmem:[%s23267_s7 + $0x3a4] ss:$8 sps:$4 sm:$0xff]  }
 0x4d4   :  { %v15719_v5 = vpop.f32.mrb[252].mxu1  ;;  %14661 = vmatprep.subr.bf16.mxu1 %v2814_v47  ;;  %v17577_v47 = vld [vmem:[%s23267_s7 + $0x380] ss:$8 sps:$4 sm:$0xff]  }
 0x4d5   :  { %v2725_v56 = vpop.f32.mrb[253].mxu1 }
 0x4d6   :  { %v15720_v62 = vpop.f32.mrb[254].mxu1 }
 0x4d7   :  { %v2816_v23 = vpack.c.bf16 %v15720_v62, %v15719_v5  ;;  %v2728_v30 = vpop.f32.mrb[255].mxu1  ;;  %14662 = vmatpush3.bf16.msra.mxu1 %v2806_v54  ;;  %v17569_v54 = vld [vmem:[%s23267_s7 + $0x374] ss:$8 sps:$4 sm:$0xff]   ;;  %v17586_v5 = vld [vmem:[%s23267_s7 + $0x420] ss:$8 sps:$4 sm:$0xff]  }
 0x4d8   :  { %v2815_v0 = vpack.c.bf16 %v2728_v30, %v2725_v56  ;;  %v17589_v56 = vld [vmem:[%s23267_s7 + $0x3a0] ss:$8 sps:$4 sm:$0xff]   ;;  %v17590_v62 = vld [vmem:[%s23267_s7 + $0x3b4] ss:$8 sps:$4 sm:$0xff]   ;;  %v17595_v30 = vld [vmem:[%s23267_s7 + $0x3b0] ss:$8 sps:$4 sm:$0xff]  }
 0x4da   :  { %2474 = vmatmul.mubr.bf16.gmra.mrb[108].mxu0 %v17565_v15  ;;  %14663 = vmatprep.subr.bf16.mxu1 %v2815_v0  ;;  %v17594_v15 = vld [vmem:[%s23267_s7 + $0x434] ss:$8 sps:$4 sm:$0xff]   ;;  %v17600_v0 = vld [vmem:[%s23267_s7 + $0x444] ss:$8 sps:$4 sm:$0xff]  }
 0x4db   :  { %14664 = vmatpush3.bf16.msra.mxu1 %v2807_v21  ;;  %2481 = vmatprep.mubr.bf16.mxu0 %v17566_v3  ;;  %v17596_v3 = vld [vmem:[%s23267_s7 + $0x3c4] ss:$8 sps:$4 sm:$0xff]  }
 0x4dc   :  { %v15723_v10 = vpop.f32.mrb[0].mxu1  ;;  %14665 = vmatprep.subr.bf16.mxu1 %v2816_v23  ;;  %v17592_v23 = vld [vmem:[%s23267_s7 + $0x430] ss:$8 sps:$4 sm:$0xff]  }
 0x4dd   :  { %v2741_v42 = vpop.f32.mrb[1].mxu1 }
 0x4de   :  { %v15724_v18 = vpop.f32.mrb[2].mxu1 }
 0x4df   :  { %v2818_v19 = vpack.c.bf16 %v15724_v18, %v15723_v10  ;;  %v2744_v50 = vpop.f32.mrb[3].mxu1  ;;  %14666 = vmatpush3.bf16.msra.mxu1 %v2808_v26  ;;  %v17572_v26 = vld [vmem:[%s23267_s7 + $0x384] ss:$8 sps:$4 sm:$0xff]   ;;  %v17598_v10 = vld [vmem:[%s23267_s7 + $0x440] ss:$8 sps:$4 sm:$0xff]  }
 0x4e0   :  { %v2817_v20 = vpack.c.bf16 %v2744_v50, %v2741_v42  ;;  %v17601_v42 = vld [vmem:[%s23267_s7 + $0x3c0] ss:$8 sps:$4 sm:$0xff]   ;;  %v17602_v18 = vld [vmem:[%s23267_s7 + $0x3d4] ss:$8 sps:$4 sm:$0xff]   ;;  %v17607_v50 = vld [vmem:[%s23267_s7 + $0x3d0] ss:$8 sps:$4 sm:$0xff]  }
 0x4e2   :  { %2482 = vmatmul.mubr.bf16.gmra.mrb[112].mxu0 %v17568_v8  ;;  %14667 = vmatprep.subr.bf16.mxu1 %v2817_v20  ;;  %v17606_v8 = vld [vmem:[%s23267_s7 + $0x454] ss:$8 sps:$4 sm:$0xff]   ;;  %v17612_v20 = vld [vmem:[%s23267_s7 + $0x464] ss:$8 sps:$4 sm:$0xff]  }
 0x4e3   :  { %14668 = vmatpush3.bf16.msra.mxu1 %v2809_v4  ;;  %2489 = vmatprep.mubr.bf16.mxu0 %v17569_v54  ;;  %v17574_v4 = vld [vmem:[%s23267_s7 + $0x400] ss:$8 sps:$4 sm:$0xff]   ;;  %v17608_v54 = vld [vmem:[%s23267_s7 + $0x3e4] ss:$8 sps:$4 sm:$0xff]  }
 0x4e4   :  { %v15727_v21 = vpop.f32.mrb[4].mxu1  ;;  %14669 = vmatprep.subr.bf16.mxu1 %v2818_v19  ;;  %v17604_v19 = vld [vmem:[%s23267_s7 + $0x450] ss:$8 sps:$4 sm:$0xff]  }
 0x4e5   :  { %v2757_v9 = vpop.f32.mrb[5].mxu1 }
 0x4e6   :  { %v15728_v31 = vpop.f32.mrb[6].mxu1 }
 0x4e7   :  { %v2820_v1 = vpack.c.bf16 %v15728_v31, %v15727_v21  ;;  %v2760_v51 = vpop.f32.mrb[7].mxu1  ;;  %14670 = vmatpush3.bf16.msra.mxu1 %v2810_v17  ;;  %v17578_v17 = vld [vmem:[%s23267_s7 + $0x394] ss:$8 sps:$4 sm:$0xff]   ;;  %v17610_v21 = vld [vmem:[%s23267_s7 + $0x460] ss:$8 sps:$4 sm:$0xff]  }
 0x4e8   :  { %v2819_v59 = vpack.c.bf16 %v2760_v51, %v2757_v9  ;;  %v17613_v9 = vld [vmem:[%s23267_s7 + $0x3e0] ss:$8 sps:$4 sm:$0xff]   ;;  %v17614_v31 = vld [vmem:[%s23267_s7 + $0x3f4] ss:$8 sps:$4 sm:$0xff]   ;;  %v17619_v51 = vld [vmem:[%s23267_s7 + $0x3f0] ss:$8 sps:$4 sm:$0xff]  }
 0x4ea   :  { %2490 = vmatmul.mubr.bf16.gmra.mrb[116].mxu0 %v17571_v16  ;;  %14671 = vmatprep.subr.bf16.mxu1 %v2819_v59  ;;  %v17618_v16 = vld [vmem:[%s23267_s7 + $0x474] ss:$8 sps:$4 sm:$0xff]   ;;  %v17620_v59 = vld [vmem:[%s23267_s7 + $0x480] ss:$8 sps:$4 sm:$0xff]  }
 0x4eb   :  { %14672 = vmatpush3.bf16.msra.mxu1 %v2811_v43  ;;  %2497 = vmatprep.mubr.bf16.mxu0 %v17572_v26  ;;  %v17580_v43 = vld [vmem:[%s23267_s7 + $0x410] ss:$8 sps:$4 sm:$0xff]   ;;  %v17622_v26 = vld [vmem:[%s23267_s7 + $0x484] ss:$8 sps:$4 sm:$0xff]  }
 0x4ec   :  { %14673 = vmatprep.subr.bf16.mxu1 %v2820_v1  ;;  %v17616_v1 = vld [vmem:[%s23267_s7 + $0x470] ss:$8 sps:$4 sm:$0xff]  }
 0x4ef   :  { %14674 = vmatpush3.bf16.msra.mxu1 %v2812_v28  ;;  %v17583_v28 = vld [vmem:[%s23267_s7 + $0x390] ss:$8 sps:$4 sm:$0xff]  }
 0x4f2   :  { %2498 = vmatmul.mubr.bf16.gmra.mrb[120].mxu0 %v17577_v47  ;;  %3014 = vmatmul.mubr.bf16.vlgmr.msra.gmra.mrb[8].mxu1 %v17574_v4  ;;  %v17625_v4 = vld [vmem:[%s23267_s7 + $0x494] ss:$8 sps:$4 sm:$0xff]   ;;  %v17623_v47 = vld [vmem:[%s23267_s7 + $0x490] ss:$8 sps:$4 sm:$0xff]  }
 0x4f3   :  { %2505 = vmatprep.mubr.bf16.mxu0 %v17578_v17  ;;  %3021 = vmatprep.mubr.bf16.mxu1 %v17582_v32  ;;  %v17644_v17 = vld [vmem:[%s23281_s28] sm:$0xff]  }
 0x4f4   :  { %15729 = vmatprep.subr.bf16.mxu0 %v17644_v17  ;;  %v17628_v32 = vld [vmem:[%s23267_s7 + $0x4a4] ss:$8 sps:$4 sm:$0xff]  }
 0x4f5   :  { %15730 = vmatpush3.bf16.msra.mxu0 %v17644_v17 }
 0x4fa   :  { %2506 = vmatmul.mubr.bf16.gmra.mrb[124].mxu0 %v17583_v28  ;;  %3022 = vmatmul.mubr.bf16.gmra.mrb[12].mxu1 %v17580_v43  ;;  %v17626_v43 = vld [vmem:[%s23267_s7 + $0x4a0] ss:$8 sps:$4 sm:$0xff]   ;;  %v17631_v28 = vld [vmem:[%s23267_s7 + $0x4b4] ss:$8 sps:$4 sm:$0xff]  }
 0x4fb   :  { %2513 = vmatprep.mubr.bf16.mxu0 %v17584_v11  ;;  %3029 = vmatprep.mubr.bf16.mxu1 %v17588_v52  ;;  %v17629_v11 = vld [vmem:[%s23267_s7 + $0x4b0] ss:$8 sps:$4 sm:$0xff]   ;;  %v17634_v52 = vld [vmem:[%s23267_s7 + $0x4c4] ss:$8 sps:$4 sm:$0xff]  }
 0x502   :  { %2514 = vmatmul.mubr.bf16.gmra.mrb[128].mxu0 %v17589_v56  ;;  %3030 = vmatmul.mubr.bf16.gmra.mrb[16].mxu1 %v17586_v5  ;;  %v17632_v5 = vld [vmem:[%s23267_s7 + $0x4c0] ss:$8 sps:$4 sm:$0xff]   ;;  %v17637_v56 = vld [vmem:[%s23267_s7 + $0x4d4] ss:$8 sps:$4 sm:$0xff]  }
 0x503   :  { %2521 = vmatprep.mubr.bf16.mxu0 %v17590_v62  ;;  %3037 = vmatprep.mubr.bf16.mxu1 %v17594_v15  ;;  %v17645_v62 = vld [vmem:[%s23281_s28 + $0x8] sm:$0xff]   ;;  %v17635_v15 = vld [vmem:[%s23267_s7 + $0x4d0] ss:$8 sps:$4 sm:$0xff]  }
 0x504   :  { %15763 = vmatprep.subr.bf16.mxu1 %v17645_v62 }
 0x505   :  { %15764 = vmatpush3.bf16.msra.mxu1 %v17645_v62 }
 0x50a   :  { %2522 = vmatmul.mubr.bf16.gmra.mrb[132].mxu0 %v17595_v30  ;;  %3038 = vmatmul.mubr.bf16.gmra.mrb[20].mxu1 %v17592_v23  ;;  %v17640_v23 = vld [vmem:[%s23267_s7 + $0x4e4] ss:$8 sps:$4 sm:$0xff]   ;;  %v17638_v30 = vld [vmem:[%s23267_s7 + $0x4e0] ss:$8 sps:$4 sm:$0xff]  }
 0x50b   :  { %2529 = vmatprep.mubr.bf16.mxu0 %v17596_v3  ;;  %3045 = vmatprep.mubr.bf16.mxu1 %v17600_v0  ;;  %v17643_v3 = vld [vmem:[%s23267_s7 + $0x4f4] ss:$8 sps:$4 sm:$0xff]   ;;  %v17641_v0 = vld [vmem:[%s23267_s7 + $0x4f0] ss:$8 sps:$4 sm:$0xff]  }
 0x512   :  { %2530 = vmatmul.mubr.bf16.gmra.mrb[136].mxu0 %v17601_v42  ;;  %3046 = vmatmul.mubr.bf16.gmra.mrb[24].mxu1 %v17598_v10 }
 0x513   :  { %2537 = vmatprep.mubr.bf16.mxu0 %v17602_v18  ;;  %3053 = vmatprep.mubr.bf16.mxu1 %v17606_v8 }
 0x51a   :  { %2538 = vmatmul.mubr.bf16.gmra.mrb[140].mxu0 %v17607_v50  ;;  %3054 = vmatmul.mubr.bf16.gmra.mrb[28].mxu1 %v17604_v19 }
 0x51b   :  { %2545 = vmatprep.mubr.bf16.mxu0 %v17608_v54  ;;  %3061 = vmatprep.mubr.bf16.mxu1 %v17612_v20 }
 0x522   :  { %2546 = vmatmul.mubr.bf16.gmra.mrb[144].mxu0 %v17613_v9  ;;  %3062 = vmatmul.mubr.bf16.gmra.mrb[32].mxu1 %v17610_v21 }
 0x523   :  { %2553 = vmatprep.mubr.bf16.mxu0 %v17614_v31  ;;  %3069 = vmatprep.mubr.bf16.mxu1 %v17618_v16 }
 0x52a   :  { %2554 = vmatmul.mubr.bf16.gmra.mrb[148].mxu0 %v17619_v51  ;;  %3070 = vmatmul.mubr.bf16.gmra.mrb[36].mxu1 %v17616_v1 }
 0x52b   :  { %3077 = vmatprep.mubr.bf16.mxu1 %v17622_v26 }
 0x532   :  { %3078 = vmatmul.mubr.bf16.gmra.mrb[40].mxu1 %v17620_v59 }
 0x533   :  { %3085 = vmatprep.mubr.bf16.mxu1 %v17625_v4 }
 0x53a   :  { %3086 = vmatmul.mubr.bf16.gmra.mrb[44].mxu1 %v17623_v47 }
 0x53b   :  { %3093 = vmatprep.mubr.bf16.mxu1 %v17628_v32 }
 0x542   :  { %3094 = vmatmul.mubr.bf16.gmra.mrb[48].mxu1 %v17626_v43 }
 0x543   :  { %3101 = vmatprep.mubr.bf16.mxu1 %v17631_v28 }
 0x54a   :  { %3102 = vmatmul.mubr.bf16.gmra.mrb[52].mxu1 %v17629_v11 }
 0x54b   :  { %3109 = vmatprep.mubr.bf16.mxu1 %v17634_v52 }
 0x552   :  { %3110 = vmatmul.mubr.bf16.gmra.mrb[56].mxu1 %v17632_v5 }
 0x553   :  { %3117 = vmatprep.mubr.bf16.mxu1 %v17637_v56 }
 0x55a   :  { %3118 = vmatmul.mubr.bf16.gmra.mrb[60].mxu1 %v17635_v15 }
 0x55b   :  { %3125 = vmatprep.mubr.bf16.mxu1 %v17640_v23 }
 0x562   :  { %3126 = vmatmul.mubr.bf16.gmra.mrb[64].mxu1 %v17638_v30 }
 0x563   :  { %3133 = vmatprep.mubr.bf16.mxu1 %v17643_v3 }
 0x56a   :  { %3134 = vmatmul.mubr.bf16.gmra.mrb[68].mxu1 %v17641_v0 }
 0x585   :  { %v14545_v10 = vpop.f32.mrb[88].mxu0 }
 0x586   :  { %v14546_v42 = vpop.f32.mrb[89].mxu0 }
 0x587   :  { %v14547_v18 = vadd.f32 %v14546_v42, %v14545_v10  ;;  %v14548_v8 = vpop.f32.mrb[90].mxu0 }
 0x588   :  { %v14549_v19 = vpop.f32.mrb[91].mxu0 }
 0x589   :  { %v19456_v50 = vadd.f32 %v14547_v18, %v19135_v38  ;;  %v14550_v54 = vadd.f32 %v14549_v19, %v14548_v8 }
 0x58b   :  { %v19459_v20 = vadd.f32 %v14550_v54, %v19138_v44 }
 0x58d   :  { %v14551_v21 = vpop.f32.mrb[92].mxu0 }
 0x58e   :  { %v14552_v9 = vpop.f32.mrb[93].mxu0 }
 0x58f   :  { %v14553_v31 = vadd.f32 %v14552_v9, %v14551_v21  ;;  %v14554_v16 = vpop.f32.mrb[94].mxu0 }
 0x590   :  { %v14555_v1 = vpop.f32.mrb[95].mxu0 }
 0x591   :  { %v19462_v51 = vadd.f32 %v14553_v31, %v19141_v55  ;;  %v14556_v26 = vadd.f32 %v14555_v1, %v14554_v16 }
 0x593   :  { %v19465_v59 = vadd.f32 %v14556_v26, %v19144_v45 }
 0x595   :  { %v14557_v4 = vpop.f32.mrb[96].mxu0 }
 0x596   :  { %v14558_v47 = vpop.f32.mrb[97].mxu0 }
 0x597   :  { %v14559_v38 = vadd.f32 %v14558_v47, %v14557_v4  ;;  %v14560_v17 = vpop.f32.mrb[98].mxu0 }
 0x598   :  { %v14561_v32 = vpop.f32.mrb[99].mxu0 }
 0x599   :  { %v19468_v44 = vadd.f32 %v14559_v38, %v19150_v24  ;;  %v14562_v43 = vadd.f32 %v14561_v32, %v14560_v17 }
 0x59b   :  { %v19471_v28 = vadd.f32 %v14562_v43, %v19153_v33 }
 0x59d   :  { %v14563_v11 = vpop.f32.mrb[100].mxu0 }
 0x59e   :  { %v14564_v52 = vpop.f32.mrb[101].mxu0 }
 0x59f   :  { %v14565_v55 = vadd.f32 %v14564_v52, %v14563_v11  ;;  %v14566_v5 = vpop.f32.mrb[102].mxu0 }
 0x5a0   :  { %v14567_v56 = vpop.f32.mrb[103].mxu0 }
 0x5a1   :  { %v19474_v45 = vadd.f32 %v14565_v55, %v19156_v37  ;;  %v14568_v62 = vadd.f32 %v14567_v56, %v14566_v5 }
 0x5a3   :  { %v19477_v15 = vadd.f32 %v14568_v62, %v19159_v27 }
 0x5a5   :  { %v14569_v23 = vpop.f32.mrb[104].mxu0 }
 0x5a6   :  { %v14570_v30 = vpop.f32.mrb[105].mxu0 }
 0x5a7   :  { %v14571_v24 = vadd.f32 %v14570_v30, %v14569_v23  ;;  %v14572_v3 = vpop.f32.mrb[106].mxu0 }
 0x5a8   :  { %v14573_v0 = vpop.f32.mrb[107].mxu0 }
 0x5a9   :  { %v19480_v33 = vadd.f32 %v14571_v24, %v19162_v25  ;;  %v14574_v10 = vadd.f32 %v14573_v0, %v14572_v3 }
 0x5ab   :  { %v19483_v42 = vadd.f32 %v14574_v10, %v19165_v36 }
 0x5ad   :  { %v14575_v18 = vpop.f32.mrb[108].mxu0 }
 0x5ae   :  { %v14576_v8 = vpop.f32.mrb[109].mxu0 }
 0x5af   :  { %v14577_v37 = vadd.f32 %v14576_v8, %v14575_v18  ;;  %v14578_v19 = vpop.f32.mrb[110].mxu0 }
 0x5b0   :  { %v14579_v54 = vpop.f32.mrb[111].mxu0 }
 0x5b1   :  { %v19486_v27 = vadd.f32 %v14577_v37, %v19168_v6  ;;  %v14580_v21 = vadd.f32 %v14579_v54, %v14578_v19 }
 0x5b3   :  { %v19489_v9 = vadd.f32 %v14580_v21, %v19171_v57 }
 0x5b5   :  { %v14581_v31 = vpop.f32.mrb[112].mxu0 }
 0x5b6   :  { %v14582_v16 = vpop.f32.mrb[113].mxu0 }
 0x5b7   :  { %v14583_v25 = vadd.f32 %v14582_v16, %v14581_v31  ;;  %v14584_v1 = vpop.f32.mrb[114].mxu0 }
 0x5b8   :  { %v14585_v26 = vpop.f32.mrb[115].mxu0 }
 0x5b9   :  { %v19492_v36 = vadd.f32 %v14583_v25, %v19174_v46  ;;  %v14586_v4 = vadd.f32 %v14585_v26, %v14584_v1 }
 0x5bb   :  { %v19495_v47 = vadd.f32 %v14586_v4, %v19177_v41 }
 0x5bd   :  { %v14587_v38 = vpop.f32.mrb[116].mxu0 }
 0x5be   :  { %v14588_v17 = vpop.f32.mrb[117].mxu0 }
 0x5bf   :  { %v14589_v6 = vadd.f32 %v14588_v17, %v14587_v38  ;;  %v14590_v32 = vpop.f32.mrb[118].mxu0 }
 0x5c0   :  { %v14591_v43 = vpop.f32.mrb[119].mxu0 }
 0x5c1   :  { %v19498_v57 = vadd.f32 %v14589_v6, %v19180_v29  ;;  %v14592_v11 = vadd.f32 %v14591_v43, %v14590_v32 }
 0x5c3   :  { %v19501_v52 = vadd.f32 %v14592_v11, %v19183_v48  ;;  %v17646_v48 = vld [vmem:[%s23281_s28 + $0x10] sm:$0xff]  }
 0x5c4   :  { %15797 = vmatprep.subr.bf16.mxu1 %v17646_v48 }
 0x5c5   :  { %v14593_v55 = vpop.f32.mrb[120].mxu0  ;;  %v14675_v5 = vpop.f32.mrb[8].mxu1 }
 0x5c6   :  { %v14594_v46 = vpop.f32.mrb[121].mxu0  ;;  %v14676_v56 = vpop.f32.mrb[9].mxu1 }
 0x5c7   :  { %v14595_v62 = vadd.f32 %v14594_v46, %v14593_v55  ;;  %v14677_v23 = vadd.f32 %v14676_v56, %v14675_v5  ;;  %v14596_v41 = vpop.f32.mrb[122].mxu0  ;;  %v14678_v30 = vpop.f32.mrb[10].mxu1 }
 0x5c8   :  { %v14597_v24 = vpop.f32.mrb[123].mxu0  ;;  %v14679_v3 = vpop.f32.mrb[11].mxu1 }
 0x5c9   :  { %v19504_v0 = vadd.f32 %v14595_v62, %v19186_v7  ;;  %v3142_v29 = vadd.f32 %v14677_v23, %v19456_v50  ;;  %v14598_v10 = vadd.f32 %v14597_v24, %v14596_v41  ;;  %v14680_v18 = vadd.f32 %v14679_v3, %v14678_v30 }
 0x5cb   :  { %v19511_v8 = vadd.f32 %v14598_v10, %v19189_v13  ;;  %v3143_v37 = vadd.f32 %v14680_v18, %v19459_v20  ;;  %v3174_v19 = vmax.f32 %v3142_v29, 0.0 }
 0x5cd   :  { %v3175_v54 = vmax.f32 %v3143_v37, 0.0  ;;  %v14599_v21 = vpop.f32.mrb[124].mxu0  ;;  %v14681_v31 = vpop.f32.mrb[12].mxu1 }
 0x5ce   :  { %v14600_v7 = vpop.f32.mrb[125].mxu0  ;;  %v14682_v16 = vpop.f32.mrb[13].mxu1 }
 0x5cf   :  { %v14601_v50 = vadd.f32 %v14600_v7, %v14599_v21  ;;  %v14683_v25 = vadd.f32 %v14682_v16, %v14681_v31  ;;  %v14602_v1 = vpop.f32.mrb[126].mxu0  ;;  %v14684_v26 = vpop.f32.mrb[14].mxu1  ;;  %v19514_v4 = vpack.c.bf16 %v3175_v54, %v3174_v19 }
 0x5d0   :  { %v14603_v38 = vpop.f32.mrb[127].mxu0  ;;  %v14685_v17 = vpop.f32.mrb[15].mxu1 }
 0x5d1   :  { %v19517_v13 = vadd.f32 %v14601_v50, %v19192_v49  ;;  %v3144_v20 = vadd.f32 %v14683_v25, %v19462_v51  ;;  %v14604_v6 = vadd.f32 %v14603_v38, %v14602_v1  ;;  %v14686_v32 = vadd.f32 %v14685_v17, %v14684_v26  ;;  %15731 = vmatprep.mubr.msk.bf16.mxu0 %vm3246_vm1, %v19514_v4 }
 0x5d2   :  { %15765 = vmatprep.mubr.msk.bf16.mxu1 %vm3246_vm1, %v19514_v4 }
 0x5d3   :  { %v19525_v43 = vadd.f32 %v14604_v6, %v19195_v14  ;;  %v3145_v11 = vadd.f32 %v14686_v32, %v19465_v59  ;;  %v3176_v55 = vmax.f32 %v3144_v20, 0.0 }
 0x5d5   :  { %v3177_v5 = vmax.f32 %v3145_v11, 0.0  ;;  %v14605_v46 = vpop.f32.mrb[128].mxu0  ;;  %v14687_v49 = vpop.f32.mrb[16].mxu1 }
 0x5d6   :  { %v14606_v56 = vpop.f32.mrb[129].mxu0  ;;  %v14688_v62 = vpop.f32.mrb[17].mxu1 }
 0x5d7   :  { %v19528_v51 = vpack.c.bf16 %v3177_v5, %v3176_v55  ;;  %v14607_v23 = vadd.f32 %v14606_v56, %v14605_v46  ;;  %v14689_v41 = vadd.f32 %v14688_v62, %v14687_v49  ;;  %v14608_v30 = vpop.f32.mrb[130].mxu0  ;;  %v14690_v24 = vpop.f32.mrb[18].mxu1 }
 0x5d8   :  { %v14609_v3 = vpop.f32.mrb[131].mxu0  ;;  %v14691_v29 = vpop.f32.mrb[19].mxu1 }
 0x5d9   :  { %v19531_v10 = vadd.f32 %v14607_v23, %v19198_v12  ;;  %v3146_v14 = vadd.f32 %v14689_v41, %v19468_v44  ;;  %v14610_v59 = vadd.f32 %v14609_v3, %v14608_v30  ;;  %v14692_v18 = vadd.f32 %v14691_v29, %v14690_v24  ;;  %15732 = vmatmul.mubr.msk.bf16.vlgmr.msra.gmra.mrb[152].mxu0 %vm3246_vm1, %v19528_v51 }
 0x5da   :  { %15766 = vmatmul.mubr.msk.bf16.vlgmr.msra.gmra.mrb[72].mxu1 %vm3246_vm1, %v19528_v51 }
 0x5db   :  { %v19539_v37 = vadd.f32 %v14610_v59, %v19204_v61  ;;  %v3147_v19 = vadd.f32 %v14692_v18, %v19471_v28  ;;  %15798 = vmatpush3.bf16.msra.mxu1 %v17646_v48  ;;  %v3178_v54 = vmax.f32 %v3146_v14, 0.0 }
 0x5dd   :  { %v3179_v21 = vmax.f32 %v3147_v19, 0.0  ;;  %v14611_v12 = vpop.f32.mrb[132].mxu0  ;;  %v14693_v31 = vpop.f32.mrb[20].mxu1 }
 0x5de   :  { %v14612_v7 = vpop.f32.mrb[133].mxu0  ;;  %v14694_v44 = vpop.f32.mrb[21].mxu1 }
 0x5df   :  { %v14613_v16 = vadd.f32 %v14612_v7, %v14611_v12  ;;  %v14695_v50 = vadd.f32 %v14694_v44, %v14693_v31  ;;  %v14614_v25 = vpop.f32.mrb[134].mxu0  ;;  %v14696_v1 = vpop.f32.mrb[22].mxu1  ;;  %v19542_v26 = vpack.c.bf16 %v3179_v21, %v3178_v54 }
 0x5e0   :  { %v14615_v38 = vpop.f32.mrb[135].mxu0  ;;  %v14697_v17 = vpop.f32.mrb[23].mxu1 }
 0x5e1   :  { %v19545_v61 = vadd.f32 %v14613_v16, %v19207_v35  ;;  %v3148_v28 = vadd.f32 %v14695_v50, %v19474_v45  ;;  %v14616_v48 = vadd.f32 %v14615_v38, %v14614_v25  ;;  %v14698_v20 = vadd.f32 %v14697_v17, %v14696_v1  ;;  %15735 = vmatprep.mubr.msk.bf16.mxu0 %vm3246_vm1, %v19542_v26 }
 0x5e2   :  { %15769 = vmatprep.mubr.msk.bf16.mxu1 %vm3246_vm1, %v19542_v26 }
 0x5e3   :  { %v19553_v6 = vadd.f32 %v14616_v48, %v19210_v40  ;;  %v3149_v32 = vadd.f32 %v14698_v20, %v19477_v15  ;;  %v3180_v11 = vmax.f32 %v3148_v28, 0.0 }
 0x5e5   :  { %v3181_v55 = vmax.f32 %v3149_v32, 0.0  ;;  %v14617_v5 = vpop.f32.mrb[136].mxu0  ;;  %v14699_v35 = vpop.f32.mrb[24].mxu1 }
 0x5e6   :  { %v14618_v46 = vpop.f32.mrb[137].mxu0  ;;  %v14700_v49 = vpop.f32.mrb[25].mxu1 }
 0x5e7   :  { %v14619_v45 = vadd.f32 %v14618_v46, %v14617_v5  ;;  %v14701_v56 = vadd.f32 %v14700_v49, %v14699_v35  ;;  %v14620_v62 = vpop.f32.mrb[138].mxu0  ;;  %v14702_v23 = vpop.f32.mrb[26].mxu1  ;;  %v19556_v41 = vpack.c.bf16 %v3181_v55, %v3180_v11 }
 0x5e8   :  { %v14621_v30 = vpop.f32.mrb[139].mxu0  ;;  %v14703_v24 = vpop.f32.mrb[27].mxu1 }
 0x5e9   :  { %v19559_v3 = vadd.f32 %v14619_v45, %v19213_v22  ;;  %v3150_v40 = vadd.f32 %v14701_v56, %v19480_v33  ;;  %v14622_v15 = vadd.f32 %v14621_v30, %v14620_v62  ;;  %v14704_v29 = vadd.f32 %v14703_v24, %v14702_v23  ;;  %15736 = vmatmul.mubr.msk.bf16.gmra.mrb[156].mxu0 %vm3246_vm1, %v19556_v41 }
 0x5ea   :  { %15770 = vmatmul.mubr.msk.bf16.gmra.mrb[76].mxu1 %vm3246_vm1, %v19556_v41 }
 0x5eb   :  { %v19567_v14 = vadd.f32 %v14622_v15, %v19216_v39  ;;  %v3151_v59 = vadd.f32 %v14704_v29, %v19483_v42  ;;  %v3182_v18 = vmax.f32 %v3150_v40, 0.0 }
 0x5ed   :  { %v3183_v19 = vmax.f32 %v3151_v59, 0.0  ;;  %v14623_v54 = vpop.f32.mrb[140].mxu0  ;;  %v14705_v22 = vpop.f32.mrb[28].mxu1 }
 0x5ee   :  { %v14624_v21 = vpop.f32.mrb[141].mxu0  ;;  %v14706_v12 = vpop.f32.mrb[29].mxu1 }
 0x5ef   :  { %v14625_v33 = vadd.f32 %v14624_v21, %v14623_v54  ;;  %v14707_v31 = vadd.f32 %v14706_v12, %v14705_v22  ;;  %v14626_v7 = vpop.f32.mrb[142].mxu0  ;;  %v14708_v44 = vpop.f32.mrb[30].mxu1  ;;  %v19570_v16 = vpack.c.bf16 %v3183_v19, %v3182_v18 }
 0x5f0   :  { %v14627_v50 = vpop.f32.mrb[143].mxu0  ;;  %v14709_v25 = vpop.f32.mrb[31].mxu1 }
 0x5f1   :  { %v19573_v1 = vadd.f32 %v14625_v33, %v19219_v34  ;;  %v3152_v39 = vadd.f32 %v14707_v31, %v19486_v27  ;;  %v14628_v42 = vadd.f32 %v14627_v50, %v14626_v7  ;;  %v14710_v38 = vadd.f32 %v14709_v25, %v14708_v44  ;;  %15739 = vmatprep.mubr.msk.bf16.mxu0 %vm3246_vm1, %v19570_v16 }
 0x5f2   :  { %15773 = vmatprep.mubr.msk.bf16.mxu1 %vm3246_vm1, %v19570_v16 }
 0x5f3   :  { %v19581_v17 = vadd.f32 %v14628_v42, %v19222_v60  ;;  %v3153_v28 = vadd.f32 %v14710_v38, %v19489_v9  ;;  %v3184_v48 = vmax.f32 %v3152_v39, 0.0 }
 0x5f5   :  { %v3185_v20 = vmax.f32 %v3153_v28, 0.0  ;;  %v14629_v32 = vpop.f32.mrb[144].mxu0  ;;  %v14711_v34 = vpop.f32.mrb[32].mxu1 }
 0x5f6   :  { %v14630_v11 = vpop.f32.mrb[145].mxu0  ;;  %v14712_v55 = vpop.f32.mrb[33].mxu1 }
 0x5f7   :  { %v14631_v27 = vadd.f32 %v14630_v11, %v14629_v32  ;;  %v14713_v5 = vadd.f32 %v14712_v55, %v14711_v34  ;;  %v14632_v35 = vpop.f32.mrb[146].mxu0  ;;  %v14714_v46 = vpop.f32.mrb[34].mxu1  ;;  %v19584_v49 = vpack.c.bf16 %v3185_v20, %v3184_v48 }
 0x5f8   :  { %v14633_v45 = vpop.f32.mrb[147].mxu0  ;;  %v14715_v56 = vpop.f32.mrb[35].mxu1 }
 0x5f9   :  { %v19587_v62 = vadd.f32 %v14631_v27, %v19225_v53  ;;  %v3154_v60 = vadd.f32 %v14713_v5, %v19492_v36  ;;  %v14634_v9 = vadd.f32 %v14633_v45, %v14632_v35  ;;  %v14716_v23 = vadd.f32 %v14715_v56, %v14714_v46  ;;  %15740 = vmatmul.mubr.msk.bf16.gmra.mrb[160].mxu0 %vm3246_vm1, %v19584_v49 }
 0x5fa   :  { %15774 = vmatmul.mubr.msk.bf16.gmra.mrb[80].mxu1 %vm3246_vm1, %v19584_v49 }
 0x5fb   :  { %v19595_v30 = vadd.f32 %v14634_v9, %v19228_v63  ;;  %v3155_v24 = vadd.f32 %v14716_v23, %v19495_v47  ;;  %v3186_v40 = vmax.f32 %v3154_v60, 0.0 }
 0x5fd   :  { %v3187_v15 = vmax.f32 %v3155_v24, 0.0  ;;  %v14635_v29 = vpop.f32.mrb[148].mxu0  ;;  %v14717_v53 = vpop.f32.mrb[36].mxu1 }
 0x5fe   :  { %v14636_v59 = vpop.f32.mrb[149].mxu0  ;;  %v14718_v18 = vpop.f32.mrb[37].mxu1 }
 0x5ff   :  { %v14637_v36 = vadd.f32 %v14636_v59, %v14635_v29  ;;  %v14719_v19 = vadd.f32 %v14718_v18, %v14717_v53  ;;  %v14638_v54 = vpop.f32.mrb[150].mxu0  ;;  %v14720_v22 = vpop.f32.mrb[38].mxu1  ;;  %v19598_v21 = vpack.c.bf16 %v3187_v15, %v3186_v40 }
 0x600   :  { %v14639_v12 = vpop.f32.mrb[151].mxu0  ;;  %v14721_v33 = vpop.f32.mrb[39].mxu1 }
 0x601   :  { %v3156_v31 = vadd.f32 %v14719_v19, %v19498_v57  ;;  %v14640_v63 = vadd.f32 %v14639_v12, %v14638_v54  ;;  %v14722_v7 = vadd.f32 %v14721_v33, %v14720_v22  ;;  %15743 = vmatprep.mubr.msk.bf16.mxu0 %vm3246_vm1, %v19598_v21  ;;  %15777 = vmatprep.mubr.msk.bf16.mxu1 %vm3246_vm1, %v19598_v21 }
 0x602   :  { %v19606_v47 = vadd.f32 %v14637_v36, %v19231_v58  ;;  %v19622_v58 = vld [vmem:[%s23281_s28 + $0x18] sm:$0xff]  }
 0x603   :  { %v3157_v44 = vadd.f32 %v14722_v7, %v19501_v52  ;;  %v19610_v50 = vadd.f32 %v14640_v63, %v19234_v2  ;;  %v3188_v25 = vmax.f32 %v3156_v31, 0.0  ;;  %15831 = vmatprep.subr.bf16.mxu1 %v19622_v58 }
 0x605   :  { %v3189_v39 = vmax.f32 %v3157_v44, 0.0  ;;  %v14723_v42 = vpop.f32.mrb[40].mxu1 }
 0x606   :  { %v14724_v57 = vpop.f32.mrb[41].mxu1 }
 0x607   :  { %v19612_v38 = vpack.c.bf16 %v3189_v39, %v3188_v25  ;;  %v14725_v28 = vadd.f32 %v14724_v57, %v14723_v42  ;;  %v14726_v48 = vpop.f32.mrb[42].mxu1 }
 0x608   :  { %v14727_v20 = vpop.f32.mrb[43].mxu1 }
 0x609   :  { %v3158_v32 = vadd.f32 %v14725_v28, %v19504_v0  ;;  %v14728_v34 = vadd.f32 %v14727_v20, %v14726_v48  ;;  %15744 = vmatmul.mubr.msk.bf16.gmra.mrb[164].mxu0 %vm3246_vm1, %v19612_v38  ;;  %15778 = vmatmul.mubr.msk.bf16.gmra.mrb[84].mxu1 %vm3246_vm1, %v19612_v38 }
 0x60b   :  { %v3159_v2 = vadd.f32 %v14728_v34, %v19511_v8  ;;  %v3190_v52 = vmax.f32 %v3158_v32, 0.0 }
 0x60d   :  { %v3191_v11 = vmax.f32 %v3159_v2, 0.0  ;;  %v14729_v55 = vpop.f32.mrb[44].mxu1 }
 0x60e   :  { %v14730_v0 = vpop.f32.mrb[45].mxu1 }
 0x60f   :  { %v19626_v27 = vpack.c.bf16 %v3191_v11, %v3190_v52  ;;  %v14731_v5 = vadd.f32 %v14730_v0, %v14729_v55  ;;  %v14732_v35 = vpop.f32.mrb[46].mxu1 }
 0x610   :  { %v14733_v46 = vpop.f32.mrb[47].mxu1 }
 0x611   :  { %v3160_v45 = vadd.f32 %v14731_v5, %v19517_v13  ;;  %v14734_v56 = vadd.f32 %v14733_v46, %v14732_v35  ;;  %15747 = vmatprep.mubr.msk.bf16.mxu0 %vm3246_vm1, %v19626_v27  ;;  %15781 = vmatprep.mubr.msk.bf16.mxu1 %vm3246_vm1, %v19626_v27 }
 0x613   :  { %v3161_v8 = vadd.f32 %v14734_v56, %v19525_v43  ;;  %v3192_v60 = vmax.f32 %v3160_v45, 0.0 }
 0x615   :  { %v3193_v9 = vmax.f32 %v3161_v8, 0.0  ;;  %v14735_v23 = vpop.f32.mrb[48].mxu1 }
 0x616   :  { %v14736_v24 = vpop.f32.mrb[49].mxu1 }
 0x617   :  { %v19634_v40 = vpack.c.bf16 %v3193_v9, %v3192_v60  ;;  %v14737_v15 = vadd.f32 %v14736_v24, %v14735_v23  ;;  %v14738_v29 = vpop.f32.mrb[50].mxu1 }
 0x618   :  { %v14739_v53 = vpop.f32.mrb[51].mxu1 }
 0x619   :  { %v3162_v13 = vadd.f32 %v14737_v15, %v19531_v10  ;;  %v14740_v59 = vadd.f32 %v14739_v53, %v14738_v29  ;;  %15748 = vmatmul.mubr.msk.bf16.gmra.mrb[168].mxu0 %vm3246_vm1, %v19634_v40  ;;  %15782 = vmatmul.mubr.msk.bf16.gmra.mrb[88].mxu1 %vm3246_vm1, %v19634_v40 }
 0x61b   :  { %v3163_v43 = vadd.f32 %v14740_v59, %v19539_v37  ;;  %v3194_v18 = vmax.f32 %v3162_v13, 0.0 }
 0x61d   :  { %v3195_v36 = vmax.f32 %v3163_v43, 0.0  ;;  %v14741_v19 = vpop.f32.mrb[52].mxu1 }
 0x61e   :  { %v14742_v54 = vpop.f32.mrb[53].mxu1 }
 0x61f   :  { %v19642_v22 = vpack.c.bf16 %v3195_v36, %v3194_v18  ;;  %v14743_v12 = vadd.f32 %v14742_v54, %v14741_v19  ;;  %v14744_v33 = vpop.f32.mrb[54].mxu1 }
 0x620   :  { %v14745_v31 = vpop.f32.mrb[55].mxu1 }
 0x621   :  { %v3164_v10 = vadd.f32 %v14743_v12, %v19545_v61  ;;  %v14746_v63 = vadd.f32 %v14745_v31, %v14744_v33  ;;  %15751 = vmatprep.mubr.msk.bf16.mxu0 %vm3246_vm1, %v19642_v22  ;;  %15785 = vmatprep.mubr.msk.bf16.mxu1 %vm3246_vm1, %v19642_v22 }
 0x623   :  { %v3165_v37 = vadd.f32 %v14746_v63, %v19553_v6  ;;  %v3196_v7 = vmax.f32 %v3164_v10, 0.0 }
 0x625   :  { %v3197_v44 = vmax.f32 %v3165_v37, 0.0  ;;  %v14747_v25 = vpop.f32.mrb[56].mxu1 }
 0x626   :  { %v14748_v39 = vpop.f32.mrb[57].mxu1 }
 0x627   :  { %v19650_v42 = vpack.c.bf16 %v3197_v44, %v3196_v7  ;;  %v14749_v57 = vadd.f32 %v14748_v39, %v14747_v25  ;;  %v14750_v28 = vpop.f32.mrb[58].mxu1 }
 0x628   :  { %v14751_v48 = vpop.f32.mrb[59].mxu1 }
 0x629   :  { %v3166_v61 = vadd.f32 %v14749_v57, %v19559_v3  ;;  %v14752_v20 = vadd.f32 %v14751_v48, %v14750_v28  ;;  %15752 = vmatmul.mubr.msk.bf16.gmra.mrb[172].mxu0 %vm3246_vm1, %v19650_v42  ;;  %15786 = vmatmul.mubr.msk.bf16.gmra.mrb[92].mxu1 %vm3246_vm1, %v19650_v42 }
 0x62b   :  { %v3167_v6 = vadd.f32 %v14752_v20, %v19567_v14  ;;  %v3198_v32 = vmax.f32 %v3166_v61, 0.0 }
 0x62d   :  { %v3199_v34 = vmax.f32 %v3167_v6, 0.0  ;;  %v14753_v2 = vpop.f32.mrb[60].mxu1 }
 0x62e   :  { %v14754_v52 = vpop.f32.mrb[61].mxu1 }
 0x62f   :  { %v19658_v11 = vpack.c.bf16 %v3199_v34, %v3198_v32  ;;  %v14755_v55 = vadd.f32 %v14754_v52, %v14753_v2  ;;  %v14756_v0 = vpop.f32.mrb[62].mxu1 }
 0x630   :  { %v14757_v5 = vpop.f32.mrb[63].mxu1 }
 0x631   :  { %v3168_v3 = vadd.f32 %v14755_v55, %v19573_v1  ;;  %v14758_v35 = vadd.f32 %v14757_v5, %v14756_v0  ;;  %15755 = vmatprep.mubr.msk.bf16.mxu0 %vm3246_vm1, %v19658_v11  ;;  %15789 = vmatprep.mubr.msk.bf16.mxu1 %vm3246_vm1, %v19658_v11 }
 0x633   :  { %v3169_v14 = vadd.f32 %v14758_v35, %v19581_v17  ;;  %v3200_v46 = vmax.f32 %v3168_v3, 0.0 }
 0x635   :  { %v3201_v45 = vmax.f32 %v3169_v14, 0.0  ;;  %v14759_v56 = vpop.f32.mrb[64].mxu1 }
 0x636   :  { %v14760_v8 = vpop.f32.mrb[65].mxu1 }
 0x637   :  { %v19666_v60 = vpack.c.bf16 %v3201_v45, %v3200_v46  ;;  %v14761_v9 = vadd.f32 %v14760_v8, %v14759_v56  ;;  %v14762_v23 = vpop.f32.mrb[66].mxu1 }
 0x638   :  { %v14763_v24 = vpop.f32.mrb[67].mxu1 }
 0x639   :  { %v3170_v1 = vadd.f32 %v14761_v9, %v19587_v62  ;;  %v14764_v15 = vadd.f32 %v14763_v24, %v14762_v23  ;;  %15756 = vmatmul.mubr.msk.bf16.gmra.mrb[176].mxu0 %vm3246_vm1, %v19666_v60  ;;  %15790 = vmatmul.mubr.msk.bf16.gmra.mrb[96].mxu1 %vm3246_vm1, %v19666_v60 }
 0x63b   :  { %v3171_v17 = vadd.f32 %v14764_v15, %v19595_v30  ;;  %v3202_v29 = vmax.f32 %v3170_v1, 0.0 }
 0x63d   :  { %v3203_v53 = vmax.f32 %v3171_v17, 0.0  ;;  %v14765_v13 = vpop.f32.mrb[68].mxu1 }
 0x63e   :  { %v14766_v59 = vpop.f32.mrb[69].mxu1 }
 0x63f   :  { %v19674_v43 = vpack.c.bf16 %v3203_v53, %v3202_v29  ;;  %v14767_v18 = vadd.f32 %v14766_v59, %v14765_v13  ;;  %v14768_v36 = vpop.f32.mrb[70].mxu1 }
 0x640   :  { %v14769_v19 = vpop.f32.mrb[71].mxu1 }
 0x641   :  { %v3172_v62 = vadd.f32 %v14767_v18, %v19606_v47  ;;  %v14770_v54 = vadd.f32 %v14769_v19, %v14768_v36  ;;  %15759 = vmatprep.mubr.msk.bf16.mxu0 %vm3246_vm1, %v19674_v43  ;;  %15793 = vmatprep.mubr.msk.bf16.mxu1 %vm3246_vm1, %v19674_v43  ;;  %v17648_v47 = vld [vmem:[%s23281_s28 + $0x20] sm:$0xff]   ;;  %s23287_s28 = sld [smem:[#allocation15_spill]] }
 0x643   :  { %v3173_v30 = vadd.f32 %v14770_v54, %v19610_v50  ;;  %v3204_v12 = vmax.f32 %v3172_v62, 0.0  ;;  %v17651_v50 = vld [vmem:[%s23282_s2 + $0x4] ss:$8 sps:$4 sm:$0xff]  }
 0x645   :  { %v3205_v33 = vmax.f32 %v3173_v30, 0.0 }
 0x647   :  { %v19682_v31 = vpack.c.bf16 %v3205_v33, %v3204_v12 }
 0x649   :  { %15760 = vmatmul.mubr.msk.bf16.gmra.mrb[180].mxu0 %vm3246_vm1, %v19682_v31  ;;  %15794 = vmatmul.mubr.msk.bf16.gmra.mrb[100].mxu1 %vm3246_vm1, %v19682_v31 }
 0x64a   :  { %15799 = vmatprep.mubr.msk.bf16.mxu1 %vm3246_vm1, %v19514_v4  ;;  %3600 = vmatprep.mubr.bf16.mxu0 %v17651_v50 }
 0x651   :  { %15800 = vmatmul.mubr.msk.bf16.vlgmr.msra.gmra.mrb[104].mxu1 %vm3246_vm1, %v19528_v51 }
 0x652   :  { %15803 = vmatprep.mubr.msk.bf16.mxu1 %vm3246_vm1, %v19542_v26  ;;  %15832 = vmatpush3.bf16.msra.mxu1 %v19622_v58 }
 0x653   :  { %15865 = vmatprep.subr.bf16.mxu1 %v17648_v47 }
 0x659   :  { %15804 = vmatmul.mubr.msk.bf16.gmra.mrb[108].mxu1 %vm3246_vm1, %v19556_v41 }
 0x65a   :  { %15807 = vmatprep.mubr.msk.bf16.mxu1 %vm3246_vm1, %v19570_v16 }
 0x661   :  { %15808 = vmatmul.mubr.msk.bf16.gmra.mrb[112].mxu1 %vm3246_vm1, %v19584_v49 }
 0x662   :  { %15811 = vmatprep.mubr.msk.bf16.mxu1 %vm3246_vm1, %v19598_v21 }
 0x669   :  { %15812 = vmatmul.mubr.msk.bf16.gmra.mrb[116].mxu1 %vm3246_vm1, %v19612_v38 }
 0x66a   :  { %15815 = vmatprep.mubr.msk.bf16.mxu1 %vm3246_vm1, %v19626_v27 }
 0x671   :  { %15816 = vmatmul.mubr.msk.bf16.gmra.mrb[120].mxu1 %vm3246_vm1, %v19634_v40 }
 0x672   :  { %15819 = vmatprep.mubr.msk.bf16.mxu1 %vm3246_vm1, %v19642_v22 }
 0x679   :  { %15820 = vmatmul.mubr.msk.bf16.gmra.mrb[124].mxu1 %vm3246_vm1, %v19650_v42 }
 0x67a   :  { %15823 = vmatprep.mubr.msk.bf16.mxu1 %vm3246_vm1, %v19658_v11 }
 0x681   :  { %15824 = vmatmul.mubr.msk.bf16.gmra.mrb[128].mxu1 %vm3246_vm1, %v19666_v60 }
 0x682   :  { %15827 = vmatprep.mubr.msk.bf16.mxu1 %vm3246_vm1, %v19674_v43 }
 0x689   :  { %15828 = vmatmul.mubr.msk.bf16.gmra.mrb[132].mxu1 %vm3246_vm1, %v19682_v31 }
 0x68a   :  { %15833 = vmatprep.mubr.msk.bf16.mxu1 %vm3246_vm1, %v19514_v4 }
 0x691   :  { %15834 = vmatmul.mubr.msk.bf16.vlgmr.msra.gmra.mrb[136].mxu1 %vm3246_vm1, %v19528_v51 }
 0x692   :  { %15837 = vmatprep.mubr.msk.bf16.mxu1 %vm3246_vm1, %v19542_v26  ;;  %15866 = vmatpush3.bf16.msra.mxu1 %v17648_v47 }
 0x699   :  { %15838 = vmatmul.mubr.msk.bf16.gmra.mrb[140].mxu1 %vm3246_vm1, %v19556_v41 }
 0x69a   :  { %15841 = vmatprep.mubr.msk.bf16.mxu1 %vm3246_vm1, %v19570_v16 }
 0x6a1   :  { %15842 = vmatmul.mubr.msk.bf16.gmra.mrb[144].mxu1 %vm3246_vm1, %v19584_v49 }
 0x6a2   :  { %15845 = vmatprep.mubr.msk.bf16.mxu1 %vm3246_vm1, %v19598_v21 }
 0x6a9   :  { %15846 = vmatmul.mubr.msk.bf16.gmra.mrb[148].mxu1 %vm3246_vm1, %v19612_v38 }
 0x6aa   :  { %15849 = vmatprep.mubr.msk.bf16.mxu1 %vm3246_vm1, %v19626_v27 }
 0x6ac   :  { %v19745_v58 = vpop.f32.mrb[152].mxu0 }
 0x6ad   :  { %v19747_v10 = vpop.f32.mrb[72].mxu1  ;;  %v19749_v63 = vpop.f32.mrb[153].mxu0 }
 0x6ae   :  { %v19751_v37 = vpop.f32.mrb[73].mxu1  ;;  %v19753_v7 = vpop.f32.mrb[154].mxu0 }
 0x6af   :  { %v19755_v44 = vpop.f32.mrb[74].mxu1  ;;  %v19757_v25 = vpop.f32.mrb[155].mxu0  ;;  %v3473_v39 = vpack.c.bf16 %v19753_v7, %v19745_v58 }
 0x6b0   :  { %v3869_v57 = vpack.c.bf16 %v19755_v44, %v19747_v10  ;;  %v19763_v28 = vpop.f32.mrb[75].mxu1  ;;  %v3472_v48 = vpack.c.bf16 %v19757_v25, %v19749_v63 }
 0x6b1   :  { %v3868_v61 = vpack.c.bf16 %v19763_v28, %v19751_v37  ;;  %15850 = vmatmul.mubr.msk.bf16.gmra.mrb[152].mxu1 %vm3246_vm1, %v19634_v40  ;;  %v17655_v28 = vld [vmem:[%s23282_s2 + $0x24] ss:$8 sps:$4 sm:$0xff]  }
 0x6b2   :  { %15853 = vmatprep.mubr.msk.bf16.mxu1 %vm3246_vm1, %v19642_v22 }
 0x6b9   :  { %15854 = vmatmul.mubr.msk.bf16.gmra.mrb[156].mxu1 %vm3246_vm1, %v19650_v42 }
 0x6ba   :  { %15857 = vmatprep.mubr.msk.bf16.mxu1 %vm3246_vm1, %v19658_v11 }
 0x6bc   :  { %v19777_v20 = vpop.f32.mrb[156].mxu0 }
 0x6bd   :  { %v19779_v6 = vpop.f32.mrb[76].mxu1  ;;  %v19781_v32 = vpop.f32.mrb[157].mxu0 }
 0x6be   :  { %v19783_v34 = vpop.f32.mrb[77].mxu1  ;;  %v19785_v2 = vpop.f32.mrb[158].mxu0 }
 0x6bf   :  { %v19787_v52 = vpop.f32.mrb[78].mxu1  ;;  %v19789_v55 = vpop.f32.mrb[159].mxu0  ;;  %v3475_v0 = vpack.c.bf16 %v19785_v2, %v19777_v20 }
 0x6c0   :  { %v3871_v5 = vpack.c.bf16 %v19787_v52, %v19779_v6  ;;  %v19795_v3 = vpop.f32.mrb[79].mxu1  ;;  %v3474_v35 = vpack.c.bf16 %v19789_v55, %v19781_v32 }
 0x6c1   :  { %v3870_v14 = vpack.c.bf16 %v19795_v3, %v19783_v34  ;;  %15858 = vmatmul.mubr.msk.bf16.gmra.mrb[160].mxu1 %vm3246_vm1, %v19666_v60  ;;  %v17658_v3 = vld [vmem:[%s23282_s2 + $0x34] ss:$8 sps:$4 sm:$0xff]  }
 0x6c2   :  { %15861 = vmatprep.mubr.msk.bf16.mxu1 %vm3246_vm1, %v19674_v43 }
 0x6c9   :  { %15862 = vmatmul.mubr.msk.bf16.gmra.mrb[164].mxu1 %vm3246_vm1, %v19682_v31 }
 0x6ca   :  { %15867 = vmatprep.mubr.msk.bf16.mxu1 %vm3246_vm1, %v19514_v4 }
 0x6cc   :  { %v19809_v46 = vpop.f32.mrb[160].mxu0 }
 0x6cd   :  { %v19811_v45 = vpop.f32.mrb[80].mxu1  ;;  %v19813_v56 = vpop.f32.mrb[161].mxu0 }
 0x6ce   :  { %v19815_v8 = vpop.f32.mrb[81].mxu1  ;;  %v19817_v9 = vpop.f32.mrb[162].mxu0 }
 0x6cf   :  { %v3477_v23 = vpack.c.bf16 %v19817_v9, %v19809_v46  ;;  %v19821_v24 = vpop.f32.mrb[82].mxu1  ;;  %v19823_v1 = vpop.f32.mrb[163].mxu0 }
 0x6d0   :  { %v3476_v15 = vpack.c.bf16 %v19823_v1, %v19813_v56  ;;  %v19829_v17 = vpop.f32.mrb[83].mxu1 }
 0x6d1   :  { %v3872_v29 = vpack.c.bf16 %v19829_v17, %v19815_v8  ;;  %15868 = vmatmul.mubr.msk.bf16.vlgmr.msra.gmra.mrb[168].mxu1 %vm3246_vm1, %v19528_v51  ;;  %v23283_v8 = vpack.c.bf16 %v19821_v24, %v19811_v45 }
 0x6d2   :  { %15871 = vmatprep.mubr.msk.bf16.mxu1 %vm3246_vm1, %v19542_v26 }
 0x6d9   :  { %15872 = vmatmul.mubr.msk.bf16.gmra.mrb[172].mxu1 %vm3246_vm1, %v19556_v41 }
 0x6da   :  { %15875 = vmatprep.mubr.msk.bf16.mxu1 %vm3246_vm1, %v19570_v16 }
 0x6dc   :  { %v19841_v53 = vpop.f32.mrb[164].mxu0  ;;  %v19843_v13 = vpop.f32.mrb[84].mxu1 }
 0x6dd   :  { %v19845_v59 = vpop.f32.mrb[165].mxu0  ;;  %v19847_v18 = vpop.f32.mrb[85].mxu1 }
 0x6de   :  { %v19849_v36 = vpop.f32.mrb[166].mxu0  ;;  %v19851_v51 = vpop.f32.mrb[86].mxu1 }
 0x6df   :  { %v3479_v26 = vpack.c.bf16 %v19849_v36, %v19841_v53  ;;  %v19857_v19 = vpop.f32.mrb[167].mxu0  ;;  %v19859_v16 = vpop.f32.mrb[87].mxu1 }
 0x6e0   :  { %v3478_v62 = vpack.c.bf16 %v19857_v19, %v19845_v59  ;;  %v17652_v19 = vld [vmem:[%s23282_s2 + $0x14] ss:$8 sps:$4 sm:$0xff]  }
 0x6e1   :  { %15876 = vmatmul.mubr.msk.bf16.gmra.mrb[176].mxu1 %vm3246_vm1, %v19584_v49 }
 0x6e2   :  { %15879 = vmatprep.mubr.msk.bf16.mxu1 %vm3246_vm1, %v19598_v21 }
 0x6e9   :  { %15880 = vmatmul.mubr.msk.bf16.gmra.mrb[180].mxu1 %vm3246_vm1, %v19612_v38 }
 0x6ea   :  { %15883 = vmatprep.mubr.msk.bf16.mxu1 %vm3246_vm1, %v19626_v27 }
 0x6ec   :  { %v15749_v30 = vpop.f32.mrb[168].mxu0  ;;  %v19873_v12 = vpop.f32.mrb[88].mxu1 }
 0x6ed   :  { %v3393_v33 = vpop.f32.mrb[169].mxu0  ;;  %v19875_v47 = vpop.f32.mrb[89].mxu1 }
 0x6ee   :  { %v15750_v50 = vpop.f32.mrb[170].mxu0  ;;  %v19877_v41 = vpop.f32.mrb[90].mxu1 }
 0x6ef   :  { %v3481_v54 = vpack.c.bf16 %v15750_v50, %v15749_v30  ;;  %v3877_v49 = vpack.c.bf16 %v19877_v41, %v19873_v12  ;;  %v3396_v21 = vpop.f32.mrb[171].mxu0  ;;  %v19881_v4 = vpop.f32.mrb[91].mxu1  ;;  %v17657_v41 = vld [vmem:[%s23282_s2 + $0x20] ss:$8 sps:$4 sm:$0xff]  }
 0x6f0   :  { %v3480_v38 = vpack.c.bf16 %v3396_v21, %v3393_v33  ;;  %v3876_v27 = vpack.c.bf16 %v19881_v4, %v19875_v47  ;;  %v17654_v4 = vld [vmem:[%s23282_s2 + $0x10] ss:$8 sps:$4 sm:$0xff]  }
 0x6f1   :  { %15884 = vmatmul.mubr.msk.bf16.gmra.mrb[184].mxu1 %vm3246_vm1, %v19634_v40 }
 0x6f2   :  { %14788 = vmatprep.subr.bf16.mxu0 %v3480_v38  ;;  %15887 = vmatprep.mubr.msk.bf16.mxu1 %vm3246_vm1, %v19642_v22 }
 0x6f3   :  { %14789 = vmatpush3.bf16.msra.mxu0 %v3472_v48 }
 0x6f4   :  { %14790 = vmatprep.subr.bf16.mxu0 %v3481_v54 }
 0x6f7   :  { %14791 = vmatpush3.bf16.msra.mxu0 %v3473_v39 }
 0x6f9   :  { %15888 = vmatmul.mubr.msk.bf16.gmra.mrb[188].mxu1 %vm3246_vm1, %v19650_v42 }
 0x6fa   :  { %15891 = vmatprep.mubr.msk.bf16.mxu1 %vm3246_vm1, %v19658_v11 }
 0x6fc   :  { %v15753_v40 = vpop.f32.mrb[172].mxu0  ;;  %v19899_v30 = vpop.f32.mrb[92].mxu1 }
 0x6fd   :  { %v3409_v33 = vpop.f32.mrb[173].mxu0  ;;  %v19901_v22 = vpop.f32.mrb[93].mxu1 }
 0x6fe   :  { %v15754_v50 = vpop.f32.mrb[174].mxu0  ;;  %v19903_v63 = vpop.f32.mrb[94].mxu1 }
 0x6ff   :  { %v3483_v25 = vpack.c.bf16 %v15754_v50, %v15753_v40  ;;  %v3879_v58 = vpack.c.bf16 %v19903_v63, %v19899_v30  ;;  %v3412_v7 = vpop.f32.mrb[175].mxu0  ;;  %v19907_v39 = vpop.f32.mrb[95].mxu1  ;;  %v23284_v63 = vpack.c.bf16 %v19859_v16, %v19847_v18  ;;  %v17664_v18 = vld [vmem:[%s23282_s2 + $0x54] ss:$8 sps:$4 sm:$0xff]  }
 0x700   :  { %v3482_v42 = vpack.c.bf16 %v3412_v7, %v3409_v33  ;;  %v3878_v11 = vpack.c.bf16 %v19907_v39, %v19901_v22 }
 0x701   :  { %15892 = vmatmul.mubr.msk.bf16.gmra.mrb[192].mxu1 %vm3246_vm1, %v19666_v60 }
 0x702   :  { %14792 = vmatprep.subr.bf16.mxu0 %v3482_v42  ;;  %15895 = vmatprep.mubr.msk.bf16.mxu1 %vm3246_vm1, %v19674_v43 }
 0x703   :  { %14793 = vmatpush3.bf16.msra.mxu0 %v3474_v35 }
 0x704   :  { %14794 = vmatprep.subr.bf16.mxu0 %v3483_v25 }
 0x707   :  { %14795 = vmatpush3.bf16.msra.mxu0 %v3475_v0 }
 0x709   :  { %15896 = vmatmul.mubr.msk.bf16.gmra.mrb[196].mxu1 %vm3246_vm1, %v19682_v31  ;;  %vm10142_vm1 = vcmask 785408  }
 0x70c   :  { %v15757_v48 = vpop.f32.mrb[176].mxu0  ;;  %v19923_v54 = vpop.f32.mrb[96].mxu1 }
 0x70d   :  { %v3425_v60 = vpop.f32.mrb[177].mxu0  ;;  %v19925_v21 = vpop.f32.mrb[97].mxu1 }
 0x70e   :  { %v15758_v38 = vpop.f32.mrb[178].mxu0  ;;  %v19927_v43 = vpop.f32.mrb[98].mxu1 }
 0x70f   :  { %v3485_v40 = vpack.c.bf16 %v15758_v38, %v15757_v48  ;;  %v3881_v32 = vpack.c.bf16 %v19927_v43, %v19923_v54  ;;  %v3428_v55 = vpop.f32.mrb[179].mxu0  ;;  %v3823_v35 = vpop.f32.mrb[99].mxu1  ;;  %v17649_v48 = vld [vmem:[%s23282_s2] ss:$8 sps:$4 sm:$0xff]  }
 0x710   :  { %v3484_v20 = vpack.c.bf16 %v3428_v55, %v3425_v60  ;;  %v3880_v2 = vpack.c.bf16 %v3823_v35, %v19925_v21  ;;  %v23285_v21 = vpack.c.bf16 %v19851_v51, %v19843_v13  ;;  %v17666_v55 = vld [vmem:[%s23282_s2 + $0x50] ss:$8 sps:$4 sm:$0xff]   ;;  %v17667_v13 = vld [vmem:[%s23282_s2 + $0x64] ss:$8 sps:$4 sm:$0xff]  }
 0x712   :  { %14796 = vmatprep.subr.bf16.mxu0 %v3484_v20 }
 0x713   :  { %14797 = vmatpush3.bf16.msra.mxu0 %v3476_v15 }
 0x714   :  { %14798 = vmatprep.subr.bf16.mxu0 %v3485_v40 }
 0x717   :  { %14799 = vmatpush3.bf16.msra.mxu0 %v3477_v23 }
 0x71c   :  { %v15761_v31 = vpop.f32.mrb[180].mxu0  ;;  %v19938_v0 = vpop.f32.mrb[100].mxu1 }
 0x71d   :  { %v3441_v33 = vpop.f32.mrb[181].mxu0  ;;  %v19940_v22 = vpop.f32.mrb[101].mxu1 }
 0x71e   :  { %v15762_v50 = vpop.f32.mrb[182].mxu0  ;;  %v19942_v25 = vpop.f32.mrb[102].mxu1 }
 0x71f   :  { %v3487_v7 = vpack.c.bf16 %v15762_v50, %v15761_v31  ;;  %v3883_v39 = vpack.c.bf16 %v19942_v25, %v19938_v0  ;;  %v3444_v56 = vpop.f32.mrb[183].mxu0  ;;  %v3839_v1 = vpop.f32.mrb[103].mxu1  ;;  %v17670_v25 = vld [vmem:[%s23282_s2 + $0x74] ss:$8 sps:$4 sm:$0xff]  }
 0x720   :  { %v3486_v15 = vpack.c.bf16 %v3444_v56, %v3441_v33  ;;  %v3882_v42 = vpack.c.bf16 %v3839_v1, %v19940_v22  ;;  %v17669_v33 = vld [vmem:[%s23282_s2 + $0x60] ss:$8 sps:$4 sm:$0xff]  }
 0x722   :  { %14800 = vmatprep.subr.bf16.mxu0 %v3486_v15  ;;  %v17672_v15 = vld [vmem:[%s23282_s2 + $0x70] ss:$8 sps:$4 sm:$0xff]  }
 0x723   :  { %14801 = vmatpush3.bf16.msra.mxu0 %v3478_v62 }
 0x724   :  { %14802 = vmatprep.subr.bf16.mxu0 %v3487_v7  ;;  %v19950_v46 = vpop.f32.mrb[104].mxu1 }
 0x725   :  { %v19952_v9 = vpop.f32.mrb[105].mxu1 }
 0x726   :  { %v19954_v23 = vpop.f32.mrb[106].mxu1 }
 0x727   :  { %v4265_v60 = vpack.c.bf16 %v19954_v23, %v19950_v46  ;;  %14803 = vmatpush3.bf16.msra.mxu0 %v3479_v26  ;;  %v19964_v59 = vpop.f32.mrb[107].mxu1 }
 0x728   :  { %v4264_v62 = vpack.c.bf16 %v19964_v59, %v19952_v9  ;;  %14869 = vmatprep.subr.bf16.mxu0 %v3876_v27 }
 0x72a   :  { %3601 = vmatmul.mubr.bf16.vlgmr.msra.gmra.mrb[184].mxu0 %v17649_v48 }
 0x72b   :  { %14870 = vmatpush3.bf16.msra.mxu0 %v3868_v61  ;;  %3608 = vmatprep.mubr.bf16.mxu0 %v17652_v19  ;;  %v17675_v19 = vld [vmem:[%s23282_s2 + $0x84] ss:$8 sps:$4 sm:$0xff]  }
 0x72c   :  { %14871 = vmatprep.subr.bf16.mxu0 %v3877_v49  ;;  %v19980_v53 = vpop.f32.mrb[108].mxu1  ;;  %v17660_v49 = vld [vmem:[%s23282_s2 + $0x30] ss:$8 sps:$4 sm:$0xff]  }
 0x72d   :  { %v19982_v36 = vpop.f32.mrb[109].mxu1 }
 0x72e   :  { %v19984_v26 = vpop.f32.mrb[110].mxu1 }
 0x72f   :  { %v4267_v47 = vpack.c.bf16 %v19984_v26, %v19980_v53  ;;  %14872 = vmatpush3.bf16.msra.mxu0 %v3869_v57  ;;  %v19994_v37 = vpop.f32.mrb[111].mxu1 }
 0x730   :  { %v4266_v61 = vpack.c.bf16 %v19994_v37, %v19982_v36  ;;  %14873 = vmatprep.subr.bf16.mxu0 %v3878_v11  ;;  %v17663_v11 = vld [vmem:[%s23282_s2 + $0x40] ss:$8 sps:$4 sm:$0xff]  }
 0x732   :  { %3609 = vmatmul.mubr.bf16.gmra.mrb[188].mxu0 %v17654_v4 }
 0x733   :  { %14874 = vmatpush3.bf16.msra.mxu0 %v3870_v14  ;;  %3616 = vmatprep.mubr.bf16.mxu0 %v17655_v28 }
 0x734   :  { %14875 = vmatprep.subr.bf16.mxu0 %v3879_v58  ;;  %v20007_v10 = vpop.f32.mrb[112].mxu1 }
 0x735   :  { %v20009_v44 = vpop.f32.mrb[113].mxu1 }
 0x736   :  { %v20011_v57 = vpop.f32.mrb[114].mxu1 }
 0x737   :  { %v4269_v12 = vpack.c.bf16 %v20011_v57, %v20007_v10  ;;  %14876 = vmatpush3.bf16.msra.mxu0 %v3871_v5  ;;  %v20021_v34 = vpop.f32.mrb[115].mxu1 }
 0x738   :  { %v4268_v14 = vpack.c.bf16 %v20021_v34, %v20009_v44  ;;  %14877 = vmatprep.subr.bf16.mxu0 %v3880_v2 }
 0x73a   :  { %3617 = vmatmul.mubr.bf16.gmra.mrb[192].mxu0 %v17657_v41 }
 0x73b   :  { %14878 = vmatpush3.bf16.msra.mxu0 %v3872_v29  ;;  %3624 = vmatprep.mubr.bf16.mxu0 %v17658_v3  ;;  %v17661_v29 = vld [vmem:[%s23282_s2 + $0x44] ss:$8 sps:$4 sm:$0xff]  }
 0x73c   :  { %14879 = vmatprep.subr.bf16.mxu0 %v3881_v32  ;;  %v20034_v6 = vpop.f32.mrb[116].mxu1 }
 0x73d   :  { %v20036_v52 = vpop.f32.mrb[117].mxu1 }
 0x73e   :  { %v20038_v5 = vpop.f32.mrb[118].mxu1 }
 0x73f   :  { %v4271_v27 = vpack.c.bf16 %v20038_v5, %v20034_v6  ;;  %14880 = vmatpush3.bf16.msra.mxu0 %v23283_v8  ;;  %v20048_v17 = vpop.f32.mrb[119].mxu1  ;;  %v17691_v5 = vld [vmem:[%s23282_s2 + $0xe4] ss:$8 sps:$4 sm:$0xff]  }
 0x740   :  { %v4270_v30 = vpack.c.bf16 %v20048_v17, %v20036_v52  ;;  %14881 = vmatprep.subr.bf16.mxu0 %v3882_v42  ;;  %v17688_v52 = vld [vmem:[%s23282_s2 + $0xd4] ss:$8 sps:$4 sm:$0xff]  }
 0x742   :  { %3625 = vmatmul.mubr.bf16.gmra.mrb[196].mxu0 %v17660_v49  ;;  %v17673_v49 = vld [vmem:[%s23282_s2 + $0x80] ss:$8 sps:$4 sm:$0xff]  }
 0x743   :  { %14882 = vmatpush3.bf16.msra.mxu0 %v23284_v63  ;;  %3632 = vmatprep.mubr.bf16.mxu0 %v17661_v29  ;;  %v17676_v63 = vld [vmem:[%s23282_s2 + $0x94] ss:$8 sps:$4 sm:$0xff]  }
 0x744   :  { %14883 = vmatprep.subr.bf16.mxu0 %v3883_v39  ;;  %v15817_v58 = vpop.f32.mrb[120].mxu1 }
 0x745   :  { %v4184_v45 = vpop.f32.mrb[121].mxu1 }
 0x746   :  { %v15818_v24 = vpop.f32.mrb[122].mxu1 }
 0x747   :  { %v4273_v54 = vpack.c.bf16 %v15818_v24, %v15817_v58  ;;  %14884 = vmatpush3.bf16.msra.mxu0 %v23285_v21  ;;  %v4187_v38 = vpop.f32.mrb[123].mxu1  ;;  %v17678_v21 = vld [vmem:[%s23282_s2 + $0x90] ss:$8 sps:$4 sm:$0xff]  }
 0x748   :  { %v4272_v16 = vpack.c.bf16 %v4187_v38, %v4184_v45  ;;  %v17681_v38 = vld [vmem:[%s23282_s2 + $0xa0] ss:$8 sps:$4 sm:$0xff]  }
 0x74a   :  { %3633 = vmatmul.mubr.bf16.gmra.mrb[200].mxu0 %v17663_v11  ;;  %14950 = vmatprep.subr.bf16.mxu0 %v4272_v16  ;;  %v17684_v16 = vld [vmem:[%s23282_s2 + $0xb0] ss:$8 sps:$4 sm:$0xff]  }
 0x74b   :  { %3640 = vmatprep.mubr.bf16.mxu0 %v17664_v18 }
 0x74c   :  { %v15821_v43 = vpop.f32.mrb[124].mxu1 }
 0x74d   :  { %v4200_v40 = vpop.f32.mrb[125].mxu1 }
 0x74e   :  { %v15822_v32 = vpop.f32.mrb[126].mxu1 }
 0x74f   :  { %v4275_v35 = vpack.c.bf16 %v15822_v32, %v15821_v43  ;;  %v4203_v20 = vpop.f32.mrb[127].mxu1 }
 0x750   :  { %v4274_v51 = vpack.c.bf16 %v4203_v20, %v4200_v40  ;;  %v17687_v40 = vld [vmem:[%s23282_s2 + $0xc0] ss:$8 sps:$4 sm:$0xff]  }
 0x752   :  { %3641 = vmatmul.mubr.bf16.gmra.mrb[204].mxu0 %v17666_v55 }
 0x753   :  { %3648 = vmatprep.mubr.bf16.mxu0 %v17667_v13  ;;  %v17690_v13 = vld [vmem:[%s23282_s2 + $0xd0] ss:$8 sps:$4 sm:$0xff]  }
 0x754   :  { %v15825_v2 = vpop.f32.mrb[128].mxu1 }
 0x755   :  { %v4216_v31 = vpop.f32.mrb[129].mxu1 }
 0x756   :  { %v15826_v0 = vpop.f32.mrb[130].mxu1 }
 0x757   :  { %v4277_v22 = vpack.c.bf16 %v15826_v0, %v15825_v2  ;;  %v4219_v50 = vpop.f32.mrb[131].mxu1 }
 0x758   :  { %v4276_v7 = vpack.c.bf16 %v4219_v50, %v4216_v31 }
 0x75a   :  { %3649 = vmatmul.mubr.bf16.gmra.mrb[208].mxu0 %v17669_v33  ;;  %v17693_v33 = vld [vmem:[%s23282_s2 + $0xe0] ss:$8 sps:$4 sm:$0xff]  }
 0x75b   :  { %3656 = vmatprep.mubr.bf16.mxu0 %v17670_v25  ;;  %v17694_v25 = vld [vmem:[%s23282_s2 + $0xf4] ss:$8 sps:$4 sm:$0xff]  }
 0x75c   :  { %v20079_v39 = vpop.f32.mrb[132].mxu1 }
 0x75d   :  { %v4232_v56 = vpop.f32.mrb[133].mxu1 }
 0x75e   :  { %v15830_v1 = vpop.f32.mrb[134].mxu1 }
 0x75f   :  { %v4279_v42 = vpack.c.bf16 %v15830_v1, %v20079_v39  ;;  %v4235_v48 = vpop.f32.mrb[135].mxu1 }
 0x760   :  { %v4278_v4 = vpack.c.bf16 %v4235_v48, %v4232_v56 }
 0x762   :  { %3657 = vmatmul.mubr.bf16.gmra.mrb[212].mxu0 %v17672_v15  ;;  %v17696_v15 = vld [vmem:[%s23282_s2 + $0xf0] ss:$8 sps:$4 sm:$0xff]  }
 0x763   :  { %3996 = vmatprep.mubr.bf16.mxu0 %v17675_v19  ;;  %v17699_v19 = vld [vmem:[%s23282_s2 + $0x104] ss:$8 sps:$4 sm:$0xff]  }
 0x764   :  { %v20088_v28 = vpop.f32.mrb[136].mxu1 }
 0x765   :  { %v20090_v41 = vpop.f32.mrb[137].mxu1 }
 0x766   :  { %v20092_v3 = vpop.f32.mrb[138].mxu1 }
 0x767   :  { %v4661_v8 = vpack.c.bf16 %v20092_v3, %v20088_v28  ;;  %v20099_v29 = vpop.f32.mrb[139].mxu1 }
 0x768   :  { %v4660_v58 = vpack.c.bf16 %v20099_v29, %v20090_v41 }
 0x76a   :  { %3997 = vmatmul.mubr.bf16.vlgmr.msra.gmra.mrb[216].mxu0 %v17673_v49 }
 0x76b   :  { %14951 = vmatpush3.bf16.msra.mxu0 %v4264_v62  ;;  %4004 = vmatprep.mubr.bf16.mxu0 %v17676_v63  ;;  %v17679_v62 = vld [vmem:[%s23282_s2 + $0xa4] ss:$8 sps:$4 sm:$0xff]  }
 0x76c   :  { %14952 = vmatprep.subr.bf16.mxu0 %v4273_v54  ;;  %v20109_v45 = vpop.f32.mrb[140].mxu1 }
 0x76d   :  { %v20111_v24 = vpop.f32.mrb[141].mxu1 }
 0x76e   :  { %v20113_v11 = vpop.f32.mrb[142].mxu1 }
 0x76f   :  { %14953 = vmatpush3.bf16.msra.mxu0 %v4265_v60  ;;  %v4663_v9 = vpack.c.bf16 %v20113_v11, %v20109_v45  ;;  %v20123_v59 = vpop.f32.mrb[143].mxu1 }
 0x770   :  { %14954 = vmatprep.subr.bf16.mxu0 %v4274_v51  ;;  %v4662_v54 = vpack.c.bf16 %v20123_v59, %v20111_v24 }
 0x772   :  { %4005 = vmatmul.mubr.bf16.gmra.mrb[220].mxu0 %v17678_v21 }
 0x773   :  { %14955 = vmatpush3.bf16.msra.mxu0 %v4266_v61  ;;  %4012 = vmatprep.mubr.bf16.mxu0 %v17679_v62  ;;  %v17682_v61 = vld [vmem:[%s23282_s2 + $0xb4] ss:$8 sps:$4 sm:$0xff]   ;;  %v17697_v62 = vld [vmem:[%s23282_s2 + $0x100] ss:$8 sps:$4 sm:$0xff]  }
 0x774   :  { %14956 = vmatprep.subr.bf16.mxu0 %v4275_v35  ;;  %v20133_v46 = vpop.f32.mrb[144].mxu1 }
 0x775   :  { %v20135_v23 = vpop.f32.mrb[145].mxu1 }
 0x776   :  { %v20137_v60 = vpop.f32.mrb[146].mxu1 }
 0x777   :  { %14957 = vmatpush3.bf16.msra.mxu0 %v4267_v47  ;;  %v4665_v36 = vpack.c.bf16 %v20137_v60, %v20133_v46  ;;  %v20147_v37 = vpop.f32.mrb[147].mxu1 }
 0x778   :  { %14958 = vmatprep.subr.bf16.mxu0 %v4276_v7  ;;  %v4664_v18 = vpack.c.bf16 %v20147_v37, %v20135_v23 }
 0x77a   :  { %4013 = vmatmul.mubr.bf16.gmra.mrb[224].mxu0 %v17681_v38 }
 0x77b   :  { %14959 = vmatpush3.bf16.msra.mxu0 %v4268_v14  ;;  %4020 = vmatprep.mubr.bf16.mxu0 %v17682_v61  ;;  %v17685_v14 = vld [vmem:[%s23282_s2 + $0xc4] ss:$8 sps:$4 sm:$0xff]  }
 0x77c   :  { %14960 = vmatprep.subr.bf16.mxu0 %v4277_v22  ;;  %v20157_v53 = vpop.f32.mrb[148].mxu1 }
 0x77d   :  { %v20159_v26 = vpop.f32.mrb[149].mxu1 }
 0x77e   :  { %v20161_v47 = vpop.f32.mrb[150].mxu1 }
 0x77f   :  { %14961 = vmatpush3.bf16.msra.mxu0 %v4269_v12  ;;  %v4667_v44 = vpack.c.bf16 %v20161_v47, %v20157_v53  ;;  %v20171_v34 = vpop.f32.mrb[151].mxu1  ;;  %v17717_v47 = vld [vmem:[%s23282_s2 + $0x164] ss:$8 sps:$4 sm:$0xff]  }
 0x780   :  { %14962 = vmatprep.subr.bf16.mxu0 %v4278_v4  ;;  %v4666_v43 = vpack.c.bf16 %v20171_v34, %v20159_v26  ;;  %v17714_v26 = vld [vmem:[%s23282_s2 + $0x154] ss:$8 sps:$4 sm:$0xff]  }
 0x782   :  { %4021 = vmatmul.mubr.bf16.gmra.mrb[228].mxu0 %v17684_v16  ;;  %v17700_v16 = vld [vmem:[%s23282_s2 + $0x114] ss:$8 sps:$4 sm:$0xff]  }
 0x783   :  { %14963 = vmatpush3.bf16.msra.mxu0 %v4270_v30  ;;  %4028 = vmatprep.mubr.bf16.mxu0 %v17685_v14 }
 0x784   :  { %14964 = vmatprep.subr.bf16.mxu0 %v4279_v42  ;;  %v15851_v10 = vpop.f32.mrb[152].mxu1 }
 0x785   :  { %v4580_v57 = vpop.f32.mrb[153].mxu1 }
 0x786   :  { %v15852_v12 = vpop.f32.mrb[154].mxu1 }
 0x787   :  { %14965 = vmatpush3.bf16.msra.mxu0 %v4271_v27  ;;  %v4669_v32 = vpack.c.bf16 %v15852_v12, %v15851_v10  ;;  %v4583_v55 = vpop.f32.mrb[155].mxu1 }
 0x788   :  { %v4668_v17 = vpack.c.bf16 %v4583_v55, %v4580_v57  ;;  %v17703_v55 = vld [vmem:[%s23282_s2 + $0x120] ss:$8 sps:$4 sm:$0xff]  }
 0x78a   :  { %4029 = vmatmul.mubr.bf16.gmra.mrb[232].mxu0 %v17687_v40  ;;  %15031 = vmatprep.subr.bf16.mxu0 %v4668_v17  ;;  %v17702_v40 = vld [vmem:[%s23282_s2 + $0x110] ss:$8 sps:$4 sm:$0xff]  }
 0x78b   :  { %4036 = vmatprep.mubr.bf16.mxu0 %v17688_v52  ;;  %v17706_v17 = vld [vmem:[%s23282_s2 + $0x130] ss:$8 sps:$4 sm:$0xff]  }
 0x78c   :  { %v15855_v30 = vpop.f32.mrb[156].mxu1 }
 0x78d   :  { %v4596_v35 = vpop.f32.mrb[157].mxu1 }
 0x78e   :  { %v15856_v20 = vpop.f32.mrb[158].mxu1 }
 0x78f   :  { %v4671_v51 = vpack.c.bf16 %v15856_v20, %v15855_v30  ;;  %v4599_v6 = vpop.f32.mrb[159].mxu1 }
 0x790   :  { %v4670_v27 = vpack.c.bf16 %v4599_v6, %v4596_v35  ;;  %v17709_v35 = vld [vmem:[%s23282_s2 + $0x140] ss:$8 sps:$4 sm:$0xff]  }
 0x792   :  { %4037 = vmatmul.mubr.bf16.gmra.mrb[236].mxu0 %v17690_v13 }
 0x793   :  { %4044 = vmatprep.mubr.bf16.mxu0 %v17691_v5  ;;  %v17712_v5 = vld [vmem:[%s23282_s2 + $0x150] ss:$8 sps:$4 sm:$0xff]  }
 0x794   :  { %v15859_v2 = vpop.f32.mrb[160].mxu1 }
 0x795   :  { %v4612_v31 = vpop.f32.mrb[161].mxu1 }
 0x796   :  { %v15860_v0 = vpop.f32.mrb[162].mxu1 }
 0x797   :  { %v4673_v22 = vpack.c.bf16 %v15860_v0, %v15859_v2  ;;  %v4615_v50 = vpop.f32.mrb[163].mxu1 }
 0x798   :  { %v4672_v7 = vpack.c.bf16 %v4615_v50, %v4612_v31 }
 0x79a   :  { %4045 = vmatmul.mubr.bf16.gmra.mrb[240].mxu0 %v17693_v33  ;;  %v17715_v33 = vld [vmem:[%s23282_s2 + $0x160] ss:$8 sps:$4 sm:$0xff]  }
 0x79b   :  { %4052 = vmatprep.mubr.bf16.mxu0 %v17694_v25  ;;  %v17720_v25 = vld [vmem:[%s23282_s2 + $0x174] ss:$8 sps:$4 sm:$0xff]  }
 0x79c   :  { %v20202_v39 = vpop.f32.mrb[164].mxu1 }
 0x79d   :  { %v4628_v56 = vpop.f32.mrb[165].mxu1 }
 0x79e   :  { %v15864_v1 = vpop.f32.mrb[166].mxu1 }
 0x79f   :  { %v4675_v42 = vpack.c.bf16 %v15864_v1, %v20202_v39  ;;  %v4631_v48 = vpop.f32.mrb[167].mxu1 }
 0x7a0   :  { %v4674_v4 = vpack.c.bf16 %v4631_v48, %v4628_v56 }
 0x7a2   :  { %4053 = vmatmul.mubr.bf16.gmra.mrb[244].mxu0 %v17696_v15  ;;  %v17718_v15 = vld [vmem:[%s23282_s2 + $0x170] ss:$8 sps:$4 sm:$0xff]  }
 0x7a3   :  { %4392 = vmatprep.mubr.bf16.mxu0 %v17699_v19  ;;  %v17723_v19 = vld [vmem:[%s23282_s2 + $0x184] ss:$8 sps:$4 sm:$0xff]  }
 0x7a4   :  { %v20211_v49 = vpop.f32.mrb[168].mxu1 }
 0x7a5   :  { %v20213_v63 = vpop.f32.mrb[169].mxu1 }
 0x7a6   :  { %v20215_v21 = vpop.f32.mrb[170].mxu1 }
 0x7a7   :  { %v5057_v38 = vpack.c.bf16 %v20215_v21, %v20211_v49  ;;  %v20222_v61 = vpop.f32.mrb[171].mxu1  ;;  %v17732_v49 = vld [vmem:[%s23282_s2 + $0x1b4] ss:$8 sps:$4 sm:$0xff]  }
 0x7a8   :  { %v5056_v14 = vpack.c.bf16 %v20222_v61, %v20213_v63  ;;  %v17727_v63 = vld [vmem:[%s23282_s2 + $0x1a0] ss:$8 sps:$4 sm:$0xff]  }
 0x7aa   :  { %4393 = vmatmul.mubr.bf16.vlgmr.msra.gmra.mrb[248].mxu0 %v17697_v62  ;;  %v17721_v62 = vld [vmem:[%s23282_s2 + $0x180] ss:$8 sps:$4 sm:$0xff]  }
 0x7ab   :  { %15032 = vmatpush3.bf16.msra.mxu0 %v4660_v58  ;;  %4400 = vmatprep.mubr.bf16.mxu0 %v17700_v16  ;;  %v17705_v58 = vld [vmem:[%s23282_s2 + $0x124] ss:$8 sps:$4 sm:$0xff]   ;;  %v17726_v16 = vld [vmem:[%s23282_s2 + $0x194] ss:$8 sps:$4 sm:$0xff]  }
 0x7ac   :  { %15033 = vmatprep.subr.bf16.mxu0 %v4669_v32  ;;  %v20232_v10 = vpop.f32.mrb[172].mxu1 }
 0x7ad   :  { %v20234_v57 = vpop.f32.mrb[173].mxu1 }
 0x7ae   :  { %v20236_v12 = vpop.f32.mrb[174].mxu1 }
 0x7af   :  { %15034 = vmatpush3.bf16.msra.mxu0 %v4661_v8  ;;  %v5059_v41 = vpack.c.bf16 %v20236_v12, %v20232_v10  ;;  %v20246_v29 = vpop.f32.mrb[175].mxu1 }
 0x7b0   :  { %15035 = vmatprep.subr.bf16.mxu0 %v4670_v27  ;;  %v5058_v32 = vpack.c.bf16 %v20246_v29, %v20234_v57 }
 0x7b2   :  { %4401 = vmatmul.mubr.bf16.gmra.mrb[252].mxu0 %v17702_v40  ;;  %v17724_v40 = vld [vmem:[%s23282_s2 + $0x190] ss:$8 sps:$4 sm:$0xff]  }
 0x7b3   :  { %15036 = vmatpush3.bf16.msra.mxu0 %v4662_v54  ;;  %4408 = vmatprep.mubr.bf16.mxu0 %v17705_v58  ;;  %v17708_v54 = vld [vmem:[%s23282_s2 + $0x134] ss:$8 sps:$4 sm:$0xff]   ;;  %v17729_v58 = vld [vmem:[%s23282_s2 + $0x1a4] ss:$8 sps:$4 sm:$0xff]  }
 0x7b4   :  { %15037 = vmatprep.subr.bf16.mxu0 %v4671_v51  ;;  %v20256_v28 = vpop.f32.mrb[176].mxu1 }
 0x7b5   :  { %v20258_v3 = vpop.f32.mrb[177].mxu1 }
 0x7b6   :  { %v20260_v8 = vpop.f32.mrb[178].mxu1 }
 0x7b7   :  { %15038 = vmatpush3.bf16.msra.mxu0 %v4663_v9  ;;  %v5061_v24 = vpack.c.bf16 %v20260_v8, %v20256_v28  ;;  %v20270_v59 = vpop.f32.mrb[179].mxu1 }
 0x7b8   :  { %15039 = vmatprep.subr.bf16.mxu0 %v4672_v7  ;;  %v5060_v52 = vpack.c.bf16 %v20270_v59, %v20258_v3  ;;  %v17738_v3 = vld [vmem:[%s23282_s2 + $0x1d4] ss:$8 sps:$4 sm:$0xff]  }
 0x7ba   :  { %4409 = vmatmul.mubr.bf16.gmra.mrb[0].mxu0 %v17703_v55 }
 0x7bb   :  { %15040 = vmatpush3.bf16.msra.mxu0 %v4664_v18  ;;  %4416 = vmatprep.mubr.bf16.mxu0 %v17708_v54  ;;  %v17711_v18 = vld [vmem:[%s23282_s2 + $0x144] ss:$8 sps:$4 sm:$0xff]  }
 0x7bc   :  { %15041 = vmatprep.subr.bf16.mxu0 %v4673_v22  ;;  %v20280_v45 = vpop.f32.mrb[180].mxu1 }
 0x7bd   :  { %v20282_v11 = vpop.f32.mrb[181].mxu1 }
 0x7be   :  { %v20284_v9 = vpop.f32.mrb[182].mxu1 }
 0x7bf   :  { %15042 = vmatpush3.bf16.msra.mxu0 %v4665_v36  ;;  %v5063_v23 = vpack.c.bf16 %v20284_v9, %v20280_v45  ;;  %v20294_v37 = vpop.f32.mrb[183].mxu1  ;;  %v17741_v45 = vld [vmem:[%s23282_s2 + $0x1e4] ss:$8 sps:$4 sm:$0xff]  }
 0x7c0   :  { %15043 = vmatprep.subr.bf16.mxu0 %v4674_v4  ;;  %v5062_v30 = vpack.c.bf16 %v20294_v37, %v20282_v11 }
 0x7c2   :  { %4417 = vmatmul.mubr.bf16.gmra.mrb[4].mxu0 %v17706_v17 }
 0x7c3   :  { %15044 = vmatpush3.bf16.msra.mxu0 %v4666_v43  ;;  %4424 = vmatprep.mubr.bf16.mxu0 %v17711_v18 }
 0x7c4   :  { %15045 = vmatprep.subr.bf16.mxu0 %v4675_v42  ;;  %v15885_v46 = vpop.f32.mrb[184].mxu1 }
 0x7c5   :  { %v4976_v60 = vpop.f32.mrb[185].mxu1 }
 0x7c6   :  { %v15886_v36 = vpop.f32.mrb[186].mxu1 }
 0x7c7   :  { %15046 = vmatpush3.bf16.msra.mxu0 %v4667_v44  ;;  %v5065_v20 = vpack.c.bf16 %v15886_v36, %v15885_v46  ;;  %v4979_v13 = vpop.f32.mrb[187].mxu1 }
 0x7c8   :  { %v5064_v34 = vpack.c.bf16 %v4979_v13, %v4976_v60  ;;  %v17744_v60 = vld [vmem:[%s23282_s2 + $0x1f4] ss:$8 sps:$4 sm:$0xff]  }
 0x7ca   :  { %4425 = vmatmul.mubr.bf16.gmra.mrb[8].mxu0 %v17709_v35  ;;  %15112 = vmatprep.subr.bf16.mxu0 %v5064_v34  ;;  %v17742_v34 = vld [vmem:[%s23282_s2 + $0x1f0] ss:$8 sps:$4 sm:$0xff]  }
 0x7cb   :  { %4432 = vmatprep.mubr.bf16.mxu0 %v17714_v26 }
 0x7cc   :  { %v15889_v43 = vpop.f32.mrb[188].mxu1 }
 0x7cd   :  { %v4992_v51 = vpop.f32.mrb[189].mxu1 }
 0x7ce   :  { %v15890_v6 = vpop.f32.mrb[190].mxu1 }
 0x7cf   :  { %v5067_v27 = vpack.c.bf16 %v15890_v6, %v15889_v43  ;;  %v4995_v53 = vpop.f32.mrb[191].mxu1 }
 0x7d0   :  { %v5066_v44 = vpack.c.bf16 %v4995_v53, %v4992_v51  ;;  %v17747_v51 = vld [vmem:[%s23282_s2 + $0x204] ss:$8 sps:$4 sm:$0xff]  }
 0x7d2   :  { %4433 = vmatmul.mubr.bf16.gmra.mrb[12].mxu0 %v17712_v5 }
 0x7d3   :  { %4440 = vmatprep.mubr.bf16.mxu0 %v17717_v47 }
 0x7d4   :  { %v15893_v2 = vpop.f32.mrb[192].mxu1 }
 0x7d5   :  { %v5008_v31 = vpop.f32.mrb[193].mxu1 }
 0x7d6   :  { %v15894_v0 = vpop.f32.mrb[194].mxu1 }
 0x7d7   :  { %v5069_v22 = vpack.c.bf16 %v15894_v0, %v15893_v2  ;;  %v5011_v50 = vpop.f32.mrb[195].mxu1 }
 0x7d8   :  { %v5068_v7 = vpack.c.bf16 %v5011_v50, %v5008_v31  ;;  %v17750_v31 = vld [vmem:[%s23282_s2 + $0x214] ss:$8 sps:$4 sm:$0xff]  }
 0x7da   :  { %4441 = vmatmul.mubr.bf16.gmra.mrb[16].mxu0 %v17715_v33 }
 0x7db   :  { %4448 = vmatprep.mubr.bf16.mxu0 %v17720_v25 }
 0x7dc   :  { %v15897_v39 = vpop.f32.mrb[196].mxu1 }
 0x7dd   :  { %v5024_v56 = vpop.f32.mrb[197].mxu1 }
 0x7de   :  { %v15898_v1 = vpop.f32.mrb[198].mxu1 }
 0x7df   :  { %v5071_v42 = vpack.c.bf16 %v15898_v1, %v15897_v39  ;;  %v5027_v48 = vpop.f32.mrb[199].mxu1 }
 0x7e0   :  { %v5070_v4 = vpack.c.bf16 %v5027_v48, %v5024_v56 }
 0x7e2   :  { %4449 = vmatmul.mubr.bf16.gmra.mrb[20].mxu0 %v17718_v15  ;;  %v17753_v15 = vld [vmem:[%s23282_s2 + $0x224] ss:$8 sps:$4 sm:$0xff]  }
 0x7e3   :  { %4788 = vmatprep.mubr.bf16.mxu0 %v17723_v19 }
 0x7ea   :  { %4789 = vmatmul.mubr.bf16.vlgmr.msra.gmra.mrb[24].mxu0 %v17721_v62 }
 0x7eb   :  { %15113 = vmatpush3.bf16.msra.mxu0 %v5056_v14  ;;  %4796 = vmatprep.mubr.bf16.mxu0 %v17726_v16  ;;  %v17735_v14 = vld [vmem:[%s23282_s2 + $0x1c4] ss:$8 sps:$4 sm:$0xff]  }
 0x7ec   :  { %15114 = vmatprep.subr.bf16.mxu0 %v5065_v20 }
 0x7ef   :  { %15115 = vmatpush3.bf16.msra.mxu0 %v5057_v38  ;;  %v17730_v38 = vld [vmem:[%s23282_s2 + $0x1b0] ss:$8 sps:$4 sm:$0xff]  }
 0x7f0   :  { %15116 = vmatprep.subr.bf16.mxu0 %v5066_v44  ;;  %v17745_v44 = vld [vmem:[%s23282_s2 + $0x200] ss:$8 sps:$4 sm:$0xff]  }
 0x7f2   :  { %4797 = vmatmul.mubr.bf16.gmra.mrb[28].mxu0 %v17724_v40  ;;  %v17756_v40 = vld [vmem:[%s23282_s2 + $0x234] ss:$8 sps:$4 sm:$0xff]  }
 0x7f3   :  { %15117 = vmatpush3.bf16.msra.mxu0 %v5058_v32  ;;  %4804 = vmatprep.mubr.bf16.mxu0 %v17729_v58  ;;  %v17733_v32 = vld [vmem:[%s23282_s2 + $0x1c0] ss:$8 sps:$4 sm:$0xff]  }
 0x7f4   :  { %15118 = vmatprep.subr.bf16.mxu0 %v5067_v27 }
 0x7f7   :  { %15119 = vmatpush3.bf16.msra.mxu0 %v5059_v41 }
 0x7f8   :  { %15120 = vmatprep.subr.bf16.mxu0 %v5068_v7  ;;  %v17748_v7 = vld [vmem:[%s23282_s2 + $0x210] ss:$8 sps:$4 sm:$0xff]  }
 0x7fa   :  { %4805 = vmatmul.mubr.bf16.gmra.mrb[32].mxu0 %v17727_v63 }
 0x7fb   :  { %15121 = vmatpush3.bf16.msra.mxu0 %v5060_v52  ;;  %4812 = vmatprep.mubr.bf16.mxu0 %v17732_v49  ;;  %v17736_v52 = vld [vmem:[%s23282_s2 + $0x1d0] ss:$8 sps:$4 sm:$0xff]  }
 0x7fc   :  { %15122 = vmatprep.subr.bf16.mxu0 %v5069_v22 }
 0x7fd   :  { %v14804_v21 = vpop.f32.mrb[184].mxu0 }
 0x7fe   :  { %v14805_v61 = vpop.f32.mrb[185].mxu0 }
 0x7ff   :  { %15123 = vmatpush3.bf16.msra.mxu0 %v5061_v24  ;;  %v20373_v10 = vadd.f32 %v14805_v61, %v14804_v21  ;;  %v14807_v57 = vpop.f32.mrb[186].mxu0  ;;  %v3222_v21 = vld [vmem:[%s23286_s9] sm:$0xff]  ;;  %v3223_v61 = vld [vmem:[%s23286_s9 + $0x8] sm:$0xff] }
 0x800   :  { %15124 = vmatprep.subr.bf16.mxu0 %v5070_v4  ;;  %v14808_v12 = vpop.f32.mrb[187].mxu0  ;;  %v17751_v4 = vld [vmem:[%s23282_s2 + $0x220] ss:$8 sps:$4 sm:$0xff]  }
 0x801   :  { %v20375_v41 = vadd.f32 %v14808_v12, %v14807_v57  ;;  %v17754_v57 = vld [vmem:[%s23282_s2 + $0x230] ss:$8 sps:$4 sm:$0xff]   ;;  %v3665_v12 = vadd.f32 %v20373_v10, %v3222_v21 }
 0x802   :  { %4813 = vmatmul.mubr.bf16.gmra.mrb[36].mxu0 %v17730_v38  ;;  %v3224_v10 = vld [vmem:[%s23286_s9 + $0x10] sm:$0xff] }
 0x803   :  { %15125 = vmatpush3.bf16.msra.mxu0 %v5062_v30  ;;  %4820 = vmatprep.mubr.bf16.mxu0 %v17735_v14  ;;  %v17739_v30 = vld [vmem:[%s23282_s2 + $0x1e0] ss:$8 sps:$4 sm:$0xff]  }
 0x804   :  { %15126 = vmatprep.subr.bf16.mxu0 %v5071_v42 }
 0x805   :  { %v14810_v29 = vpop.f32.mrb[188].mxu0 }
 0x806   :  { %v14811_v28 = vpop.f32.mrb[189].mxu0 }
 0x807   :  { %15127 = vmatpush3.bf16.msra.mxu0 %v5063_v23  ;;  %v20389_v8 = vadd.f32 %v14811_v28, %v14810_v29  ;;  %v14813_v55 = vpop.f32.mrb[190].mxu0 }
 0x808   :  { %v14814_v24 = vpop.f32.mrb[191].mxu0 }
 0x809   :  { %v20391_v59 = vadd.f32 %v14814_v24, %v14813_v55  ;;  %v3666_v55 = vadd.f32 %v20375_v41, %v3223_v61  ;;  %v17757_v41 = vld [vmem:[%s23282_s2 + $0x240] ss:$8 sps:$4 sm:$0xff]  }
 0x80a   :  { %4821 = vmatmul.mubr.bf16.gmra.mrb[40].mxu0 %v17733_v32  ;;  %v17759_v32 = vld [vmem:[%s23282_s2 + $0x244] ss:$8 sps:$4 sm:$0xff]  }
 0x80b   :  { %4828 = vmatprep.mubr.bf16.mxu0 %v17738_v3 }
 0x80d   :  { %v14816_v54 = vpop.f32.mrb[192].mxu0 }
 0x80e   :  { %v14817_v11 = vpop.f32.mrb[193].mxu0 }
 0x80f   :  { %v20399_v9 = vadd.f32 %v14817_v11, %v14816_v54  ;;  %v14819_v17 = vpop.f32.mrb[194].mxu0 }
 0x810   :  { %v14820_v23 = vpop.f32.mrb[195].mxu0 }
 0x811   :  { %v20401_v37 = vadd.f32 %v14820_v23, %v14819_v17  ;;  %v3667_v23 = vadd.f32 %v20389_v8, %v3224_v10  ;;  %v3226_v8 = vld [vmem:[%s23286_s9 + $0x20] sm:$0xff] }
 0x812   :  { %4829 = vmatmul.mubr.bf16.gmra.mrb[44].mxu0 %v17736_v52 }
 0x813   :  { %4836 = vmatprep.mubr.bf16.mxu0 %v17741_v45  ;;  %v3225_v45 = vld [vmem:[%s23286_s9 + $0x18] sm:$0xff] }
 0x815   :  { %v14822_v18 = vpop.f32.mrb[196].mxu0 }
 0x816   :  { %v14823_v46 = vpop.f32.mrb[197].mxu0 }
 0x817   :  { %v20409_v36 = vadd.f32 %v14823_v46, %v14822_v18  ;;  %v14825_v35 = vpop.f32.mrb[198].mxu0 }
 0x818   :  { %v14826_v20 = vpop.f32.mrb[199].mxu0 }
 0x819   :  { %v20411_v13 = vadd.f32 %v14826_v20, %v14825_v35  ;;  %v3668_v35 = vadd.f32 %v20391_v59, %v3225_v45  ;;  %v17760_v59 = vld [vmem:[%s23282_s2 + $0x250] ss:$8 sps:$4 sm:$0xff]  }
 0x81a   :  { %4837 = vmatmul.mubr.bf16.gmra.mrb[48].mxu0 %v17739_v30  ;;  %v17762_v30 = vld [vmem:[%s23282_s2 + $0x254] ss:$8 sps:$4 sm:$0xff]  }
 0x81b   :  { %4844 = vmatprep.mubr.bf16.mxu0 %v17744_v60 }
 0x81d   :  { %v14828_v26 = vpop.f32.mrb[200].mxu0 }
 0x81e   :  { %v14829_v43 = vpop.f32.mrb[201].mxu0 }
 0x81f   :  { %v20419_v6 = vadd.f32 %v14829_v43, %v14828_v26  ;;  %v14831_v5 = vpop.f32.mrb[202].mxu0 }
 0x820   :  { %v14832_v27 = vpop.f32.mrb[203].mxu0 }
 0x821   :  { %v20421_v53 = vadd.f32 %v14832_v27, %v14831_v5  ;;  %v3669_v27 = vadd.f32 %v20399_v9, %v3226_v8  ;;  %v3228_v9 = vld [vmem:[%s23286_s9 + $0x30] sm:$0xff] }
 0x822   :  { %4845 = vmatmul.mubr.bf16.gmra.mrb[52].mxu0 %v17742_v34 }
 0x823   :  { %5184 = vmatprep.mubr.bf16.mxu0 %v17747_v51  ;;  %v3227_v51 = vld [vmem:[%s23286_s9 + $0x28] sm:$0xff] }
 0x825   :  { %v14834_v47 = vpop.f32.mrb[204].mxu0 }
 0x826   :  { %v14835_v2 = vpop.f32.mrb[205].mxu0 }
 0x827   :  { %v20429_v0 = vadd.f32 %v14835_v2, %v14834_v47  ;;  %v14837_v33 = vpop.f32.mrb[206].mxu0 }
 0x828   :  { %v14838_v22 = vpop.f32.mrb[207].mxu0 }
 0x829   :  { %v20431_v50 = vadd.f32 %v14838_v22, %v14837_v33  ;;  %v3670_v33 = vadd.f32 %v20401_v37, %v3227_v51  ;;  %v17763_v37 = vld [vmem:[%s23282_s2 + $0x260] ss:$8 sps:$4 sm:$0xff]  }
 0x82a   :  { %5185 = vmatmul.mubr.bf16.vlgmr.msra.gmra.mrb[56].mxu0 %v17745_v44  ;;  %v17765_v44 = vld [vmem:[%s23282_s2 + $0x264] ss:$8 sps:$4 sm:$0xff]  }
 0x82b   :  { %5192 = vmatprep.mubr.bf16.mxu0 %v17750_v31 }
 0x82d   :  { %v14840_v25 = vpop.f32.mrb[208].mxu0 }
 0x82e   :  { %v14841_v39 = vpop.f32.mrb[209].mxu0 }
 0x82f   :  { %v20436_v56 = vadd.f32 %v14841_v39, %v14840_v25  ;;  %v14843_v1 = vpop.f32.mrb[210].mxu0 }
 0x830   :  { %v14844_v42 = vpop.f32.mrb[211].mxu0 }
 0x831   :  { %v20441_v48 = vadd.f32 %v14844_v42, %v14843_v1  ;;  %v3229_v1 = vld [vmem:[%s23286_s9 + $0x38] sm:$0xff]  ;;  %v3671_v42 = vadd.f32 %v20409_v36, %v3228_v9  ;;  %v3230_v36 = vld [vmem:[%s23286_s9 + $0x40] sm:$0xff] }
 0x832   :  { %5193 = vmatmul.mubr.bf16.gmra.mrb[60].mxu0 %v17748_v7 }
 0x833   :  { %5200 = vmatprep.mubr.bf16.mxu0 %v17753_v15 }
 0x835   :  { %v14846_v19 = vpop.f32.mrb[212].mxu0 }
 0x836   :  { %v14847_v62 = vpop.f32.mrb[213].mxu0 }
 0x837   :  { %v14849_v16 = vpop.f32.mrb[214].mxu0  ;;  %v20449_v58 = vadd.f32 %v14847_v62, %v14846_v19 }
 0x838   :  { %v14850_v63 = vpop.f32.mrb[215].mxu0 }
 0x839   :  { %v20451_v49 = vadd.f32 %v14850_v63, %v14849_v16 }
 0x83a   :  { %5201 = vmatmul.mubr.bf16.gmra.mrb[64].mxu0 %v17751_v4  ;;  %v17768_v4 = vld [vmem:[%s23282_s2 + $0x274] ss:$8 sps:$4 sm:$0xff]  }
 0x83b   :  { %5208 = vmatprep.mubr.bf16.mxu0 %v17756_v40  ;;  %v3672_v40 = vadd.f32 %v20411_v13, %v3229_v1  ;;  %v17766_v13 = vld [vmem:[%s23282_s2 + $0x270] ss:$8 sps:$4 sm:$0xff]  }
 0x83d   :  { %v14885_v38 = vpop.f32.mrb[216].mxu0 }
 0x83e   :  { %v14886_v14 = vpop.f32.mrb[217].mxu0 }
 0x83f   :  { %v14888_v29 = vpop.f32.mrb[218].mxu0  ;;  %v14887_v28 = vadd.f32 %v14886_v14, %v14885_v38  ;;  %v3231_v14 = vld [vmem:[%s23286_s9 + $0x48] sm:$0xff] }
 0x840   :  { %v14889_v3 = vpop.f32.mrb[219].mxu0 }
 0x841   :  { %v20467_v24 = vadd.f32 %v14887_v28, %v3665_v12  ;;  %v14890_v54 = vadd.f32 %v14889_v3, %v14888_v29  ;;  %v3673_v12 = vadd.f32 %v20419_v6, %v3230_v36  ;;  %v3674_v3 = vadd.f32 %v20421_v53, %v3231_v14  ;;  %v3233_v6 = vld [vmem:[%s23286_s9 + $0x58] sm:$0xff] }
 0x842   :  { %5209 = vmatmul.mubr.bf16.gmra.mrb[68].mxu0 %v17754_v57 }
 0x843   :  { %5216 = vmatprep.mubr.bf16.mxu0 %v17759_v32  ;;  %v20469_v52 = vadd.f32 %v14890_v54, %v3666_v55 }
 0x845   :  { %v14891_v11 = vpop.f32.mrb[220].mxu0 }
 0x846   :  { %v14892_v17 = vpop.f32.mrb[221].mxu0 }
 0x847   :  { %v14894_v18 = vpop.f32.mrb[222].mxu0  ;;  %v14893_v46 = vadd.f32 %v14892_v17, %v14891_v11  ;;  %v3232_v11 = vld [vmem:[%s23286_s9 + $0x50] sm:$0xff] }
 0x848   :  { %v14895_v60 = vpop.f32.mrb[223].mxu0 }
 0x849   :  { %v20485_v20 = vadd.f32 %v14893_v46, %v3667_v23  ;;  %v14896_v26 = vadd.f32 %v14895_v60, %v14894_v18 }
 0x84a   :  { %5217 = vmatmul.mubr.bf16.gmra.mrb[72].mxu0 %v17757_v41  ;;  %v3675_v41 = vadd.f32 %v20429_v0, %v3232_v11 }
 0x84b   :  { %5224 = vmatprep.mubr.bf16.mxu0 %v17762_v30  ;;  %v20487_v34 = vadd.f32 %v14896_v26, %v3668_v35  ;;  %v3676_v30 = vadd.f32 %v20431_v50, %v3233_v6  ;;  %v3234_v26 = vld [vmem:[%s23286_s9 + $0x60] sm:$0xff] }
 0x84c   :  { %v3677_v51 = vadd.f32 %v20436_v56, %v3234_v26  ;;  %v3237_v56 = vld [vmem:[%s23286_s9 + $0x78] sm:$0xff] }
 0x84d   :  { %v14897_v43 = vpop.f32.mrb[224].mxu0 }
 0x84e   :  { %v14898_v5 = vpop.f32.mrb[225].mxu0 }
 0x84f   :  { %v14900_v47 = vpop.f32.mrb[226].mxu0  ;;  %v14899_v2 = vadd.f32 %v14898_v5, %v14897_v43  ;;  %v3235_v43 = vld [vmem:[%s23286_s9 + $0x68] sm:$0xff] }
 0x850   :  { %v14901_v31 = vpop.f32.mrb[227].mxu0 }
 0x851   :  { %v20503_v22 = vadd.f32 %v14899_v2, %v3669_v27  ;;  %v14902_v25 = vadd.f32 %v14901_v31, %v14900_v47  ;;  %v3678_v27 = vadd.f32 %v20441_v48, %v3235_v43  ;;  %v3236_v31 = vld [vmem:[%s23286_s9 + $0x70] sm:$0xff] }
 0x852   :  { %5225 = vmatmul.mubr.bf16.gmra.mrb[76].mxu0 %v17760_v59 }
 0x853   :  { %5232 = vmatprep.mubr.bf16.mxu0 %v17765_v44  ;;  %v20505_v7 = vadd.f32 %v14902_v25, %v3670_v33 }
 0x855   :  { %v14903_v39 = vpop.f32.mrb[228].mxu0 }
 0x856   :  { %v14904_v15 = vpop.f32.mrb[229].mxu0 }
 0x857   :  { %v14906_v19 = vpop.f32.mrb[230].mxu0  ;;  %v14905_v62 = vadd.f32 %v14904_v15, %v14903_v39  ;;  %v3679_v39 = vadd.f32 %v20449_v58, %v3236_v31 }
 0x858   :  { %v14907_v16 = vpop.f32.mrb[231].mxu0 }
 0x859   :  { %v20521_v63 = vadd.f32 %v14905_v62, %v3671_v42  ;;  %v14908_v21 = vadd.f32 %v14907_v16, %v14906_v19 }
 0x85a   :  { %5233 = vmatmul.mubr.bf16.gmra.mrb[80].mxu0 %v17763_v37  ;;  %v3680_v37 = vadd.f32 %v20451_v49, %v3237_v56 }
 0x85b   :  { %5240 = vmatprep.mubr.bf16.mxu0 %v17768_v4  ;;  %v20523_v38 = vadd.f32 %v14908_v21, %v3672_v40 }
 0x85d   :  { %v14909_v61 = vpop.f32.mrb[232].mxu0 }
 0x85e   :  { %v14910_v57 = vpop.f32.mrb[233].mxu0 }
 0x85f   :  { %v14912_v29 = vpop.f32.mrb[234].mxu0  ;;  %v14911_v32 = vadd.f32 %v14910_v57, %v14909_v61 }
 0x860   :  { %v14913_v28 = vpop.f32.mrb[235].mxu0 }
 0x861   :  { %v20536_v55 = vadd.f32 %v14911_v32, %v3673_v12  ;;  %v14914_v54 = vadd.f32 %v14913_v28, %v14912_v29 }
 0x862   :  { %5241 = vmatmul.mubr.bf16.gmra.mrb[84].mxu0 %v17766_v13 }
 0x863   :  { %v20538_v10 = vadd.f32 %v14914_v54, %v3674_v3 }
 0x865   :  { %v14915_v45 = vpop.f32.mrb[236].mxu0 }
 0x866   :  { %v14916_v17 = vpop.f32.mrb[237].mxu0 }
 0x867   :  { %v14918_v23 = vpop.f32.mrb[238].mxu0  ;;  %v14917_v53 = vadd.f32 %v14916_v17, %v14915_v45 }
 0x868   :  { %v14919_v18 = vpop.f32.mrb[239].mxu0 }
 0x869   :  { %v20548_v46 = vadd.f32 %v14917_v53, %v3675_v41  ;;  %v14920_v60 = vadd.f32 %v14919_v18, %v14918_v23 }
 0x86b   :  { %v20550_v35 = vadd.f32 %v14920_v60, %v3676_v30 }
 0x86d   :  { %v14921_v8 = vpop.f32.mrb[240].mxu0 }
 0x86e   :  { %v14922_v0 = vpop.f32.mrb[241].mxu0 }
 0x86f   :  { %v14924_v5 = vpop.f32.mrb[242].mxu0  ;;  %v14923_v59 = vadd.f32 %v14922_v0, %v14921_v8 }
 0x870   :  { %v14925_v50 = vpop.f32.mrb[243].mxu0 }
 0x871   :  { %v20560_v47 = vadd.f32 %v14923_v59, %v3677_v51  ;;  %v14926_v44 = vadd.f32 %v14925_v50, %v14924_v5 }
 0x873   :  { %v20562_v2 = vadd.f32 %v14926_v44, %v3678_v27 }
 0x875   :  { %v14927_v33 = vpop.f32.mrb[244].mxu0 }
 0x876   :  { %v14928_v25 = vpop.f32.mrb[245].mxu0 }
 0x877   :  { %v14930_v9 = vpop.f32.mrb[246].mxu0  ;;  %v14929_v1 = vadd.f32 %v14928_v25, %v14927_v33 }
 0x878   :  { %v14931_v48 = vpop.f32.mrb[247].mxu0 }
 0x879   :  { %v20571_v15 = vadd.f32 %v14929_v1, %v3679_v39  ;;  %v14932_v42 = vadd.f32 %v14931_v48, %v14930_v9 }
 0x87b   :  { %v20574_v19 = vadd.f32 %v14932_v42, %v3680_v37 }
 0x87d   :  { %v14966_v4 = vpop.f32.mrb[248].mxu0 }
 0x87e   :  { %v14967_v62 = vpop.f32.mrb[249].mxu0 }
 0x87f   :  { %v14969_v16 = vpop.f32.mrb[250].mxu0  ;;  %v14968_v40 = vadd.f32 %v14967_v62, %v14966_v4 }
 0x880   :  { %v14970_v21 = vpop.f32.mrb[251].mxu0 }
 0x881   :  { %v20577_v36 = vadd.f32 %v14968_v40, %v20467_v24  ;;  %v14971_v61 = vadd.f32 %v14970_v21, %v14969_v16  ;;  %v5295_v24 = vld [vmem:[%s23287_s28] sm:$0xf] }
 0x882   :  { %17366 = vmatprep.subr.msk.bf16.mxu1 %vm5321_vm2, %v5295_v24 }
 0x883   :  { %v20580_v58 = vadd.f32 %v14971_v61, %v20469_v52  ;;  %v13241_v52 = vld [vmem:[%s23287_s28 + $0x4] sm:$0xf] }
 0x884   :  { %17367 = vmatprep.subr.msk.bf16.mxu0 %vm5321_vm2, %v13241_v52 }
 0x885   :  { %v14972_v14 = vpop.f32.mrb[252].mxu0 }
 0x886   :  { %v14973_v57 = vpop.f32.mrb[253].mxu0 }
 0x887   :  { %v14975_v13 = vpop.f32.mrb[254].mxu0  ;;  %v14974_v12 = vadd.f32 %v14973_v57, %v14972_v14 }
 0x888   :  { %v14976_v49 = vpop.f32.mrb[255].mxu0 }
 0x889   :  { %v20583_v29 = vadd.f32 %v14974_v12, %v20485_v20  ;;  %v14977_v32 = vadd.f32 %v14976_v49, %v14975_v13  ;;  %v5323_v20 = vsel %vm5321_vm2, %v5295_v24, 0  ;;  %v20640_v24 = vld [vmem:[%s23287_s28 + $0x8] sm:$0xf] }
 0x88a   :  { %15900 = vmatpush3.bf16.msra.mxu1 %v5323_v20 }
 0x88b   :  { %v20586_v28 = vadd.f32 %v14977_v32, %v20487_v34  ;;  %v5520_v34 = vsel %vm5321_vm2, %v13241_v52, 0 }
 0x88c   :  { %15946 = vmatpush3.bf16.msra.mxu0 %v5520_v34 }
 0x88d   :  { %v14978_v3 = vpop.f32.mrb[0].mxu0  ;;  %17368 = vmatprep.subr.msk.bf16.mxu0 %vm5321_vm2, %v20640_v24 }
 0x88e   :  { %v14979_v54 = vpop.f32.mrb[1].mxu0 }
 0x88f   :  { %v14981_v11 = vpop.f32.mrb[2].mxu0  ;;  %v14980_v45 = vadd.f32 %v14979_v54, %v14978_v3 }
 0x890   :  { %v14982_v6 = vpop.f32.mrb[3].mxu0 }
 0x891   :  { %v20599_v17 = vadd.f32 %v14980_v45, %v20503_v22  ;;  %v14983_v41 = vadd.f32 %v14982_v6, %v14981_v11 }
 0x893   :  { %v20602_v23 = vadd.f32 %v14983_v41, %v20505_v7 }
 0x895   :  { %v14984_v53 = vpop.f32.mrb[4].mxu0 }
 0x896   :  { %v14985_v18 = vpop.f32.mrb[5].mxu0 }
 0x897   :  { %v14987_v30 = vpop.f32.mrb[6].mxu0  ;;  %v14986_v60 = vadd.f32 %v14985_v18, %v14984_v53 }
 0x898   :  { %v14988_v26 = vpop.f32.mrb[7].mxu0 }
 0x899   :  { %v20605_v8 = vadd.f32 %v14986_v60, %v20521_v63  ;;  %v14989_v43 = vadd.f32 %v14988_v26, %v14987_v30 }
 0x89b   :  { %v20608_v0 = vadd.f32 %v14989_v43, %v20523_v38 }
 0x89d   :  { %v14990_v51 = vpop.f32.mrb[8].mxu0 }
 0x89e   :  { %v14991_v5 = vpop.f32.mrb[9].mxu0 }
 0x89f   :  { %v14993_v22 = vpop.f32.mrb[10].mxu0  ;;  %v14992_v59 = vadd.f32 %v14991_v5, %v14990_v51 }
 0x8a0   :  { %v14994_v50 = vpop.f32.mrb[11].mxu0 }
 0x8a1   :  { %v20611_v7 = vadd.f32 %v14992_v59, %v20536_v55  ;;  %v14995_v27 = vadd.f32 %v14994_v50, %v14993_v22 }
 0x8a3   :  { %v20614_v44 = vadd.f32 %v14995_v27, %v20538_v10 }
 0x8a5   :  { %v14996_v31 = vpop.f32.mrb[12].mxu0 }
 0x8a6   :  { %v14997_v33 = vpop.f32.mrb[13].mxu0 }
 0x8a7   :  { %v14999_v63 = vpop.f32.mrb[14].mxu0  ;;  %v14998_v25 = vadd.f32 %v14997_v33, %v14996_v31 }
 0x8a8   :  { %v15000_v56 = vpop.f32.mrb[15].mxu0 }
 0x8a9   :  { %v20617_v38 = vadd.f32 %v14998_v25, %v20548_v46  ;;  %v15001_v9 = vadd.f32 %v15000_v56, %v14999_v63 }
 0x8ab   :  { %v20620_v39 = vadd.f32 %v15001_v9, %v20550_v35 }
 0x8ad   :  { %v15002_v1 = vpop.f32.mrb[16].mxu0 }
 0x8ae   :  { %v15003_v48 = vpop.f32.mrb[17].mxu0 }
 0x8af   :  { %v15005_v55 = vpop.f32.mrb[18].mxu0  ;;  %v15004_v37 = vadd.f32 %v15003_v48, %v15002_v1 }
 0x8b0   :  { %v15006_v42 = vpop.f32.mrb[19].mxu0 }
 0x8b1   :  { %v20623_v10 = vadd.f32 %v15004_v37, %v20560_v47  ;;  %v15007_v4 = vadd.f32 %v15006_v42, %v15005_v55 }
 0x8b3   :  { %v20626_v62 = vadd.f32 %v15007_v4, %v20562_v2 }
 0x8b5   :  { %v15008_v16 = vpop.f32.mrb[20].mxu0 }
 0x8b6   :  { %v15009_v40 = vpop.f32.mrb[21].mxu0 }
 0x8b7   :  { %v15011_v46 = vpop.f32.mrb[22].mxu0  ;;  %v15010_v21 = vadd.f32 %v15009_v40, %v15008_v16 }
 0x8b8   :  { %v15012_v61 = vpop.f32.mrb[23].mxu0 }
 0x8b9   :  { %v20629_v35 = vadd.f32 %v15010_v21, %v20571_v15  ;;  %v15013_v14 = vadd.f32 %v15012_v61, %v15011_v46 }
 0x8bb   :  { %v20632_v57 = vadd.f32 %v15013_v14, %v20574_v19 }
 0x8bd   :  { %v15047_v13 = vpop.f32.mrb[24].mxu0 }
 0x8be   :  { %v15048_v12 = vpop.f32.mrb[25].mxu0 }
 0x8bf   :  { %v15050_v47 = vpop.f32.mrb[26].mxu0  ;;  %v15049_v49 = vadd.f32 %v15048_v12, %v15047_v13 }
 0x8c0   :  { %v15051_v32 = vpop.f32.mrb[27].mxu0 }
 0x8c1   :  { %v20635_v2 = vadd.f32 %v15049_v49, %v20577_v36  ;;  %v15052_v3 = vadd.f32 %v15051_v32, %v15050_v47 }
 0x8c3   :  { %v20643_v15 = vadd.f32 %v15052_v3, %v20580_v58 }
 0x8c5   :  { %v15053_v19 = vpop.f32.mrb[28].mxu0 }
 0x8c6   :  { %v15054_v52 = vpop.f32.mrb[29].mxu0 }
 0x8c7   :  { %v15056_v54 = vpop.f32.mrb[30].mxu0  ;;  %v15055_v20 = vadd.f32 %v15054_v52, %v15053_v19 }
 0x8c8   :  { %v15057_v34 = vpop.f32.mrb[31].mxu0 }
 0x8c9   :  { %v20648_v36 = vadd.f32 %v15055_v20, %v20583_v29  ;;  %v15058_v11 = vadd.f32 %v15057_v34, %v15056_v54 }
 0x8cb   :  { %v20651_v45 = vadd.f32 %v15058_v11, %v20586_v28 }
 0x8cd   :  { %v15059_v6 = vpop.f32.mrb[32].mxu0 }
 0x8ce   :  { %v15060_v41 = vpop.f32.mrb[33].mxu0 }
 0x8cf   :  { %v15062_v53 = vpop.f32.mrb[34].mxu0  ;;  %v15061_v58 = vadd.f32 %v15060_v41, %v15059_v6 }
 0x8d0   :  { %v15063_v18 = vpop.f32.mrb[35].mxu0 }
 0x8d1   :  { %v20654_v30 = vadd.f32 %v15061_v58, %v20599_v17  ;;  %v15064_v60 = vadd.f32 %v15063_v18, %v15062_v53 }
 0x8d3   :  { %v20657_v26 = vadd.f32 %v15064_v60, %v20602_v23 }
 0x8d5   :  { %v15065_v43 = vpop.f32.mrb[36].mxu0 }
 0x8d6   :  { %v15066_v51 = vpop.f32.mrb[37].mxu0 }
 0x8d7   :  { %v15068_v29 = vpop.f32.mrb[38].mxu0  ;;  %v15067_v5 = vadd.f32 %v15066_v51, %v15065_v43 }
 0x8d8   :  { %v15069_v22 = vpop.f32.mrb[39].mxu0 }
 0x8d9   :  { %v20660_v28 = vadd.f32 %v15067_v5, %v20605_v8  ;;  %v15070_v59 = vadd.f32 %v15069_v22, %v15068_v29 }
 0x8db   :  { %v20663_v50 = vadd.f32 %v15070_v59, %v20608_v0 }
 0x8dd   :  { %v15071_v27 = vpop.f32.mrb[40].mxu0 }
 0x8de   :  { %v15072_v31 = vpop.f32.mrb[41].mxu0 }
 0x8df   :  { %v15073_v17 = vadd.f32 %v15072_v31, %v15071_v27  ;;  %v15074_v33 = vpop.f32.mrb[42].mxu0 }
 0x8e0   :  { %v15075_v63 = vpop.f32.mrb[43].mxu0 }
 0x8e1   :  { %v20666_v23 = vadd.f32 %v15073_v17, %v20611_v7  ;;  %v15076_v25 = vadd.f32 %v15075_v63, %v15074_v33 }
 0x8e3   :  { %v20669_v56 = vadd.f32 %v15076_v25, %v20614_v44 }
 0x8e5   :  { %v15077_v9 = vpop.f32.mrb[44].mxu0 }
 0x8e6   :  { %v15078_v1 = vpop.f32.mrb[45].mxu0 }
 0x8e7   :  { %v15079_v8 = vadd.f32 %v15078_v1, %v15077_v9  ;;  %v15080_v48 = vpop.f32.mrb[46].mxu0 }
 0x8e8   :  { %v15081_v55 = vpop.f32.mrb[47].mxu0 }
 0x8e9   :  { %v20672_v0 = vadd.f32 %v15079_v8, %v20617_v38  ;;  %v15082_v37 = vadd.f32 %v15081_v55, %v15080_v48 }
 0x8eb   :  { %v20675_v42 = vadd.f32 %v15082_v37, %v20620_v39 }
 0x8ed   :  { %v15083_v4 = vpop.f32.mrb[48].mxu0 }
 0x8ee   :  { %v15084_v16 = vpop.f32.mrb[49].mxu0 }
 0x8ef   :  { %v15085_v7 = vadd.f32 %v15084_v16, %v15083_v4  ;;  %v15086_v40 = vpop.f32.mrb[50].mxu0 }
 0x8f0   :  { %v15087_v46 = vpop.f32.mrb[51].mxu0 }
 0x8f1   :  { %v20678_v44 = vadd.f32 %v15085_v7, %v20623_v10  ;;  %v15088_v21 = vadd.f32 %v15087_v46, %v15086_v40 }
 0x8f3   :  { %v20681_v61 = vadd.f32 %v15088_v21, %v20626_v62 }
 0x8f5   :  { %v15089_v14 = vpop.f32.mrb[52].mxu0 }
 0x8f6   :  { %v15090_v13 = vpop.f32.mrb[53].mxu0 }
 0x8f7   :  { %v15091_v38 = vadd.f32 %v15090_v13, %v15089_v14  ;;  %v15092_v12 = vpop.f32.mrb[54].mxu0 }
 0x8f8   :  { %v15093_v47 = vpop.f32.mrb[55].mxu0 }
 0x8f9   :  { %v20684_v39 = vadd.f32 %v15091_v38, %v20629_v35  ;;  %v15094_v49 = vadd.f32 %v15093_v47, %v15092_v12 }
 0x8fb   :  { %v20687_v32 = vadd.f32 %v15094_v49, %v20632_v57 }
 0x8fd   :  { %v15128_v3 = vpop.f32.mrb[56].mxu0 }
 0x8fe   :  { %v15129_v19 = vpop.f32.mrb[57].mxu0 }
 0x8ff   :  { %v15130_v10 = vadd.f32 %v15129_v19, %v15128_v3  ;;  %v15131_v52 = vpop.f32.mrb[58].mxu0 }
 0x900   :  { %v15132_v54 = vpop.f32.mrb[59].mxu0 }
 0x901   :  { %v5249_v62 = vadd.f32 %v15130_v10, %v20635_v2  ;;  %v15133_v20 = vadd.f32 %v15132_v54, %v15131_v52 }
 0x903   :  { %v5250_v34 = vadd.f32 %v15133_v20, %v20643_v15  ;;  %v5265_v11 = vmax.f32 %v5249_v62, 0.0 }
 0x905   :  { %v5266_v6 = vmax.f32 %v5250_v34, 0.0  ;;  %v15134_v41 = vpop.f32.mrb[60].mxu0 }
 0x906   :  { %v15135_v53 = vpop.f32.mrb[61].mxu0 }
 0x907   :  { %v20691_v35 = vpack.c.bf16 %v5266_v6, %v5265_v11  ;;  %v15136_v58 = vadd.f32 %v15135_v53, %v15134_v41  ;;  %v15137_v57 = vpop.f32.mrb[62].mxu0 }
 0x908   :  { %v15138_v18 = vpop.f32.mrb[63].mxu0 }
 0x909   :  { %v5251_v60 = vadd.f32 %v15136_v58, %v20648_v36  ;;  %v15139_v43 = vadd.f32 %v15138_v18, %v15137_v57  ;;  %15901 = vmatprep.mubr.msk.bf16.mxu1 %vm5296_vm3, %v20691_v35  ;;  %15947 = vmatprep.mubr.msk.bf16.mxu0 %vm5296_vm3, %v20691_v35  ;;  %v5718_v36 = vsel %vm5321_vm2, %v20640_v24, 0 }
 0x90b   :  { %v5252_v2 = vadd.f32 %v15139_v43, %v20651_v45  ;;  %v5267_v15 = vmax.f32 %v5251_v60, 0.0 }
 0x90d   :  { %v5268_v51 = vmax.f32 %v5252_v2, 0.0  ;;  %v15140_v29 = vpop.f32.mrb[64].mxu0 }
 0x90e   :  { %v15141_v5 = vpop.f32.mrb[65].mxu0 }
 0x90f   :  { %v20699_v22 = vpack.c.bf16 %v5268_v51, %v5267_v15  ;;  %v15142_v59 = vadd.f32 %v15141_v5, %v15140_v29  ;;  %v15143_v27 = vpop.f32.mrb[66].mxu0 }
 0x910   :  { %v15144_v31 = vpop.f32.mrb[67].mxu0 }
 0x911   :  { %v5253_v17 = vadd.f32 %v15142_v59, %v20654_v30  ;;  %v15145_v33 = vadd.f32 %v15144_v31, %v15143_v27  ;;  %15902 = vmatmul.mubr.msk.bf16.vlgmr.msra.gmra.mrb[200].mxu1 %vm5296_vm3, %v20699_v22  ;;  %15948 = vmatmul.mubr.msk.bf16.vlgmr.msra.gmra.mrb[88].mxu0 %vm5296_vm3, %v20699_v22 }
 0x912   :  { %15992 = vmatpush3.bf16.msra.mxu0 %v5718_v36 }
 0x913   :  { %v5254_v45 = vadd.f32 %v15145_v33, %v20657_v26  ;;  %v5269_v63 = vmax.f32 %v5253_v17, 0.0 }
 0x915   :  { %v5270_v25 = vmax.f32 %v5254_v45, 0.0  ;;  %v15146_v9 = vpop.f32.mrb[68].mxu0 }
 0x916   :  { %v15147_v1 = vpop.f32.mrb[69].mxu0 }
 0x917   :  { %v20709_v8 = vpack.c.bf16 %v5270_v25, %v5269_v63  ;;  %v15148_v24 = vadd.f32 %v15147_v1, %v15146_v9  ;;  %v15149_v48 = vpop.f32.mrb[70].mxu0 }
 0x918   :  { %v15150_v55 = vpop.f32.mrb[71].mxu0 }
 0x919   :  { %v5255_v30 = vadd.f32 %v15148_v24, %v20660_v28  ;;  %v15151_v37 = vadd.f32 %v15150_v55, %v15149_v48  ;;  %15905 = vmatprep.mubr.msk.bf16.mxu1 %vm5296_vm3, %v20709_v8  ;;  %15951 = vmatprep.mubr.msk.bf16.mxu0 %vm5296_vm3, %v20709_v8 }
 0x91b   :  { %v5256_v26 = vadd.f32 %v15151_v37, %v20663_v50  ;;  %v5271_v4 = vmax.f32 %v5255_v30, 0.0 }
 0x91d   :  { %v5272_v16 = vmax.f32 %v5256_v26, 0.0  ;;  %v15152_v7 = vpop.f32.mrb[72].mxu0 }
 0x91e   :  { %v15153_v40 = vpop.f32.mrb[73].mxu0 }
 0x91f   :  { %v5284_v46 = vpack.c.bf16 %v5272_v16, %v5271_v4  ;;  %v15154_v21 = vadd.f32 %v15153_v40, %v15152_v7  ;;  %v15155_v14 = vpop.f32.mrb[74].mxu0 }
 0x920   :  { %v15156_v13 = vpop.f32.mrb[75].mxu0 }
 0x921   :  { %v5257_v38 = vadd.f32 %v15154_v21, %v20666_v23  ;;  %v15157_v28 = vadd.f32 %v15156_v13, %v15155_v14  ;;  %15906 = vmatmul.mubr.msk.bf16.gmra.mrb[204].mxu1 %vm5296_vm3, %v5284_v46  ;;  %15952 = vmatmul.mubr.msk.bf16.gmra.mrb[92].mxu0 %vm5296_vm3, %v5284_v46 }
 0x923   :  { %v5258_v12 = vadd.f32 %v15157_v28, %v20669_v56  ;;  %v5273_v47 = vmax.f32 %v5257_v38, 0.0 }
 0x925   :  { %v5274_v49 = vmax.f32 %v5258_v12, 0.0  ;;  %v15158_v50 = vpop.f32.mrb[76].mxu0 }
 0x926   :  { %v15159_v3 = vpop.f32.mrb[77].mxu0 }
 0x927   :  { %v5285_v19 = vpack.c.bf16 %v5274_v49, %v5273_v47  ;;  %v15160_v10 = vadd.f32 %v15159_v3, %v15158_v50  ;;  %v15161_v52 = vpop.f32.mrb[78].mxu0 }
 0x928   :  { %v15162_v54 = vpop.f32.mrb[79].mxu0 }
 0x929   :  { %v5259_v62 = vadd.f32 %v15160_v10, %v20672_v0  ;;  %v15163_v20 = vadd.f32 %v15162_v54, %v15161_v52  ;;  %15909 = vmatprep.mubr.msk.bf16.mxu1 %vm5296_vm3, %v5285_v19  ;;  %15955 = vmatprep.mubr.msk.bf16.mxu0 %vm5296_vm3, %v5285_v19 }
 0x92b   :  { %v5260_v23 = vadd.f32 %v15163_v20, %v20675_v42  ;;  %v5275_v34 = vmax.f32 %v5259_v62, 0.0 }
 0x92d   :  { %v5276_v11 = vmax.f32 %v5260_v23, 0.0  ;;  %v15164_v56 = vpop.f32.mrb[80].mxu0 }
 0x92e   :  { %v15165_v6 = vpop.f32.mrb[81].mxu0 }
 0x92f   :  { %v5286_v41 = vpack.c.bf16 %v5276_v11, %v5275_v34  ;;  %v15166_v53 = vadd.f32 %v15165_v6, %v15164_v56  ;;  %v15167_v58 = vpop.f32.mrb[82].mxu0 }
 0x930   :  { %v15168_v57 = vpop.f32.mrb[83].mxu0 }
 0x931   :  { %v5261_v18 = vadd.f32 %v15166_v53, %v20678_v44  ;;  %v15169_v60 = vadd.f32 %v15168_v57, %v15167_v58  ;;  %15910 = vmatmul.mubr.msk.bf16.gmra.mrb[208].mxu1 %vm5296_vm3, %v5286_v41  ;;  %15956 = vmatmul.mubr.msk.bf16.gmra.mrb[96].mxu0 %vm5296_vm3, %v5286_v41 }
 0x933   :  { %v5262_v0 = vadd.f32 %v15169_v60, %v20681_v61  ;;  %v5277_v43 = vmax.f32 %v5261_v18, 0.0 }
 0x935   :  { %v5278_v2 = vmax.f32 %v5262_v0, 0.0  ;;  %v15170_v42 = vpop.f32.mrb[84].mxu0 }
 0x936   :  { %v15171_v15 = vpop.f32.mrb[85].mxu0 }
 0x937   :  { %v5287_v51 = vpack.c.bf16 %v5278_v2, %v5277_v43  ;;  %v15172_v29 = vadd.f32 %v15171_v15, %v15170_v42  ;;  %v15173_v5 = vpop.f32.mrb[86].mxu0  ;;  %v17769_v2 = vld [vmem:[%s23288_s3] sm:$0xff]  }
 0x938   :  { %v15174_v59 = vpop.f32.mrb[87].mxu0 }
 0x939   :  { %v5263_v27 = vadd.f32 %v15172_v29, %v20684_v39  ;;  %v15175_v36 = vadd.f32 %v15174_v59, %v15173_v5  ;;  %15913 = vmatprep.mubr.msk.bf16.mxu1 %vm5296_vm3, %v5287_v51  ;;  %15959 = vmatprep.mubr.msk.bf16.mxu0 %vm5296_vm3, %v5287_v51  ;;  %v18115_v39 = vmov 0.0  }
 0x93a   :  { %15917 = vmatprep.subr.bf16.mxu1 %v18115_v39  ;;  %16037 = vmatprep.subr.bf16.mxu0 %v18115_v39 }
 0x93b   :  { %v5264_v44 = vadd.f32 %v15175_v36, %v20687_v32  ;;  %v5279_v31 = vmax.f32 %v5263_v27, 0.0  ;;  %v17770_v27 = vld [vmem:[%s23288_s3 + $0x8] sm:$0xff]  }
 0x93d   :  { %v5280_v17 = vmax.f32 %v5264_v44, 0.0 }
 0x93f   :  { %v5288_v61 = vpack.c.bf16 %v5280_v17, %v5279_v31 }
 0x941   :  { %15914 = vmatmul.mubr.msk.bf16.gmra.mrb[212].mxu1 %vm5296_vm3, %v5288_v61  ;;  %15960 = vmatmul.mubr.msk.bf16.gmra.mrb[100].mxu0 %vm5296_vm3, %v5288_v61 }
 0x942   :  { %15993 = vmatprep.mubr.msk.bf16.mxu0 %vm5296_vm3, %v20691_v35  ;;  %15933 = vmatprep.mubr.msk.bf16.mxu1 %vm18116_vm4, %v18115_v39 }
 0x949   :  { %15994 = vmatmul.mubr.msk.bf16.vlgmr.msra.gmra.mrb[104].mxu0 %vm5296_vm3, %v20699_v22 }
 0x94a   :  { %15997 = vmatprep.mubr.msk.bf16.mxu0 %vm5296_vm3, %v20709_v8 }
 0x951   :  { %15998 = vmatmul.mubr.msk.bf16.gmra.mrb[108].mxu0 %vm5296_vm3, %v5284_v46 }
 0x952   :  { %16001 = vmatprep.mubr.msk.bf16.mxu0 %vm5296_vm3, %v5285_v19 }
 0x959   :  { %16002 = vmatmul.mubr.msk.bf16.gmra.mrb[112].mxu0 %vm5296_vm3, %v5286_v41 }
 0x95a   :  { %16005 = vmatprep.mubr.msk.bf16.mxu0 %vm5296_vm3, %v5287_v51 }
 0x961   :  { %16006 = vmatmul.mubr.msk.bf16.gmra.mrb[116].mxu0 %vm5296_vm3, %v5288_v61 }
 0x962   :  { %16039 = vmatprep.mubr.msk.bf16.mxu0 %vm18116_vm4, %v18115_v39 }
 0x9e4   :  { %v15903_v32 = vpop.f32.mrb[200].mxu1  ;;  %v20752_v35 = vpop.f32.mrb[88].mxu0 }
 0x9e5   :  { %v5359_v22 = vpop.f32.mrb[201].mxu1  ;;  %v20754_v33 = vpop.f32.mrb[89].mxu0 }
 0x9e6   :  { %v15904_v45 = vpop.f32.mrb[202].mxu1  ;;  %v20756_v63 = vpop.f32.mrb[90].mxu0 }
 0x9e7   :  { %v5429_v25 = vpack.c.bf16 %v15904_v45, %v15903_v32  ;;  %v5627_v9 = vpack.c.bf16 %v20756_v63, %v20752_v35  ;;  %v5362_v1 = vpop.f32.mrb[203].mxu1  ;;  %v20760_v8 = vpop.f32.mrb[91].mxu0  ;;  %v17771_v35 = vld [vmem:[%s23288_s3 + $0x10] sm:$0xff]  }
 0x9e8   :  { %v5428_v24 = vpack.c.bf16 %v5362_v1, %v5359_v22  ;;  %v5626_v48 = vpack.c.bf16 %v20760_v8, %v20754_v33 }
 0x9ea   :  { %15918 = vmatpush3.bf16.msra.mxu1 %v5428_v24 }
 0x9eb   :  { %15919 = vmatprep.subr.bf16.mxu1 %v18115_v39 }
 0x9ee   :  { %15920 = vmatpush3.bf16.msra.mxu1 %v5429_v25 }
 0x9ef   :  { %15921 = vmatprep.subr.bf16.mxu1 %v18115_v39 }
 0x9f4   :  { %v15907_v55 = vpop.f32.mrb[204].mxu1  ;;  %v20766_v30 = vpop.f32.mrb[92].mxu0 }
 0x9f5   :  { %v5375_v37 = vpop.f32.mrb[205].mxu1  ;;  %v20768_v26 = vpop.f32.mrb[93].mxu0 }
 0x9f6   :  { %v15908_v4 = vpop.f32.mrb[206].mxu1  ;;  %v20770_v16 = vpop.f32.mrb[94].mxu0 }
 0x9f7   :  { %v5431_v7 = vpack.c.bf16 %v15908_v4, %v15907_v55  ;;  %v5629_v40 = vpack.c.bf16 %v20770_v16, %v20766_v30  ;;  %v5378_v46 = vpop.f32.mrb[207].mxu1  ;;  %v5575_v21 = vpop.f32.mrb[95].mxu0  ;;  %v17772_v55 = vld [vmem:[%s23288_s3 + $0x18] sm:$0xff]   ;;  %v17773_v30 = vld [vmem:[%s23288_s3 + $0x20] sm:$0xff]  }
 0x9f8   :  { %v5430_v14 = vpack.c.bf16 %v5378_v46, %v5375_v37  ;;  %v5628_v13 = vpack.c.bf16 %v5575_v21, %v20768_v26  ;;  %v17774_v37 = vld [vmem:[%s23288_s3 + $0x28] sm:$0xff]   ;;  %v17775_v26 = vld [vmem:[%s23288_s3 + $0x30] sm:$0xff]   ;;  %v17776_v4 = vld [vmem:[%s23288_s3 + $0x38] sm:$0xff]  }
 0x9f9   :  { %v17777_v16 = vld [vmem:[%s23288_s3 + $0x40] sm:$0xff]  }
 0x9fa   :  { %15922 = vmatpush3.bf16.msra.mxu1 %v5430_v14  ;;  %v5925_v46 = vld [vmem:[%s23289_s11] sm:$0x3] }
 0x9fb   :  { %15923 = vmatprep.subr.bf16.mxu1 %v18115_v39 }
 0x9fe   :  { %15924 = vmatpush3.bf16.msra.mxu1 %v5431_v7  ;;  %v18117_v7 = vmov 65535  }
 0x9ff   :  { %15925 = vmatprep.subr.bf16.mxu1 %v18115_v39 }
 0xa04   :  { %v15911_v38 = vpop.f32.mrb[208].mxu1  ;;  %v20777_v28 = vpop.f32.mrb[96].mxu0 }
 0xa05   :  { %v5391_v12 = vpop.f32.mrb[209].mxu1  ;;  %v20779_v47 = vpop.f32.mrb[97].mxu0 }
 0xa06   :  { %v15912_v49 = vpop.f32.mrb[210].mxu1  ;;  %v20781_v50 = vpop.f32.mrb[98].mxu0 }
 0xa07   :  { %v5433_v3 = vpack.c.bf16 %v15912_v49, %v15911_v38  ;;  %v5631_v19 = vpack.c.bf16 %v20781_v50, %v20777_v28  ;;  %v5394_v10 = vpop.f32.mrb[211].mxu1  ;;  %v5591_v52 = vpop.f32.mrb[99].mxu0  ;;  %v5290_v28 = vld [vmem:[%s23290_s30 + $0x8] sm:$0xff] }
 0xa08   :  { %v5432_v54 = vpack.c.bf16 %v5394_v10, %v5391_v12  ;;  %v5630_v62 = vpack.c.bf16 %v5591_v52, %v20779_v47 }
 0xa0a   :  { %15926 = vmatpush3.bf16.msra.mxu1 %v5432_v54  ;;  %v5291_v54 = vld [vmem:[%s23290_s30 + $0x10] sm:$0xff] }
 0xa0b   :  { %15927 = vmatprep.subr.bf16.mxu1 %v18115_v39 }
 0xa0e   :  { %15928 = vmatpush3.bf16.msra.mxu1 %v5433_v3 }
 0xa0f   :  { %15929 = vmatprep.subr.bf16.mxu1 %v18115_v39 }
 0xa14   :  { %v15915_v20 = vpop.f32.mrb[212].mxu1  ;;  %v20788_v23 = vpop.f32.mrb[100].mxu0 }
 0xa15   :  { %v5407_v34 = vpop.f32.mrb[213].mxu1  ;;  %v5604_v11 = vpop.f32.mrb[101].mxu0 }
 0xa16   :  { %v15916_v56 = vpop.f32.mrb[214].mxu1  ;;  %v15962_v6 = vpop.f32.mrb[102].mxu0 }
 0xa17   :  { %v5435_v41 = vpack.c.bf16 %v15916_v56, %v15915_v20  ;;  %v5633_v53 = vpack.c.bf16 %v15962_v6, %v20788_v23  ;;  %v5410_v58 = vpop.f32.mrb[215].mxu1  ;;  %v5607_v57 = vpop.f32.mrb[103].mxu0 }
 0xa18   :  { %v5434_v18 = vpack.c.bf16 %v5410_v58, %v5407_v34  ;;  %v5632_v60 = vpack.c.bf16 %v5607_v57, %v5604_v11  ;;  %v5292_v34 = vld [vmem:[%s23290_s30 + $0x18] sm:$0xff] }
 0xa1a   :  { %15930 = vmatpush3.bf16.msra.mxu1 %v5434_v18  ;;  %v5293_v18 = vld [vmem:[%s23290_s30 + $0x20] sm:$0xff] }
 0xa1b   :  { %15931 = vmatprep.subr.bf16.mxu1 %v18115_v39 }
 0xa1c   :  { %v15995_v0 = vpop.f32.mrb[104].mxu0 }
 0xa1d   :  { %v5754_v43 = vpop.f32.mrb[105].mxu0 }
 0xa1e   :  { %15932 = vmatpush3.bf16.msra.mxu1 %v5435_v41  ;;  %v15996_v42 = vpop.f32.mrb[106].mxu0 }
 0xa1f   :  { %v5825_v15 = vpack.c.bf16 %v15996_v42, %v15995_v0  ;;  %v5757_v51 = vpop.f32.mrb[107].mxu0  ;;  %15963 = vmatprep.subr.bf16.mxu1 %v18115_v39 }
 0xa20   :  { %v5824_v29 = vpack.c.bf16 %v5757_v51, %v5754_v43  ;;  %v5294_v43 = vld [vmem:[%s23290_s30 + $0x28] sm:$0xff] }
 0xa21   :  { %15934 = vmatmul.mubr.bf16.vlgmr.msra.gmra.mrb[216].mxu1 %v17769_v2 }
 0xa22   :  { %15964 = vmatpush3.bf16.msra.mxu1 %v5626_v48  ;;  %15937 = vmatprep.mubr.msk.bf16.mxu1 %vm18116_vm4, %v18115_v39 }
 0xa23   :  { %15965 = vmatprep.subr.bf16.mxu1 %v18115_v39 }
 0xa24   :  { %v15999_v5 = vpop.f32.mrb[108].mxu0 }
 0xa25   :  { %v5770_v59 = vpop.f32.mrb[109].mxu0 }
 0xa26   :  { %15966 = vmatpush3.bf16.msra.mxu1 %v5627_v9  ;;  %v16000_v36 = vpop.f32.mrb[110].mxu0 }
 0xa27   :  { %v5827_v44 = vpack.c.bf16 %v16000_v36, %v15999_v5  ;;  %v5773_v31 = vpop.f32.mrb[111].mxu0  ;;  %15967 = vmatprep.subr.bf16.mxu1 %v18115_v39  ;;  %v17778_v36 = vld [vmem:[%s23227_s10] sm:$0xff]  }
 0xa28   :  { %v5826_v17 = vpack.c.bf16 %v5773_v31, %v5770_v59 }
 0xa29   :  { %15938 = vmatmul.mubr.bf16.gmra.mrb[220].mxu1 %v17770_v27 }
 0xa2a   :  { %15968 = vmatpush3.bf16.msra.mxu1 %v5628_v13  ;;  %15941 = vmatprep.mubr.msk.bf16.mxu1 %vm18116_vm4, %v18115_v39  ;;  %v5289_v13 = vld [vmem:[%s23290_s30] sm:$0xff] }
 0xa2b   :  { %15969 = vmatprep.subr.bf16.mxu1 %v18115_v39 }
 0xa2c   :  { %v16003_v61 = vpop.f32.mrb[112].mxu0 }
 0xa2d   :  { %v5786_v32 = vpop.f32.mrb[113].mxu0 }
 0xa2e   :  { %15970 = vmatpush3.bf16.msra.mxu1 %v5629_v40  ;;  %v16004_v22 = vpop.f32.mrb[114].mxu0  ;;  %v5938_v40 = vsel %vm5936_vm5, 4294967295, %v18117_v7 }
 0xa2f   :  { %v5829_v33 = vpack.c.bf16 %v16004_v22, %v16003_v61  ;;  %v5789_v45 = vpop.f32.mrb[115].mxu0  ;;  %15971 = vmatprep.subr.bf16.mxu1 %v18115_v39  ;;  %v20866_v21 = vsel %vm5937_vm6, %v5938_v40, 0 }
 0xa30   :  { %v5828_v63 = vpack.c.bf16 %v5789_v45, %v5786_v32  ;;  %v5941_v14 = vand.u32 %v20866_v21, %v5925_v46 }
 0xa31   :  { %15942 = vmatmul.mubr.bf16.gmra.mrb[224].mxu1 %v17771_v35 }
 0xa32   :  { %15972 = vmatpush3.bf16.msra.mxu1 %v5630_v62  ;;  %15979 = vmatprep.mubr.msk.bf16.mxu1 %vm18116_vm4, %v18115_v39 }
 0xa33   :  { %15973 = vmatprep.subr.bf16.mxu1 %v18115_v39  ;;  %16038 = vmatpush3.bf16.msra.mxu0 %v5941_v14 }
 0xa34   :  { %v16007_v25 = vpop.f32.mrb[116].mxu0  ;;  %16061 = vmatprep.subr.bf16.mxu0 %v18115_v39 }
 0xa35   :  { %v5802_v9 = vpop.f32.mrb[117].mxu0 }
 0xa36   :  { %15974 = vmatpush3.bf16.msra.mxu1 %v5631_v19  ;;  %v16008_v1 = vpop.f32.mrb[118].mxu0  ;;  %v13284_v19 = vld [vmem:[%s23289_s11 + $0x2] sm:$0x3] }
 0xa37   :  { %v5831_v8 = vpack.c.bf16 %v16008_v1, %v16007_v25  ;;  %v5805_v24 = vpop.f32.mrb[119].mxu0  ;;  %15975 = vmatprep.subr.bf16.mxu1 %v18115_v39  ;;  %v6075_v62 = vand.u32 %v13284_v19, %v20866_v21  ;;  %v17782_v19 = vld [vmem:[%s23227_s10 + $0x14] ss:$0 sps:$4 sm:$0x33]  }
 0xa38   :  { %v5830_v48 = vpack.c.bf16 %v5805_v24, %v5802_v9 }
 0xa3a   :  { %15976 = vmatpush3.bf16.msra.mxu1 %v5632_v60 }
 0xa3b   :  { %15977 = vmatprep.subr.bf16.mxu1 %v18115_v39 }
 0xa3e   :  { %15978 = vmatpush3.bf16.msra.mxu1 %v5633_v53 }
 0xa3f   :  { %16009 = vmatprep.subr.bf16.mxu1 %v18115_v39 }
 0xa41   :  { %15980 = vmatmul.mubr.bf16.vlgmr.msra.gmra.mrb[216].mxu1 %v17772_v55  ;;  %v17781_v55 = vld [vmem:[%s23227_s10 + $0xc] sm:$0xff]  }
 0xa42   :  { %16010 = vmatpush3.bf16.msra.mxu1 %v5824_v29  ;;  %15983 = vmatprep.mubr.msk.bf16.mxu1 %vm18116_vm4, %v18115_v39 }
 0xa43   :  { %16011 = vmatprep.subr.bf16.mxu1 %v18115_v39 }
 0xa46   :  { %16012 = vmatpush3.bf16.msra.mxu1 %v5825_v15 }
 0xa47   :  { %16013 = vmatprep.subr.bf16.mxu1 %v18115_v39 }
 0xa49   :  { %15984 = vmatmul.mubr.bf16.gmra.mrb[220].mxu1 %v17773_v30 }
 0xa4a   :  { %16014 = vmatpush3.bf16.msra.mxu1 %v5826_v17  ;;  %15987 = vmatprep.mubr.msk.bf16.mxu1 %vm18116_vm4, %v18115_v39 }
 0xa4b   :  { %16015 = vmatprep.subr.bf16.mxu1 %v18115_v39 }
 0xa4e   :  { %16016 = vmatpush3.bf16.msra.mxu1 %v5827_v44 }
 0xa4f   :  { %16017 = vmatprep.subr.bf16.mxu1 %v18115_v39 }
 0xa51   :  { %15988 = vmatmul.mubr.bf16.gmra.mrb[224].mxu1 %v17774_v37 }
 0xa52   :  { %16018 = vmatpush3.bf16.msra.mxu1 %v5828_v63  ;;  %16025 = vmatprep.mubr.msk.bf16.mxu1 %vm18116_vm4, %v18115_v39 }
 0xa53   :  { %16019 = vmatprep.subr.bf16.mxu1 %v18115_v39 }
 0xa56   :  { %16020 = vmatpush3.bf16.msra.mxu1 %v5829_v33 }
 0xa57   :  { %16021 = vmatprep.subr.bf16.mxu1 %v18115_v39 }
 0xa5a   :  { %16022 = vmatpush3.bf16.msra.mxu1 %v5830_v48  ;;  %v17779_v48 = vld [vmem:[%s23227_s10 + $0x8] ss:$0 sps:$4 sm:$0x33]  }
 0xa5b   :  { %16023 = vmatprep.subr.bf16.mxu1 %v18115_v39 }
 0xa5e   :  { %16024 = vmatpush3.bf16.msra.mxu1 %v5831_v8 }
 0xa61   :  { %16026 = vmatmul.mubr.bf16.vlgmr.msra.gmra.mrb[216].mxu1 %v17775_v26 }
 0xa62   :  { %16029 = vmatprep.mubr.msk.bf16.mxu1 %vm18116_vm4, %v18115_v39 }
 0xa69   :  { %16030 = vmatmul.mubr.bf16.gmra.mrb[220].mxu1 %v17776_v4 }
 0xa6a   :  { %16033 = vmatprep.mubr.msk.bf16.mxu1 %vm18116_vm4, %v18115_v39 }
 0xa71   :  { %16034 = vmatmul.mubr.bf16.gmra.mrb[224].mxu1 %v17777_v16 }
 0xa72   :  { %16057 = vmatprep.mubr.msk.bf16.mxu1 %vm6014_vm8, %v17778_v36  ;;  %v5924_v36 = vld [vmem:[%s23229_s12 + $0x10] sm:$0xf] }
 0xb34   :  { %v5884_v38 = vpop.f32.mrb[216].mxu1 }
 0xb35   :  { %v16833_v12 = vadd.f32 %v5884_v38, %v5289_v13  ;;  %v16027_v47 = vpop.f32.mrb[217].mxu1 }
 0xb36   :  { %v5887_v49 = vpop.f32.mrb[218].mxu1 }
 0xb37   :  { %v16834_v50 = vadd.f32 %v5887_v49, %v5290_v28  ;;  %v16028_v3 = vpop.f32.mrb[219].mxu1  ;;  %v5913_v10 = vmax.f32 %v16833_v12, 0.0 }
 0xb38   :  { %v13295_v3 = vld [vmem:[%s23289_s11 + $0x4] sm:$0x3] }
 0xb39   :  { %v5914_v52 = vmax.f32 %v16834_v50, 0.0 }
 0xb3b   :  { %v20883_v20 = vpack.c.bf16 %v5914_v52, %v5913_v10  ;;  %v6209_v10 = vand.u32 %v13295_v3, %v20866_v21  ;;  %v17783_v52 = vld [vmem:[%s23227_s10 + $0x18] sm:$0xff]   ;;  %v17786_v3 = vld [vmem:[%s23231_s13 + $0x10] sm:$0xff]  }
 0xb3c   :  { %v5892_v23 = vpop.f32.mrb[220].mxu1 }
 0xb3d   :  { %v16835_v11 = vadd.f32 %v5892_v23, %v5291_v54  ;;  %v16031_v56 = vpop.f32.mrb[221].mxu1  ;;  %16040 = vmatmul.mubr.msk.bf16.vlgmr.msra.gmra.mrb[120].mxu0 %vm5926_vm7, %v20883_v20 }
 0xb3e   :  { %v5895_v6 = vpop.f32.mrb[222].mxu1  ;;  %16043 = vmatprep.mubr.msk.bf16.mxu0 %vm18116_vm4, %v18115_v39  ;;  %16062 = vmatpush3.bf16.msra.mxu0 %v6075_v62 }
 0xb3f   :  { %v16836_v41 = vadd.f32 %v5895_v6, %v5292_v34  ;;  %v16032_v53 = vpop.f32.mrb[223].mxu1  ;;  %v5915_v58 = vmax.f32 %v16835_v11, 0.0 }
 0xb41   :  { %v5916_v57 = vmax.f32 %v16836_v41, 0.0 }
 0xb43   :  { %v20895_v60 = vpack.c.bf16 %v5916_v57, %v5915_v58 }
 0xb44   :  { %v5900_v0 = vpop.f32.mrb[224].mxu1 }
 0xb45   :  { %v16837_v2 = vadd.f32 %v5900_v0, %v5293_v18  ;;  %v16035_v42 = vpop.f32.mrb[225].mxu1  ;;  %16044 = vmatmul.mubr.msk.bf16.gmra.mrb[124].mxu0 %vm5926_vm7, %v20895_v60 }
 0xb46   :  { %v5903_v15 = vpop.f32.mrb[226].mxu1  ;;  %16047 = vmatprep.mubr.msk.bf16.mxu0 %vm18116_vm4, %v18115_v39  ;;  %v18118_v42 = vmov 0  }
 0xb47   :  { %v16838_v51 = vadd.f32 %v5903_v15, %v5294_v43  ;;  %v16036_v29 = vpop.f32.mrb[227].mxu1  ;;  %v5917_v5 = vmax.f32 %v16837_v2, 0.0  ;;  %v17780_v43 = vld [vmem:[%s23227_s10 + $0x20] ss:$0 sps:$4 sm:$0x33]   ;;  %v6361_v15 = vsel %vm5936_vm5, 65535, %v18118_v42 }
 0xb48   :  { %v6353_v2 = vld [vmem:[%s23228_s14] sm:$0x1] }
 0xb49   :  { %v5918_v59 = vmax.f32 %v16838_v51, 0.0  ;;  %v13314_v51 = vld [vmem:[%s23228_s14 + $0x1] sm:$0x1]  ;;  %v6363_v29 = vand.u32 %v6361_v15, %v6353_v2 }
 0xb4b   :  { %v20904_v27 = vpack.c.bf16 %v5918_v59, %v5917_v5  ;;  %v6515_v5 = vand.u32 %v13314_v51, %v6361_v15  ;;  %16109 = vmatprep.subr.bf16.mxu0 %v6363_v29  ;;  %v13329_v59 = vld [vmem:[%s23228_s14 + $0x2] sm:$0x1] }
 0xb4d   :  { %16048 = vmatmul.mubr.msk.bf16.gmra.mrb[128].mxu0 %vm5926_vm7, %v20904_v27 }
 0xb4e   :  { %16063 = vmatprep.mubr.msk.bf16.mxu0 %vm18116_vm4, %v18115_v39 }
 0xb55   :  { %16064 = vmatmul.mubr.msk.bf16.vlgmr.msra.gmra.mrb[132].mxu0 %vm5926_vm7, %v20883_v20 }
 0xb56   :  { %16067 = vmatprep.mubr.msk.bf16.mxu0 %vm18116_vm4, %v18115_v39  ;;  %16110 = vmatpush3.bf16.msra.mxu0 %v6363_v29 }
 0xb57   :  { %16115 = vmatprep.subr.bf16.mxu0 %v18115_v39 }
 0xb5d   :  { %16068 = vmatmul.mubr.msk.bf16.gmra.mrb[136].mxu0 %vm5926_vm7, %v20895_v60 }
 0xb5e   :  { %16071 = vmatprep.mubr.msk.bf16.mxu0 %vm18116_vm4, %v18115_v39 }
 0xb65   :  { %16072 = vmatmul.mubr.msk.bf16.gmra.mrb[140].mxu0 %vm5926_vm7, %v20904_v27 }
 0xc10   :  { %v5977_v44 = vpop.f32.mrb[120].mxu0 }
 0xc11   :  { %v16041_v31 = vpop.f32.mrb[121].mxu0 }
 0xc12   :  { %v5980_v17 = vpop.f32.mrb[122].mxu0 }
 0xc13   :  { %v6003_v61 = vpack.c.bf16 %v5980_v17, %v5977_v44  ;;  %v16042_v32 = vpop.f32.mrb[123].mxu0  ;;  %v5922_v44 = vld [vmem:[%s23229_s12] sm:$0xff] }
 0xc14   :  { %v5923_v32 = vld [vmem:[%s23229_s12 + $0x8] sm:$0xff] }
 0xc15   :  { %16051 = vmatprep.subr.bf16.mxu1 %v6003_v61 }
 0xc16   :  { %16052 = vmatpush3.bf16.msra.mxu1 %v6003_v61 }
 0xc18   :  { %v5985_v35 = vpop.f32.mrb[124].mxu0 }
 0xc19   :  { %v16045_v22 = vpop.f32.mrb[125].mxu0 }
 0xc1a   :  { %v5988_v33 = vpop.f32.mrb[126].mxu0 }
 0xc1b   :  { %v6004_v45 = vpack.c.bf16 %v5988_v33, %v5985_v35  ;;  %v16046_v63 = vpop.f32.mrb[127].mxu0 }
 0xc1d   :  { %16053 = vmatprep.subr.bf16.mxu1 %v6004_v45 }
 0xc1e   :  { %16054 = vmatpush3.bf16.msra.mxu1 %v6004_v45 }
 0xc20   :  { %v5993_v25 = vpop.f32.mrb[128].mxu0 }
 0xc21   :  { %v16049_v9 = vpop.f32.mrb[129].mxu0 }
 0xc22   :  { %v5996_v1 = vpop.f32.mrb[130].mxu0 }
 0xc23   :  { %v6005_v8 = vpack.c.bf16 %v5996_v1, %v5993_v25  ;;  %v16050_v24 = vpop.f32.mrb[131].mxu0 }
 0xc25   :  { %16055 = vmatprep.subr.bf16.mxu1 %v6005_v8 }
 0xc26   :  { %16056 = vmatpush3.bf16.msra.mxu1 %v6005_v8 }
 0xc28   :  { %v6111_v30 = vpop.f32.mrb[132].mxu0 }
 0xc29   :  { %v16065_v37 = vpop.f32.mrb[133].mxu0  ;;  %16058 = vmatmul.mubr.msk.bf16.vlgmr.msra.gmra.mrb[228].mxu1 %vm6014_vm8, %v17779_v48 }
 0xc2a   :  { %v6114_v26 = vpop.f32.mrb[134].mxu0  ;;  %16081 = vmatprep.mubr.msk.bf16.mxu1 %vm6014_vm8, %v17781_v55 }
 0xc2b   :  { %v6138_v4 = vpack.c.bf16 %v6114_v26, %v6111_v30  ;;  %v16066_v16 = vpop.f32.mrb[135].mxu0 }
 0xc2d   :  { %16075 = vmatprep.subr.bf16.mxu1 %v6138_v4 }
 0xc2e   :  { %16076 = vmatpush3.bf16.msra.mxu1 %v6138_v4 }
 0xc30   :  { %v6119_v40 = vpop.f32.mrb[136].mxu0 }
 0xc31   :  { %v16069_v46 = vpop.f32.mrb[137].mxu0 }
 0xc32   :  { %v6122_v14 = vpop.f32.mrb[138].mxu0 }
 0xc33   :  { %v6139_v13 = vpack.c.bf16 %v6122_v14, %v6119_v40  ;;  %v16070_v38 = vpop.f32.mrb[139].mxu0 }
 0xc35   :  { %16077 = vmatprep.subr.bf16.mxu1 %v6139_v13 }
 0xc36   :  { %16078 = vmatpush3.bf16.msra.mxu1 %v6139_v13  ;;  %v17784_v13 = vld [vmem:[%s23231_s13] sm:$0xff]  }
 0xc38   :  { %v6127_v28 = vpop.f32.mrb[140].mxu0 }
 0xc39   :  { %v16073_v12 = vpop.f32.mrb[141].mxu0 }
 0xc3a   :  { %v6130_v47 = vpop.f32.mrb[142].mxu0 }
 0xc3b   :  { %v6140_v49 = vpack.c.bf16 %v6130_v47, %v6127_v28  ;;  %v16074_v50 = vpop.f32.mrb[143].mxu0 }
 0xc3c   :  { %v17785_v50 = vld [vmem:[%s23231_s13 + $0x8] sm:$0xff]  }
 0xc3d   :  { %16079 = vmatprep.subr.bf16.mxu1 %v6140_v49 }
 0xc3e   :  { %16080 = vmatpush3.bf16.msra.mxu1 %v6140_v49 }
 0xc3f   :  { %16085 = vmatprep.subr.bf16.mxu1 %v18115_v39 }
 0xc41   :  { %16082 = vmatmul.mubr.msk.bf16.vlgmr.msra.gmra.mrb[228].mxu1 %vm6014_vm8, %v17782_v19  ;;  %v17787_v19 = vld [vmem:[%s23231_s13 + $0x18] sm:$0xff]  }
 0xc42   :  { %16086 = vmatpush3.bf16.msra.mxu1 %v6209_v10  ;;  %16087 = vmatprep.mubr.msk.bf16.mxu1 %vm18116_vm4, %v18115_v39 }
 0xc49   :  { %16088 = vmatmul.mubr.msk.bf16.vlgmr.msra.gmra.mrb[232].mxu1 %vm5926_vm7, %v20883_v20 }
 0xc4a   :  { %16091 = vmatprep.mubr.msk.bf16.mxu1 %vm18116_vm4, %v18115_v39 }
 0xc51   :  { %16092 = vmatmul.mubr.msk.bf16.gmra.mrb[236].mxu1 %vm5926_vm7, %v20895_v60 }
 0xc52   :  { %16095 = vmatprep.mubr.msk.bf16.mxu1 %vm18116_vm4, %v18115_v39 }
 0xc59   :  { %16096 = vmatmul.mubr.msk.bf16.gmra.mrb[240].mxu1 %vm5926_vm7, %v20904_v27  ;;  %v6667_v27 = vand.u32 %v13329_v59, %v6361_v15 }
 0xc5a   :  { %16105 = vmatprep.mubr.msk.bf16.mxu1 %vm6014_vm8, %v17783_v52 }
 0xd1c   :  { %v6245_v54 = vpop.f32.mrb[232].mxu1 }
 0xd1d   :  { %v16089_v62 = vpop.f32.mrb[233].mxu1 }
 0xd1e   :  { %v6248_v20 = vpop.f32.mrb[234].mxu1  ;;  %v17789_v62 = vld [vmem:[%s23231_s13 + $0x28] sm:$0xff]  }
 0xd1f   :  { %v6272_v23 = vpack.c.bf16 %v6248_v20, %v6245_v54  ;;  %v16090_v34 = vpop.f32.mrb[235].mxu1  ;;  %v17788_v54 = vld [vmem:[%s23231_s13 + $0x20] sm:$0xff]   ;;  %v17790_v20 = vld [vmem:[%s23231_s13 + $0x30] sm:$0xff]  }
 0xd20   :  { %v17792_v34 = vld [vmem:[%s23231_s13 + $0x40] sm:$0xff]  }
 0xd21   :  { %16099 = vmatprep.subr.bf16.mxu1 %v6272_v23 }
 0xd22   :  { %16100 = vmatpush3.bf16.msra.mxu1 %v6272_v23  ;;  %v17791_v23 = vld [vmem:[%s23231_s13 + $0x38] sm:$0xff]  }
 0xd24   :  { %v6253_v11 = vpop.f32.mrb[236].mxu1 }
 0xd25   :  { %v16093_v56 = vpop.f32.mrb[237].mxu1 }
 0xd26   :  { %v6256_v6 = vpop.f32.mrb[238].mxu1  ;;  %v13361_v56 = vld [vmem:[%s23232_s17 + $0x2] sm:$0x3] }
 0xd27   :  { %v6273_v41 = vpack.c.bf16 %v6256_v6, %v6253_v11  ;;  %v16094_v53 = vpop.f32.mrb[239].mxu1  ;;  %v6833_v11 = vld [vmem:[%s23232_s17] sm:$0x3] }
 0xd28   :  { %v6844_v6 = vand.u32 %v6833_v11, %v20866_v21  ;;  %v6347_v53 = vld [vmem:[%s23233_s15] sm:$0xff] }
 0xd29   :  { %16101 = vmatprep.subr.bf16.mxu1 %v6273_v41 }
 0xd2a   :  { %16102 = vmatpush3.bf16.msra.mxu1 %v6273_v41  ;;  %v7082_v41 = vand.u32 %v13361_v56, %v20866_v21 }
 0xd2c   :  { %v6261_v58 = vpop.f32.mrb[240].mxu1 }
 0xd2d   :  { %v16097_v57 = vpop.f32.mrb[241].mxu1 }
 0xd2e   :  { %v6264_v18 = vpop.f32.mrb[242].mxu1  ;;  %v6348_v57 = vld [vmem:[%s23233_s15 + $0x8] sm:$0xff] }
 0xd2f   :  { %v6274_v60 = vpack.c.bf16 %v6264_v18, %v6261_v58  ;;  %v16098_v0 = vpop.f32.mrb[243].mxu1 }
 0xd30   :  { %v13393_v0 = vld [vmem:[%s23232_s17 + $0x4] sm:$0x3] }
 0xd31   :  { %16103 = vmatprep.subr.bf16.mxu1 %v6274_v60  ;;  %v7321_v29 = vand.u32 %v13393_v0, %v20866_v21 }
 0xd32   :  { %16104 = vmatpush3.bf16.msra.mxu1 %v6274_v60 }
 0xd33   :  { %16131 = vmatprep.subr.bf16.mxu1 %v6515_v5 }
 0xd35   :  { %16106 = vmatmul.mubr.msk.bf16.vlgmr.msra.gmra.mrb[228].mxu1 %vm6014_vm8, %v17780_v43 }
 0xd36   :  { %16132 = vmatpush3.bf16.msra.mxu1 %v6515_v5  ;;  %v6349_v5 = vld [vmem:[%s23233_s15 + $0x10] sm:$0xff] }
 0xd37   :  { %16153 = vmatprep.subr.bf16.mxu1 %v6667_v27 }
 0xe08   :  { %v16107_v31 = vpop.f32.mrb[228].mxu1 }
 0xe09   :  { %v16839_v17 = vadd.f32 %v16107_v31, %v5924_v36  ;;  %v6323_v61 = vpop.f32.mrb[229].mxu1 }
 0xe0a   :  { %v16840_v35 = vadd.f32 %v6323_v61, %v5922_v44  ;;  %v16108_v22 = vpop.f32.mrb[230].mxu1 }
 0xe0b   :  { %6344 = vst.msk [vmem:[%s23230_s26 + $0x10] sm:$0xf] %vm6343_vm9, %v16839_v17  ;;  %v6326_v33 = vpop.f32.mrb[231].mxu1  ;;  %v6346_v25 = vpack.c.bf16 %v16839_v17, %v16839_v17  ;;  %v6352_v22 = vld [vmem:[%s23233_s15 + $0x28] sm:$0xff] }
 0xe0c   :  { %6341 = vst.msk [vmem:[%s23230_s26] sm:$0xff] %vm6340_vm10, %v16840_v35  ;;  %v16841_v45 = vadd.f32 %v6326_v33, %v5923_v32  ;;  %v6351_v32 = vld [vmem:[%s23233_s15 + $0x20] sm:$0xff] }
 0xe0e   :  { %6342 = vst.msk [vmem:[%s23230_s26 + $0x8] sm:$0xff] %vm6340_vm10, %v16841_v45  ;;  %v6345_v63 = vpack.c.bf16 %v16841_v45, %v16840_v35 }
 0xe10   :  { %16111 = vmatprep.mubr.msk.bf16.mxu0 %vm6340_vm10, %v6345_v63  ;;  %16133 = vmatprep.mubr.msk.bf16.mxu1 %vm6340_vm10, %v6345_v63 }
 0xe11   :  { %16112 = vmatmul.mubr.msk.bf16.vlgmr.msra.gmra.mrb[144].mxu0 %vm6340_vm10, %v6346_v25  ;;  %16134 = vmatmul.mubr.msk.bf16.vlgmr.msra.gmra.mrb[244].mxu1 %vm6340_vm10, %v6346_v25 }
 0xe12   :  { %16155 = vmatprep.mubr.msk.bf16.mxu1 %vm6340_vm10, %v6345_v63  ;;  %16154 = vmatpush3.bf16.msra.mxu1 %v6667_v27  ;;  %v6350_v27 = vld [vmem:[%s23233_s15 + $0x18] sm:$0xff] }
 0xe13   :  { %16119 = vmatprep.mubr.msk.bf16.mxu0 %vm18116_vm4, %v18115_v39  ;;  %16175 = vmatprep.subr.bf16.mxu1 %v18115_v39 }
 0xe19   :  { %16156 = vmatmul.mubr.msk.bf16.vlgmr.msra.gmra.mrb[248].mxu1 %vm6340_vm10, %v6346_v25 }
 0xe1a   :  { %16177 = vmatprep.mubr.msk.bf16.mxu1 %vm18116_vm4, %v18115_v39  ;;  %16176 = vmatpush3.bf16.msra.mxu1 %v6844_v6  ;;  %v17793_v6 = vld [vmem:[%s23234_s16] sm:$0xff]  }
 0xe1b   :  { %16189 = vmatprep.subr.bf16.mxu1 %v18115_v39 }
 0xee4   :  { %v16113_v9 = vpop.f32.mrb[144].mxu0  ;;  %v16135_v1 = vpop.f32.mrb[244].mxu1 }
 0xee5   :  { %v6399_v8 = vpop.f32.mrb[145].mxu0  ;;  %v6551_v24 = vpop.f32.mrb[245].mxu1  ;;  %v6420_v16 = vpack.c.bf16 %v16113_v9, %v16113_v9  ;;  %v6573_v47 = vpack.c.bf16 %v16135_v1, %v16135_v1 }
 0xee6   :  { %v16114_v48 = vpop.f32.mrb[146].mxu0  ;;  %v16136_v55 = vpop.f32.mrb[246].mxu1 }
 0xee7   :  { %v6402_v30 = vpop.f32.mrb[147].mxu0  ;;  %v6554_v37 = vpop.f32.mrb[247].mxu1  ;;  %v6447_v46 = vsel %vm5937_vm6, %v6420_v16, 0  ;;  %v6599_v49 = vsel %vm5937_vm6, %v6573_v47, 0 }
 0xee8   :  { %v6419_v26 = vpack.c.bf16 %v6402_v30, %v6399_v8  ;;  %v6572_v4 = vpack.c.bf16 %v6554_v37, %v6551_v24 }
 0xeea   :  { %16116 = vmatpush3.bf16.msra.mxu0 %v6419_v26 }
 0xeeb   :  { %16117 = vmatprep.subr.bf16.mxu0 %v18115_v39 }
 0xeec   :  { %v16157_v40 = vpop.f32.mrb[248].mxu1 }
 0xeed   :  { %v6703_v14 = vpop.f32.mrb[249].mxu1  ;;  %v6725_v10 = vpack.c.bf16 %v16157_v40, %v16157_v40 }
 0xeee   :  { %16118 = vmatpush3.bf16.msra.mxu0 %v6447_v46  ;;  %v16158_v38 = vpop.f32.mrb[250].mxu1 }
 0xeef   :  { %v6706_v28 = vpop.f32.mrb[251].mxu1  ;;  %16137 = vmatprep.subr.bf16.mxu0 %v18115_v39  ;;  %v6751_v52 = vsel %vm5937_vm6, %v6725_v10, 0 }
 0xef0   :  { %v6724_v12 = vpack.c.bf16 %v6706_v28, %v6703_v14 }
 0xef1   :  { %16120 = vmatmul.mubr.msk.bf16.vlgmr.msra.gmra.mrb[148].mxu0 %vm6436_vm11, %v17784_v13 }
 0xef2   :  { %16138 = vmatpush3.bf16.msra.mxu0 %v6572_v4  ;;  %16123 = vmatprep.mubr.msk.bf16.mxu0 %vm18116_vm4, %v18115_v39 }
 0xef3   :  { %16139 = vmatprep.subr.bf16.mxu0 %v18115_v39 }
 0xef6   :  { %16140 = vmatpush3.bf16.msra.mxu0 %v6599_v49 }
 0xef7   :  { %16159 = vmatprep.subr.bf16.mxu0 %v18115_v39 }
 0xef9   :  { %16124 = vmatmul.mubr.msk.bf16.gmra.mrb[152].mxu0 %vm6436_vm11, %v17785_v50 }
 0xefa   :  { %16127 = vmatprep.mubr.msk.bf16.mxu0 %vm18116_vm4, %v18115_v39 }
 0xf01   :  { %16128 = vmatmul.mubr.msk.bf16.gmra.mrb[156].mxu0 %vm6436_vm11, %v17786_v3 }
 0xf02   :  { %16141 = vmatprep.mubr.msk.bf16.mxu0 %vm18116_vm4, %v18115_v39 }
 0xf09   :  { %16142 = vmatmul.mubr.msk.bf16.vlgmr.msra.gmra.mrb[148].mxu0 %vm6436_vm11, %v17787_v19 }
 0xf0a   :  { %16160 = vmatpush3.bf16.msra.mxu0 %v6724_v12  ;;  %16145 = vmatprep.mubr.msk.bf16.mxu0 %vm18116_vm4, %v18115_v39 }
 0xf0b   :  { %16161 = vmatprep.subr.bf16.mxu0 %v18115_v39 }
 0xf0e   :  { %16162 = vmatpush3.bf16.msra.mxu0 %v6751_v52 }
 0xf0f   :  { %16223 = vmatprep.subr.bf16.mxu0 %v18115_v39 }
 0xf11   :  { %16146 = vmatmul.mubr.msk.bf16.gmra.mrb[152].mxu0 %vm6436_vm11, %v17788_v54 }
 0xf12   :  { %16149 = vmatprep.mubr.msk.bf16.mxu0 %vm18116_vm4, %v18115_v39 }
 0xf19   :  { %16150 = vmatmul.mubr.msk.bf16.gmra.mrb[156].mxu0 %vm6436_vm11, %v17789_v62 }
 0xf1a   :  { %16163 = vmatprep.mubr.msk.bf16.mxu0 %vm18116_vm4, %v18115_v39 }
 0xf21   :  { %16164 = vmatmul.mubr.msk.bf16.vlgmr.msra.gmra.mrb[148].mxu0 %vm6436_vm11, %v17790_v20 }
 0xf22   :  { %16167 = vmatprep.mubr.msk.bf16.mxu0 %vm18116_vm4, %v18115_v39  ;;  %16224 = vmatpush3.bf16.msra.mxu0 %v7082_v41 }
 0xf23   :  { %16271 = vmatprep.subr.bf16.mxu0 %v18115_v39 }
 0xf29   :  { %16168 = vmatmul.mubr.msk.bf16.gmra.mrb[152].mxu0 %vm6436_vm11, %v17791_v23 }
 0xf2a   :  { %16171 = vmatprep.mubr.msk.bf16.mxu0 %vm18116_vm4, %v18115_v39 }
 0xf31   :  { %16172 = vmatmul.mubr.msk.bf16.gmra.mrb[156].mxu0 %vm6436_vm11, %v17792_v34 }
 0xf32   :  { %16225 = vmatprep.mubr.msk.bf16.mxu0 %vm18116_vm4, %v18115_v39 }
 0xff4   :  { %v6787_v58 = vpop.f32.mrb[148].mxu0 }
 0xff5   :  { %v16165_v18 = vpop.f32.mrb[149].mxu0  ;;  %v16842_v43 = vadd.f32 %v6787_v58, %v6347_v53 }
 0xff6   :  { %v6790_v60 = vpop.f32.mrb[150].mxu0 }
 0xff7   :  { %v16843_v2 = vadd.f32 %v6790_v60, %v6348_v57  ;;  %v16166_v15 = vpop.f32.mrb[151].mxu0  ;;  %v17794_v60 = vld [vmem:[%s23234_s16 + $0x8] sm:$0xff]  }
 0xff9   :  { %v6816_v51 = vpack.c.bf16 %v16843_v2, %v16842_v43 }
 0xffb   :  { %16178 = vmatmul.mubr.msk.bf16.vlgmr.msra.gmra.mrb[252].mxu1 %vm5926_vm7, %v6816_v51  ;;  %16226 = vmatmul.mubr.msk.bf16.vlgmr.msra.gmra.mrb[160].mxu0 %vm5926_vm7, %v6816_v51 }
 0xffc   :  { %v6795_v59 = vpop.f32.mrb[152].mxu0  ;;  %16181 = vmatprep.mubr.msk.bf16.mxu1 %vm18116_vm4, %v18115_v39  ;;  %16229 = vmatprep.mubr.msk.bf16.mxu0 %vm18116_vm4, %v18115_v39 }
 0xffd   :  { %v16169_v21 = vpop.f32.mrb[153].mxu0  ;;  %16272 = vmatpush3.bf16.msra.mxu0 %v7321_v29  ;;  %v16844_v44 = vadd.f32 %v6795_v59, %v6349_v5  ;;  %v17795_v29 = vld [vmem:[%s23234_s16 + $0x10] sm:$0xff]  }
 0xffe   :  { %v6798_v36 = vpop.f32.mrb[154].mxu0  ;;  %16319 = vmatprep.subr.bf16.mxu0 %v18115_v39 }
 0xfff   :  { %v16845_v31 = vadd.f32 %v6798_v36, %v6350_v27  ;;  %v16170_v17 = vpop.f32.mrb[155].mxu0 }
0x1000   :  { %v17798_v17 = vld [vmem:[%s23234_s16 + $0x28] sm:$0xff]  }
0x1001   :  { %v6817_v61 = vpack.c.bf16 %v16845_v31, %v16844_v44  ;;  %v17796_v44 = vld [vmem:[%s23234_s16 + $0x18] sm:$0xff]   ;;  %v17797_v31 = vld [vmem:[%s23234_s16 + $0x20] sm:$0xff]  }
0x1003   :  { %16182 = vmatmul.mubr.msk.bf16.gmra.mrb[0].mxu1 %vm5926_vm7, %v6817_v61  ;;  %16230 = vmatmul.mubr.msk.bf16.gmra.mrb[164].mxu0 %vm5926_vm7, %v6817_v61 }
0x1004   :  { %v6803_v35 = vpop.f32.mrb[156].mxu0  ;;  %16185 = vmatprep.mubr.msk.bf16.mxu1 %vm18116_vm4, %v18115_v39  ;;  %16233 = vmatprep.mubr.msk.bf16.mxu0 %vm18116_vm4, %v18115_v39 }
0x1005   :  { %v16173_v33 = vpop.f32.mrb[157].mxu0  ;;  %v16846_v63 = vadd.f32 %v6803_v35, %v6351_v32  ;;  %v17800_v32 = vld [vmem:[%s23234_s16 + $0x38] sm:$0xff]   ;;  %v17801_v35 = vld [vmem:[%s23234_s16 + $0x40] sm:$0xff]  }
0x1006   :  { %v6806_v45 = vpop.f32.mrb[158].mxu0  ;;  %v17803_v33 = vld [vmem:[%s23234_s16 + $0x50] sm:$0xff]  }
0x1007   :  { %v16847_v25 = vadd.f32 %v6806_v45, %v6352_v22  ;;  %v16174_v9 = vpop.f32.mrb[159].mxu0  ;;  %v17802_v22 = vld [vmem:[%s23234_s16 + $0x48] sm:$0xff]   ;;  %v17804_v45 = vld [vmem:[%s23234_s16 + $0x58] sm:$0xff]  }
0x1008   :  { %v17807_v9 = vld [vmem:[%s23234_s16 + $0x70] sm:$0xff]  }
0x1009   :  { %v6818_v1 = vpack.c.bf16 %v16847_v25, %v16846_v63  ;;  %v17805_v63 = vld [vmem:[%s23234_s16 + $0x60] sm:$0xff]   ;;  %v17806_v25 = vld [vmem:[%s23234_s16 + $0x68] sm:$0xff]  }
0x100b   :  { %16186 = vmatmul.mubr.msk.bf16.gmra.mrb[4].mxu1 %vm5926_vm7, %v6818_v1  ;;  %16234 = vmatmul.mubr.msk.bf16.gmra.mrb[168].mxu0 %vm5926_vm7, %v6818_v1 }
0x100c   :  { %16273 = vmatprep.mubr.msk.bf16.mxu0 %vm18116_vm4, %v18115_v39  ;;  %16195 = vmatprep.mubr.msk.bf16.mxu1 %vm18116_vm4, %v18115_v39 }
0x1013   :  { %16274 = vmatmul.mubr.msk.bf16.vlgmr.msra.gmra.mrb[172].mxu0 %vm5926_vm7, %v6816_v51 }
0x1014   :  { %16277 = vmatprep.mubr.msk.bf16.mxu0 %vm18116_vm4, %v18115_v39 }
0x101b   :  { %16278 = vmatmul.mubr.msk.bf16.gmra.mrb[176].mxu0 %vm5926_vm7, %v6817_v61  ;;  %v17799_v61 = vld [vmem:[%s23234_s16 + $0x30] sm:$0xff]  }
0x101c   :  { %16281 = vmatprep.mubr.msk.bf16.mxu0 %vm18116_vm4, %v18115_v39 }
0x1023   :  { %16282 = vmatmul.mubr.msk.bf16.gmra.mrb[180].mxu0 %vm5926_vm7, %v6818_v1  ;;  %v17808_v1 = vld [vmem:[%s23234_s16 + $0x78] sm:$0xff]  }
0x1024   :  { %16321 = vmatprep.mubr.msk.bf16.mxu0 %vm18116_vm4, %v18115_v39 }
0x10ce   :  { %v6880_v8 = vpop.f32.mrb[252].mxu1  ;;  %v7118_v24 = vpop.f32.mrb[160].mxu0 }
0x10cf   :  { %v16179_v48 = vpop.f32.mrb[253].mxu1  ;;  %v16227_v55 = vpop.f32.mrb[161].mxu0 }
0x10d0   :  { %v6883_v30 = vpop.f32.mrb[254].mxu1  ;;  %v7121_v37 = vpop.f32.mrb[162].mxu0  ;;  %v17811_v48 = vld [vmem:[%s23234_s16 + $0x90] sm:$0xff]   ;;  %v17812_v55 = vld [vmem:[%s23234_s16 + $0x98] sm:$0xff]  }
0x10d1   :  { %v6917_v26 = vpack.c.bf16 %v6883_v30, %v6880_v8  ;;  %v7156_v4 = vpack.c.bf16 %v7121_v37, %v7118_v24  ;;  %v16180_v16 = vpop.f32.mrb[255].mxu1  ;;  %v16228_v40 = vpop.f32.mrb[163].mxu0  ;;  %v17809_v8 = vld [vmem:[%s23234_s16 + $0x80] sm:$0xff]   ;;  %v17810_v24 = vld [vmem:[%s23234_s16 + $0x88] sm:$0xff]   ;;  %v7630_v37 = vsel %vm7629_vm12, 4294967295, %v18117_v7 }
0x10d2   :  { %v17813_v30 = vld [vmem:[%s23234_s16 + $0xa0] sm:$0xff]  }
0x10d3   :  { %16190 = vmatpush3.bf16.msra.mxu1 %v6917_v26  ;;  %v7606_v26 = vld [vmem:[%s23235_s20] sm:$0xf]  ;;  %v13460_v16 = vld [vmem:[%s23235_s20 + $0x4] sm:$0xf] }
0x10d4   :  { %16191 = vmatprep.subr.bf16.mxu1 %v18115_v39  ;;  %v6819_v7 = vld [vmem:[%s23236_s18] sm:$0xff] }
0x10d6   :  { %v6888_v46 = vpop.f32.mrb[0].mxu1  ;;  %v7126_v14 = vpop.f32.mrb[164].mxu0 }
0x10d7   :  { %v16183_v13 = vpop.f32.mrb[1].mxu1  ;;  %v16231_v38 = vpop.f32.mrb[165].mxu0 }
0x10d8   :  { %v6891_v28 = vpop.f32.mrb[2].mxu1  ;;  %v7129_v12 = vpop.f32.mrb[166].mxu0  ;;  %v6820_v13 = vld [vmem:[%s23236_s18 + $0x8] sm:$0xff] }
0x10d9   :  { %v6918_v47 = vpack.c.bf16 %v6891_v28, %v6888_v46  ;;  %v7157_v49 = vpack.c.bf16 %v7129_v12, %v7126_v14  ;;  %v16184_v50 = vpop.f32.mrb[3].mxu1  ;;  %v16232_v3 = vpop.f32.mrb[167].mxu0 }
0x10da   :  { %v13524_v50 = vld [vmem:[%s23235_s20 + $0x8] sm:$0xf] }
0x10db   :  { %16192 = vmatpush3.bf16.msra.mxu1 %v6918_v47 }
0x10dc   :  { %16193 = vmatprep.subr.bf16.mxu1 %v18115_v39 }
0x10de   :  { %v6896_v19 = vpop.f32.mrb[4].mxu1  ;;  %v7134_v10 = vpop.f32.mrb[168].mxu0 }
0x10df   :  { %v16187_v52 = vpop.f32.mrb[5].mxu1  ;;  %v16235_v54 = vpop.f32.mrb[169].mxu0 }
0x10e0   :  { %v6899_v62 = vpop.f32.mrb[6].mxu1  ;;  %v7137_v20 = vpop.f32.mrb[170].mxu0 }
0x10e1   :  { %v6919_v23 = vpack.c.bf16 %v6899_v62, %v6896_v19  ;;  %v7158_v34 = vpack.c.bf16 %v7137_v20, %v7134_v10  ;;  %v16188_v11 = vpop.f32.mrb[7].mxu1  ;;  %v16236_v56 = vpop.f32.mrb[171].mxu0  ;;  %v6821_v10 = vld [vmem:[%s23236_s18 + $0x10] sm:$0xff]  ;;  %v6822_v20 = vld [vmem:[%s23236_s18 + $0x18] sm:$0xff] }
0x10e3   :  { %16194 = vmatpush3.bf16.msra.mxu1 %v6919_v23 }
0x10e4   :  { %16237 = vmatprep.subr.bf16.mxu1 %v18115_v39 }
0x10e6   :  { %16196 = vmatmul.mubr.msk.bf16.vlgmr.msra.gmra.mrb[8].mxu1 %vm6014_vm8, %v17793_v6  ;;  %v7357_v41 = vpop.f32.mrb[172].mxu0 }
0x10e7   :  { %16238 = vmatpush3.bf16.msra.mxu1 %v7156_v4  ;;  %v16275_v53 = vpop.f32.mrb[173].mxu0  ;;  %16199 = vmatprep.mubr.msk.bf16.mxu1 %vm18116_vm4, %v18115_v39  ;;  %v21267_v4 = vsel %vm5321_vm2, %v7630_v37, 0  ;;  %v6829_v37 = vld [vmem:[%s23236_s18 + $0x50] sm:$0xff]  ;;  %vm12546_vm2 = vcmask 228352  }
0x10e8   :  { %v7360_v58 = vpop.f32.mrb[174].mxu0  ;;  %16239 = vmatprep.subr.bf16.mxu1 %v18115_v39  ;;  %v7633_v40 = vand.u32 %v21267_v4, %v7606_v26  ;;  %v8048_v46 = vand.u32 %v13460_v16, %v21267_v4  ;;  %v8463_v54 = vand.u32 %v13524_v50, %v21267_v4 }
0x10e9   :  { %v7395_v57 = vpack.c.bf16 %v7360_v58, %v7357_v41  ;;  %v16276_v18 = vpop.f32.mrb[175].mxu0  ;;  %v6823_v58 = vld [vmem:[%s23236_s18 + $0x20] sm:$0xff] }
0x10ea   :  { %16320 = vmatpush3.bf16.msra.mxu0 %v7633_v40  ;;  %v6830_v40 = vld [vmem:[%s23236_s18 + $0x58] sm:$0xff] }
0x10eb   :  { %16240 = vmatpush3.bf16.msra.mxu1 %v7157_v49 }
0x10ec   :  { %16241 = vmatprep.subr.bf16.mxu1 %v18115_v39 }
0x10ee   :  { %16200 = vmatmul.mubr.msk.bf16.gmra.mrb[12].mxu1 %vm6014_vm8, %v17794_v60  ;;  %v7365_v0 = vpop.f32.mrb[176].mxu0  ;;  %v6824_v60 = vld [vmem:[%s23236_s18 + $0x28] sm:$0xff] }
0x10ef   :  { %16242 = vmatpush3.bf16.msra.mxu1 %v7158_v34  ;;  %v16279_v43 = vpop.f32.mrb[177].mxu0  ;;  %16203 = vmatprep.mubr.msk.bf16.mxu1 %vm18116_vm4, %v18115_v39 }
0x10f0   :  { %v7368_v2 = vpop.f32.mrb[178].mxu0  ;;  %16285 = vmatprep.subr.bf16.mxu1 %v18115_v39 }
0x10f1   :  { %v7396_v15 = vpack.c.bf16 %v7368_v2, %v7365_v0  ;;  %v16280_v51 = vpop.f32.mrb[179].mxu0 }
0x10f6   :  { %16204 = vmatmul.mubr.msk.bf16.gmra.mrb[16].mxu1 %vm6014_vm8, %v17795_v29  ;;  %v7373_v5 = vpop.f32.mrb[180].mxu0 }
0x10f7   :  { %v16283_v59 = vpop.f32.mrb[181].mxu0  ;;  %16207 = vmatprep.mubr.msk.bf16.mxu1 %vm18116_vm4, %v18115_v39 }
0x10f8   :  { %v7376_v27 = vpop.f32.mrb[182].mxu0  ;;  %v6825_v59 = vld [vmem:[%s23236_s18 + $0x30] sm:$0xff] }
0x10f9   :  { %v7397_v21 = vpack.c.bf16 %v7376_v27, %v7373_v5  ;;  %v16284_v36 = vpop.f32.mrb[183].mxu0 }
0x10fa   :  { %v6826_v36 = vld [vmem:[%s23236_s18 + $0x38] sm:$0xff] }
0x10fe   :  { %16208 = vmatmul.mubr.msk.bf16.gmra.mrb[20].mxu1 %vm6014_vm8, %v17796_v44 }
0x10ff   :  { %16211 = vmatprep.mubr.msk.bf16.mxu1 %vm18116_vm4, %v18115_v39 }
0x1106   :  { %16212 = vmatmul.mubr.msk.bf16.gmra.mrb[24].mxu1 %vm6014_vm8, %v17797_v31 }
0x1107   :  { %16215 = vmatprep.mubr.msk.bf16.mxu1 %vm18116_vm4, %v18115_v39 }
0x110e   :  { %16216 = vmatmul.mubr.msk.bf16.gmra.mrb[28].mxu1 %vm6014_vm8, %v17798_v17 }
0x110f   :  { %16219 = vmatprep.mubr.msk.bf16.mxu1 %vm18116_vm4, %v18115_v39 }
0x1116   :  { %16220 = vmatmul.mubr.msk.bf16.gmra.mrb[32].mxu1 %vm6014_vm8, %v17799_v61 }
0x1117   :  { %16243 = vmatprep.mubr.msk.bf16.mxu1 %vm18116_vm4, %v18115_v39 }
0x111e   :  { %16244 = vmatmul.mubr.msk.bf16.vlgmr.msra.gmra.mrb[8].mxu1 %vm6014_vm8, %v17800_v32 }
0x111f   :  { %16286 = vmatpush3.bf16.msra.mxu1 %v7395_v57  ;;  %16247 = vmatprep.mubr.msk.bf16.mxu1 %vm18116_vm4, %v18115_v39 }
0x1120   :  { %16287 = vmatprep.subr.bf16.mxu1 %v18115_v39 }
0x1123   :  { %16288 = vmatpush3.bf16.msra.mxu1 %v7396_v15 }
0x1124   :  { %16289 = vmatprep.subr.bf16.mxu1 %v18115_v39 }
0x1126   :  { %16248 = vmatmul.mubr.msk.bf16.gmra.mrb[12].mxu1 %vm6014_vm8, %v17801_v35 }
0x1127   :  { %16290 = vmatpush3.bf16.msra.mxu1 %v7397_v21  ;;  %16251 = vmatprep.mubr.msk.bf16.mxu1 %vm18116_vm4, %v18115_v39 }
0x1128   :  { %16391 = vmatprep.subr.bf16.mxu1 %v18115_v39 }
0x112e   :  { %16252 = vmatmul.mubr.msk.bf16.gmra.mrb[16].mxu1 %vm6014_vm8, %v17802_v22 }
0x112f   :  { %16255 = vmatprep.mubr.msk.bf16.mxu1 %vm18116_vm4, %v18115_v39 }
0x1136   :  { %16256 = vmatmul.mubr.msk.bf16.gmra.mrb[20].mxu1 %vm6014_vm8, %v17803_v33  ;;  %v6827_v33 = vld [vmem:[%s23236_s18 + $0x40] sm:$0xff] }
0x1137   :  { %16259 = vmatprep.mubr.msk.bf16.mxu1 %vm18116_vm4, %v18115_v39 }
0x113e   :  { %16260 = vmatmul.mubr.msk.bf16.gmra.mrb[24].mxu1 %vm6014_vm8, %v17804_v45 }
0x113f   :  { %16263 = vmatprep.mubr.msk.bf16.mxu1 %vm18116_vm4, %v18115_v39 }
0x1146   :  { %16264 = vmatmul.mubr.msk.bf16.gmra.mrb[28].mxu1 %vm6014_vm8, %v17805_v63 }
0x1147   :  { %16267 = vmatprep.mubr.msk.bf16.mxu1 %vm18116_vm4, %v18115_v39 }
0x114e   :  { %16268 = vmatmul.mubr.msk.bf16.gmra.mrb[32].mxu1 %vm6014_vm8, %v17806_v25  ;;  %v6828_v25 = vld [vmem:[%s23236_s18 + $0x48] sm:$0xff] }
0x114f   :  { %16291 = vmatprep.mubr.msk.bf16.mxu1 %vm18116_vm4, %v18115_v39 }
0x1156   :  { %16292 = vmatmul.mubr.msk.bf16.vlgmr.msra.gmra.mrb[8].mxu1 %vm6014_vm8, %v17807_v9 }
0x1157   :  { %16295 = vmatprep.mubr.msk.bf16.mxu1 %vm18116_vm4, %v18115_v39  ;;  %16392 = vmatpush3.bf16.msra.mxu1 %v8048_v46 }
0x1158   :  { %16463 = vmatprep.subr.bf16.mxu1 %v18115_v39 }
0x115e   :  { %16296 = vmatmul.mubr.msk.bf16.gmra.mrb[12].mxu1 %vm6014_vm8, %v17808_v1 }
0x115f   :  { %16299 = vmatprep.mubr.msk.bf16.mxu1 %vm18116_vm4, %v18115_v39 }
0x1166   :  { %16300 = vmatmul.mubr.msk.bf16.gmra.mrb[16].mxu1 %vm6014_vm8, %v17809_v8 }
0x1167   :  { %16303 = vmatprep.mubr.msk.bf16.mxu1 %vm18116_vm4, %v18115_v39 }
0x116e   :  { %16304 = vmatmul.mubr.msk.bf16.gmra.mrb[20].mxu1 %vm6014_vm8, %v17810_v24 }
0x116f   :  { %16307 = vmatprep.mubr.msk.bf16.mxu1 %vm18116_vm4, %v18115_v39 }
0x1176   :  { %16308 = vmatmul.mubr.msk.bf16.gmra.mrb[24].mxu1 %vm6014_vm8, %v17811_v48 }
0x1177   :  { %16311 = vmatprep.mubr.msk.bf16.mxu1 %vm18116_vm4, %v18115_v39 }
0x117e   :  { %16312 = vmatmul.mubr.msk.bf16.gmra.mrb[28].mxu1 %vm6014_vm8, %v17812_v55 }
0x117f   :  { %16315 = vmatprep.mubr.msk.bf16.mxu1 %vm18116_vm4, %v18115_v39 }
0x1186   :  { %16316 = vmatmul.mubr.msk.bf16.gmra.mrb[32].mxu1 %vm6014_vm8, %v17813_v30 }
0x1187   :  { %16393 = vmatprep.mubr.msk.bf16.mxu1 %vm18116_vm4, %v18115_v39 }
0x1229   :  { %v7488_v14 = vpop.f32.mrb[8].mxu1 }
0x122a   :  { %v16848_v38 = vadd.f32 %v7488_v14, %v6819_v7  ;;  %v16293_v28 = vpop.f32.mrb[9].mxu1 }
0x122b   :  { %v7491_v12 = vpop.f32.mrb[10].mxu1 }
0x122c   :  { %v16849_v47 = vadd.f32 %v7491_v12, %v6820_v13  ;;  %v16294_v49 = vpop.f32.mrb[11].mxu1  ;;  %v7557_v3 = vmax.f32 %v16848_v38, 0.0 }
0x122e   :  { %v7558_v19 = vmax.f32 %v16849_v47, 0.0  ;;  %v6831_v47 = vld [vmem:[%s23236_s18 + $0x60] sm:$0xff] }
0x1230   :  { %v21287_v52 = vpack.c.bf16 %v7558_v19, %v7557_v3  ;;  %v6832_v3 = vld [vmem:[%s23236_s18 + $0x68] sm:$0xff] }
0x1231   :  { %v7496_v62 = vpop.f32.mrb[12].mxu1 }
0x1232   :  { %v16850_v23 = vadd.f32 %v7496_v62, %v6821_v10  ;;  %v16297_v34 = vpop.f32.mrb[13].mxu1  ;;  %16322 = vmatmul.mubr.msk.bf16.vlgmr.msra.gmra.mrb[184].mxu0 %vm7607_vm13, %v21287_v52  ;;  %16394 = vmatmul.mubr.msk.bf16.vlgmr.msra.gmra.mrb[36].mxu1 %vm7607_vm13, %v21287_v52 }
0x1233   :  { %v7499_v11 = vpop.f32.mrb[14].mxu1  ;;  %16325 = vmatprep.mubr.msk.bf16.mxu0 %vm18116_vm4, %v18115_v39  ;;  %16397 = vmatprep.mubr.msk.bf16.mxu1 %vm18116_vm4, %v18115_v39 }
0x1234   :  { %v16851_v56 = vadd.f32 %v7499_v11, %v6822_v20  ;;  %v16298_v6 = vpop.f32.mrb[15].mxu1  ;;  %16464 = vmatpush3.bf16.msra.mxu1 %v8463_v54  ;;  %v7559_v41 = vmax.f32 %v16850_v23, 0.0 }
0x1235   :  { %16535 = vmatprep.subr.bf16.mxu1 %v18115_v39 }
0x1236   :  { %v7560_v53 = vmax.f32 %v16851_v56, 0.0  ;;  %v13588_v56 = vld [vmem:[%s23235_s20 + $0xc] sm:$0xf] }
0x1237   :  { %v8878_v6 = vand.u32 %v13588_v56, %v21267_v4 }
0x1238   :  { %v21305_v57 = vpack.c.bf16 %v7560_v53, %v7559_v41  ;;  %v13652_v41 = vld [vmem:[%s23235_s20 + $0x10] sm:$0xf] }
0x1239   :  { %v7504_v18 = vpop.f32.mrb[16].mxu1  ;;  %v9293_v53 = vand.u32 %v13652_v41, %v21267_v4  ;;  %v17814_v4 = vld [vmem:[%s23237_s19] sm:$0xff]  }
0x123a   :  { %v16852_v0 = vadd.f32 %v7504_v18, %v6823_v58  ;;  %v16301_v43 = vpop.f32.mrb[17].mxu1  ;;  %16326 = vmatmul.mubr.msk.bf16.gmra.mrb[188].mxu0 %vm7607_vm13, %v21305_v57  ;;  %16398 = vmatmul.mubr.msk.bf16.gmra.mrb[40].mxu1 %vm7607_vm13, %v21305_v57 }
0x123b   :  { %v7507_v2 = vpop.f32.mrb[18].mxu1  ;;  %16329 = vmatprep.mubr.msk.bf16.mxu0 %vm18116_vm4, %v18115_v39  ;;  %16401 = vmatprep.mubr.msk.bf16.mxu1 %vm18116_vm4, %v18115_v39 }
0x123c   :  { %v16853_v15 = vadd.f32 %v7507_v2, %v6824_v60  ;;  %v16302_v51 = vpop.f32.mrb[19].mxu1  ;;  %v7561_v29 = vmax.f32 %v16852_v0, 0.0 }
0x123e   :  { %v7562_v5 = vmax.f32 %v16853_v15, 0.0 }
0x1240   :  { %v21321_v27 = vpack.c.bf16 %v7562_v5, %v7561_v29 }
0x1241   :  { %v7512_v21 = vpop.f32.mrb[20].mxu1 }
0x1242   :  { %v16854_v44 = vadd.f32 %v7512_v21, %v6825_v59  ;;  %v16305_v31 = vpop.f32.mrb[21].mxu1  ;;  %16330 = vmatmul.mubr.msk.bf16.gmra.mrb[192].mxu0 %vm7607_vm13, %v21321_v27  ;;  %16402 = vmatmul.mubr.msk.bf16.gmra.mrb[44].mxu1 %vm7607_vm13, %v21321_v27 }
0x1243   :  { %v7515_v17 = vpop.f32.mrb[22].mxu1  ;;  %16333 = vmatprep.mubr.msk.bf16.mxu0 %vm18116_vm4, %v18115_v39  ;;  %16405 = vmatprep.mubr.msk.bf16.mxu1 %vm18116_vm4, %v18115_v39 }
0x1244   :  { %v16855_v61 = vadd.f32 %v7515_v17, %v6826_v36  ;;  %v16306_v32 = vpop.f32.mrb[23].mxu1  ;;  %v7563_v35 = vmax.f32 %v16854_v44, 0.0 }
0x1246   :  { %v7564_v22 = vmax.f32 %v16855_v61, 0.0 }
0x1248   :  { %v21337_v45 = vpack.c.bf16 %v7564_v22, %v7563_v35 }
0x1249   :  { %v7520_v63 = vpop.f32.mrb[24].mxu1 }
0x124a   :  { %v16856_v9 = vadd.f32 %v7520_v63, %v6827_v33  ;;  %v16309_v1 = vpop.f32.mrb[25].mxu1  ;;  %16334 = vmatmul.mubr.msk.bf16.gmra.mrb[196].mxu0 %vm7607_vm13, %v21337_v45  ;;  %16406 = vmatmul.mubr.msk.bf16.gmra.mrb[48].mxu1 %vm7607_vm13, %v21337_v45 }
0x124b   :  { %v7523_v8 = vpop.f32.mrb[26].mxu1  ;;  %16337 = vmatprep.mubr.msk.bf16.mxu0 %vm18116_vm4, %v18115_v39  ;;  %16409 = vmatprep.mubr.msk.bf16.mxu1 %vm18116_vm4, %v18115_v39 }
0x124c   :  { %v16857_v24 = vadd.f32 %v7523_v8, %v6828_v25  ;;  %v16310_v48 = vpop.f32.mrb[27].mxu1  ;;  %v7565_v55 = vmax.f32 %v16856_v9, 0.0 }
0x124e   :  { %v7566_v30 = vmax.f32 %v16857_v24, 0.0 }
0x1250   :  { %v21353_v26 = vpack.c.bf16 %v7566_v30, %v7565_v55 }
0x1251   :  { %v7528_v16 = vpop.f32.mrb[28].mxu1 }
0x1252   :  { %v16858_v46 = vadd.f32 %v7528_v16, %v6829_v37  ;;  %v16313_v7 = vpop.f32.mrb[29].mxu1  ;;  %16338 = vmatmul.mubr.msk.bf16.gmra.mrb[200].mxu0 %vm7607_vm13, %v21353_v26  ;;  %16410 = vmatmul.mubr.msk.bf16.gmra.mrb[52].mxu1 %vm7607_vm13, %v21353_v26 }
0x1253   :  { %v7531_v14 = vpop.f32.mrb[30].mxu1  ;;  %16341 = vmatprep.mubr.msk.bf16.mxu0 %vm18116_vm4, %v18115_v39  ;;  %16413 = vmatprep.mubr.msk.bf16.mxu1 %vm18116_vm4, %v18115_v39 }
0x1254   :  { %v16859_v13 = vadd.f32 %v7531_v14, %v6830_v40  ;;  %v16314_v38 = vpop.f32.mrb[31].mxu1  ;;  %v7567_v28 = vmax.f32 %v16858_v46, 0.0 }
0x1256   :  { %v7568_v12 = vmax.f32 %v16859_v13, 0.0 }
0x1258   :  { %v21369_v49 = vpack.c.bf16 %v7568_v12, %v7567_v28 }
0x1259   :  { %v7536_v50 = vpop.f32.mrb[32].mxu1 }
0x125a   :  { %v16860_v19 = vadd.f32 %v7536_v50, %v6831_v47  ;;  %v16317_v10 = vpop.f32.mrb[33].mxu1  ;;  %16342 = vmatmul.mubr.msk.bf16.gmra.mrb[204].mxu0 %vm7607_vm13, %v21369_v49  ;;  %16414 = vmatmul.mubr.msk.bf16.gmra.mrb[56].mxu1 %vm7607_vm13, %v21369_v49 }
0x125b   :  { %v7539_v54 = vpop.f32.mrb[34].mxu1  ;;  %16345 = vmatprep.mubr.msk.bf16.mxu0 %vm18116_vm4, %v18115_v39  ;;  %16417 = vmatprep.mubr.msk.bf16.mxu1 %vm18116_vm4, %v18115_v39 }
0x125c   :  { %v16861_v62 = vadd.f32 %v7539_v54, %v6832_v3  ;;  %v16318_v20 = vpop.f32.mrb[35].mxu1  ;;  %v7569_v23 = vmax.f32 %v16860_v19, 0.0 }
0x125e   :  { %v7570_v34 = vmax.f32 %v16861_v62, 0.0 }
0x1260   :  { %v21382_v11 = vpack.c.bf16 %v7570_v34, %v7569_v23 }
0x1262   :  { %16346 = vmatmul.mubr.msk.bf16.gmra.mrb[208].mxu0 %vm7607_vm13, %v21382_v11  ;;  %16418 = vmatmul.mubr.msk.bf16.gmra.mrb[60].mxu1 %vm7607_vm13, %v21382_v11 }
0x1263   :  { %16465 = vmatprep.mubr.msk.bf16.mxu1 %vm18116_vm4, %v18115_v39  ;;  %16363 = vmatprep.mubr.msk.bf16.mxu0 %vm7829_vm14, %v17814_v4 }
0x126a   :  { %16466 = vmatmul.mubr.msk.bf16.vlgmr.msra.gmra.mrb[64].mxu1 %vm7607_vm13, %v21287_v52 }
0x126b   :  { %16469 = vmatprep.mubr.msk.bf16.mxu1 %vm18116_vm4, %v18115_v39  ;;  %16536 = vmatpush3.bf16.msra.mxu1 %v8878_v6 }
0x126c   :  { %16607 = vmatprep.subr.bf16.mxu1 %v18115_v39 }
0x1272   :  { %16470 = vmatmul.mubr.msk.bf16.gmra.mrb[68].mxu1 %vm7607_vm13, %v21305_v57 }
0x1273   :  { %16473 = vmatprep.mubr.msk.bf16.mxu1 %vm18116_vm4, %v18115_v39 }
0x127a   :  { %16474 = vmatmul.mubr.msk.bf16.gmra.mrb[72].mxu1 %vm7607_vm13, %v21321_v27 }
0x127b   :  { %16477 = vmatprep.mubr.msk.bf16.mxu1 %vm18116_vm4, %v18115_v39 }
0x1282   :  { %16478 = vmatmul.mubr.msk.bf16.gmra.mrb[76].mxu1 %vm7607_vm13, %v21337_v45 }
0x1283   :  { %16481 = vmatprep.mubr.msk.bf16.mxu1 %vm18116_vm4, %v18115_v39 }
0x128a   :  { %16482 = vmatmul.mubr.msk.bf16.gmra.mrb[80].mxu1 %vm7607_vm13, %v21353_v26 }
0x128b   :  { %16485 = vmatprep.mubr.msk.bf16.mxu1 %vm18116_vm4, %v18115_v39 }
0x1292   :  { %16486 = vmatmul.mubr.msk.bf16.gmra.mrb[84].mxu1 %vm7607_vm13, %v21369_v49 }
0x1293   :  { %16489 = vmatprep.mubr.msk.bf16.mxu1 %vm18116_vm4, %v18115_v39 }
0x129a   :  { %16490 = vmatmul.mubr.msk.bf16.gmra.mrb[88].mxu1 %vm7607_vm13, %v21382_v11 }
0x129b   :  { %16537 = vmatprep.mubr.msk.bf16.mxu1 %vm18116_vm4, %v18115_v39 }
0x12a2   :  { %16538 = vmatmul.mubr.msk.bf16.vlgmr.msra.gmra.mrb[92].mxu1 %vm7607_vm13, %v21287_v52 }
0x12a3   :  { %16541 = vmatprep.mubr.msk.bf16.mxu1 %vm18116_vm4, %v18115_v39  ;;  %16608 = vmatpush3.bf16.msra.mxu1 %v9293_v53 }
0x12aa   :  { %16542 = vmatmul.mubr.msk.bf16.gmra.mrb[96].mxu1 %vm7607_vm13, %v21305_v57 }
0x12ab   :  { %16545 = vmatprep.mubr.msk.bf16.mxu1 %vm18116_vm4, %v18115_v39 }
0x12b2   :  { %16546 = vmatmul.mubr.msk.bf16.gmra.mrb[100].mxu1 %vm7607_vm13, %v21321_v27 }
0x12b3   :  { %16549 = vmatprep.mubr.msk.bf16.mxu1 %vm18116_vm4, %v18115_v39 }
0x12ba   :  { %16550 = vmatmul.mubr.msk.bf16.gmra.mrb[104].mxu1 %vm7607_vm13, %v21337_v45 }
0x12bb   :  { %16553 = vmatprep.mubr.msk.bf16.mxu1 %vm18116_vm4, %v18115_v39 }
0x12c2   :  { %16554 = vmatmul.mubr.msk.bf16.gmra.mrb[108].mxu1 %vm7607_vm13, %v21353_v26 }
0x12c3   :  { %16557 = vmatprep.mubr.msk.bf16.mxu1 %vm18116_vm4, %v18115_v39 }
0x12ca   :  { %16558 = vmatmul.mubr.msk.bf16.gmra.mrb[112].mxu1 %vm7607_vm13, %v21369_v49 }
0x12cb   :  { %16561 = vmatprep.mubr.msk.bf16.mxu1 %vm18116_vm4, %v18115_v39 }
0x12d2   :  { %16562 = vmatmul.mubr.msk.bf16.gmra.mrb[116].mxu1 %vm7607_vm13, %v21382_v11 }
0x12d3   :  { %16609 = vmatprep.mubr.msk.bf16.mxu1 %vm18116_vm4, %v18115_v39 }
0x12da   :  { %16610 = vmatmul.mubr.msk.bf16.vlgmr.msra.gmra.mrb[120].mxu1 %vm7607_vm13, %v21287_v52 }
0x12db   :  { %16613 = vmatprep.mubr.msk.bf16.mxu1 %vm18116_vm4, %v18115_v39 }
0x12e2   :  { %16614 = vmatmul.mubr.msk.bf16.gmra.mrb[124].mxu1 %vm7607_vm13, %v21305_v57 }
0x12e3   :  { %16617 = vmatprep.mubr.msk.bf16.mxu1 %vm18116_vm4, %v18115_v39 }
0x12ea   :  { %16618 = vmatmul.mubr.msk.bf16.gmra.mrb[128].mxu1 %vm7607_vm13, %v21321_v27 }
0x12eb   :  { %16621 = vmatprep.mubr.msk.bf16.mxu1 %vm18116_vm4, %v18115_v39 }
0x12f2   :  { %16622 = vmatmul.mubr.msk.bf16.gmra.mrb[132].mxu1 %vm7607_vm13, %v21337_v45 }
0x12f3   :  { %16625 = vmatprep.mubr.msk.bf16.mxu1 %vm18116_vm4, %v18115_v39 }
0x12fa   :  { %16626 = vmatmul.mubr.msk.bf16.gmra.mrb[136].mxu1 %vm7607_vm13, %v21353_v26 }
0x12fb   :  { %16629 = vmatprep.mubr.msk.bf16.mxu1 %vm18116_vm4, %v18115_v39 }
0x1302   :  { %16630 = vmatmul.mubr.msk.bf16.gmra.mrb[140].mxu1 %vm7607_vm13, %v21369_v49 }
0x1303   :  { %16633 = vmatprep.mubr.msk.bf16.mxu1 %vm18116_vm4, %v18115_v39 }
0x1305   :  { %v7669_v52 = vpop.f32.mrb[184].mxu0  ;;  %v8084_v58 = vpop.f32.mrb[36].mxu1 }
0x1306   :  { %v16323_v57 = vpop.f32.mrb[185].mxu0  ;;  %v16395_v18 = vpop.f32.mrb[37].mxu1 }
0x1307   :  { %v7672_v60 = vpop.f32.mrb[186].mxu0  ;;  %v8087_v0 = vpop.f32.mrb[38].mxu1 }
0x1308   :  { %v7752_v43 = vpack.c.bf16 %v7672_v60, %v7669_v52  ;;  %v21483_v2 = vpack.c.bf16 %v8087_v0, %v8084_v58  ;;  %v16324_v15 = vpop.f32.mrb[187].mxu0  ;;  %v16396_v51 = vpop.f32.mrb[39].mxu1 }
0x1309   :  { %v17815_v15 = vld [vmem:[%s23237_s19 + $0x8] sm:$0xff]   ;;  %v17816_v51 = vld [vmem:[%s23237_s19 + $0x10] sm:$0xff]  }
0x130a   :  { %16349 = vmatprep.subr.bf16.mxu0 %v7752_v43  ;;  %16634 = vmatmul.mubr.msk.bf16.gmra.mrb[144].mxu1 %vm7607_vm13, %v21382_v11 }
0x130b   :  { %16350 = vmatpush3.bf16.msra.mxu0 %v7752_v43 }
0x130d   :  { %v7677_v29 = vpop.f32.mrb[188].mxu0  ;;  %v8092_v5 = vpop.f32.mrb[40].mxu1 }
0x130e   :  { %v16327_v59 = vpop.f32.mrb[189].mxu0  ;;  %v16399_v39 = vpop.f32.mrb[41].mxu1 }
0x130f   :  { %v7680_v27 = vpop.f32.mrb[190].mxu0  ;;  %v8095_v21 = vpop.f32.mrb[42].mxu1 }
0x1310   :  { %v7753_v36 = vpack.c.bf16 %v7680_v27, %v7677_v29  ;;  %v21487_v44 = vpack.c.bf16 %v8095_v21, %v8092_v5  ;;  %v16328_v31 = vpop.f32.mrb[191].mxu0  ;;  %v16400_v17 = vpop.f32.mrb[43].mxu1  ;;  %v17817_v21 = vld [vmem:[%s23237_s19 + $0x18] sm:$0xff]  }
0x1312   :  { %16351 = vmatprep.subr.bf16.mxu0 %v7753_v36 }
0x1313   :  { %16352 = vmatpush3.bf16.msra.mxu0 %v7753_v36  ;;  %v17818_v36 = vld [vmem:[%s23237_s19 + $0x20] sm:$0xff]  }
0x1315   :  { %v7685_v61 = vpop.f32.mrb[192].mxu0  ;;  %v8100_v32 = vpop.f32.mrb[44].mxu1 }
0x1316   :  { %v16331_v35 = vpop.f32.mrb[193].mxu0  ;;  %v16403_v22 = vpop.f32.mrb[45].mxu1 }
0x1317   :  { %v7688_v33 = vpop.f32.mrb[194].mxu0  ;;  %v8103_v45 = vpop.f32.mrb[46].mxu1  ;;  %v17820_v35 = vld [vmem:[%s23237_s19 + $0x30] sm:$0xff]  }
0x1318   :  { %v7754_v63 = vpack.c.bf16 %v7688_v33, %v7685_v61  ;;  %v21489_v25 = vpack.c.bf16 %v8103_v45, %v8100_v32  ;;  %v16332_v9 = vpop.f32.mrb[195].mxu0  ;;  %v16404_v1 = vpop.f32.mrb[47].mxu1  ;;  %v17819_v32 = vld [vmem:[%s23237_s19 + $0x28] sm:$0xff]  }
0x1319   :  { %v17821_v9 = vld [vmem:[%s23237_s19 + $0x38] sm:$0xff]   ;;  %v17822_v1 = vld [vmem:[%s23237_s19 + $0x40] sm:$0xff]  }
0x131a   :  { %16353 = vmatprep.subr.bf16.mxu0 %v7754_v63 }
0x131b   :  { %16354 = vmatpush3.bf16.msra.mxu0 %v7754_v63 }
0x131d   :  { %v7693_v8 = vpop.f32.mrb[196].mxu0  ;;  %v8108_v24 = vpop.f32.mrb[48].mxu1 }
0x131e   :  { %v16335_v48 = vpop.f32.mrb[197].mxu0  ;;  %v16407_v55 = vpop.f32.mrb[49].mxu1 }
0x131f   :  { %v7696_v30 = vpop.f32.mrb[198].mxu0  ;;  %v8111_v37 = vpop.f32.mrb[50].mxu1 }
0x1320   :  { %v7755_v26 = vpack.c.bf16 %v7696_v30, %v7693_v8  ;;  %v21491_v16 = vpack.c.bf16 %v8111_v37, %v8108_v24  ;;  %v16336_v40 = vpop.f32.mrb[199].mxu0  ;;  %v16408_v46 = vpop.f32.mrb[51].mxu1  ;;  %v17823_v37 = vld [vmem:[%s23237_s19 + $0x48] sm:$0xff]  }
0x1322   :  { %16355 = vmatprep.subr.bf16.mxu0 %v7755_v26 }
0x1323   :  { %16356 = vmatpush3.bf16.msra.mxu0 %v7755_v26  ;;  %v17824_v26 = vld [vmem:[%s23237_s19 + $0x50] sm:$0xff]  }
0x1325   :  { %v7701_v7 = vpop.f32.mrb[200].mxu0  ;;  %v8116_v14 = vpop.f32.mrb[52].mxu1 }
0x1326   :  { %v16339_v13 = vpop.f32.mrb[201].mxu0  ;;  %v16411_v38 = vpop.f32.mrb[53].mxu1 }
0x1327   :  { %v7704_v28 = vpop.f32.mrb[202].mxu0  ;;  %v8119_v12 = vpop.f32.mrb[54].mxu1  ;;  %v17825_v13 = vld [vmem:[%s23237_s19 + $0x58] sm:$0xff]   ;;  %v17826_v38 = vld [vmem:[%s23237_s19 + $0x60] sm:$0xff]  }
0x1328   :  { %v7756_v47 = vpack.c.bf16 %v7704_v28, %v7701_v7  ;;  %v8172_v49 = vpack.c.bf16 %v8119_v12, %v8116_v14  ;;  %v16340_v50 = vpop.f32.mrb[203].mxu0  ;;  %v16412_v3 = vpop.f32.mrb[55].mxu1 }
0x1329   :  { %v17827_v3 = vld [vmem:[%s23237_s19 + $0x68] sm:$0xff]  }
0x132a   :  { %16357 = vmatprep.subr.bf16.mxu0 %v7756_v47 }
0x132b   :  { %16358 = vmatpush3.bf16.msra.mxu0 %v7756_v47 }
0x132d   :  { %v7709_v19 = vpop.f32.mrb[204].mxu0  ;;  %v8124_v10 = vpop.f32.mrb[56].mxu1 }
0x132e   :  { %v16343_v54 = vpop.f32.mrb[205].mxu0  ;;  %v16415_v62 = vpop.f32.mrb[57].mxu1 }
0x132f   :  { %v7712_v20 = vpop.f32.mrb[206].mxu0  ;;  %v8127_v23 = vpop.f32.mrb[58].mxu1 }
0x1330   :  { %v7757_v34 = vpack.c.bf16 %v7712_v20, %v7709_v19  ;;  %v8173_v11 = vpack.c.bf16 %v8127_v23, %v8124_v10  ;;  %v16344_v56 = vpop.f32.mrb[207].mxu0  ;;  %v16416_v6 = vpop.f32.mrb[59].mxu1  ;;  %v17828_v19 = vld [vmem:[%s23237_s19 + $0x70] sm:$0xff]  }
0x1332   :  { %16359 = vmatprep.subr.bf16.mxu0 %v7757_v34 }
0x1333   :  { %16360 = vmatpush3.bf16.msra.mxu0 %v7757_v34  ;;  %v17829_v34 = vld [vmem:[%s23237_s19 + $0x78] sm:$0xff]  }
0x1335   :  { %v7717_v41 = vpop.f32.mrb[208].mxu0  ;;  %v8132_v53 = vpop.f32.mrb[60].mxu1 }
0x1336   :  { %v16347_v4 = vpop.f32.mrb[209].mxu0  ;;  %v16419_v52 = vpop.f32.mrb[61].mxu1 }
0x1337   :  { %v7720_v58 = vpop.f32.mrb[210].mxu0  ;;  %v8135_v57 = vpop.f32.mrb[62].mxu1  ;;  %v17831_v52 = vld [vmem:[%s23237_s19 + $0x88] sm:$0xff]  }
0x1338   :  { %v7758_v18 = vpack.c.bf16 %v7720_v58, %v7717_v41  ;;  %v8174_v60 = vpack.c.bf16 %v8135_v57, %v8132_v53  ;;  %v16348_v0 = vpop.f32.mrb[211].mxu0  ;;  %v16420_v43 = vpop.f32.mrb[63].mxu1  ;;  %v17832_v58 = vld [vmem:[%s23237_s19 + $0x90] sm:$0xff]  }
0x133a   :  { %16361 = vmatprep.subr.bf16.mxu0 %v7758_v18 }
0x133b   :  { %16362 = vmatpush3.bf16.msra.mxu0 %v7758_v18 }
0x133c   :  { %16421 = vmatprep.subr.bf16.mxu0 %v21483_v2 }
0x133d   :  { %v8499_v29 = vpop.f32.mrb[64].mxu1 }
0x133e   :  { %16364 = vmatmul.mubr.msk.bf16.vlgmr.msra.gmra.mrb[212].mxu0 %vm7829_vm14, %v17815_v15  ;;  %v16467_v5 = vpop.f32.mrb[65].mxu1  ;;  %v17833_v15 = vld [vmem:[%s23237_s19 + $0x98] sm:$0xff]  }
0x133f   :  { %16422 = vmatpush3.bf16.msra.mxu0 %v21483_v2  ;;  %v8502_v59 = vpop.f32.mrb[66].mxu1  ;;  %16367 = vmatprep.mubr.msk.bf16.mxu0 %vm7829_vm14, %v17816_v51  ;;  %v17834_v51 = vld [vmem:[%s23237_s19 + $0xa0] sm:$0xff]  }
0x1340   :  { %v21503_v39 = vpack.c.bf16 %v8502_v59, %v8499_v29  ;;  %16423 = vmatprep.subr.bf16.mxu0 %v21487_v44  ;;  %v16468_v27 = vpop.f32.mrb[67].mxu1 }
0x1343   :  { %16424 = vmatpush3.bf16.msra.mxu0 %v21487_v44 }
0x1344   :  { %16425 = vmatprep.subr.bf16.mxu0 %v21489_v25 }
0x1345   :  { %v8507_v2 = vpop.f32.mrb[68].mxu1 }
0x1346   :  { %16368 = vmatmul.mubr.msk.bf16.gmra.mrb[216].mxu0 %vm7829_vm14, %v17817_v21  ;;  %v16471_v31 = vpop.f32.mrb[69].mxu1  ;;  %v17835_v21 = vld [vmem:[%s23237_s19 + $0xa8] sm:$0xff]  }
0x1347   :  { %16426 = vmatpush3.bf16.msra.mxu0 %v21489_v25  ;;  %v8510_v17 = vpop.f32.mrb[70].mxu1  ;;  %16371 = vmatprep.mubr.msk.bf16.mxu0 %vm7829_vm14, %v17818_v36  ;;  %v17836_v36 = vld [vmem:[%s23237_s19 + $0xb0] sm:$0xff]  }
0x1348   :  { %v21517_v61 = vpack.c.bf16 %v8510_v17, %v8507_v2  ;;  %16427 = vmatprep.subr.bf16.mxu0 %v21491_v16  ;;  %v16472_v44 = vpop.f32.mrb[71].mxu1 }
0x134b   :  { %16428 = vmatpush3.bf16.msra.mxu0 %v21491_v16 }
0x134c   :  { %16429 = vmatprep.subr.bf16.mxu0 %v8172_v49 }
0x134d   :  { %v8515_v22 = vpop.f32.mrb[72].mxu1 }
0x134e   :  { %16372 = vmatmul.mubr.msk.bf16.gmra.mrb[220].mxu0 %vm7829_vm14, %v17819_v32  ;;  %v16475_v33 = vpop.f32.mrb[73].mxu1  ;;  %v17837_v32 = vld [vmem:[%s23237_s19 + $0xb8] sm:$0xff]  }
0x134f   :  { %16430 = vmatpush3.bf16.msra.mxu0 %v8172_v49  ;;  %v8518_v45 = vpop.f32.mrb[74].mxu1  ;;  %16375 = vmatprep.mubr.msk.bf16.mxu0 %vm7829_vm14, %v17820_v35  ;;  %v17838_v35 = vld [vmem:[%s23237_s19 + $0xc0] sm:$0xff]  }
0x1350   :  { %v8585_v63 = vpack.c.bf16 %v8518_v45, %v8515_v22  ;;  %16431 = vmatprep.subr.bf16.mxu0 %v8173_v11  ;;  %v16476_v25 = vpop.f32.mrb[75].mxu1 }
0x1353   :  { %16432 = vmatpush3.bf16.msra.mxu0 %v8173_v11  ;;  %v17830_v11 = vld [vmem:[%s23237_s19 + $0x80] sm:$0xff]  }
0x1354   :  { %16433 = vmatprep.subr.bf16.mxu0 %v8174_v60 }
0x1355   :  { %v8523_v8 = vpop.f32.mrb[76].mxu1 }
0x1356   :  { %16376 = vmatmul.mubr.msk.bf16.gmra.mrb[224].mxu0 %vm7829_vm14, %v17821_v9  ;;  %v16479_v24 = vpop.f32.mrb[77].mxu1  ;;  %v17839_v9 = vld [vmem:[%s23237_s19 + $0xc8] sm:$0xff]  }
0x1357   :  { %16434 = vmatpush3.bf16.msra.mxu0 %v8174_v60  ;;  %v8526_v48 = vpop.f32.mrb[78].mxu1  ;;  %16379 = vmatprep.mubr.msk.bf16.mxu0 %vm7829_vm14, %v17822_v1  ;;  %v17840_v1 = vld [vmem:[%s23237_s19 + $0xd0] sm:$0xff]  }
0x1358   :  { %v8586_v55 = vpack.c.bf16 %v8526_v48, %v8523_v8  ;;  %v16480_v30 = vpop.f32.mrb[79].mxu1  ;;  %16493 = vmatprep.subr.bf16.mxu0 %v21503_v39 }
0x135d   :  { %v8531_v16 = vpop.f32.mrb[80].mxu1 }
0x135e   :  { %16380 = vmatmul.mubr.msk.bf16.gmra.mrb[228].mxu0 %vm7829_vm14, %v17823_v37  ;;  %v16483_v40 = vpop.f32.mrb[81].mxu1  ;;  %v17841_v37 = vld [vmem:[%s23237_s19 + $0xd8] sm:$0xff]  }
0x135f   :  { %v8534_v46 = vpop.f32.mrb[82].mxu1  ;;  %16383 = vmatprep.mubr.msk.bf16.mxu0 %vm7829_vm14, %v17824_v26  ;;  %v17842_v26 = vld [vmem:[%s23237_s19 + $0xe0] sm:$0xff]  }
0x1360   :  { %v8587_v7 = vpack.c.bf16 %v8534_v46, %v8531_v16  ;;  %v16484_v14 = vpop.f32.mrb[83].mxu1 }
0x1365   :  { %v8539_v28 = vpop.f32.mrb[84].mxu1 }
0x1366   :  { %16384 = vmatmul.mubr.msk.bf16.gmra.mrb[232].mxu0 %vm7829_vm14, %v17825_v13  ;;  %v16487_v12 = vpop.f32.mrb[85].mxu1  ;;  %v17843_v13 = vld [vmem:[%s23237_s19 + $0xe8] sm:$0xff]  }
0x1367   :  { %v8542_v47 = vpop.f32.mrb[86].mxu1  ;;  %16387 = vmatprep.mubr.msk.bf16.mxu0 %vm7829_vm14, %v17826_v38  ;;  %v17844_v38 = vld [vmem:[%s23237_s19 + $0xf0] sm:$0xff]  }
0x1368   :  { %v8588_v49 = vpack.c.bf16 %v8542_v47, %v8539_v28  ;;  %v16488_v50 = vpop.f32.mrb[87].mxu1 }
0x136d   :  { %v8547_v10 = vpop.f32.mrb[88].mxu1 }
0x136e   :  { %16388 = vmatmul.mubr.msk.bf16.gmra.mrb[236].mxu0 %vm7829_vm14, %v17827_v3  ;;  %v16491_v54 = vpop.f32.mrb[89].mxu1  ;;  %v17845_v3 = vld [vmem:[%s23237_s19 + $0xf8] sm:$0xff]  }
0x136f   :  { %v8550_v62 = vpop.f32.mrb[90].mxu1  ;;  %16435 = vmatprep.mubr.msk.bf16.mxu0 %vm7829_vm14, %v17828_v19  ;;  %v17846_v19 = vld [vmem:[%s23237_s19 + $0x100] sm:$0xff]  }
0x1370   :  { %v8589_v20 = vpack.c.bf16 %v8550_v62, %v8547_v10  ;;  %v16492_v23 = vpop.f32.mrb[91].mxu1 }
0x1375   :  { %v8914_v56 = vpop.f32.mrb[92].mxu1 }
0x1376   :  { %16436 = vmatmul.mubr.msk.bf16.vlgmr.msra.gmra.mrb[212].mxu0 %vm7829_vm14, %v17829_v34  ;;  %v16539_v6 = vpop.f32.mrb[93].mxu1  ;;  %v17847_v34 = vld [vmem:[%s23237_s19 + $0x108] sm:$0xff]  }
0x1377   :  { %16494 = vmatpush3.bf16.msra.mxu0 %v21503_v39  ;;  %v8917_v41 = vpop.f32.mrb[94].mxu1  ;;  %16439 = vmatprep.mubr.msk.bf16.mxu0 %vm7829_vm14, %v17830_v11  ;;  %v17848_v11 = vld [vmem:[%s23237_s19 + $0x110] sm:$0xff]  }
0x1378   :  { %16495 = vmatprep.subr.bf16.mxu0 %v21517_v61  ;;  %v21572_v53 = vpack.c.bf16 %v8917_v41, %v8914_v56  ;;  %v16540_v4 = vpop.f32.mrb[95].mxu1 }
0x137b   :  { %16496 = vmatpush3.bf16.msra.mxu0 %v21517_v61 }
0x137c   :  { %16497 = vmatprep.subr.bf16.mxu0 %v8585_v63 }
0x137d   :  { %v8922_v57 = vpop.f32.mrb[96].mxu1 }
0x137e   :  { %16440 = vmatmul.mubr.msk.bf16.gmra.mrb[216].mxu0 %vm7829_vm14, %v17831_v52  ;;  %v16543_v18 = vpop.f32.mrb[97].mxu1  ;;  %v17849_v52 = vld [vmem:[%s23237_s19 + $0x118] sm:$0xff]  }
0x137f   :  { %16498 = vmatpush3.bf16.msra.mxu0 %v8585_v63  ;;  %v8925_v60 = vpop.f32.mrb[98].mxu1  ;;  %16443 = vmatprep.mubr.msk.bf16.mxu0 %vm7829_vm14, %v17832_v58  ;;  %v17850_v58 = vld [vmem:[%s23237_s19 + $0x120] sm:$0xff]  }
0x1380   :  { %16499 = vmatprep.subr.bf16.mxu0 %v8586_v55  ;;  %v21583_v0 = vpack.c.bf16 %v8925_v60, %v8922_v57  ;;  %v16544_v43 = vpop.f32.mrb[99].mxu1 }
0x1383   :  { %16500 = vmatpush3.bf16.msra.mxu0 %v8586_v55 }
0x1384   :  { %16501 = vmatprep.subr.bf16.mxu0 %v8587_v7 }
0x1385   :  { %v8930_v29 = vpop.f32.mrb[100].mxu1 }
0x1386   :  { %16444 = vmatmul.mubr.msk.bf16.gmra.mrb[220].mxu0 %vm7829_vm14, %v17833_v15  ;;  %v16547_v5 = vpop.f32.mrb[101].mxu1  ;;  %v17851_v15 = vld [vmem:[%s23237_s19 + $0x128] sm:$0xff]  }
0x1387   :  { %16502 = vmatpush3.bf16.msra.mxu0 %v8587_v7  ;;  %v8933_v59 = vpop.f32.mrb[102].mxu1  ;;  %16447 = vmatprep.mubr.msk.bf16.mxu0 %vm7829_vm14, %v17834_v51  ;;  %v17852_v51 = vld [vmem:[%s23237_s19 + $0x130] sm:$0xff]  }
0x1388   :  { %16503 = vmatprep.subr.bf16.mxu0 %v8588_v49  ;;  %v9000_v39 = vpack.c.bf16 %v8933_v59, %v8930_v29  ;;  %v16548_v27 = vpop.f32.mrb[103].mxu1 }
0x138b   :  { %16504 = vmatpush3.bf16.msra.mxu0 %v8588_v49 }
0x138c   :  { %16505 = vmatprep.subr.bf16.mxu0 %v8589_v20 }
0x138d   :  { %v8938_v2 = vpop.f32.mrb[104].mxu1 }
0x138e   :  { %16448 = vmatmul.mubr.msk.bf16.gmra.mrb[224].mxu0 %vm7829_vm14, %v17835_v21  ;;  %v16551_v31 = vpop.f32.mrb[105].mxu1  ;;  %v17884_v21 = vld [vmem:[%s23238_s23] sm:$0x7f]  }
0x138f   :  { %16506 = vmatpush3.bf16.msra.mxu0 %v8589_v20  ;;  %v8941_v17 = vpop.f32.mrb[106].mxu1  ;;  %16451 = vmatprep.mubr.msk.bf16.mxu0 %vm7829_vm14, %v17836_v36  ;;  %v17853_v36 = vld [vmem:[%s23237_s19 + $0x138] sm:$0xff]   ;;  %v17854_v31 = vld [vmem:[%s23237_s19 + $0x140] sm:$0xff]  }
0x1390   :  { %v9001_v61 = vpack.c.bf16 %v8941_v17, %v8938_v2  ;;  %16565 = vmatprep.subr.bf16.mxu0 %v21572_v53  ;;  %v16552_v44 = vpop.f32.mrb[107].mxu1  ;;  %17369 = vmatprep.subr.msk.bf16.mxu1 %vm9825_vm15, %v17884_v21  ;;  %v9827_v2 = vsel %vm9825_vm15, %v17884_v21, 0 }
0x1391   :  { %16680 = vmatpush3.bf16.msra.mxu1 %v9827_v2  ;;  %v7585_v2 = vld [vmem:[%s23239_s21 + $0x38] sm:$0xff] }
0x1395   :  { %v8946_v22 = vpop.f32.mrb[108].mxu1 }
0x1396   :  { %16452 = vmatmul.mubr.msk.bf16.gmra.mrb[228].mxu0 %vm7829_vm14, %v17837_v32  ;;  %v16555_v33 = vpop.f32.mrb[109].mxu1 }
0x1397   :  { %v8949_v45 = vpop.f32.mrb[110].mxu1  ;;  %16455 = vmatprep.mubr.msk.bf16.mxu0 %vm7829_vm14, %v17838_v35  ;;  %v17856_v33 = vld [vmem:[%s23237_s19 + $0x150] sm:$0xff]  }
0x1398   :  { %v9002_v63 = vpack.c.bf16 %v8949_v45, %v8946_v22  ;;  %v16556_v25 = vpop.f32.mrb[111].mxu1  ;;  %v17855_v22 = vld [vmem:[%s23237_s19 + $0x148] sm:$0xff]  }
0x139d   :  { %v8954_v8 = vpop.f32.mrb[112].mxu1 }
0x139e   :  { %16456 = vmatmul.mubr.msk.bf16.gmra.mrb[232].mxu0 %vm7829_vm14, %v17839_v9  ;;  %v16559_v24 = vpop.f32.mrb[113].mxu1 }
0x139f   :  { %v8957_v48 = vpop.f32.mrb[114].mxu1  ;;  %16459 = vmatprep.mubr.msk.bf16.mxu0 %vm7829_vm14, %v17840_v1  ;;  %v17858_v24 = vld [vmem:[%s23237_s19 + $0x160] sm:$0xff]  }
0x13a0   :  { %v9003_v55 = vpack.c.bf16 %v8957_v48, %v8954_v8  ;;  %v16560_v30 = vpop.f32.mrb[115].mxu1  ;;  %v17857_v8 = vld [vmem:[%s23237_s19 + $0x158] sm:$0xff]   ;;  %v17859_v48 = vld [vmem:[%s23237_s19 + $0x168] sm:$0xff]  }
0x13a1   :  { %v17861_v30 = vld [vmem:[%s23237_s19 + $0x178] sm:$0xff]  }
0x13a5   :  { %v8962_v16 = vpop.f32.mrb[116].mxu1 }
0x13a6   :  { %16460 = vmatmul.mubr.msk.bf16.gmra.mrb[236].mxu0 %vm7829_vm14, %v17841_v37  ;;  %v16563_v40 = vpop.f32.mrb[117].mxu1  ;;  %v17862_v37 = vld [vmem:[%s23237_s19 + $0x180] sm:$0xff]  }
0x13a7   :  { %v8965_v46 = vpop.f32.mrb[118].mxu1  ;;  %16507 = vmatprep.mubr.msk.bf16.mxu0 %vm7829_vm14, %v17842_v26  ;;  %v17863_v26 = vld [vmem:[%s23237_s19 + $0x188] sm:$0xff]   ;;  %v17865_v40 = vld [vmem:[%s23237_s19 + $0x198] sm:$0xff]  }
0x13a8   :  { %v9004_v7 = vpack.c.bf16 %v8965_v46, %v8962_v16  ;;  %v16564_v14 = vpop.f32.mrb[119].mxu1  ;;  %v17864_v16 = vld [vmem:[%s23237_s19 + $0x190] sm:$0xff]   ;;  %v17866_v46 = vld [vmem:[%s23237_s19 + $0x1a0] sm:$0xff]  }
0x13a9   :  { %v17868_v14 = vld [vmem:[%s23237_s19 + $0x1b0] sm:$0xff]  }
0x13ad   :  { %v9329_v28 = vpop.f32.mrb[120].mxu1 }
0x13ae   :  { %16508 = vmatmul.mubr.msk.bf16.vlgmr.msra.gmra.mrb[212].mxu0 %vm7829_vm14, %v17843_v13  ;;  %v16611_v12 = vpop.f32.mrb[121].mxu1  ;;  %v17869_v13 = vld [vmem:[%s23237_s19 + $0x1b8] sm:$0xff]  }
0x13af   :  { %16566 = vmatpush3.bf16.msra.mxu0 %v21572_v53  ;;  %v9332_v47 = vpop.f32.mrb[122].mxu1  ;;  %16511 = vmatprep.mubr.msk.bf16.mxu0 %vm7829_vm14, %v17844_v38  ;;  %v17870_v38 = vld [vmem:[%s23237_s19 + $0x1c0] sm:$0xff]   ;;  %v17872_v12 = vld [vmem:[%s23237_s19 + $0x1d0] sm:$0xff]  }
0x13b0   :  { %16567 = vmatprep.subr.bf16.mxu0 %v21583_v0  ;;  %v21636_v49 = vpack.c.bf16 %v9332_v47, %v9329_v28  ;;  %v16612_v50 = vpop.f32.mrb[123].mxu1  ;;  %v17871_v28 = vld [vmem:[%s23237_s19 + $0x1c8] sm:$0xff]   ;;  %v17873_v47 = vld [vmem:[%s23237_s19 + $0x1d8] sm:$0xff]  }
0x13b1   :  { %v17875_v50 = vld [vmem:[%s23237_s19 + $0x1e8] sm:$0xff]  }
0x13b3   :  { %16568 = vmatpush3.bf16.msra.mxu0 %v21583_v0 }
0x13b4   :  { %16569 = vmatprep.subr.bf16.mxu0 %v9000_v39 }
0x13b5   :  { %v9337_v10 = vpop.f32.mrb[124].mxu1 }
0x13b6   :  { %16512 = vmatmul.mubr.msk.bf16.gmra.mrb[216].mxu0 %vm7829_vm14, %v17845_v3  ;;  %v16615_v54 = vpop.f32.mrb[125].mxu1  ;;  %v17876_v3 = vld [vmem:[%s23237_s19 + $0x1f0] sm:$0xff]  }
0x13b7   :  { %16570 = vmatpush3.bf16.msra.mxu0 %v9000_v39  ;;  %v9340_v62 = vpop.f32.mrb[126].mxu1  ;;  %16515 = vmatprep.mubr.msk.bf16.mxu0 %vm7829_vm14, %v17846_v19  ;;  %v17877_v19 = vld [vmem:[%s23237_s19 + $0x1f8] sm:$0xff]   ;;  %v17879_v54 = vld [vmem:[%s23237_s19 + $0x208] sm:$0xff]  }
0x13b8   :  { %16571 = vmatprep.subr.bf16.mxu0 %v9001_v61  ;;  %v21647_v20 = vpack.c.bf16 %v9340_v62, %v9337_v10  ;;  %v16616_v23 = vpop.f32.mrb[127].mxu1  ;;  %v17878_v10 = vld [vmem:[%s23237_s19 + $0x200] sm:$0xff]   ;;  %v17880_v62 = vld [vmem:[%s23237_s19 + $0x210] sm:$0xff]  }
0x13b9   :  { %v17882_v23 = vld [vmem:[%s23237_s19 + $0x220] sm:$0xff]  }
0x13bb   :  { %16572 = vmatpush3.bf16.msra.mxu0 %v9001_v61 }
0x13bc   :  { %16573 = vmatprep.subr.bf16.mxu0 %v9002_v63 }
0x13bd   :  { %v9345_v56 = vpop.f32.mrb[128].mxu1 }
0x13be   :  { %16516 = vmatmul.mubr.msk.bf16.gmra.mrb[220].mxu0 %vm7829_vm14, %v17847_v34  ;;  %v16619_v6 = vpop.f32.mrb[129].mxu1  ;;  %v17883_v34 = vld [vmem:[%s23237_s19 + $0x228] sm:$0xff]  }
0x13bf   :  { %16574 = vmatpush3.bf16.msra.mxu0 %v9002_v63  ;;  %v9348_v41 = vpop.f32.mrb[130].mxu1  ;;  %16519 = vmatprep.mubr.msk.bf16.mxu0 %vm7829_vm14, %v17848_v11  ;;  %v17885_v11 = vld [vmem:[%s23238_s23 + $0x8] sm:$0x7f]   ;;  %v7578_v6 = vld [vmem:[%s23239_s21] sm:$0xff] }
0x13c0   :  { %16575 = vmatprep.subr.bf16.mxu0 %v9003_v55  ;;  %v9415_v53 = vpack.c.bf16 %v9348_v41, %v9345_v56  ;;  %v16620_v4 = vpop.f32.mrb[131].mxu1  ;;  %17370 = vmatprep.subr.msk.bf16.mxu1 %vm9825_vm15, %v17885_v11  ;;  %v7580_v56 = vld [vmem:[%s23239_s21 + $0x10] sm:$0xff] }
0x13c3   :  { %16576 = vmatpush3.bf16.msra.mxu0 %v9003_v55  ;;  %v17860_v55 = vld [vmem:[%s23237_s19 + $0x170] sm:$0xff]  }
0x13c4   :  { %16577 = vmatprep.subr.bf16.mxu0 %v9004_v7 }
0x13c5   :  { %v9353_v57 = vpop.f32.mrb[132].mxu1 }
0x13c6   :  { %16520 = vmatmul.mubr.msk.bf16.gmra.mrb[224].mxu0 %vm7829_vm14, %v17849_v52  ;;  %v16623_v18 = vpop.f32.mrb[133].mxu1 }
0x13c7   :  { %16578 = vmatpush3.bf16.msra.mxu0 %v9004_v7  ;;  %v9356_v60 = vpop.f32.mrb[134].mxu1  ;;  %16523 = vmatprep.mubr.msk.bf16.mxu0 %vm7829_vm14, %v17850_v58  ;;  %v17867_v7 = vld [vmem:[%s23237_s19 + $0x1a8] sm:$0xff]  }
0x13c8   :  { %v9416_v0 = vpack.c.bf16 %v9356_v60, %v9353_v57  ;;  %16637 = vmatprep.subr.bf16.mxu0 %v21636_v49  ;;  %v16624_v43 = vpop.f32.mrb[135].mxu1  ;;  %v7579_v58 = vld [vmem:[%s23239_s21 + $0x8] sm:$0xff] }
0x13cd   :  { %v9361_v29 = vpop.f32.mrb[136].mxu1 }
0x13ce   :  { %16524 = vmatmul.mubr.msk.bf16.gmra.mrb[228].mxu0 %vm7829_vm14, %v17851_v15  ;;  %v16627_v5 = vpop.f32.mrb[137].mxu1 }
0x13cf   :  { %v9364_v59 = vpop.f32.mrb[138].mxu1  ;;  %16527 = vmatprep.mubr.msk.bf16.mxu0 %vm7829_vm14, %v17852_v51 }
0x13d0   :  { %v9417_v39 = vpack.c.bf16 %v9364_v59, %v9361_v29  ;;  %v16628_v27 = vpop.f32.mrb[139].mxu1  ;;  %v7584_v59 = vld [vmem:[%s23239_s21 + $0x30] sm:$0xff] }
0x13d1   :  { %v7582_v27 = vld [vmem:[%s23239_s21 + $0x20] sm:$0xff] }
0x13d5   :  { %v9369_v17 = vpop.f32.mrb[140].mxu1 }
0x13d6   :  { %16528 = vmatmul.mubr.msk.bf16.gmra.mrb[232].mxu0 %vm7829_vm14, %v17853_v36  ;;  %v16631_v61 = vpop.f32.mrb[141].mxu1 }
0x13d7   :  { %v9372_v44 = vpop.f32.mrb[142].mxu1  ;;  %16531 = vmatprep.mubr.msk.bf16.mxu0 %vm7829_vm14, %v17854_v31  ;;  %v7583_v61 = vld [vmem:[%s23239_s21 + $0x28] sm:$0xff] }
0x13d8   :  { %v9418_v32 = vpack.c.bf16 %v9372_v44, %v9369_v17  ;;  %v16632_v35 = vpop.f32.mrb[143].mxu1  ;;  %v10367_v44 = vsel %vm9825_vm15, %v17885_v11, 0  ;;  %v7591_v11 = vld [vmem:[%s23239_s21 + $0x68] sm:$0xff] }
0x13dd   :  { %v9377_v45 = vpop.f32.mrb[144].mxu1 }
0x13de   :  { %16532 = vmatmul.mubr.msk.bf16.gmra.mrb[236].mxu0 %vm7829_vm14, %v17855_v22  ;;  %v16635_v63 = vpop.f32.mrb[145].mxu1 }
0x13df   :  { %v9380_v25 = vpop.f32.mrb[146].mxu1  ;;  %16579 = vmatprep.mubr.msk.bf16.mxu0 %vm7829_vm14, %v17856_v33 }
0x13e0   :  { %v9419_v9 = vpack.c.bf16 %v9380_v25, %v9377_v45  ;;  %v16636_v1 = vpop.f32.mrb[147].mxu1 }
0x13e6   :  { %16580 = vmatmul.mubr.msk.bf16.vlgmr.msra.gmra.mrb[212].mxu0 %vm7829_vm14, %v17857_v8 }
0x13e7   :  { %16638 = vmatpush3.bf16.msra.mxu0 %v21636_v49  ;;  %16583 = vmatprep.mubr.msk.bf16.mxu0 %vm7829_vm14, %v17858_v24  ;;  %v17874_v49 = vld [vmem:[%s23237_s19 + $0x1e0] sm:$0xff]   ;;  %v7588_v24 = vld [vmem:[%s23239_s21 + $0x50] sm:$0xff] }
0x13e8   :  { %16639 = vmatprep.subr.bf16.mxu0 %v21647_v20 }
0x13eb   :  { %16640 = vmatpush3.bf16.msra.mxu0 %v21647_v20  ;;  %v17881_v20 = vld [vmem:[%s23237_s19 + $0x218] sm:$0xff]  }
0x13ec   :  { %16641 = vmatprep.subr.bf16.mxu0 %v9415_v53 }
0x13ee   :  { %16584 = vmatmul.mubr.msk.bf16.gmra.mrb[216].mxu0 %vm7829_vm14, %v17859_v48 }
0x13ef   :  { %16642 = vmatpush3.bf16.msra.mxu0 %v9415_v53  ;;  %16587 = vmatprep.mubr.msk.bf16.mxu0 %vm7829_vm14, %v17860_v55  ;;  %v7581_v53 = vld [vmem:[%s23239_s21 + $0x18] sm:$0xff]  ;;  %v7586_v55 = vld [vmem:[%s23239_s21 + $0x40] sm:$0xff] }
0x13f0   :  { %16643 = vmatprep.subr.bf16.mxu0 %v9416_v0 }
0x13f3   :  { %16644 = vmatpush3.bf16.msra.mxu0 %v9416_v0 }
0x13f4   :  { %16645 = vmatprep.subr.bf16.mxu0 %v9417_v39 }
0x13f6   :  { %16588 = vmatmul.mubr.msk.bf16.gmra.mrb[220].mxu0 %vm7829_vm14, %v17861_v30 }
0x13f7   :  { %16646 = vmatpush3.bf16.msra.mxu0 %v9417_v39  ;;  %16591 = vmatprep.mubr.msk.bf16.mxu0 %vm7829_vm14, %v17862_v37 }
0x13f8   :  { %16647 = vmatprep.subr.bf16.mxu0 %v9418_v32 }
0x13fb   :  { %16648 = vmatpush3.bf16.msra.mxu0 %v9418_v32  ;;  %v21843_v32 = vld [vmem:[%s23238_s23 + $0x10] sm:$0x7f]  }
0x13fc   :  { %16649 = vmatprep.subr.bf16.mxu0 %v9419_v9 }
0x13fe   :  { %16592 = vmatmul.mubr.msk.bf16.gmra.mrb[224].mxu0 %vm7829_vm14, %v17863_v26  ;;  %v7589_v26 = vld [vmem:[%s23239_s21 + $0x58] sm:$0xff] }
0x13ff   :  { %16650 = vmatpush3.bf16.msra.mxu0 %v9419_v9  ;;  %16595 = vmatprep.mubr.msk.bf16.mxu0 %vm7829_vm14, %v17864_v16 }
0x1400   :  { %10185 = vmatprep.subr.bf16.mxu0 %v18118_v42 }
0x1406   :  { %16596 = vmatmul.mubr.msk.bf16.gmra.mrb[228].mxu0 %vm7829_vm14, %v17865_v40 }
0x1407   :  { %16599 = vmatprep.mubr.msk.bf16.mxu0 %vm7829_vm14, %v17866_v46  ;;  %v7587_v46 = vld [vmem:[%s23239_s21 + $0x48] sm:$0xff] }
0x140e   :  { %16600 = vmatmul.mubr.msk.bf16.gmra.mrb[232].mxu0 %vm7829_vm14, %v17867_v7 }
0x140f   :  { %16603 = vmatprep.mubr.msk.bf16.mxu0 %vm7829_vm14, %v17868_v14 }
0x1416   :  { %16604 = vmatmul.mubr.msk.bf16.gmra.mrb[236].mxu0 %vm7829_vm14, %v17869_v13 }
0x1417   :  { %16651 = vmatprep.mubr.msk.bf16.mxu0 %vm7829_vm14, %v17870_v38 }
0x141e   :  { %16652 = vmatmul.mubr.msk.bf16.vlgmr.msra.gmra.mrb[212].mxu0 %vm7829_vm14, %v17871_v28 }
0x141f   :  { %16655 = vmatprep.mubr.msk.bf16.mxu0 %vm7829_vm14, %v17872_v12 }
0x1426   :  { %16656 = vmatmul.mubr.msk.bf16.gmra.mrb[216].mxu0 %vm7829_vm14, %v17873_v47 }
0x1427   :  { %16659 = vmatprep.mubr.msk.bf16.mxu0 %vm7829_vm14, %v17874_v49 }
0x142e   :  { %16660 = vmatmul.mubr.msk.bf16.gmra.mrb[220].mxu0 %vm7829_vm14, %v17875_v50 }
0x142f   :  { %16663 = vmatprep.mubr.msk.bf16.mxu0 %vm7829_vm14, %v17876_v3  ;;  %v7592_v3 = vld [vmem:[%s23239_s21 + $0x70] sm:$0xff] }
0x1436   :  { %16664 = vmatmul.mubr.msk.bf16.gmra.mrb[224].mxu0 %vm7829_vm14, %v17877_v19 }
0x1437   :  { %16667 = vmatprep.mubr.msk.bf16.mxu0 %vm7829_vm14, %v17878_v10  ;;  %v7590_v10 = vld [vmem:[%s23239_s21 + $0x60] sm:$0xff] }
0x143e   :  { %16668 = vmatmul.mubr.msk.bf16.gmra.mrb[228].mxu0 %vm7829_vm14, %v17879_v54 }
0x143f   :  { %16671 = vmatprep.mubr.msk.bf16.mxu0 %vm7829_vm14, %v17880_v62 }
0x1446   :  { %16672 = vmatmul.mubr.msk.bf16.gmra.mrb[232].mxu0 %vm7829_vm14, %v17881_v20  ;;  %v7593_v20 = vld [vmem:[%s23239_s21 + $0x78] sm:$0xff] }
0x1447   :  { %16675 = vmatprep.mubr.msk.bf16.mxu0 %vm7829_vm14, %v17882_v23 }
0x144e   :  { %16676 = vmatmul.mubr.msk.bf16.gmra.mrb[236].mxu0 %vm7829_vm14, %v17883_v34 }
0x14f1   :  { %v16653_v41 = vpop.f32.mrb[212].mxu0 }
0x14f2   :  { %v16862_v4 = vadd.f32 %v16653_v41, %v7580_v56  ;;  %v9566_v52 = vpop.f32.mrb[213].mxu0 }
0x14f3   :  { %v16863_v57 = vadd.f32 %v9566_v52, %v7578_v6  ;;  %v16654_v18 = vpop.f32.mrb[214].mxu0 }
0x14f4   :  { %v16864_v60 = vadd.f32 %v16654_v18, %v7581_v53  ;;  %v9569_v0 = vpop.f32.mrb[215].mxu0  ;;  %v9707_v15 = vmax.f32 %v16862_v4, 0.0 }
0x14f5   :  { %v16865_v43 = vadd.f32 %v9569_v0, %v7579_v58  ;;  %v9705_v29 = vmax.f32 %v16863_v57, 0.0 }
0x14f6   :  { %v9708_v51 = vmax.f32 %v16864_v60, 0.0  ;;  %v7596_v60 = vld [vmem:[%s23239_s21 + $0x90] sm:$0xff] }
0x14f7   :  { %v9706_v5 = vmax.f32 %v16865_v43, 0.0  ;;  %v7594_v43 = vld [vmem:[%s23239_s21 + $0x80] sm:$0xff] }
0x14f8   :  { %v21826_v39 = vpack.c.bf16 %v9708_v51, %v9707_v15 }
0x14f9   :  { %v21831_v21 = vpack.c.bf16 %v9706_v5, %v9705_v29  ;;  %v16657_v36 = vpop.f32.mrb[216].mxu0  ;;  %v7597_v29 = vld [vmem:[%s23239_s21 + $0x98] sm:$0xff] }
0x14fa   :  { %v16866_v31 = vadd.f32 %v16657_v36, %v7584_v59  ;;  %v9582_v17 = vpop.f32.mrb[217].mxu0 }
0x14fb   :  { %v16867_v35 = vadd.f32 %v9582_v17, %v7582_v27  ;;  %v16658_v22 = vpop.f32.mrb[218].mxu0  ;;  %16681 = vmatprep.mubr.msk.bf16.mxu1 %vm9782_vm0, %v21831_v21  ;;  %v7595_v27 = vld [vmem:[%s23239_s21 + $0x88] sm:$0xff] }
0x14fc   :  { %v16868_v33 = vadd.f32 %v16658_v22, %v7585_v2  ;;  %v9585_v45 = vpop.f32.mrb[219].mxu0  ;;  %16682 = vmatmul.mubr.msk.bf16.vlgmr.msra.gmra.mrb[148].mxu1 %vm9782_vm0, %v21826_v39  ;;  %v9711_v25 = vmax.f32 %v16866_v31, 0.0 }
0x14fd   :  { %v16869_v63 = vadd.f32 %v9585_v45, %v7583_v61  ;;  %16710 = vmatpush3.bf16.msra.mxu1 %v10367_v44  ;;  %v9709_v1 = vmax.f32 %v16867_v35, 0.0  ;;  %v7600_v45 = vld [vmem:[%s23239_s21 + $0xb0] sm:$0xff] }
0x14fe   :  { %v9712_v9 = vmax.f32 %v16868_v33, 0.0  ;;  %17371 = vmatprep.subr.msk.bf16.mxu1 %vm9825_vm15, %v21843_v32 }
0x14ff   :  { %v9710_v8 = vmax.f32 %v16869_v63, 0.0 }
0x1500   :  { %v21854_v48 = vpack.c.bf16 %v9712_v9, %v9711_v25  ;;  %v7598_v25 = vld [vmem:[%s23239_s21 + $0xa0] sm:$0xff] }
0x1501   :  { %v21859_v30 = vpack.c.bf16 %v9710_v8, %v9709_v1  ;;  %v16661_v37 = vpop.f32.mrb[220].mxu0  ;;  %v7601_v8 = vld [vmem:[%s23239_s21 + $0xb8] sm:$0xff] }
0x1502   :  { %v16870_v16 = vadd.f32 %v16661_v37, %v7588_v24  ;;  %v9598_v40 = vpop.f32.mrb[221].mxu0  ;;  %v7599_v37 = vld [vmem:[%s23239_s21 + $0xa8] sm:$0xff] }
0x1503   :  { %v16871_v7 = vadd.f32 %v9598_v40, %v7586_v55  ;;  %v16662_v14 = vpop.f32.mrb[222].mxu0  ;;  %16685 = vmatprep.mubr.msk.bf16.mxu1 %vm9782_vm0, %v21859_v30 }
0x1504   :  { %v16872_v13 = vadd.f32 %v16662_v14, %v7589_v26  ;;  %v9601_v38 = vpop.f32.mrb[223].mxu0  ;;  %16686 = vmatmul.mubr.msk.bf16.gmra.mrb[152].mxu1 %vm9782_vm0, %v21854_v48  ;;  %v9715_v12 = vmax.f32 %v16870_v16, 0.0 }
0x1505   :  { %v16873_v28 = vadd.f32 %v9601_v38, %v7587_v46  ;;  %v9713_v49 = vmax.f32 %v16871_v7, 0.0 }
0x1506   :  { %v9716_v47 = vmax.f32 %v16872_v13, 0.0 }
0x1507   :  { %v9714_v50 = vmax.f32 %v16873_v28, 0.0 }
0x1508   :  { %v21874_v19 = vpack.c.bf16 %v9716_v47, %v9715_v12  ;;  %v7604_v12 = vld [vmem:[%s23239_s21 + $0xd0] sm:$0xff] }
0x1509   :  { %v21879_v54 = vpack.c.bf16 %v9714_v50, %v9713_v49  ;;  %v16665_v62 = vpop.f32.mrb[224].mxu0  ;;  %v7602_v49 = vld [vmem:[%s23239_s21 + $0xc0] sm:$0xff] }
0x150a   :  { %v16874_v23 = vadd.f32 %v16665_v62, %v7592_v3  ;;  %v9614_v34 = vpop.f32.mrb[225].mxu0 }
0x150b   :  { %v16875_v56 = vadd.f32 %v9614_v34, %v7590_v10  ;;  %v16666_v6 = vpop.f32.mrb[226].mxu0  ;;  %16689 = vmatprep.mubr.msk.bf16.mxu1 %vm9782_vm0, %v21879_v54  ;;  %v7605_v10 = vld [vmem:[%s23239_s21 + $0xd8] sm:$0xff] }
0x150c   :  { %v16876_v41 = vadd.f32 %v16666_v6, %v7593_v20  ;;  %v9617_v53 = vpop.f32.mrb[227].mxu0  ;;  %16690 = vmatmul.mubr.msk.bf16.gmra.mrb[156].mxu1 %vm9782_vm0, %v21874_v19  ;;  %v9719_v52 = vmax.f32 %v16874_v23, 0.0  ;;  %v7603_v23 = vld [vmem:[%s23239_s21 + $0xc8] sm:$0xff] }
0x150d   :  { %v16877_v4 = vadd.f32 %v9617_v53, %v7591_v11  ;;  %v9717_v57 = vmax.f32 %v16875_v56, 0.0 }
0x150e   :  { %v9720_v58 = vmax.f32 %v16876_v41, 0.0 }
0x150f   :  { %v9718_v18 = vmax.f32 %v16877_v4, 0.0 }
0x1510   :  { %v21894_v0 = vpack.c.bf16 %v9720_v58, %v9719_v52 }
0x1511   :  { %v21899_v15 = vpack.c.bf16 %v9718_v18, %v9717_v57  ;;  %v16669_v51 = vpop.f32.mrb[228].mxu0 }
0x1512   :  { %v16878_v5 = vadd.f32 %v16669_v51, %v7596_v60  ;;  %v9630_v59 = vpop.f32.mrb[229].mxu0  ;;  %v10907_v60 = vsel %vm9825_vm15, %v21843_v32, 0  ;;  %v17888_v51 = vld [vmem:[%s23238_s23 + $0x20] sm:$0x7f]  }
0x1513   :  { %v16879_v36 = vadd.f32 %v9630_v59, %v7594_v43  ;;  %v16670_v2 = vpop.f32.mrb[230].mxu0  ;;  %16693 = vmatprep.mubr.msk.bf16.mxu1 %vm9782_vm0, %v21899_v15  ;;  %v17887_v43 = vld [vmem:[%s23238_s23 + $0x18] sm:$0x7f]  }
0x1514   :  { %v16880_v31 = vadd.f32 %v16670_v2, %v7597_v29  ;;  %v9633_v17 = vpop.f32.mrb[231].mxu0  ;;  %16694 = vmatmul.mubr.msk.bf16.gmra.mrb[160].mxu1 %vm9782_vm0, %v21894_v0  ;;  %v9723_v44 = vmax.f32 %v16878_v5, 0.0  ;;  %v11447_v32 = vsel %vm9825_vm15, %v17887_v43, 0  ;;  %v17891_v29 = vld [vmem:[%s23240_s22 + $0x4] ss:$8 sps:$4 sm:$0xff]   ;;  %v11987_v5 = vsel %vm9825_vm15, %v17888_v51, 0 }
0x1515   :  { %v16881_v61 = vadd.f32 %v9633_v17, %v7595_v27  ;;  %v9721_v22 = vmax.f32 %v16879_v36, 0.0  ;;  %13759 = vmatprep.mubr.msk.bf16.mxu0 %vm10142_vm1, %v17891_v29 }
0x1516   :  { %v9724_v35 = vmax.f32 %v16880_v31, 0.0 }
0x1517   :  { %v9722_v33 = vmax.f32 %v16881_v61, 0.0 }
0x1518   :  { %v21914_v63 = vpack.c.bf16 %v9724_v35, %v9723_v44 }
0x1519   :  { %v21919_v9 = vpack.c.bf16 %v9722_v33, %v9721_v22  ;;  %v16673_v1 = vpop.f32.mrb[232].mxu0 }
0x151a   :  { %v16882_v24 = vadd.f32 %v16673_v1, %v7600_v45  ;;  %v9646_v55 = vpop.f32.mrb[233].mxu0 }
0x151b   :  { %v16883_v26 = vadd.f32 %v9646_v55, %v7598_v25  ;;  %v16674_v16 = vpop.f32.mrb[234].mxu0  ;;  %16697 = vmatprep.mubr.msk.bf16.mxu1 %vm9782_vm0, %v21919_v9 }
0x151c   :  { %v16884_v40 = vadd.f32 %v16674_v16, %v7601_v8  ;;  %v9649_v46 = vpop.f32.mrb[235].mxu0  ;;  %16698 = vmatmul.mubr.msk.bf16.gmra.mrb[164].mxu1 %vm9782_vm0, %v21914_v63  ;;  %v9727_v14 = vmax.f32 %v16882_v24, 0.0 }
0x151d   :  { %v16885_v7 = vadd.f32 %v9649_v46, %v7599_v37  ;;  %v9725_v38 = vmax.f32 %v16883_v26, 0.0 }
0x151e   :  { %v9728_v13 = vmax.f32 %v16884_v40, 0.0 }
0x151f   :  { %v9726_v28 = vmax.f32 %v16885_v7, 0.0 }
0x1520   :  { %v21934_v47 = vpack.c.bf16 %v9728_v13, %v9727_v14 }
0x1521   :  { %v21939_v50 = vpack.c.bf16 %v9726_v28, %v9725_v38  ;;  %v16677_v3 = vpop.f32.mrb[236].mxu0 }
0x1522   :  { %v16886_v62 = vadd.f32 %v16677_v3, %v7604_v12  ;;  %v9662_v20 = vpop.f32.mrb[237].mxu0 }
0x1523   :  { %v16887_v34 = vadd.f32 %v9662_v20, %v7602_v49  ;;  %v16678_v11 = vpop.f32.mrb[238].mxu0  ;;  %16701 = vmatprep.mubr.msk.bf16.mxu1 %vm9782_vm0, %v21939_v50 }
0x1524   :  { %v16888_v56 = vadd.f32 %v16678_v11, %v7605_v10  ;;  %v9665_v6 = vpop.f32.mrb[239].mxu0  ;;  %16702 = vmatmul.mubr.msk.bf16.gmra.mrb[168].mxu1 %vm9782_vm0, %v21934_v47  ;;  %v9731_v53 = vmax.f32 %v16886_v62, 0.0  ;;  %v17894_v11 = vld [vmem:[%s23240_s22 + $0x14] ss:$8 sps:$4 sm:$0xff]  }
0x1525   :  { %v16889_v41 = vadd.f32 %v9665_v6, %v7603_v23  ;;  %v9729_v52 = vmax.f32 %v16887_v34, 0.0  ;;  %v17889_v23 = vld [vmem:[%s23240_s22] ss:$8 sps:$4 sm:$0xff]  }
0x1526   :  { %v9732_v4 = vmax.f32 %v16888_v56, 0.0 }
0x1527   :  { %v9730_v58 = vmax.f32 %v16889_v41, 0.0 }
0x1528   :  { %v21951_v57 = vpack.c.bf16 %v9732_v4, %v9731_v53  ;;  %v17892_v4 = vld [vmem:[%s23240_s22 + $0x10] ss:$8 sps:$4 sm:$0xff]  }
0x1529   :  { %v21953_v18 = vpack.c.bf16 %v9730_v58, %v9729_v52  ;;  %v17897_v58 = vld [vmem:[%s23240_s22 + $0x24] ss:$8 sps:$4 sm:$0xff]  }
0x152b   :  { %16705 = vmatprep.mubr.msk.bf16.mxu1 %vm9782_vm0, %v21953_v18 }
0x152c   :  { %16706 = vmatmul.mubr.msk.bf16.gmra.mrb[172].mxu1 %vm9782_vm0, %v21951_v57 }
0x152d   :  { %16711 = vmatprep.mubr.msk.bf16.mxu1 %vm9782_vm0, %v21831_v21 }
0x1534   :  { %16712 = vmatmul.mubr.msk.bf16.vlgmr.msra.gmra.mrb[176].mxu1 %vm9782_vm0, %v21826_v39 }
0x1535   :  { %16715 = vmatprep.mubr.msk.bf16.mxu1 %vm9782_vm0, %v21859_v30  ;;  %16740 = vmatpush3.bf16.msra.mxu1 %v10907_v60 }
0x1536   :  { %17372 = vmatprep.subr.msk.bf16.mxu1 %vm9825_vm15, %v17887_v43 }
0x153c   :  { %16716 = vmatmul.mubr.msk.bf16.gmra.mrb[180].mxu1 %vm9782_vm0, %v21854_v48 }
0x153d   :  { %16719 = vmatprep.mubr.msk.bf16.mxu1 %vm9782_vm0, %v21879_v54 }
0x1544   :  { %16720 = vmatmul.mubr.msk.bf16.gmra.mrb[184].mxu1 %vm9782_vm0, %v21874_v19 }
0x1545   :  { %16723 = vmatprep.mubr.msk.bf16.mxu1 %vm9782_vm0, %v21899_v15 }
0x154c   :  { %16724 = vmatmul.mubr.msk.bf16.gmra.mrb[188].mxu1 %vm9782_vm0, %v21894_v0 }
0x154d   :  { %16727 = vmatprep.mubr.msk.bf16.mxu1 %vm9782_vm0, %v21919_v9 }
0x1554   :  { %16728 = vmatmul.mubr.msk.bf16.gmra.mrb[192].mxu1 %vm9782_vm0, %v21914_v63 }
0x1555   :  { %16731 = vmatprep.mubr.msk.bf16.mxu1 %vm9782_vm0, %v21939_v50 }
0x155c   :  { %16732 = vmatmul.mubr.msk.bf16.gmra.mrb[196].mxu1 %vm9782_vm0, %v21934_v47 }
0x155d   :  { %16735 = vmatprep.mubr.msk.bf16.mxu1 %vm9782_vm0, %v21953_v18 }
0x1564   :  { %16736 = vmatmul.mubr.msk.bf16.gmra.mrb[200].mxu1 %vm9782_vm0, %v21951_v57 }
0x1565   :  { %16741 = vmatprep.mubr.msk.bf16.mxu1 %vm9782_vm0, %v21831_v21 }
0x156c   :  { %16742 = vmatmul.mubr.msk.bf16.vlgmr.msra.gmra.mrb[204].mxu1 %vm9782_vm0, %v21826_v39 }
0x156d   :  { %16745 = vmatprep.mubr.msk.bf16.mxu1 %vm9782_vm0, %v21859_v30  ;;  %16770 = vmatpush3.bf16.msra.mxu1 %v11447_v32 }
0x156e   :  { %17373 = vmatprep.subr.msk.bf16.mxu1 %vm9825_vm15, %v17888_v51  ;;  %v17895_v51 = vld [vmem:[%s23240_s22 + $0x20] ss:$8 sps:$4 sm:$0xff]  }
0x1574   :  { %16746 = vmatmul.mubr.msk.bf16.gmra.mrb[208].mxu1 %vm9782_vm0, %v21854_v48 }
0x1575   :  { %16749 = vmatprep.mubr.msk.bf16.mxu1 %vm9782_vm0, %v21879_v54 }
0x157c   :  { %16750 = vmatmul.mubr.msk.bf16.gmra.mrb[212].mxu1 %vm9782_vm0, %v21874_v19 }
0x157d   :  { %16753 = vmatprep.mubr.msk.bf16.mxu1 %vm9782_vm0, %v21899_v15 }
0x1584   :  { %16754 = vmatmul.mubr.msk.bf16.gmra.mrb[216].mxu1 %vm9782_vm0, %v21894_v0 }
0x1585   :  { %16757 = vmatprep.mubr.msk.bf16.mxu1 %vm9782_vm0, %v21919_v9 }
0x158c   :  { %16758 = vmatmul.mubr.msk.bf16.gmra.mrb[220].mxu1 %vm9782_vm0, %v21914_v63 }
0x158d   :  { %16761 = vmatprep.mubr.msk.bf16.mxu1 %vm9782_vm0, %v21939_v50 }
0x1594   :  { %16762 = vmatmul.mubr.msk.bf16.gmra.mrb[224].mxu1 %vm9782_vm0, %v21934_v47 }
0x1595   :  { %16765 = vmatprep.mubr.msk.bf16.mxu1 %vm9782_vm0, %v21953_v18 }
0x159c   :  { %16766 = vmatmul.mubr.msk.bf16.gmra.mrb[232].mxu1 %vm9782_vm0, %v21951_v57 }
0x159d   :  { %16771 = vmatprep.mubr.msk.bf16.mxu1 %vm9782_vm0, %v21831_v21 }
0x15a4   :  { %16772 = vmatmul.mubr.msk.bf16.vlgmr.msra.gmra.mrb[236].mxu1 %vm9782_vm0, %v21826_v39 }
0x15a5   :  { %16775 = vmatprep.mubr.msk.bf16.mxu1 %vm9782_vm0, %v21859_v30  ;;  %16800 = vmatpush3.bf16.msra.mxu1 %v11987_v5  ;;  %v17900_v5 = vld [vmem:[%s23240_s22 + $0x34] ss:$8 sps:$4 sm:$0xff]  }
0x15ac   :  { %16776 = vmatmul.mubr.msk.bf16.gmra.mrb[240].mxu1 %vm9782_vm0, %v21854_v48 }
0x15ad   :  { %16779 = vmatprep.mubr.msk.bf16.mxu1 %vm9782_vm0, %v21879_v54 }
0x15b4   :  { %16780 = vmatmul.mubr.msk.bf16.gmra.mrb[228].mxu1 %vm9782_vm0, %v21874_v19 }
0x15b5   :  { %16783 = vmatprep.mubr.msk.bf16.mxu1 %vm9782_vm0, %v21899_v15 }
0x15bc   :  { %16784 = vmatmul.mubr.msk.bf16.gmra.mrb[244].mxu1 %vm9782_vm0, %v21894_v0 }
0x15bd   :  { %16787 = vmatprep.mubr.msk.bf16.mxu1 %vm9782_vm0, %v21919_v9 }
0x15c4   :  { %16788 = vmatmul.mubr.msk.bf16.gmra.mrb[248].mxu1 %vm9782_vm0, %v21914_v63 }
0x15c5   :  { %16791 = vmatprep.mubr.msk.bf16.mxu1 %vm9782_vm0, %v21939_v50 }
0x15cc   :  { %16792 = vmatmul.mubr.msk.bf16.gmra.mrb[252].mxu1 %vm9782_vm0, %v21934_v47 }
0x15cd   :  { %16795 = vmatprep.mubr.msk.bf16.mxu1 %vm9782_vm0, %v21953_v18 }
0x15cf   :  { %v16683_v59 = vpop.f32.mrb[148].mxu1 }
0x15d0   :  { %v9863_v27 = vpop.f32.mrb[149].mxu1 }
0x15d1   :  { %v16684_v36 = vpop.f32.mrb[150].mxu1 }
0x15d2   :  { %v10003_v2 = vpack.c.bf16 %v16684_v36, %v16683_v59  ;;  %v9866_v31 = vpop.f32.mrb[151].mxu1 }
0x15d3   :  { %v10002_v17 = vpack.c.bf16 %v9866_v31, %v9863_v27 }
0x15d4   :  { %16796 = vmatmul.mubr.msk.bf16.gmra.mrb[0].mxu1 %vm9782_vm0, %v21951_v57 }
0x15d5   :  { %10186 = vmatpush1.bf16.msra.mxu0 %v10002_v17  ;;  %16801 = vmatprep.mubr.msk.bf16.mxu1 %vm9782_vm0, %v21831_v21  ;;  %v17898_v17 = vld [vmem:[%s23240_s22 + $0x30] ss:$8 sps:$4 sm:$0xff]  }
0x15d6   :  { %10187 = vmatprep.subr.bf16.mxu0 %v18118_v42 }
0x15d7   :  { %v16687_v61 = vpop.f32.mrb[152].mxu1 }
0x15d8   :  { %v9879_v44 = vpop.f32.mrb[153].mxu1 }
0x15d9   :  { %v16688_v35 = vpop.f32.mrb[154].mxu1  ;;  %10188 = vmatpush1.bf16.msra.mxu0 %v10003_v2 }
0x15da   :  { %v10005_v22 = vpack.c.bf16 %v16688_v35, %v16687_v61  ;;  %v9882_v33 = vpop.f32.mrb[155].mxu1  ;;  %10189 = vmatprep.subr.bf16.mxu0 %v18118_v42 }
0x15db   :  { %v10004_v45 = vpack.c.bf16 %v9882_v33, %v9879_v44  ;;  %v17903_v44 = vld [vmem:[%s23240_s22 + $0x44] ss:$8 sps:$4 sm:$0xff]  }
0x15dc   :  { %16802 = vmatmul.mubr.msk.bf16.vlgmr.msra.gmra.mrb[4].mxu1 %vm9782_vm0, %v21826_v39 }
0x15dd   :  { %10190 = vmatpush1.bf16.msra.mxu0 %v10004_v45  ;;  %16805 = vmatprep.mubr.msk.bf16.mxu1 %vm9782_vm0, %v21859_v30 }
0x15de   :  { %10191 = vmatprep.subr.bf16.mxu0 %v18118_v42 }
0x15df   :  { %v16691_v21 = vpop.f32.mrb[156].mxu1 }
0x15e0   :  { %v9895_v25 = vpop.f32.mrb[157].mxu1 }
0x15e1   :  { %v16692_v1 = vpop.f32.mrb[158].mxu1  ;;  %10192 = vmatpush1.bf16.msra.mxu0 %v10005_v22 }
0x15e2   :  { %v10007_v8 = vpack.c.bf16 %v16692_v1, %v16691_v21  ;;  %v9898_v24 = vpop.f32.mrb[159].mxu1  ;;  %10193 = vmatprep.subr.bf16.mxu0 %v18118_v42 }
0x15e3   :  { %v10006_v55 = vpack.c.bf16 %v9898_v24, %v9895_v25  ;;  %v17901_v25 = vld [vmem:[%s23240_s22 + $0x40] ss:$8 sps:$4 sm:$0xff]  }
0x15e4   :  { %16806 = vmatmul.mubr.msk.bf16.gmra.mrb[8].mxu1 %vm9782_vm0, %v21854_v48 }
0x15e5   :  { %10194 = vmatpush1.bf16.msra.mxu0 %v10006_v55  ;;  %16809 = vmatprep.mubr.msk.bf16.mxu1 %vm9782_vm0, %v21879_v54 }
0x15e6   :  { %10195 = vmatprep.subr.bf16.mxu0 %v18118_v42 }
0x15e7   :  { %v16695_v39 = vpop.f32.mrb[160].mxu1 }
0x15e8   :  { %v9911_v30 = vpop.f32.mrb[161].mxu1 }
0x15e9   :  { %v16696_v37 = vpop.f32.mrb[162].mxu1  ;;  %10196 = vmatpush1.bf16.msra.mxu0 %v10007_v8  ;;  %v17906_v8 = vld [vmem:[%s23240_s22 + $0x54] ss:$8 sps:$4 sm:$0xff]  }
0x15ea   :  { %v10009_v26 = vpack.c.bf16 %v16696_v37, %v16695_v39  ;;  %v9914_v16 = vpop.f32.mrb[163].mxu1  ;;  %10197 = vmatprep.subr.bf16.mxu0 %v18118_v42 }
0x15eb   :  { %v10008_v40 = vpack.c.bf16 %v9914_v16, %v9911_v30 }
0x15ec   :  { %16810 = vmatmul.mubr.msk.bf16.gmra.mrb[12].mxu1 %vm9782_vm0, %v21874_v19 }
0x15ed   :  { %10198 = vmatpush1.bf16.msra.mxu0 %v10008_v40  ;;  %16813 = vmatprep.mubr.msk.bf16.mxu1 %vm9782_vm0, %v21899_v15  ;;  %v17909_v40 = vld [vmem:[%s23240_s22 + $0x64] ss:$8 sps:$4 sm:$0xff]  }
0x15ee   :  { %10199 = vmatprep.subr.bf16.mxu0 %v18118_v42 }
0x15ef   :  { %v16699_v48 = vpop.f32.mrb[164].mxu1 }
0x15f0   :  { %v9927_v54 = vpop.f32.mrb[165].mxu1 }
0x15f1   :  { %v16700_v46 = vpop.f32.mrb[166].mxu1  ;;  %10200 = vmatpush1.bf16.msra.mxu0 %v10009_v26  ;;  %v17904_v26 = vld [vmem:[%s23240_s22 + $0x50] ss:$8 sps:$4 sm:$0xff]  }
0x15f2   :  { %v10011_v7 = vpack.c.bf16 %v16700_v46, %v16699_v48  ;;  %v9930_v14 = vpop.f32.mrb[167].mxu1  ;;  %10201 = vmatprep.subr.bf16.mxu0 %v18118_v42 }
0x15f3   :  { %v10010_v13 = vpack.c.bf16 %v9930_v14, %v9927_v54 }
0x15f4   :  { %16814 = vmatmul.mubr.msk.bf16.gmra.mrb[16].mxu1 %vm9782_vm0, %v21894_v0 }
0x15f5   :  { %10202 = vmatpush1.bf16.msra.mxu0 %v10010_v13  ;;  %16817 = vmatprep.mubr.msk.bf16.mxu1 %vm9782_vm0, %v21919_v9  ;;  %v17907_v13 = vld [vmem:[%s23240_s22 + $0x60] ss:$8 sps:$4 sm:$0xff]  }
0x15f6   :  { %10203 = vmatprep.subr.bf16.mxu0 %v18118_v42 }
0x15f7   :  { %v16703_v19 = vpop.f32.mrb[168].mxu1 }
0x15f8   :  { %v9943_v15 = vpop.f32.mrb[169].mxu1 }
0x15f9   :  { %v16704_v38 = vpop.f32.mrb[170].mxu1  ;;  %10204 = vmatpush1.bf16.msra.mxu0 %v10011_v7 }
0x15fa   :  { %v10013_v28 = vpack.c.bf16 %v16704_v38, %v16703_v19  ;;  %v9946_v12 = vpop.f32.mrb[171].mxu1  ;;  %10205 = vmatprep.subr.bf16.mxu0 %v18118_v42 }
0x15fb   :  { %v10012_v49 = vpack.c.bf16 %v9946_v12, %v9943_v15  ;;  %v17912_v15 = vld [vmem:[%s23240_s22 + $0x74] ss:$8 sps:$4 sm:$0xff]  }
0x15fc   :  { %16818 = vmatmul.mubr.msk.bf16.gmra.mrb[20].mxu1 %vm9782_vm0, %v21914_v63 }
0x15fd   :  { %10206 = vmatpush1.bf16.msra.mxu0 %v10012_v49  ;;  %16821 = vmatprep.mubr.msk.bf16.mxu1 %vm9782_vm0, %v21939_v50 }
0x15fe   :  { %10207 = vmatprep.subr.bf16.mxu0 %v18118_v42 }
0x15ff   :  { %v16707_v0 = vpop.f32.mrb[172].mxu1 }
0x1600   :  { %v9959_v9 = vpop.f32.mrb[173].mxu1 }
0x1601   :  { %v16708_v3 = vpop.f32.mrb[174].mxu1  ;;  %10208 = vmatpush1.bf16.msra.mxu0 %v10013_v28 }
0x1602   :  { %v10015_v10 = vpack.c.bf16 %v16708_v3, %v16707_v0  ;;  %v9962_v62 = vpop.f32.mrb[175].mxu1  ;;  %10209 = vmatprep.subr.bf16.mxu0 %v18118_v42 }
0x1603   :  { %v10014_v20 = vpack.c.bf16 %v9962_v62, %v9959_v9  ;;  %v17910_v9 = vld [vmem:[%s23240_s22 + $0x70] ss:$8 sps:$4 sm:$0xff]  }
0x1604   :  { %16822 = vmatmul.mubr.msk.bf16.gmra.mrb[24].mxu1 %vm9782_vm0, %v21934_v47 }
0x1605   :  { %10210 = vmatpush1.bf16.msra.mxu0 %v10014_v20  ;;  %16825 = vmatprep.mubr.msk.bf16.mxu1 %vm9782_vm0, %v21953_v18 }
0x1606   :  { %10211 = vmatprep.subr.bf16.mxu0 %v18118_v42 }
0x1607   :  { %v16713_v63 = vpop.f32.mrb[176].mxu1 }
0x1608   :  { %v10403_v50 = vpop.f32.mrb[177].mxu1 }
0x1609   :  { %10212 = vmatpush1.bf16.msra.mxu0 %v10015_v10  ;;  %v16714_v34 = vpop.f32.mrb[178].mxu1  ;;  %v17915_v10 = vld [vmem:[%s23240_s22 + $0x84] ss:$8 sps:$4 sm:$0xff]  }
0x160a   :  { %v10544_v56 = vpack.c.bf16 %v16714_v34, %v16713_v63  ;;  %v10406_v47 = vpop.f32.mrb[179].mxu1  ;;  %10725 = vmatprep.subr.bf16.mxu0 %v18118_v42  ;;  %v17913_v34 = vld [vmem:[%s23240_s22 + $0x80] ss:$8 sps:$4 sm:$0xff]  }
0x160b   :  { %v10543_v6 = vpack.c.bf16 %v10406_v47, %v10403_v50 }
0x160c   :  { %10218 = vmatmul.mubr.bf16.vlgmr.msra.gmra.mrb[240].mxu0 %v17889_v23  ;;  %16826 = vmatmul.mubr.msk.bf16.gmra.mrb[28].mxu1 %vm9782_vm0, %v21951_v57 }
0x160d   :  { %10726 = vmatpush1.bf16.msra.mxu0 %v10543_v6  ;;  %13760 = vmatprep.mubr.msk.bf16.mxu0 %vm10142_vm1, %v17894_v11 }
0x160e   :  { %10727 = vmatprep.subr.bf16.mxu0 %v18118_v42 }
0x160f   :  { %v16717_v41 = vpop.f32.mrb[180].mxu1 }
0x1610   :  { %v10419_v53 = vpop.f32.mrb[181].mxu1 }
0x1611   :  { %v16718_v52 = vpop.f32.mrb[182].mxu1  ;;  %10728 = vmatpush1.bf16.msra.mxu0 %v10544_v56  ;;  %v17918_v56 = vld [vmem:[%s23240_s22 + $0x94] ss:$8 sps:$4 sm:$0xff]  }
0x1612   :  { %v10546_v18 = vpack.c.bf16 %v16718_v52, %v16717_v41  ;;  %v10422_v60 = vpop.f32.mrb[183].mxu1  ;;  %10729 = vmatprep.subr.bf16.mxu0 %v18118_v42  ;;  %v17916_v52 = vld [vmem:[%s23240_s22 + $0x90] ss:$8 sps:$4 sm:$0xff]  }
0x1613   :  { %v10545_v57 = vpack.c.bf16 %v10422_v60, %v10419_v53 }
0x1614   :  { %10226 = vmatmul.mubr.bf16.gmra.mrb[244].mxu0 %v17892_v4 }
0x1615   :  { %10730 = vmatpush1.bf16.msra.mxu0 %v10545_v57  ;;  %13761 = vmatprep.mubr.msk.bf16.mxu0 %vm10142_vm1, %v17897_v58 }
0x1616   :  { %10731 = vmatprep.subr.bf16.mxu0 %v18118_v42 }
0x1617   :  { %v16721_v43 = vpop.f32.mrb[184].mxu1 }
0x1618   :  { %v10435_v32 = vpop.f32.mrb[185].mxu1 }
0x1619   :  { %v16722_v29 = vpop.f32.mrb[186].mxu1  ;;  %10732 = vmatpush1.bf16.msra.mxu0 %v10546_v18  ;;  %v17921_v18 = vld [vmem:[%s23240_s22 + $0xa4] ss:$8 sps:$4 sm:$0xff]  }
0x161a   :  { %v10548_v59 = vpack.c.bf16 %v16722_v29, %v16721_v43  ;;  %v10438_v27 = vpop.f32.mrb[187].mxu1  ;;  %10733 = vmatprep.subr.bf16.mxu0 %v18118_v42  ;;  %v17919_v29 = vld [vmem:[%s23240_s22 + $0xa0] ss:$8 sps:$4 sm:$0xff]  }
0x161b   :  { %v10547_v36 = vpack.c.bf16 %v10438_v27, %v10435_v32 }
0x161c   :  { %10234 = vmatmul.mubr.bf16.gmra.mrb[248].mxu0 %v17895_v51 }
0x161d   :  { %10734 = vmatpush1.bf16.msra.mxu0 %v10547_v36  ;;  %13762 = vmatprep.mubr.msk.bf16.mxu0 %vm10142_vm1, %v17900_v5 }
0x161e   :  { %10735 = vmatprep.subr.bf16.mxu0 %v18118_v42 }
0x161f   :  { %v16725_v2 = vpop.f32.mrb[188].mxu1 }
0x1620   :  { %v10451_v31 = vpop.f32.mrb[189].mxu1 }
0x1621   :  { %v16726_v61 = vpop.f32.mrb[190].mxu1  ;;  %10736 = vmatpush1.bf16.msra.mxu0 %v10548_v59  ;;  %v17924_v59 = vld [vmem:[%s23240_s22 + $0xb4] ss:$8 sps:$4 sm:$0xff]  }
0x1622   :  { %v10550_v35 = vpack.c.bf16 %v16726_v61, %v16725_v2  ;;  %v10454_v22 = vpop.f32.mrb[191].mxu1  ;;  %10737 = vmatprep.subr.bf16.mxu0 %v18118_v42  ;;  %v17922_v61 = vld [vmem:[%s23240_s22 + $0xb0] ss:$8 sps:$4 sm:$0xff]  }
0x1623   :  { %v10549_v33 = vpack.c.bf16 %v10454_v22, %v10451_v31 }
0x1624   :  { %10242 = vmatmul.mubr.bf16.gmra.mrb[252].mxu0 %v17898_v17 }
0x1625   :  { %10738 = vmatpush1.bf16.msra.mxu0 %v10549_v33  ;;  %13763 = vmatprep.mubr.msk.bf16.mxu0 %vm10142_vm1, %v17903_v44 }
0x1626   :  { %10739 = vmatprep.subr.bf16.mxu0 %v18118_v42 }
0x1627   :  { %v16729_v45 = vpop.f32.mrb[192].mxu1 }
0x1628   :  { %v10467_v21 = vpop.f32.mrb[193].mxu1 }
0x1629   :  { %v16730_v1 = vpop.f32.mrb[194].mxu1  ;;  %10740 = vmatpush1.bf16.msra.mxu0 %v10550_v35  ;;  %v17927_v35 = vld [vmem:[%s23240_s22 + $0xc4] ss:$8 sps:$4 sm:$0xff]  }
0x162a   :  { %v10552_v24 = vpack.c.bf16 %v16730_v1, %v16729_v45  ;;  %v10470_v55 = vpop.f32.mrb[195].mxu1  ;;  %10741 = vmatprep.subr.bf16.mxu0 %v18118_v42  ;;  %v17925_v1 = vld [vmem:[%s23240_s22 + $0xc0] ss:$8 sps:$4 sm:$0xff]  }
0x162b   :  { %v10551_v39 = vpack.c.bf16 %v10470_v55, %v10467_v21 }
0x162c   :  { %10250 = vmatmul.mubr.bf16.gmra.mrb[0].mxu0 %v17901_v25 }
0x162d   :  { %10742 = vmatpush1.bf16.msra.mxu0 %v10551_v39  ;;  %13764 = vmatprep.mubr.msk.bf16.mxu0 %vm10142_vm1, %v17906_v8 }
0x162e   :  { %10743 = vmatprep.subr.bf16.mxu0 %v18118_v42 }
0x162f   :  { %v16733_v30 = vpop.f32.mrb[196].mxu1 }
0x1630   :  { %v10483_v37 = vpop.f32.mrb[197].mxu1 }
0x1631   :  { %v16734_v16 = vpop.f32.mrb[198].mxu1  ;;  %10744 = vmatpush1.bf16.msra.mxu0 %v10552_v24  ;;  %v17930_v24 = vld [vmem:[%s23240_s22 + $0xd4] ss:$8 sps:$4 sm:$0xff]  }
0x1632   :  { %v10554_v48 = vpack.c.bf16 %v16734_v16, %v16733_v30  ;;  %v10486_v54 = vpop.f32.mrb[199].mxu1  ;;  %10745 = vmatprep.subr.bf16.mxu0 %v18118_v42  ;;  %v17928_v16 = vld [vmem:[%s23240_s22 + $0xd0] ss:$8 sps:$4 sm:$0xff]  }
0x1633   :  { %v10553_v46 = vpack.c.bf16 %v10486_v54, %v10483_v37 }
0x1634   :  { %10258 = vmatmul.mubr.bf16.gmra.mrb[4].mxu0 %v17904_v26 }
0x1635   :  { %10746 = vmatpush1.bf16.msra.mxu0 %v10553_v46  ;;  %13765 = vmatprep.mubr.msk.bf16.mxu0 %vm10142_vm1, %v17909_v40 }
0x1636   :  { %10747 = vmatprep.subr.bf16.mxu0 %v18118_v42 }
0x1637   :  { %v16737_v7 = vpop.f32.mrb[200].mxu1 }
0x1638   :  { %v10499_v14 = vpop.f32.mrb[201].mxu1 }
0x1639   :  { %v16738_v19 = vpop.f32.mrb[202].mxu1  ;;  %10748 = vmatpush1.bf16.msra.mxu0 %v10554_v48  ;;  %v17933_v48 = vld [vmem:[%s23240_s22 + $0xe4] ss:$8 sps:$4 sm:$0xff]  }
0x163a   :  { %v10556_v38 = vpack.c.bf16 %v16738_v19, %v16737_v7  ;;  %v10502_v28 = vpop.f32.mrb[203].mxu1  ;;  %10749 = vmatprep.subr.bf16.mxu0 %v18118_v42  ;;  %v17931_v19 = vld [vmem:[%s23240_s22 + $0xe0] ss:$8 sps:$4 sm:$0xff]  }
0x163b   :  { %v10555_v12 = vpack.c.bf16 %v10502_v28, %v10499_v14  ;;  %v17978_v28 = vld [vmem:[%s23240_s22 + $0x1d4] ss:$8 sps:$4 sm:$0xff]  }
0x163c   :  { %10266 = vmatmul.mubr.bf16.gmra.mrb[8].mxu0 %v17907_v13 }
0x163d   :  { %10750 = vmatpush1.bf16.msra.mxu0 %v10555_v12  ;;  %13766 = vmatprep.mubr.msk.bf16.mxu0 %vm10142_vm1, %v17912_v15 }
0x163e   :  { %10751 = vmatprep.subr.bf16.mxu0 %v18118_v42 }
0x163f   :  { %v22163_v49 = vpop.f32.mrb[204].mxu1 }
0x1640   :  { %v22165_v0 = vpop.f32.mrb[205].mxu1 }
0x1641   :  { %10752 = vmatpush1.bf16.msra.mxu0 %v10556_v38  ;;  %v22170_v3 = vpop.f32.mrb[206].mxu1  ;;  %v17936_v38 = vld [vmem:[%s23240_s22 + $0xf4] ss:$8 sps:$4 sm:$0xff]  }
0x1642   :  { %v11084_v62 = vpack.c.bf16 %v22170_v3, %v22163_v49  ;;  %v22177_v20 = vpop.f32.mrb[207].mxu1  ;;  %11265 = vmatprep.subr.bf16.mxu0 %v18118_v42 }
0x1643   :  { %v11083_v63 = vpack.c.bf16 %v22177_v20, %v22165_v0  ;;  %v17939_v0 = vld [vmem:[%s23240_s22 + $0x104] ss:$8 sps:$4 sm:$0xff]  }
0x1644   :  { %10274 = vmatmul.mubr.bf16.gmra.mrb[12].mxu0 %v17910_v9 }
0x1645   :  { %13767 = vmatprep.mubr.msk.bf16.mxu0 %vm10142_vm1, %v17915_v10 }
0x1647   :  { %v22183_v50 = vpop.f32.mrb[208].mxu1 }
0x1648   :  { %v22185_v23 = vpop.f32.mrb[209].mxu1 }
0x1649   :  { %v22190_v11 = vpop.f32.mrb[210].mxu1 }
0x164a   :  { %v11086_v47 = vpack.c.bf16 %v22190_v11, %v22183_v50  ;;  %v22197_v6 = vpop.f32.mrb[211].mxu1 }
0x164b   :  { %v11085_v41 = vpack.c.bf16 %v22197_v6, %v22185_v23  ;;  %v17942_v23 = vld [vmem:[%s23240_s22 + $0x114] ss:$8 sps:$4 sm:$0xff]  }
0x164c   :  { %10282 = vmatmul.mubr.bf16.gmra.mrb[16].mxu0 %v17913_v34 }
0x164d   :  { %13768 = vmatprep.mubr.msk.bf16.mxu0 %vm10142_vm1, %v17918_v56  ;;  %v17934_v56 = vld [vmem:[%s23240_s22 + $0xf0] ss:$8 sps:$4 sm:$0xff]  }
0x164f   :  { %v22202_v53 = vpop.f32.mrb[212].mxu1 }
0x1650   :  { %v22204_v4 = vpop.f32.mrb[213].mxu1 }
0x1651   :  { %v22209_v58 = vpop.f32.mrb[214].mxu1 }
0x1652   :  { %v11088_v60 = vpack.c.bf16 %v22209_v58, %v22202_v53  ;;  %v22216_v57 = vpop.f32.mrb[215].mxu1 }
0x1653   :  { %v11087_v43 = vpack.c.bf16 %v22216_v57, %v22204_v4  ;;  %v17945_v4 = vld [vmem:[%s23240_s22 + $0x124] ss:$8 sps:$4 sm:$0xff]  }
0x1654   :  { %10290 = vmatmul.mubr.bf16.gmra.mrb[20].mxu0 %v17916_v52 }
0x1655   :  { %13769 = vmatprep.mubr.msk.bf16.mxu0 %vm10142_vm1, %v17921_v18  ;;  %v17973_v18 = vld [vmem:[%s23240_s22 + $0x1c0] ss:$8 sps:$4 sm:$0xff]  }
0x1657   :  { %v22221_v32 = vpop.f32.mrb[216].mxu1 }
0x1658   :  { %v22223_v51 = vpop.f32.mrb[217].mxu1 }
0x1659   :  { %v22228_v5 = vpop.f32.mrb[218].mxu1 }
0x165a   :  { %v11090_v27 = vpack.c.bf16 %v22228_v5, %v22221_v32  ;;  %v22235_v36 = vpop.f32.mrb[219].mxu1 }
0x165b   :  { %v11089_v2 = vpack.c.bf16 %v22235_v36, %v22223_v51  ;;  %v17948_v51 = vld [vmem:[%s23240_s22 + $0x134] ss:$8 sps:$4 sm:$0xff]  }
0x165c   :  { %10298 = vmatmul.mubr.bf16.gmra.mrb[24].mxu0 %v17919_v29 }
0x165d   :  { %13770 = vmatprep.mubr.msk.bf16.mxu0 %vm10142_vm1, %v17924_v59  ;;  %v17970_v59 = vld [vmem:[%s23240_s22 + $0x1b0] ss:$8 sps:$4 sm:$0xff]  }
0x165f   :  { %v22240_v31 = vpop.f32.mrb[220].mxu1 }
0x1660   :  { %v22242_v17 = vpop.f32.mrb[221].mxu1 }
0x1661   :  { %v22247_v44 = vpop.f32.mrb[222].mxu1 }
0x1662   :  { %v11092_v22 = vpack.c.bf16 %v22247_v44, %v22240_v31  ;;  %v22254_v33 = vpop.f32.mrb[223].mxu1 }
0x1663   :  { %v11091_v45 = vpack.c.bf16 %v22254_v33, %v22242_v17  ;;  %v17951_v17 = vld [vmem:[%s23240_s22 + $0x144] ss:$8 sps:$4 sm:$0xff]  }
0x1664   :  { %10306 = vmatmul.mubr.bf16.gmra.mrb[28].mxu0 %v17922_v61 }
0x1665   :  { %13771 = vmatprep.mubr.msk.bf16.mxu0 %vm10142_vm1, %v17927_v35 }
0x1667   :  { %v22259_v21 = vpop.f32.mrb[224].mxu1 }
0x1668   :  { %v22261_v25 = vpop.f32.mrb[225].mxu1 }
0x1669   :  { %v22266_v8 = vpop.f32.mrb[226].mxu1 }
0x166a   :  { %v11094_v55 = vpack.c.bf16 %v22266_v8, %v22259_v21  ;;  %v22273_v39 = vpop.f32.mrb[227].mxu1 }
0x166b   :  { %v11093_v30 = vpack.c.bf16 %v22273_v39, %v22261_v25  ;;  %v17954_v25 = vld [vmem:[%s23240_s22 + $0x154] ss:$8 sps:$4 sm:$0xff]  }
0x166c   :  { %10314 = vmatmul.mubr.bf16.gmra.mrb[32].mxu0 %v17925_v1 }
0x166d   :  { %13772 = vmatprep.mubr.msk.bf16.mxu0 %vm10142_vm1, %v17930_v24  ;;  %v17967_v24 = vld [vmem:[%s23240_s22 + $0x1a0] ss:$8 sps:$4 sm:$0xff]  }
0x166f   :  { %v22278_v37 = vpop.f32.mrb[232].mxu1 }
0x1670   :  { %v22280_v26 = vpop.f32.mrb[233].mxu1 }
0x1671   :  { %v22285_v40 = vpop.f32.mrb[234].mxu1 }
0x1672   :  { %v11096_v54 = vpack.c.bf16 %v22285_v40, %v22278_v37  ;;  %v22292_v46 = vpop.f32.mrb[235].mxu1 }
0x1673   :  { %v11095_v7 = vpack.c.bf16 %v22292_v46, %v22280_v26  ;;  %v17957_v26 = vld [vmem:[%s23240_s22 + $0x164] ss:$8 sps:$4 sm:$0xff]  }
0x1674   :  { %10322 = vmatmul.mubr.bf16.gmra.mrb[36].mxu0 %v17928_v16 }
0x1675   :  { %13846 = vmatprep.mubr.msk.bf16.mxu0 %vm10142_vm1, %v17933_v48 }
0x1677   :  { %v22297_v14 = vpop.f32.mrb[236].mxu1 }
0x1678   :  { %v22299_v13 = vpop.f32.mrb[237].mxu1 }
0x1679   :  { %v22304_v15 = vpop.f32.mrb[238].mxu1 }
0x167a   :  { %v22311_v12 = vpop.f32.mrb[239].mxu1 }
0x167b   :  { %v11623_v9 = vpack.c.bf16 %v22311_v12, %v22299_v13 }
0x167c   :  { %10758 = vmatmul.mubr.bf16.vlgmr.msra.gmra.mrb[240].mxu0 %v17931_v19 }
0x167d   :  { %11266 = vmatpush1.bf16.msra.mxu0 %v11083_v63  ;;  %13847 = vmatprep.mubr.msk.bf16.mxu0 %vm10142_vm1, %v17936_v38  ;;  %v17964_v38 = vld [vmem:[%s23240_s22 + $0x190] ss:$8 sps:$4 sm:$0xff]  }
0x167e   :  { %11267 = vmatprep.subr.bf16.mxu0 %v18118_v42 }
0x167f   :  { %v22320_v10 = vpop.f32.mrb[240].mxu1 }
0x1680   :  { %v22322_v34 = vpop.f32.mrb[241].mxu1 }
0x1681   :  { %11268 = vmatpush1.bf16.msra.mxu0 %v11084_v62  ;;  %v22330_v52 = vpop.f32.mrb[242].mxu1  ;;  %v17937_v62 = vld [vmem:[%s23240_s22 + $0x100] ss:$8 sps:$4 sm:$0xff]  }
0x1682   :  { %v22337_v63 = vpop.f32.mrb[243].mxu1  ;;  %11269 = vmatprep.subr.bf16.mxu0 %v18118_v42 }
0x1683   :  { %v23292_v13 = vpack.c.bf16 %v22337_v63, %v22322_v34  ;;  %v17987_v34 = vld [vmem:[%s23240_s22 + $0x204] ss:$8 sps:$4 sm:$0xff]   ;;  %v17985_v63 = vld [vmem:[%s23240_s22 + $0x200] ss:$8 sps:$4 sm:$0xff]  }
0x1684   :  { %10766 = vmatmul.mubr.bf16.gmra.mrb[244].mxu0 %v17934_v56 }
0x1685   :  { %11270 = vmatpush1.bf16.msra.mxu0 %v11085_v41  ;;  %13848 = vmatprep.mubr.msk.bf16.mxu0 %vm10142_vm1, %v17939_v0 }
0x1686   :  { %11271 = vmatprep.subr.bf16.mxu0 %v18118_v42 }
0x1687   :  { %v22347_v49 = vpop.f32.mrb[228].mxu1 }
0x1688   :  { %v22349_v3 = vpop.f32.mrb[229].mxu1 }
0x1689   :  { %11272 = vmatpush1.bf16.msra.mxu0 %v11086_v47  ;;  %v22357_v29 = vpop.f32.mrb[230].mxu1  ;;  %v17940_v47 = vld [vmem:[%s23240_s22 + $0x110] ss:$8 sps:$4 sm:$0xff]  }
0x168a   :  { %v22364_v41 = vpop.f32.mrb[231].mxu1  ;;  %11273 = vmatprep.subr.bf16.mxu0 %v18118_v42 }
0x168b   :  { %v23294_v12 = vpack.c.bf16 %v22364_v41, %v22349_v3  ;;  %v17990_v3 = vld [vmem:[%s23240_s22 + $0x214] ss:$8 sps:$4 sm:$0xff]   ;;  %v17988_v41 = vld [vmem:[%s23240_s22 + $0x210] ss:$8 sps:$4 sm:$0xff]  }
0x168c   :  { %10774 = vmatmul.mubr.bf16.gmra.mrb[248].mxu0 %v17937_v62 }
0x168d   :  { %11274 = vmatpush1.bf16.msra.mxu0 %v11087_v43  ;;  %13849 = vmatprep.mubr.msk.bf16.mxu0 %vm10142_vm1, %v17942_v23  ;;  %v17960_v23 = vld [vmem:[%s23240_s22 + $0x174] ss:$8 sps:$4 sm:$0xff]  }
0x168e   :  { %11275 = vmatprep.subr.bf16.mxu0 %v18118_v42 }
0x168f   :  { %v22374_v50 = vpop.f32.mrb[244].mxu1 }
0x1690   :  { %v22376_v11 = vpop.f32.mrb[245].mxu1 }
0x1691   :  { %11276 = vmatpush1.bf16.msra.mxu0 %v11088_v60  ;;  %v22384_v61 = vpop.f32.mrb[246].mxu1  ;;  %v17943_v60 = vld [vmem:[%s23240_s22 + $0x120] ss:$8 sps:$4 sm:$0xff]  }
0x1692   :  { %v22391_v43 = vpop.f32.mrb[247].mxu1  ;;  %11277 = vmatprep.subr.bf16.mxu0 %v18118_v42 }
0x1694   :  { %10782 = vmatmul.mubr.bf16.gmra.mrb[252].mxu0 %v17940_v47 }
0x1695   :  { %11278 = vmatpush1.bf16.msra.mxu0 %v11089_v2  ;;  %13850 = vmatprep.mubr.msk.bf16.mxu0 %vm10142_vm1, %v17945_v4 }
0x1696   :  { %11279 = vmatprep.subr.bf16.mxu0 %v18118_v42 }
0x1697   :  { %v22401_v53 = vpop.f32.mrb[248].mxu1 }
0x1698   :  { %v22403_v58 = vpop.f32.mrb[249].mxu1 }
0x1699   :  { %11280 = vmatpush1.bf16.msra.mxu0 %v11090_v27  ;;  %v22411_v1 = vpop.f32.mrb[250].mxu1  ;;  %v17946_v27 = vld [vmem:[%s23240_s22 + $0x130] ss:$8 sps:$4 sm:$0xff]  }
0x169a   :  { %v22418_v2 = vpop.f32.mrb[251].mxu1  ;;  %11281 = vmatprep.subr.bf16.mxu0 %v18118_v42 }
0x169c   :  { %10790 = vmatmul.mubr.bf16.gmra.mrb[0].mxu0 %v17943_v60  ;;  %v17961_v60 = vld [vmem:[%s23240_s22 + $0x180] ss:$8 sps:$4 sm:$0xff]  }
0x169d   :  { %11282 = vmatpush1.bf16.msra.mxu0 %v11091_v45  ;;  %13851 = vmatprep.mubr.msk.bf16.mxu0 %vm10142_vm1, %v17948_v51 }
0x169e   :  { %11283 = vmatprep.subr.bf16.mxu0 %v18118_v42 }
0x169f   :  { %v22428_v32 = vpop.f32.mrb[252].mxu1 }
0x16a0   :  { %v22430_v5 = vpop.f32.mrb[253].mxu1 }
0x16a1   :  { %11284 = vmatpush1.bf16.msra.mxu0 %v11092_v22  ;;  %v22438_v16 = vpop.f32.mrb[254].mxu1  ;;  %v17949_v22 = vld [vmem:[%s23240_s22 + $0x140] ss:$8 sps:$4 sm:$0xff]  }
0x16a2   :  { %v22445_v45 = vpop.f32.mrb[255].mxu1  ;;  %11285 = vmatprep.subr.bf16.mxu0 %v18118_v42 }
0x16a4   :  { %10798 = vmatmul.mubr.bf16.gmra.mrb[4].mxu0 %v17946_v27 }
0x16a5   :  { %11286 = vmatpush1.bf16.msra.mxu0 %v11093_v30  ;;  %13852 = vmatprep.mubr.msk.bf16.mxu0 %vm10142_vm1, %v17951_v17  ;;  %v17958_v17 = vld [vmem:[%s23240_s22 + $0x170] ss:$8 sps:$4 sm:$0xff]  }
0x16a6   :  { %11287 = vmatprep.subr.bf16.mxu0 %v18118_v42 }
0x16a7   :  { %v22455_v31 = vpop.f32.mrb[0].mxu1 }
0x16a8   :  { %v22457_v44 = vpop.f32.mrb[1].mxu1 }
0x16a9   :  { %11288 = vmatpush1.bf16.msra.mxu0 %v11094_v55  ;;  %v22465_v19 = vpop.f32.mrb[2].mxu1  ;;  %v17952_v55 = vld [vmem:[%s23240_s22 + $0x150] ss:$8 sps:$4 sm:$0xff]  }
0x16aa   :  { %v22472_v30 = vpop.f32.mrb[3].mxu1  ;;  %11289 = vmatprep.subr.bf16.mxu0 %v18118_v42 }
0x16ac   :  { %10806 = vmatmul.mubr.bf16.gmra.mrb[8].mxu0 %v17949_v22 }
0x16ad   :  { %11290 = vmatpush1.bf16.msra.mxu0 %v11095_v7  ;;  %13853 = vmatprep.mubr.msk.bf16.mxu0 %vm10142_vm1, %v17954_v25  ;;  %v17963_v25 = vld [vmem:[%s23240_s22 + $0x184] ss:$8 sps:$4 sm:$0xff]  }
0x16ae   :  { %11291 = vmatprep.subr.bf16.mxu0 %v18118_v42 }
0x16af   :  { %v22482_v21 = vpop.f32.mrb[4].mxu1 }
0x16b0   :  { %v22484_v8 = vpop.f32.mrb[5].mxu1 }
0x16b1   :  { %11292 = vmatpush1.bf16.msra.mxu0 %v11096_v54  ;;  %v22492_v56 = vpop.f32.mrb[6].mxu1  ;;  %v17955_v54 = vld [vmem:[%s23240_s22 + $0x160] ss:$8 sps:$4 sm:$0xff]  }
0x16b2   :  { %v22499_v7 = vpop.f32.mrb[7].mxu1  ;;  %11805 = vmatprep.subr.bf16.mxu0 %v18118_v42 }
0x16b4   :  { %10814 = vmatmul.mubr.bf16.gmra.mrb[12].mxu0 %v17952_v55  ;;  %v17966_v55 = vld [vmem:[%s23240_s22 + $0x194] ss:$8 sps:$4 sm:$0xff]  }
0x16b5   :  { %13854 = vmatprep.mubr.msk.bf16.mxu0 %vm10142_vm1, %v17957_v26 }
0x16b7   :  { %v22505_v37 = vpop.f32.mrb[8].mxu1 }
0x16b8   :  { %v22507_v40 = vpop.f32.mrb[9].mxu1 }
0x16b9   :  { %v22512_v62 = vpop.f32.mrb[10].mxu1 }
0x16ba   :  { %v22519_v4 = vpop.f32.mrb[11].mxu1 }
0x16bc   :  { %10822 = vmatmul.mubr.bf16.gmra.mrb[16].mxu0 %v17955_v54  ;;  %v17969_v54 = vld [vmem:[%s23240_s22 + $0x1a4] ss:$8 sps:$4 sm:$0xff]  }
0x16bd   :  { %13855 = vmatprep.mubr.msk.bf16.mxu0 %vm10142_vm1, %v17960_v23 }
0x16bf   :  { %v22524_v51 = vpop.f32.mrb[12].mxu1 }
0x16c0   :  { %v22526_v27 = vpop.f32.mrb[13].mxu1 }
0x16c1   :  { %v22531_v22 = vpop.f32.mrb[14].mxu1 }
0x16c2   :  { %v22538_v26 = vpop.f32.mrb[15].mxu1 }
0x16c4   :  { %10830 = vmatmul.mubr.bf16.gmra.mrb[20].mxu0 %v17958_v17 }
0x16c5   :  { %13856 = vmatprep.mubr.msk.bf16.mxu0 %vm10142_vm1, %v17963_v25  ;;  %v17972_v25 = vld [vmem:[%s23240_s22 + $0x1b4] ss:$8 sps:$4 sm:$0xff]  }
0x16c7   :  { %v22543_v23 = vpop.f32.mrb[16].mxu1 }
0x16c8   :  { %v22545_v47 = vpop.f32.mrb[17].mxu1 }
0x16c9   :  { %v22550_v46 = vpop.f32.mrb[18].mxu1 }
0x16ca   :  { %v22557_v17 = vpop.f32.mrb[19].mxu1 }
0x16cc   :  { %10838 = vmatmul.mubr.bf16.gmra.mrb[24].mxu0 %v17961_v60 }
0x16cd   :  { %13857 = vmatprep.mubr.msk.bf16.mxu0 %vm10142_vm1, %v17966_v55  ;;  %v17975_v55 = vld [vmem:[%s23240_s22 + $0x1c4] ss:$8 sps:$4 sm:$0xff]  }
0x16cf   :  { %v22562_v0 = vpop.f32.mrb[20].mxu1 }
0x16d0   :  { %v22564_v39 = vpop.f32.mrb[21].mxu1 }
0x16d1   :  { %v22569_v33 = vpop.f32.mrb[22].mxu1 }
0x16d2   :  { %v22576_v60 = vpop.f32.mrb[23].mxu1 }
0x16d4   :  { %10846 = vmatmul.mubr.bf16.gmra.mrb[28].mxu0 %v17964_v38 }
0x16d5   :  { %13858 = vmatprep.mubr.msk.bf16.mxu0 %vm10142_vm1, %v17969_v54 }
0x16d7   :  { %v22581_v48 = vpop.f32.mrb[24].mxu1 }
0x16d8   :  { %v22583_v36 = vpop.f32.mrb[25].mxu1 }
0x16d9   :  { %v22588_v57 = vpop.f32.mrb[26].mxu1 }
0x16da   :  { %v22595_v38 = vpop.f32.mrb[27].mxu1 }
0x16dc   :  { %10854 = vmatmul.mubr.bf16.gmra.mrb[32].mxu0 %v17967_v24 }
0x16dd   :  { %13859 = vmatprep.mubr.msk.bf16.mxu0 %vm10142_vm1, %v17972_v25 }
0x16df   :  { %v22600_v35 = vpop.f32.mrb[28].mxu1 }
0x16e0   :  { %v22602_v6 = vpop.f32.mrb[29].mxu1 }
0x16e1   :  { %v22607_v20 = vpop.f32.mrb[30].mxu1 }
0x16e2   :  { %v12176_v54 = vpack.c.bf16 %v22607_v20, %v22600_v35  ;;  %v22614_v24 = vpop.f32.mrb[31].mxu1  ;;  %v18042_v20 = vld [vmem:[%s23240_s22 + $0x330] ss:$8 sps:$4 sm:$0xff]   ;;  %v18047_v35 = vld [vmem:[%s23240_s22 + $0x344] ss:$8 sps:$4 sm:$0xff]  }
0x16e3   :  { %v12175_v25 = vpack.c.bf16 %v22614_v24, %v22602_v6  ;;  %v18039_v6 = vld [vmem:[%s23240_s22 + $0x320] ss:$8 sps:$4 sm:$0xff]   ;;  %v18053_v24 = vld [vmem:[%s23240_s22 + $0x364] ss:$8 sps:$4 sm:$0xff]  }
0x16e4   :  { %10862 = vmatmul.mubr.bf16.gmra.mrb[36].mxu0 %v17970_v59  ;;  %v17976_v59 = vld [vmem:[%s23240_s22 + $0x1d0] ss:$8 sps:$4 sm:$0xff]  }
0x16e5   :  { %13933 = vmatprep.mubr.msk.bf16.mxu0 %vm10142_vm1, %v17975_v55  ;;  %v23291_v55 = vpack.c.bf16 %v22304_v15, %v22297_v14  ;;  %v17979_v14 = vld [vmem:[%s23240_s22 + $0x1e0] ss:$8 sps:$4 sm:$0xff]   ;;  %v23293_v15 = vpack.c.bf16 %v22330_v52, %v22320_v10  ;;  %v23295_v10 = vpack.c.bf16 %v22357_v29, %v22347_v49  ;;  %v23296_v52 = vpack.c.bf16 %v22391_v43, %v22376_v11  ;;  %v17993_v11 = vld [vmem:[%s23240_s22 + $0x224] ss:$8 sps:$4 sm:$0xff]  }
0x16e6   :  { %v23297_v49 = vpack.c.bf16 %v22384_v61, %v22374_v50  ;;  %v23298_v29 = vpack.c.bf16 %v22418_v2, %v22403_v58  ;;  %v23299_v50 = vpack.c.bf16 %v22411_v1, %v22401_v53  ;;  %v23300_v61 = vpack.c.bf16 %v22445_v45, %v22430_v5  ;;  %v17991_v43 = vld [vmem:[%s23240_s22 + $0x220] ss:$8 sps:$4 sm:$0xff]   ;;  %v17996_v58 = vld [vmem:[%s23240_s22 + $0x234] ss:$8 sps:$4 sm:$0xff]   ;;  %v17994_v2 = vld [vmem:[%s23240_s22 + $0x230] ss:$8 sps:$4 sm:$0xff]  }
0x16e7   :  { %v23301_v53 = vpack.c.bf16 %v22438_v16, %v22428_v32  ;;  %v23302_v1 = vpack.c.bf16 %v22472_v30, %v22457_v44  ;;  %v23303_v32 = vpack.c.bf16 %v22465_v19, %v22455_v31  ;;  %v17999_v5 = vld [vmem:[%s23240_s22 + $0x244] ss:$8 sps:$4 sm:$0xff]   ;;  %v17997_v16 = vld [vmem:[%s23240_s22 + $0x240] ss:$8 sps:$4 sm:$0xff]   ;;  %v18002_v45 = vld [vmem:[%s23240_s22 + $0x254] ss:$8 sps:$4 sm:$0xff]  }
0x16e8   :  { %v18000_v31 = vld [vmem:[%s23240_s22 + $0x250] ss:$8 sps:$4 sm:$0xff]   ;;  %v18005_v44 = vld [vmem:[%s23240_s22 + $0x264] ss:$8 sps:$4 sm:$0xff]   ;;  %v18003_v19 = vld [vmem:[%s23240_s22 + $0x260] ss:$8 sps:$4 sm:$0xff]  }
0x16e9   :  { %v18008_v30 = vld [vmem:[%s23240_s22 + $0x274] ss:$8 sps:$4 sm:$0xff]  }
0x16ec   :  { %11298 = vmatmul.mubr.bf16.vlgmr.msra.gmra.mrb[240].mxu0 %v17973_v18  ;;  %v17981_v18 = vld [vmem:[%s23240_s22 + $0x1e4] ss:$8 sps:$4 sm:$0xff]  }
0x16ed   :  { %11806 = vmatpush1.bf16.msra.mxu0 %v11623_v9  ;;  %13934 = vmatprep.mubr.msk.bf16.mxu0 %vm10142_vm1, %v17978_v28  ;;  %v17984_v28 = vld [vmem:[%s23240_s22 + $0x1f4] ss:$8 sps:$4 sm:$0xff]   ;;  %v17982_v9 = vld [vmem:[%s23240_s22 + $0x1f0] ss:$8 sps:$4 sm:$0xff]  }
0x16ee   :  { %11807 = vmatprep.subr.bf16.mxu0 %v18118_v42 }
0x16f1   :  { %11808 = vmatpush1.bf16.msra.mxu0 %v23291_v55  ;;  %v18011_v55 = vld [vmem:[%s23240_s22 + $0x284] ss:$8 sps:$4 sm:$0xff]  }
0x16f2   :  { %11809 = vmatprep.subr.bf16.mxu0 %v18118_v42 }
0x16f4   :  { %11306 = vmatmul.mubr.bf16.gmra.mrb[244].mxu0 %v17976_v59  ;;  %v18006_v59 = vld [vmem:[%s23240_s22 + $0x270] ss:$8 sps:$4 sm:$0xff]  }
0x16f5   :  { %11810 = vmatpush1.bf16.msra.mxu0 %v23292_v13  ;;  %13935 = vmatprep.mubr.msk.bf16.mxu0 %vm10142_vm1, %v17981_v18  ;;  %v18009_v18 = vld [vmem:[%s23240_s22 + $0x280] ss:$8 sps:$4 sm:$0xff]   ;;  %v18014_v13 = vld [vmem:[%s23240_s22 + $0x294] ss:$8 sps:$4 sm:$0xff]  }
0x16f6   :  { %11811 = vmatprep.subr.bf16.mxu0 %v18118_v42 }
0x16f9   :  { %11812 = vmatpush1.bf16.msra.mxu0 %v23293_v15  ;;  %v18017_v15 = vld [vmem:[%s23240_s22 + $0x2a4] ss:$8 sps:$4 sm:$0xff]  }
0x16fa   :  { %11813 = vmatprep.subr.bf16.mxu0 %v18118_v42 }
0x16fc   :  { %11314 = vmatmul.mubr.bf16.gmra.mrb[248].mxu0 %v17979_v14  ;;  %v18012_v14 = vld [vmem:[%s23240_s22 + $0x290] ss:$8 sps:$4 sm:$0xff]  }
0x16fd   :  { %11814 = vmatpush1.bf16.msra.mxu0 %v23294_v12  ;;  %13936 = vmatprep.mubr.msk.bf16.mxu0 %vm10142_vm1, %v17984_v28  ;;  %v18015_v28 = vld [vmem:[%s23240_s22 + $0x2a0] ss:$8 sps:$4 sm:$0xff]   ;;  %v18020_v12 = vld [vmem:[%s23240_s22 + $0x2b4] ss:$8 sps:$4 sm:$0xff]  }
0x16fe   :  { %11815 = vmatprep.subr.bf16.mxu0 %v18118_v42 }
0x1701   :  { %11816 = vmatpush1.bf16.msra.mxu0 %v23295_v10  ;;  %v18018_v10 = vld [vmem:[%s23240_s22 + $0x2b0] ss:$8 sps:$4 sm:$0xff]  }
0x1702   :  { %11817 = vmatprep.subr.bf16.mxu0 %v18118_v42 }
0x1704   :  { %11322 = vmatmul.mubr.bf16.gmra.mrb[252].mxu0 %v17982_v9  ;;  %v23304_v9 = vpack.c.bf16 %v22499_v7, %v22484_v8  ;;  %v23306_v8 = vpack.c.bf16 %v22519_v4, %v22507_v40  ;;  %v18026_v7 = vld [vmem:[%s23240_s22 + $0x2d4] ss:$8 sps:$4 sm:$0xff]   ;;  %v23308_v40 = vpack.c.bf16 %v22538_v26, %v22526_v27  ;;  %v18029_v4 = vld [vmem:[%s23240_s22 + $0x2e4] ss:$8 sps:$4 sm:$0xff]   ;;  %v23310_v27 = vpack.c.bf16 %v22557_v17, %v22545_v47 }
0x1705   :  { %11818 = vmatpush1.bf16.msra.mxu0 %v23296_v52  ;;  %13937 = vmatprep.mubr.msk.bf16.mxu0 %vm10142_vm1, %v17987_v34  ;;  %v23305_v34 = vpack.c.bf16 %v22492_v56, %v22482_v21  ;;  %v18023_v52 = vld [vmem:[%s23240_s22 + $0x2c4] ss:$8 sps:$4 sm:$0xff]   ;;  %v18021_v21 = vld [vmem:[%s23240_s22 + $0x2c0] ss:$8 sps:$4 sm:$0xff]   ;;  %v23307_v56 = vpack.c.bf16 %v22512_v62, %v22505_v37  ;;  %v18024_v37 = vld [vmem:[%s23240_s22 + $0x2d0] ss:$8 sps:$4 sm:$0xff]   ;;  %v23309_v62 = vpack.c.bf16 %v22531_v22, %v22524_v51 }
0x1706   :  { %11819 = vmatprep.subr.bf16.mxu0 %v18118_v42  ;;  %v18027_v51 = vld [vmem:[%s23240_s22 + $0x2e0] ss:$8 sps:$4 sm:$0xff]   ;;  %v23311_v22 = vpack.c.bf16 %v22550_v46, %v22543_v23  ;;  %v18032_v26 = vld [vmem:[%s23240_s22 + $0x2f4] ss:$8 sps:$4 sm:$0xff]   ;;  %v23312_v47 = vpack.c.bf16 %v22576_v60, %v22564_v39  ;;  %v18030_v46 = vld [vmem:[%s23240_s22 + $0x2f0] ss:$8 sps:$4 sm:$0xff]   ;;  %v23313_v23 = vpack.c.bf16 %v22569_v33, %v22562_v0  ;;  %v23314_v39 = vpack.c.bf16 %v22595_v38, %v22583_v36 }
0x1707   :  { %v18035_v17 = vld [vmem:[%s23240_s22 + $0x304] ss:$8 sps:$4 sm:$0xff]   ;;  %v18033_v33 = vld [vmem:[%s23240_s22 + $0x300] ss:$8 sps:$4 sm:$0xff]   ;;  %v23315_v0 = vpack.c.bf16 %v22588_v57, %v22581_v48  ;;  %v18038_v60 = vld [vmem:[%s23240_s22 + $0x314] ss:$8 sps:$4 sm:$0xff]  }
0x1708   :  { %v18036_v57 = vld [vmem:[%s23240_s22 + $0x310] ss:$8 sps:$4 sm:$0xff]   ;;  %v18041_v36 = vld [vmem:[%s23240_s22 + $0x324] ss:$8 sps:$4 sm:$0xff]   ;;  %v18045_v48 = vld [vmem:[%s23240_s22 + $0x340] ss:$8 sps:$4 sm:$0xff]  }
0x1709   :  { %11820 = vmatpush1.bf16.msra.mxu0 %v23297_v49  ;;  %v18050_v38 = vld [vmem:[%s23240_s22 + $0x354] ss:$8 sps:$4 sm:$0xff]   ;;  %v18054_v49 = vld [vmem:[%s23240_s22 + $0x370] ss:$8 sps:$4 sm:$0xff]  }
0x170a   :  { %11821 = vmatprep.subr.bf16.mxu0 %v18118_v42 }
0x170c   :  { %11330 = vmatmul.mubr.bf16.gmra.mrb[0].mxu0 %v17985_v63  ;;  %v18056_v63 = vld [vmem:[%s23240_s22 + $0x374] ss:$8 sps:$4 sm:$0xff]  }
0x170d   :  { %11822 = vmatpush1.bf16.msra.mxu0 %v23298_v29  ;;  %13938 = vmatprep.mubr.msk.bf16.mxu0 %vm10142_vm1, %v17990_v3  ;;  %v18059_v3 = vld [vmem:[%s23240_s22 + $0x384] ss:$8 sps:$4 sm:$0xff]   ;;  %v18057_v29 = vld [vmem:[%s23240_s22 + $0x380] ss:$8 sps:$4 sm:$0xff]  }
0x170e   :  { %11823 = vmatprep.subr.bf16.mxu0 %v18118_v42 }
0x1711   :  { %11824 = vmatpush1.bf16.msra.mxu0 %v23299_v50  ;;  %v18060_v50 = vld [vmem:[%s23240_s22 + $0x390] ss:$8 sps:$4 sm:$0xff]  }
0x1712   :  { %11825 = vmatprep.subr.bf16.mxu0 %v18118_v42 }
0x1714   :  { %11338 = vmatmul.mubr.bf16.gmra.mrb[4].mxu0 %v17988_v41  ;;  %v18062_v41 = vld [vmem:[%s23240_s22 + $0x394] ss:$8 sps:$4 sm:$0xff]  }
0x1715   :  { %11826 = vmatpush1.bf16.msra.mxu0 %v23300_v61  ;;  %13939 = vmatprep.mubr.msk.bf16.mxu0 %vm10142_vm1, %v17993_v11  ;;  %v18065_v11 = vld [vmem:[%s23240_s22 + $0x3a4] ss:$8 sps:$4 sm:$0xff]   ;;  %v18063_v61 = vld [vmem:[%s23240_s22 + $0x3a0] ss:$8 sps:$4 sm:$0xff]  }
0x1716   :  { %11827 = vmatprep.subr.bf16.mxu0 %v18118_v42 }
0x1719   :  { %11828 = vmatpush1.bf16.msra.mxu0 %v23301_v53  ;;  %v18066_v53 = vld [vmem:[%s23240_s22 + $0x3b0] ss:$8 sps:$4 sm:$0xff]  }
0x171a   :  { %11829 = vmatprep.subr.bf16.mxu0 %v18118_v42 }
0x171c   :  { %11346 = vmatmul.mubr.bf16.gmra.mrb[8].mxu0 %v17991_v43  ;;  %v18068_v43 = vld [vmem:[%s23240_s22 + $0x3b4] ss:$8 sps:$4 sm:$0xff]  }
0x171d   :  { %11830 = vmatpush1.bf16.msra.mxu0 %v23302_v1  ;;  %13940 = vmatprep.mubr.msk.bf16.mxu0 %vm10142_vm1, %v17996_v58  ;;  %v18071_v58 = vld [vmem:[%s23240_s22 + $0x3c4] ss:$8 sps:$4 sm:$0xff]   ;;  %v18069_v1 = vld [vmem:[%s23240_s22 + $0x3c0] ss:$8 sps:$4 sm:$0xff]  }
0x171e   :  { %11831 = vmatprep.subr.bf16.mxu0 %v18118_v42 }
0x1721   :  { %11832 = vmatpush1.bf16.msra.mxu0 %v23303_v32  ;;  %v18072_v32 = vld [vmem:[%s23240_s22 + $0x3d0] ss:$8 sps:$4 sm:$0xff]  }
0x1722   :  { %12345 = vmatprep.subr.bf16.mxu0 %v18118_v42 }
0x1724   :  { %11354 = vmatmul.mubr.bf16.gmra.mrb[12].mxu0 %v17994_v2  ;;  %v18074_v2 = vld [vmem:[%s23240_s22 + $0x3d4] ss:$8 sps:$4 sm:$0xff]  }
0x1725   :  { %13941 = vmatprep.mubr.msk.bf16.mxu0 %vm10142_vm1, %v17999_v5  ;;  %v18077_v5 = vld [vmem:[%s23240_s22 + $0x3e4] ss:$8 sps:$4 sm:$0xff]  }
0x172c   :  { %11362 = vmatmul.mubr.bf16.gmra.mrb[16].mxu0 %v17997_v16  ;;  %v18075_v16 = vld [vmem:[%s23240_s22 + $0x3e0] ss:$8 sps:$4 sm:$0xff]  }
0x172d   :  { %13942 = vmatprep.mubr.msk.bf16.mxu0 %vm10142_vm1, %v18002_v45  ;;  %v18080_v45 = vld [vmem:[%s23240_s22 + $0x3f4] ss:$8 sps:$4 sm:$0xff]  }
0x1734   :  { %11370 = vmatmul.mubr.bf16.gmra.mrb[20].mxu0 %v18000_v31  ;;  %v18078_v31 = vld [vmem:[%s23240_s22 + $0x3f0] ss:$8 sps:$4 sm:$0xff]  }
0x1735   :  { %13943 = vmatprep.mubr.msk.bf16.mxu0 %vm10142_vm1, %v18005_v44  ;;  %v18083_v44 = vld [vmem:[%s23240_s22 + $0x404] ss:$8 sps:$4 sm:$0xff]  }
0x173c   :  { %11378 = vmatmul.mubr.bf16.gmra.mrb[24].mxu0 %v18003_v19  ;;  %v18081_v19 = vld [vmem:[%s23240_s22 + $0x400] ss:$8 sps:$4 sm:$0xff]  }
0x173d   :  { %13944 = vmatprep.mubr.msk.bf16.mxu0 %vm10142_vm1, %v18008_v30  ;;  %v18086_v30 = vld [vmem:[%s23240_s22 + $0x414] ss:$8 sps:$4 sm:$0xff]  }
0x1744   :  { %11386 = vmatmul.mubr.bf16.gmra.mrb[28].mxu0 %v18006_v59  ;;  %v18084_v59 = vld [vmem:[%s23240_s22 + $0x410] ss:$8 sps:$4 sm:$0xff]  }
0x1745   :  { %13945 = vmatprep.mubr.msk.bf16.mxu0 %vm10142_vm1, %v18011_v55  ;;  %v18089_v55 = vld [vmem:[%s23240_s22 + $0x424] ss:$8 sps:$4 sm:$0xff]  }
0x174c   :  { %11394 = vmatmul.mubr.bf16.gmra.mrb[32].mxu0 %v18009_v18  ;;  %v18087_v18 = vld [vmem:[%s23240_s22 + $0x420] ss:$8 sps:$4 sm:$0xff]  }
0x174d   :  { %13946 = vmatprep.mubr.msk.bf16.mxu0 %vm10142_vm1, %v18014_v13  ;;  %v18092_v13 = vld [vmem:[%s23240_s22 + $0x434] ss:$8 sps:$4 sm:$0xff]  }
0x1754   :  { %11402 = vmatmul.mubr.bf16.gmra.mrb[36].mxu0 %v18012_v14  ;;  %v18090_v14 = vld [vmem:[%s23240_s22 + $0x430] ss:$8 sps:$4 sm:$0xff]  }
0x1755   :  { %14020 = vmatprep.mubr.msk.bf16.mxu0 %vm10142_vm1, %v18017_v15  ;;  %v18095_v15 = vld [vmem:[%s23240_s22 + $0x444] ss:$8 sps:$4 sm:$0xff]  }
0x175c   :  { %11838 = vmatmul.mubr.bf16.vlgmr.msra.gmra.mrb[240].mxu0 %v18015_v28  ;;  %v18093_v28 = vld [vmem:[%s23240_s22 + $0x440] ss:$8 sps:$4 sm:$0xff]  }
0x175d   :  { %12346 = vmatpush1.bf16.msra.mxu0 %v23304_v9  ;;  %14021 = vmatprep.mubr.msk.bf16.mxu0 %vm10142_vm1, %v18020_v12  ;;  %v18098_v12 = vld [vmem:[%s23240_s22 + $0x454] ss:$8 sps:$4 sm:$0xff]   ;;  %v18096_v9 = vld [vmem:[%s23240_s22 + $0x450] ss:$8 sps:$4 sm:$0xff]  }
0x175e   :  { %12347 = vmatprep.subr.bf16.mxu0 %v18118_v42 }
0x1761   :  { %12348 = vmatpush1.bf16.msra.mxu0 %v23305_v34 }
0x1762   :  { %12349 = vmatprep.subr.bf16.mxu0 %v18118_v42 }
0x1764   :  { %11846 = vmatmul.mubr.bf16.gmra.mrb[244].mxu0 %v18018_v10  ;;  %v9747_v10 = vld [vmem:[%s23241_s24] sm:$0xff] }
0x1765   :  { %12350 = vmatpush1.bf16.msra.mxu0 %v23306_v8  ;;  %14022 = vmatprep.mubr.msk.bf16.mxu0 %vm10142_vm1, %v18023_v52  ;;  %v9748_v52 = vld [vmem:[%s23241_s24 + $0x8] sm:$0xff] }
0x1766   :  { %12351 = vmatprep.subr.bf16.mxu0 %v18118_v42 }
0x1769   :  { %12352 = vmatpush1.bf16.msra.mxu0 %v23307_v56 }
0x176a   :  { %12353 = vmatprep.subr.bf16.mxu0 %v18118_v42 }
0x176c   :  { %11854 = vmatmul.mubr.bf16.gmra.mrb[248].mxu0 %v18021_v21 }
0x176d   :  { %12354 = vmatpush1.bf16.msra.mxu0 %v23308_v40  ;;  %14023 = vmatprep.mubr.msk.bf16.mxu0 %vm10142_vm1, %v18026_v7 }
0x176e   :  { %12355 = vmatprep.subr.bf16.mxu0 %v18118_v42 }
0x1771   :  { %12356 = vmatpush1.bf16.msra.mxu0 %v23309_v62 }
0x1772   :  { %12357 = vmatprep.subr.bf16.mxu0 %v18118_v42 }
0x1774   :  { %11862 = vmatmul.mubr.bf16.gmra.mrb[252].mxu0 %v18024_v37 }
0x1775   :  { %12358 = vmatpush1.bf16.msra.mxu0 %v23310_v27  ;;  %14024 = vmatprep.mubr.msk.bf16.mxu0 %vm10142_vm1, %v18029_v4  ;;  %v9749_v4 = vld [vmem:[%s23241_s24 + $0x10] sm:$0xff] }
0x1776   :  { %12359 = vmatprep.subr.bf16.mxu0 %v18118_v42 }
0x1779   :  { %12360 = vmatpush1.bf16.msra.mxu0 %v23311_v22 }
0x177a   :  { %12361 = vmatprep.subr.bf16.mxu0 %v18118_v42 }
0x177c   :  { %11870 = vmatmul.mubr.bf16.gmra.mrb[0].mxu0 %v18027_v51  ;;  %v9750_v51 = vld [vmem:[%s23241_s24 + $0x18] sm:$0xff] }
0x177d   :  { %12362 = vmatpush1.bf16.msra.mxu0 %v23312_v47  ;;  %14025 = vmatprep.mubr.msk.bf16.mxu0 %vm10142_vm1, %v18032_v26 }
0x177e   :  { %12363 = vmatprep.subr.bf16.mxu0 %v18118_v42 }
0x1781   :  { %12364 = vmatpush1.bf16.msra.mxu0 %v23313_v23 }
0x1782   :  { %12365 = vmatprep.subr.bf16.mxu0 %v18118_v42 }
0x1784   :  { %11878 = vmatmul.mubr.bf16.gmra.mrb[4].mxu0 %v18030_v46 }
0x1785   :  { %12366 = vmatpush1.bf16.msra.mxu0 %v23314_v39  ;;  %14026 = vmatprep.mubr.msk.bf16.mxu0 %vm10142_vm1, %v18035_v17 }
0x1786   :  { %12367 = vmatprep.subr.bf16.mxu0 %v18118_v42 }
0x1789   :  { %12368 = vmatpush1.bf16.msra.mxu0 %v23315_v0 }
0x178a   :  { %12369 = vmatprep.subr.bf16.mxu0 %v18118_v42 }
0x178c   :  { %11886 = vmatmul.mubr.bf16.gmra.mrb[8].mxu0 %v18033_v33  ;;  %v9751_v33 = vld [vmem:[%s23241_s24 + $0x20] sm:$0xff] }
0x178d   :  { %12370 = vmatpush1.bf16.msra.mxu0 %v12175_v25  ;;  %14027 = vmatprep.mubr.msk.bf16.mxu0 %vm10142_vm1, %v18038_v60  ;;  %v18051_v25 = vld [vmem:[%s23240_s22 + $0x360] ss:$8 sps:$4 sm:$0xff]  }
0x178e   :  { %12371 = vmatprep.subr.bf16.mxu0 %v18118_v42  ;;  %v18044_v42 = vld [vmem:[%s23240_s22 + $0x334] ss:$8 sps:$4 sm:$0xff]   ;;  %v9752_v60 = vld [vmem:[%s23241_s24 + $0x28] sm:$0xff] }
0x1791   :  { %12372 = vmatpush1.bf16.msra.mxu0 %v12176_v54  ;;  %v18048_v54 = vld [vmem:[%s23240_s22 + $0x350] ss:$8 sps:$4 sm:$0xff]  }
0x1794   :  { %11894 = vmatmul.mubr.bf16.gmra.mrb[12].mxu0 %v18036_v57 }
0x1795   :  { %14028 = vmatprep.mubr.msk.bf16.mxu0 %vm10142_vm1, %v18041_v36 }
0x179c   :  { %11902 = vmatmul.mubr.bf16.gmra.mrb[16].mxu0 %v18039_v6 }
0x179d   :  { %14029 = vmatprep.mubr.msk.bf16.mxu0 %vm10142_vm1, %v18044_v42 }
0x17a4   :  { %11910 = vmatmul.mubr.bf16.gmra.mrb[20].mxu0 %v18042_v20 }
0x17a5   :  { %14030 = vmatprep.mubr.msk.bf16.mxu0 %vm10142_vm1, %v18047_v35 }
0x17ac   :  { %11918 = vmatmul.mubr.bf16.gmra.mrb[24].mxu0 %v18045_v48 }
0x17ad   :  { %14031 = vmatprep.mubr.msk.bf16.mxu0 %vm10142_vm1, %v18050_v38  ;;  %v9753_v38 = vld [vmem:[%s23241_s24 + $0x30] sm:$0xff] }
0x17b4   :  { %11926 = vmatmul.mubr.bf16.gmra.mrb[28].mxu0 %v18048_v54 }
0x17b5   :  { %14032 = vmatprep.mubr.msk.bf16.mxu0 %vm10142_vm1, %v18053_v24  ;;  %v9754_v24 = vld [vmem:[%s23241_s24 + $0x38] sm:$0xff] }
0x17bc   :  { %11934 = vmatmul.mubr.bf16.gmra.mrb[32].mxu0 %v18051_v25 }
0x17bd   :  { %14033 = vmatprep.mubr.msk.bf16.mxu0 %vm10142_vm1, %v18056_v63 }
0x17c4   :  { %11942 = vmatmul.mubr.bf16.gmra.mrb[36].mxu0 %v18054_v49 }
0x17c5   :  { %14107 = vmatprep.mubr.msk.bf16.mxu0 %vm10142_vm1, %v18059_v3 }
0x17cc   :  { %12378 = vmatmul.mubr.bf16.vlgmr.msra.gmra.mrb[240].mxu0 %v18057_v29 }
0x17cd   :  { %14108 = vmatprep.mubr.msk.bf16.mxu0 %vm10142_vm1, %v18062_v41 }
0x17d4   :  { %12386 = vmatmul.mubr.bf16.gmra.mrb[244].mxu0 %v18060_v50 }
0x17d5   :  { %14109 = vmatprep.mubr.msk.bf16.mxu0 %vm10142_vm1, %v18065_v11  ;;  %v9755_v11 = vld [vmem:[%s23241_s24 + $0x40] sm:$0xff] }
0x17dc   :  { %12394 = vmatmul.mubr.bf16.gmra.mrb[248].mxu0 %v18063_v61 }
0x17dd   :  { %14110 = vmatprep.mubr.msk.bf16.mxu0 %vm10142_vm1, %v18068_v43  ;;  %v9756_v43 = vld [vmem:[%s23241_s24 + $0x48] sm:$0xff] }
0x17e4   :  { %12402 = vmatmul.mubr.bf16.gmra.mrb[252].mxu0 %v18066_v53 }
0x17e5   :  { %14111 = vmatprep.mubr.msk.bf16.mxu0 %vm10142_vm1, %v18071_v58 }
0x17ec   :  { %12410 = vmatmul.mubr.bf16.gmra.mrb[0].mxu0 %v18069_v1 }
0x17ed   :  { %14112 = vmatprep.mubr.msk.bf16.mxu0 %vm10142_vm1, %v18074_v2 }
0x17f4   :  { %12418 = vmatmul.mubr.bf16.gmra.mrb[4].mxu0 %v18072_v32 }
0x17f5   :  { %14113 = vmatprep.mubr.msk.bf16.mxu0 %vm10142_vm1, %v18077_v5 }
0x17fc   :  { %12426 = vmatmul.mubr.bf16.gmra.mrb[8].mxu0 %v18075_v16 }
0x17fd   :  { %14114 = vmatprep.mubr.msk.bf16.mxu0 %vm10142_vm1, %v18080_v45  ;;  %v9757_v45 = vld [vmem:[%s23241_s24 + $0x50] sm:$0xff] }
0x1804   :  { %12434 = vmatmul.mubr.bf16.gmra.mrb[12].mxu0 %v18078_v31 }
0x1805   :  { %14115 = vmatprep.mubr.msk.bf16.mxu0 %vm10142_vm1, %v18083_v44  ;;  %v9758_v44 = vld [vmem:[%s23241_s24 + $0x58] sm:$0xff] }
0x180c   :  { %12442 = vmatmul.mubr.bf16.gmra.mrb[16].mxu0 %v18081_v19 }
0x180d   :  { %14116 = vmatprep.mubr.msk.bf16.mxu0 %vm10142_vm1, %v18086_v30 }
0x1814   :  { %12450 = vmatmul.mubr.bf16.gmra.mrb[20].mxu0 %v18084_v59 }
0x1815   :  { %14117 = vmatprep.mubr.msk.bf16.mxu0 %vm10142_vm1, %v18089_v55 }
0x181c   :  { %12458 = vmatmul.mubr.bf16.gmra.mrb[24].mxu0 %v18087_v18 }
0x181d   :  { %14118 = vmatprep.mubr.msk.bf16.mxu0 %vm10142_vm1, %v18092_v13 }
0x1824   :  { %12466 = vmatmul.mubr.bf16.gmra.mrb[28].mxu0 %v18090_v14 }
0x1825   :  { %14119 = vmatprep.mubr.msk.bf16.mxu0 %vm10142_vm1, %v18095_v15  ;;  %v9759_v15 = vld [vmem:[%s23241_s24 + $0x60] sm:$0xff] }
0x182c   :  { %12474 = vmatmul.mubr.bf16.gmra.mrb[32].mxu0 %v18093_v28 }
0x182d   :  { %14120 = vmatprep.mubr.msk.bf16.mxu0 %vm10142_vm1, %v18098_v12  ;;  %v9760_v12 = vld [vmem:[%s23241_s24 + $0x68] sm:$0xff] }
0x1834   :  { %12482 = vmatmul.mubr.bf16.gmra.mrb[36].mxu0 %v18096_v9 }
0x189f   :  { %v12379_v34 = vpop.f32.mrb[240].mxu0 }
0x18a0   :  { %v16890_v8 = vadd.f32 %v12379_v34, %v9747_v10  ;;  %v12381_v21 = vpop.f32.mrb[241].mxu0 }
0x18a1   :  { %v12382_v56 = vpop.f32.mrb[242].mxu0 }
0x18a2   :  { %v12518_v7 = vmax.f32 %v16890_v8, 0.0  ;;  %v16891_v40 = vadd.f32 %v12382_v56, %v9748_v52  ;;  %v12384_v37 = vpop.f32.mrb[243].mxu0 }
0x18a3   :  { %v9762_v37 = vld [vmem:[%s23241_s24 + $0x78] sm:$0xff] }
0x18a4   :  { %12547 = vst.msk [vmem:[%s23242_s25] sm:$0xff] %vm12546_vm2, %v12518_v7  ;;  %v12519_v62 = vmax.f32 %v16891_v40, 0.0  ;;  %v9761_v7 = vld [vmem:[%s23241_s24 + $0x70] sm:$0xff] }
0x18a6   :  { %12548 = vst.msk [vmem:[%s23242_s25 + $0x8] sm:$0xff] %vm12546_vm2, %v12519_v62 }
0x18a7   :  { %v12387_v27 = vpop.f32.mrb[244].mxu0 }
0x18a8   :  { %v16892_v22 = vadd.f32 %v12387_v27, %v9749_v4  ;;  %v12389_v26 = vpop.f32.mrb[245].mxu0 }
0x18a9   :  { %v12390_v47 = vpop.f32.mrb[246].mxu0 }
0x18aa   :  { %v12520_v46 = vmax.f32 %v16892_v22, 0.0  ;;  %v16893_v23 = vadd.f32 %v12390_v47, %v9750_v51  ;;  %v12392_v17 = vpop.f32.mrb[247].mxu0 }
0x18ab   :  { %v9764_v17 = vld [vmem:[%s23241_s24 + $0x88] sm:$0xff] }
0x18ac   :  { %12549 = vst.msk [vmem:[%s23242_s25 + $0x10] sm:$0xff] %vm12546_vm2, %v12520_v46  ;;  %v12521_v39 = vmax.f32 %v16893_v23, 0.0  ;;  %v9763_v46 = vld [vmem:[%s23241_s24 + $0x80] sm:$0xff] }
0x18ae   :  { %12550 = vst.msk [vmem:[%s23242_s25 + $0x18] sm:$0xff] %vm12546_vm2, %v12521_v39 }
0x18af   :  { %v12395_v0 = vpop.f32.mrb[248].mxu0 }
0x18b0   :  { %v16894_v57 = vadd.f32 %v12395_v0, %v9751_v33  ;;  %v12397_v36 = vpop.f32.mrb[249].mxu0 }
0x18b1   :  { %v12398_v6 = vpop.f32.mrb[250].mxu0 }
0x18b2   :  { %v12522_v42 = vmax.f32 %v16894_v57, 0.0  ;;  %v16895_v20 = vadd.f32 %v12398_v6, %v9752_v60  ;;  %v12400_v35 = vpop.f32.mrb[251].mxu0 }
0x18b3   :  { %v9766_v35 = vld [vmem:[%s23241_s24 + $0x98] sm:$0xff] }
0x18b4   :  { %12551 = vst.msk [vmem:[%s23242_s25 + $0x20] sm:$0xff] %vm12546_vm2, %v12522_v42  ;;  %v12523_v48 = vmax.f32 %v16895_v20, 0.0  ;;  %v9765_v42 = vld [vmem:[%s23241_s24 + $0x90] sm:$0xff] }
0x18b6   :  { %12552 = vst.msk [vmem:[%s23242_s25 + $0x28] sm:$0xff] %vm12546_vm2, %v12523_v48 }
0x18b7   :  { %v12403_v54 = vpop.f32.mrb[252].mxu0 }
0x18b8   :  { %v16896_v25 = vadd.f32 %v12403_v54, %v9753_v38  ;;  %v12405_v63 = vpop.f32.mrb[253].mxu0 }
0x18b9   :  { %v12406_v49 = vpop.f32.mrb[254].mxu0 }
0x18ba   :  { %v12524_v3 = vmax.f32 %v16896_v25, 0.0  ;;  %v16897_v29 = vadd.f32 %v12406_v49, %v9754_v24  ;;  %v12408_v41 = vpop.f32.mrb[255].mxu0 }
0x18bb   :  { %v9768_v41 = vld [vmem:[%s23241_s24 + $0xa8] sm:$0xff] }
0x18bc   :  { %12553 = vst.msk [vmem:[%s23242_s25 + $0x30] sm:$0xff] %vm12546_vm2, %v12524_v3  ;;  %v12525_v50 = vmax.f32 %v16897_v29, 0.0  ;;  %v9767_v3 = vld [vmem:[%s23241_s24 + $0xa0] sm:$0xff] }
0x18be   :  { %12554 = vst.msk [vmem:[%s23242_s25 + $0x38] sm:$0xff] %vm12546_vm2, %v12525_v50 }
0x18bf   :  { %v12411_v61 = vpop.f32.mrb[0].mxu0 }
0x18c0   :  { %v16898_v53 = vadd.f32 %v12411_v61, %v9755_v11  ;;  %v12413_v58 = vpop.f32.mrb[1].mxu0 }
0x18c1   :  { %v12414_v1 = vpop.f32.mrb[2].mxu0 }
0x18c2   :  { %v12526_v2 = vmax.f32 %v16898_v53, 0.0  ;;  %v16899_v32 = vadd.f32 %v12414_v1, %v9756_v43  ;;  %v12416_v5 = vpop.f32.mrb[3].mxu0 }
0x18c3   :  { %v9770_v5 = vld [vmem:[%s23241_s24 + $0xb8] sm:$0xff] }
0x18c4   :  { %12555 = vst.msk [vmem:[%s23242_s25 + $0x40] sm:$0xff] %vm12546_vm2, %v12526_v2  ;;  %v12527_v16 = vmax.f32 %v16899_v32, 0.0  ;;  %v9769_v2 = vld [vmem:[%s23241_s24 + $0xb0] sm:$0xff] }
0x18c6   :  { %12556 = vst.msk [vmem:[%s23242_s25 + $0x48] sm:$0xff] %vm12546_vm2, %v12527_v16 }
0x18c7   :  { %v12419_v31 = vpop.f32.mrb[4].mxu0 }
0x18c8   :  { %v16900_v19 = vadd.f32 %v12419_v31, %v9757_v45  ;;  %v12421_v30 = vpop.f32.mrb[5].mxu0 }
0x18c9   :  { %v12422_v59 = vpop.f32.mrb[6].mxu0 }
0x18ca   :  { %v12528_v55 = vmax.f32 %v16900_v19, 0.0  ;;  %v16901_v18 = vadd.f32 %v12422_v59, %v9758_v44  ;;  %v12424_v13 = vpop.f32.mrb[7].mxu0 }
0x18cb   :  { %v9772_v13 = vld [vmem:[%s23241_s24 + $0xc8] sm:$0xff] }
0x18cc   :  { %12557 = vst.msk [vmem:[%s23242_s25 + $0x50] sm:$0xff] %vm12546_vm2, %v12528_v55  ;;  %v12529_v14 = vmax.f32 %v16901_v18, 0.0  ;;  %v9771_v55 = vld [vmem:[%s23241_s24 + $0xc0] sm:$0xff] }
0x18ce   :  { %12558 = vst.msk [vmem:[%s23242_s25 + $0x58] sm:$0xff] %vm12546_vm2, %v12529_v14 }
0x18cf   :  { %v12427_v28 = vpop.f32.mrb[8].mxu0 }
0x18d0   :  { %v16902_v9 = vadd.f32 %v12427_v28, %v9759_v15  ;;  %v12429_v10 = vpop.f32.mrb[9].mxu0 }
0x18d1   :  { %v12430_v34 = vpop.f32.mrb[10].mxu0 }
0x18d2   :  { %v12530_v52 = vmax.f32 %v16902_v9, 0.0  ;;  %v16903_v8 = vadd.f32 %v12430_v34, %v9760_v12  ;;  %v12432_v21 = vpop.f32.mrb[11].mxu0 }
0x18d3   :  { %v9774_v21 = vld [vmem:[%s23241_s24 + $0xd8] sm:$0xff] }
0x18d4   :  { %12559 = vst.msk [vmem:[%s23242_s25 + $0x60] sm:$0xff] %vm12546_vm2, %v12530_v52  ;;  %v12531_v56 = vmax.f32 %v16903_v8, 0.0  ;;  %v9773_v52 = vld [vmem:[%s23241_s24 + $0xd0] sm:$0xff] }
0x18d6   :  { %12560 = vst.msk [vmem:[%s23242_s25 + $0x68] sm:$0xff] %vm12546_vm2, %v12531_v56 }
0x18d7   :  { %v12435_v40 = vpop.f32.mrb[12].mxu0 }
0x18d8   :  { %v16904_v62 = vadd.f32 %v12435_v40, %v9761_v7  ;;  %v12437_v4 = vpop.f32.mrb[13].mxu0 }
0x18d9   :  { %v12438_v27 = vpop.f32.mrb[14].mxu0 }
0x18da   :  { %v12532_v51 = vmax.f32 %v16904_v62, 0.0  ;;  %v16905_v22 = vadd.f32 %v12438_v27, %v9762_v37  ;;  %v12440_v26 = vpop.f32.mrb[15].mxu0 }
0x18dc   :  { %12561 = vst.msk [vmem:[%s23242_s25 + $0x70] sm:$0xff] %vm12546_vm2, %v12532_v51  ;;  %v12533_v47 = vmax.f32 %v16905_v22, 0.0 }
0x18de   :  { %12562 = vst.msk [vmem:[%s23242_s25 + $0x78] sm:$0xff] %vm12546_vm2, %v12533_v47 }
0x18df   :  { %v12443_v23 = vpop.f32.mrb[16].mxu0 }
0x18e0   :  { %v16906_v39 = vadd.f32 %v12443_v23, %v9763_v46  ;;  %v12445_v33 = vpop.f32.mrb[17].mxu0 }
0x18e1   :  { %v12446_v0 = vpop.f32.mrb[18].mxu0 }
0x18e2   :  { %v12534_v60 = vmax.f32 %v16906_v39, 0.0  ;;  %v16907_v57 = vadd.f32 %v12446_v0, %v9764_v17  ;;  %v12448_v36 = vpop.f32.mrb[19].mxu0 }
0x18e4   :  { %12563 = vst.msk [vmem:[%s23242_s25 + $0x80] sm:$0xff] %vm12546_vm2, %v12534_v60  ;;  %v12535_v6 = vmax.f32 %v16907_v57, 0.0 }
0x18e6   :  { %12564 = vst.msk [vmem:[%s23242_s25 + $0x88] sm:$0xff] %vm12546_vm2, %v12535_v6 }
0x18e7   :  { %v12451_v20 = vpop.f32.mrb[20].mxu0 }
0x18e8   :  { %v16908_v48 = vadd.f32 %v12451_v20, %v9765_v42  ;;  %v12453_v38 = vpop.f32.mrb[21].mxu0 }
0x18e9   :  { %v12454_v54 = vpop.f32.mrb[22].mxu0 }
0x18ea   :  { %v12536_v24 = vmax.f32 %v16908_v48, 0.0  ;;  %v16909_v25 = vadd.f32 %v12454_v54, %v9766_v35  ;;  %v12456_v63 = vpop.f32.mrb[23].mxu0 }
0x18ec   :  { %12565 = vst.msk [vmem:[%s23242_s25 + $0x90] sm:$0xff] %vm12546_vm2, %v12536_v24  ;;  %v12537_v49 = vmax.f32 %v16909_v25, 0.0 }
0x18ee   :  { %12566 = vst.msk [vmem:[%s23242_s25 + $0x98] sm:$0xff] %vm12546_vm2, %v12537_v49 }
0x18ef   :  { %v12459_v29 = vpop.f32.mrb[24].mxu0 }
0x18f0   :  { %v16910_v50 = vadd.f32 %v12459_v29, %v9767_v3  ;;  %v12461_v11 = vpop.f32.mrb[25].mxu0 }
0x18f1   :  { %v12462_v61 = vpop.f32.mrb[26].mxu0 }
0x18f2   :  { %v12538_v43 = vmax.f32 %v16910_v50, 0.0  ;;  %v16911_v53 = vadd.f32 %v12462_v61, %v9768_v41  ;;  %v12464_v58 = vpop.f32.mrb[27].mxu0 }
0x18f4   :  { %12567 = vst.msk [vmem:[%s23242_s25 + $0xa0] sm:$0xff] %vm12546_vm2, %v12538_v43  ;;  %v12539_v1 = vmax.f32 %v16911_v53, 0.0 }
0x18f6   :  { %12568 = vst.msk [vmem:[%s23242_s25 + $0xa8] sm:$0xff] %vm12546_vm2, %v12539_v1 }
0x18f7   :  { %v12467_v32 = vpop.f32.mrb[28].mxu0 }
0x18f8   :  { %v16912_v16 = vadd.f32 %v12467_v32, %v9769_v2  ;;  %v12469_v45 = vpop.f32.mrb[29].mxu0 }
0x18f9   :  { %v12470_v31 = vpop.f32.mrb[30].mxu0 }
0x18fa   :  { %v12540_v44 = vmax.f32 %v16912_v16, 0.0  ;;  %v16913_v19 = vadd.f32 %v12470_v31, %v9770_v5  ;;  %v12472_v30 = vpop.f32.mrb[31].mxu0 }
0x18fc   :  { %12569 = vst.msk [vmem:[%s23242_s25 + $0xb0] sm:$0xff] %vm12546_vm2, %v12540_v44  ;;  %v12541_v59 = vmax.f32 %v16913_v19, 0.0 }
0x18fe   :  { %12570 = vst.msk [vmem:[%s23242_s25 + $0xb8] sm:$0xff] %vm12546_vm2, %v12541_v59 }
0x18ff   :  { %v12475_v18 = vpop.f32.mrb[32].mxu0 }
0x1900   :  { %v16914_v14 = vadd.f32 %v12475_v18, %v9771_v55  ;;  %v12477_v15 = vpop.f32.mrb[33].mxu0 }
0x1901   :  { %v12478_v28 = vpop.f32.mrb[34].mxu0 }
0x1902   :  { %v12542_v12 = vmax.f32 %v16914_v14, 0.0  ;;  %v16915_v9 = vadd.f32 %v12478_v28, %v9772_v13  ;;  %v12480_v10 = vpop.f32.mrb[35].mxu0 }
0x1904   :  { %12571 = vst.msk [vmem:[%s23242_s25 + $0xc0] sm:$0xff] %vm12546_vm2, %v12542_v12  ;;  %v12543_v34 = vmax.f32 %v16915_v9, 0.0 }
0x1906   :  { %12572 = vst.msk [vmem:[%s23242_s25 + $0xc8] sm:$0xff] %vm12546_vm2, %v12543_v34 }
0x1907   :  { %v12483_v8 = vpop.f32.mrb[36].mxu0 }
0x1908   :  { %v16916_v56 = vadd.f32 %v12483_v8, %v9773_v52  ;;  %v12485_v7 = vpop.f32.mrb[37].mxu0 }
0x1909   :  { %v12486_v40 = vpop.f32.mrb[38].mxu0 }
0x190a   :  { %v12544_v37 = vmax.f32 %v16916_v56, 0.0  ;;  %v16917_v62 = vadd.f32 %v12486_v40, %v9774_v21  ;;  %v12488_v4 = vpop.f32.mrb[39].mxu0 }
0x190c   :  { %12573 = vst.msk [vmem:[%s23242_s25 + $0xd0] sm:$0xff] %vm12546_vm2, %v12544_v37  ;;  %v12545_v27 = vmax.f32 %v16917_v62, 0.0 }
0x190e   :  { %12574 = vst.msk [vmem:[%s23242_s25 + $0xd8] sm:$0xff] %vm12546_vm2, %v12545_v27 }

</bundles_post_ra>
